<compile_context>
chip_gen: v7x
topology: tpu7x:2x2x1
jax: 0.10.0
libtpu: 0.0.40
codegen_flags: <defaults>
</compile_context>

<pallas_src>
import math
from functools import partial

import jax
import jax.numpy as jnp
from jax.experimental import pallas as pl
from jax.experimental.pallas import tpu as pltpu

HIDDEN = 100          # torch module hidden width
HP = 128              # zero-padded hidden width (full (8,128) tiles, clean MXU shapes)
LN2 = 0.6931471805599453
EPS = 1e-7
TANHSIGMA = 1.0
DELTA_X = 1.0
DELTA_C = 1.0
C_TAUUNIF = 2.871234000188191
SMALL = 0.1 ** (56.0 / 3.0)
INV_DX2 = 1.0 / (DELTA_X * DELTA_X)
INV_DC2 = 1.0 / (DELTA_C * DELTA_C)
M12 = math.tanh(INV_DC2)   # |g0_2 - g0_3|^2 == 1 -> tanh(1/delta^2), compile-time constant


# ----------------------------- shared math helpers -----------------------------
def _fpow(x, p):
    # fractional power via exp/log (positive x by construction)
    return jnp.exp(p * jnp.log(x))


def _ssp0(x):
    # shifted_softplus0: log(1 + exp(2*ln2*x)) / ln2 -- overflow-safe formulation
    y = 2.0 * LN2 * x
    return (jnp.maximum(y, 0.0) + jnp.log(1.0 + jnp.exp(-jnp.abs(y)))) / LN2


def _ssp1(x):  # shifted_softplus1
    return _ssp0(x - 1.0)


def _bf(x):
    return x.astype(jnp.bfloat16)


def _bf_vals(x):
    # round to bf16 values but keep an f32 container (exact in later f32 arithmetic)
    return x.astype(jnp.bfloat16).astype(jnp.float32)


# ----------------------------- pure-JAX MLPs (mirror the kernel's bf16 rounding) -------------
def _mirror_x12(t2, p):
    # fc1/fc2 of the exchange net; bf16 matmul operands, f32 accumulation, f32 softplus
    w1 = _bf_vals(p["w1"])
    w2 = _bf(p["w2"])
    h = _ssp0(t2[:, 0:1] * w1[0:1, :] + t2[:, 1:2] * w1[1:2, :] + p["b1"]).astype(jnp.bfloat16)
    return _ssp0(jnp.dot(h, w2, preferred_element_type=jnp.float32) + p["b2"]).astype(jnp.bfloat16)


def _mirror_c12(t1, p):
    w1c = _bf_vals(p["w1c"])
    w2c = _bf(p["w2c"])
    h = _ssp0(t1[:, 0:1] * w1c[0:1, :] + t1[:, 1:2] * w1c[1:2, :] + p["b1c"]).astype(jnp.bfloat16)
    return _ssp0(jnp.dot(h, w2c, preferred_element_type=jnp.float32) + p["b2c"]).astype(jnp.bfloat16)


def ref_forward_x(t, p):
    h = _mirror_x12(t, p)
    h = _ssp0(jnp.dot(h, _bf(p["w3"]), preferred_element_type=jnp.float32)
              + p["b3"]).astype(jnp.bfloat16)
    return jnp.dot(h, _bf(p["w4"]), preferred_element_type=jnp.float32) + p["b4"]


def ref_forward_c(t, p):
    hc = _mirror_c12(t[:, 0:2], p)
    hx = _mirror_x12(t[:, 2:4], p)
    h3 = _ssp0(jnp.dot(hc, _bf(p["w3c"][:HIDDEN]), preferred_element_type=jnp.float32)
               + jnp.dot(hx, _bf(p["w3c"][HIDDEN:]), preferred_element_type=jnp.float32)
               + p["b3c"]).astype(jnp.bfloat16)
    return jnp.dot(h3, _bf(p["w4c"]), preferred_element_type=jnp.float32) + p["b4c"]


# ----------------------------- exchange kernel (calc_s0) -----------------------------
def _pcnn_x_kernel(x_ref, w1t_ref, b1_ref, w2t_ref, b2_ref, w3t_ref, b3_ref,
                   w4c_ref, b4_ref, f00_ref, out_ref):
    x = x_ref[...]                                      # (3, T), points on lanes
    rho, sigma, tau = x[0:1, :], x[1:2, :], x[2:3, :]
    hr, qs, ht = 0.5 * rho, 0.25 * sigma, 0.5 * tau

    # makeg on (hr, hr, qs, qs, qs, ht, ht): only the s (t2) and tau (t3) features are used.
    tot = hr + hr + EPS
    unif = _fpow(tot, 1.0 / 3.0)
    unif4 = unif * unif * unif * unif
    s = jnp.tanh(jnp.sqrt(qs + qs + 2.0 * qs + SMALL) / unif4 / TANHSIGMA)
    tf = jnp.tanh(((ht + ht) / (C_TAUUNIF * unif4 * unif) - 1.0) / TANHSIGMA)
    ones = jnp.ones_like(s)

    w1t = w1t_ref[...]; b1 = b1_ref[...]
    w2t = w2t_ref[...]; b2 = b2_ref[...]
    w3t = w3t_ref[...]; b3 = b3_ref[...]
    w4c = w4c_ref[...]; b4 = b4_ref[...]

    def mlp(r0, r1):                                    # (1,T),(1,T) -> (1,T)
        h = _ssp0(w1t[:, 0:1] * r0 + w1t[:, 1:2] * r1 + b1).astype(jnp.bfloat16)
        h = _ssp0(jnp.dot(w2t, h, preferred_element_type=jnp.float32) + b2).astype(jnp.bfloat16)
        h = _ssp0(jnp.dot(w3t, h, preferred_element_type=jnp.float32) + b3).astype(jnp.bfloat16)
        return jnp.sum(h * w4c, axis=0, keepdims=True) + b4

    f_nn = mlp(s, tf)                                   # forward(gx),   gx   = [s, tf]
    fg2 = mlp(ones, tf)                                 # forward(g0_2), g0_2 = [1, tf]
    fg1 = f00_ref[...]                                  # forward(g0_1=[0,0]) -> host constant

    # connection epilogue.  m01 = tanh(1 + tf^2) >= tanh(1) >> EPS, so the torch
    # `where(m01 < 1e-7, ...)` guards never fire and the common 1/m01 factor cancels in total.
    e0 = jnp.tanh((s * s + tf * tf) * INV_DX2)          # |gx - g0_1|^2
    e1 = jnp.tanh((s - 1.0) * (s - 1.0) * INV_DX2)      # |gx - g0_2|^2
    fs0 = f_nn - fg1 + 1.0
    fs1 = f_nn - fg2 + 1.0
    total = (fs0 * e1 + fs1 * e0) / (e1 + e0)
    out_ref[...] = _ssp1(total)                         # (1, T) lane-dense store


# ----------------------------- correlation kernel (calc_c) -----------------------------
def _pcnn_c_kernel(x_ref, w1ct_ref, b1c_ref, w2ct_ref, b2c_ref,
                   w1t_ref, b1_ref, w2t_ref, b2_ref,
                   w3cct_ref, w3cxt_ref, b3c_ref, w4cc_ref, b4c_ref,
                   px00_ref, pc00_ref, out_ref):
    x = x_ref[...]                                      # (7, T)
    x0, x1 = x[0:1, :], x[1:2, :]
    x2, x3, x4 = x[2:3, :], x[3:4, :], x[4:5, :]
    x5, x6 = x[5:6, :], x[6:7, :]

    # makeg (all four features), lane dense (1, T) rows
    tot = x1 + x0 + EPS
    unif = _fpow(tot, 1.0 / 3.0)
    div = 1.0 / tot
    z = (x0 - x1) * div
    rho_f = jnp.tanh(unif / TANHSIGMA)
    zeta_f = jnp.tanh((_fpow(1.0 + z, 4.0 / 3.0) + _fpow(1.0 - z, 4.0 / 3.0)) * 0.5 / TANHSIGMA)
    unif4 = unif * unif * unif * unif
    s_f = jnp.tanh(jnp.sqrt(x2 + x4 + 2.0 * x3 + SMALL) / unif4 / TANHSIGMA)
    tau_f = jnp.tanh(((x5 + x6) / (C_TAUUNIF * unif4 * unif) - 1.0) / TANHSIGMA)
    zeros = jnp.zeros_like(rho_f)
    ones = jnp.ones_like(rho_f)

    w1ct = w1ct_ref[...]; b1c = b1c_ref[...]
    w2ct = w2ct_ref[...]; b2c = b2c_ref[...]
    w1t = w1t_ref[...]; b1 = b1_ref[...]
    w2t = w2t_ref[...]; b2 = b2_ref[...]
    w3cct = w3cct_ref[...]; w3cxt = w3cxt_ref[...]; b3c = b3c_ref[...]
    w4cc = w4cc_ref[...]; b4c = b4c_ref[...]
    px00 = px00_ref[...]; pc00 = pc00_ref[...]

    def hidden12(r0, r1, wa, ba, wb, bb):               # layers 1-2 -> (HP, T) bf16
        h = _ssp0(wa[:, 0:1] * r0 + wa[:, 1:2] * r1 + ba).astype(jnp.bfloat16)
        return _ssp0(jnp.dot(wb, h, preferred_element_type=jnp.float32) + bb).astype(jnp.bfloat16)

    # distinct fc1c/fc2c (t1) inputs: [rho,zeta] (shared by gc & g0_1), g0_2, g0_3, g_lowdens
    hc_rz = hidden12(rho_f, zeta_f, w1ct, b1c, w2ct, b2c)
    hc_0z = hidden12(zeros, zeta_f, w1ct, b1c, w2ct, b2c)
    hc_1z = hidden12(ones, zeta_f, w1ct, b1c, w2ct, b2c)
    hc_r0 = hidden12(rho_f, zeros, w1ct, b1c, w2ct, b2c)
    # single distinct fc1/fc2 (t2) input: [s,tau] shared by gc, g0_2, g0_3, g_lowdens, g_lowdens0
    hx_st = hidden12(s_f, tau_f, w1t, b1, w2t, b2)

    # layer-3 partial products (fc3c input is a concat -> split the matmul by linearity);
    # px00 / pc00 are the host-precomputed partials for the constant t2=[0,0] / t1=[0,0] inputs.
    pc_rz = jnp.dot(w3cct, hc_rz, preferred_element_type=jnp.float32)
    pc_0z = jnp.dot(w3cct, hc_0z, preferred_element_type=jnp.float32)
    pc_1z = jnp.dot(w3cct, hc_1z, preferred_element_type=jnp.float32)
    pc_r0 = jnp.dot(w3cct, hc_r0, preferred_element_type=jnp.float32)
    px_st = jnp.dot(w3cxt, hx_st, preferred_element_type=jnp.float32)

    def head(pre):                                      # fc3c softplus + fc4c -> (1, T)
        h3 = _ssp0(pre + b3c).astype(jnp.bfloat16)
        return jnp.sum(h3 * w4cc, axis=0, keepdims=True) + b4c

    f_nn = head(pc_rz + px_st)                          # forward_c(gc)
    fg1 = head(pc_rz + px00)                            # forward_c([rho, zeta, 0, 0])
    fg2 = head(pc_0z + px_st)                           # forward_c([0, zeta, s, tau])
    fg3 = head(pc_1z + px_st)                           # forward_c([1, zeta, s, tau])
    f_lo = head(pc_r0 + px_st)                          # forward_c([rho, 0, s, tau])
    f_l0 = head(pc00 + px_st)                           # forward_c([0, 0, s, tau])
    f_low = f_lo - f_l0 + 1.0                           # f_nn_lowdens

    # connection epilogue.  tot >= EPS => rho_f^2 >~ 2e-5 > EPS so the m01 guard never fires;
    # m12 = tanh(1) is constant.  The common positive factor m01*safe(m02)*m12 cancels between
    # numerator and denominator of total, so cs* below are the torch cs scaled by it.
    e0 = jnp.tanh((s_f * s_f + tau_f * tau_f) * INV_DC2)                    # |gc - g0_1|^2
    e1 = jnp.tanh(rho_f * rho_f * INV_DC2)                                  # |gc - g0_2|^2
    e2 = jnp.tanh((rho_f - 1.0) * (rho_f - 1.0) * INV_DC2)                  # |gc - g0_3|^2
    m01 = jnp.tanh((rho_f * rho_f + s_f * s_f + tau_f * tau_f) * INV_DC2)   # |g0_1 - g0_2|^2
    m02 = jnp.tanh(((rho_f - 1.0) * (rho_f - 1.0) + s_f * s_f + tau_f * tau_f) * INV_DC2)

    guard02 = m02 < EPS
    s02 = jnp.where(guard02, 1.0, m02)
    e2_02 = jnp.where(guard02, 1.0, e2)
    e0_02 = jnp.where(guard02, 1.0, e0)

    cs0 = e1 * e2_02 * M12
    cs1 = e2 * e0 * s02
    cs2 = e0_02 * e1 * m01

    fs0 = f_nn - fg1 + 1.0
    fs1 = f_nn - fg2 + f_low
    fs2 = f_nn - fg3 + 1.0
    total = (fs0 * cs0 + fs1 * cs1 + fs2 * cs2) / (cs0 + cs1 + cs2)
    out_ref[...] = _ssp1(total)                         # (1, T) lane-dense store


# ----------------------------- weight preparation (host side) -----------------------------
def _pad2(a, rows, cols):
    a = jnp.asarray(a, jnp.float32)
    return jnp.zeros((rows, cols), jnp.float32).at[: a.shape[0], : a.shape[1]].set(a)


_X_ORDER = ("w1t", "b1", "w2t", "b2", "w3t", "b3", "w4c", "b4", "f00")
_C_ORDER = ("w1ct", "b1c", "w2ct", "b2c", "w1t", "b1", "w2t", "b2",
            "w3cct", "w3cxt", "b3c", "w4cc", "b4c", "px00", "pc00")


def _prep_x(p):
    w = {}
    w["w1t"] = _bf_vals(_pad2(p["w1"].T, HP, 2))        # layer 1 as broadcast MA (f32, bf16 vals)
    w["b1"] = _pad2(p["b1"].T, HP, 1)
    w["w2t"] = _bf(_pad2(p["w2"].T, HP, HP))
    w["b2"] = _pad2(p["b2"].T, HP, 1)
    w["w3t"] = _bf(_pad2(p["w3"].T, HP, HP))
    w["b3"] = _pad2(p["b3"].T, HP, 1)
    w["w4c"] = _bf_vals(_pad2(p["w4"], HP, 1))          # (HP, 1) output column
    w["b4"] = jnp.asarray(p["b4"], jnp.float32).reshape(1, 1)
    # forward(g0_1=[0,0]) is input independent: precompute on the host
    w["f00"] = ref_forward_x(jnp.zeros((1, 2), jnp.float32), p).reshape(1, 1)
    return w


def _prep_c(p):
    w = {}
    w["w1ct"] = _bf_vals(_pad2(p["w1c"].T, HP, 2))
    w["b1c"] = _pad2(p["b1c"].T, HP, 1)
    w["w2ct"] = _bf(_pad2(p["w2c"].T, HP, HP))
    w["b2c"] = _pad2(p["b2c"].T, HP, 1)
    w["w1t"] = _bf_vals(_pad2(p["w1"].T, HP, 2))
    w["b1"] = _pad2(p["b1"].T, HP, 1)
    w["w2t"] = _bf(_pad2(p["w2"].T, HP, HP))
    w["b2"] = _pad2(p["b2"].T, HP, 1)
    w["w3cct"] = _bf(_pad2(p["w3c"][:HIDDEN].T, HP, HP))
    w["w3cxt"] = _bf(_pad2(p["w3c"][HIDDEN:].T, HP, HP))
    w["b3c"] = _pad2(p["b3c"].T, HP, 1)
    w["w4cc"] = _bf_vals(_pad2(p["w4c"], HP, 1))
    w["b4c"] = jnp.asarray(p["b4c"], jnp.float32).reshape(1, 1)
    # constant layer-1/2 hiddens for t1=[0,0] / t2=[0,0] and their layer-3 partial products
    zero2 = jnp.zeros((1, 2), jnp.float32)
    hx00 = _mirror_x12(zero2, p)
    hc00 = _mirror_c12(zero2, p)
    px00 = jnp.dot(hx00, _bf(p["w3c"][HIDDEN:]), preferred_element_type=jnp.float32)
    pc00 = jnp.dot(hc00, _bf(p["w3c"][:HIDDEN]), preferred_element_type=jnp.float32)
    w["px00"] = _pad2(px00.T, HP, 1)
    w["pc00"] = _pad2(pc00.T, HP, 1)
    return w


# ----------------------------- pallas_call wrappers -----------------------------
def _full_spec(a):
    nd = a.ndim
    return pl.BlockSpec(a.shape, lambda i, _n=nd: (0,) * _n)


@partial(jax.jit, static_argnames=("tile",))
def pcnn_mgga_fx(rho, sigma, tau, params, tile=512):
    # NOTE: keep tile <= 1024 on v7x (64 MiB VMEM); 512 fits the default scoped VMEM everywhere.
    N = rho.shape[0]
    xin = jnp.stack([rho, sigma, tau], axis=0).astype(jnp.float32)   # (3, N), points on lanes
    npad = (-N) % tile
    if npad:
        xin = jnp.concatenate([xin, jnp.ones((3, npad), jnp.float32)], axis=1)
    ntot = N + npad
    w = _prep_x(params)
    weights = [w[k] for k in _X_ORDER]
    out = pl.pallas_call(
        _pcnn_x_kernel,
        out_shape=jax.ShapeDtypeStruct((1, ntot), jnp.float32),
        grid_spec=pltpu.PrefetchScalarGridSpec(
            num_scalar_prefetch=0,
            grid=(ntot // tile,),
            in_specs=[pl.BlockSpec((3, tile), lambda i: (0, i))]
                     + [_full_spec(a) for a in weights],
            out_specs=pl.BlockSpec((1, tile), lambda i: (0, i)),
        ),
        compiler_params=pltpu.CompilerParams(dimension_semantics=("parallel",)),
    )(xin, *weights)
    return out[0, :N]


@partial(jax.jit, static_argnames=("tile",))
def pcnn_mgga_fc(rho_u, rho_d, suu, sud, sdd, tau_u, tau_d, params, tile=512):
    N = rho_u.shape[0]
    xin = jnp.stack([rho_u, rho_d, suu, sud, sdd, tau_u, tau_d],
                    axis=0).astype(jnp.float32)                      # (7, N)
    npad = (-N) % tile
    if npad:
        xin = jnp.concatenate([xin, jnp.ones((7, npad), jnp.float32)], axis=1)
    ntot = N + npad
    w = _prep_c(params)
    weights = [w[k] for k in _C_ORDER]
    out = pl.pallas_call(
        _pcnn_c_kernel,
        out_shape=jax.ShapeDtypeStruct((1, ntot), jnp.float32),
        grid_spec=pltpu.PrefetchScalarGridSpec(
            num_scalar_prefetch=0,
            grid=(ntot // tile,),
            in_specs=[pl.BlockSpec((7, tile), lambda i: (0, i))]
                     + [_full_spec(a) for a in weights],
            out_specs=pl.BlockSpec((1, tile), lambda i: (0, i)),
        ),
        compiler_params=pltpu.CompilerParams(dimension_semantics=("parallel",)),
    )(xin, *weights)
    return out[0, :N]


# ----------------------------- deterministic parameter init -----------------------------
def init_params(key):
    def linear(k, fan_in, fan_out):
        k1, k2 = jax.random.split(k)
        bound = 1.0 / (fan_in ** 0.5)
        wt = jax.random.uniform(k1, (fan_in, fan_out), jnp.float32, -bound, bound)
        b = jax.random.uniform(k2, (1, fan_out), jnp.float32, -bound, bound)
        return wt, b

    keys = jax.random.split(key, 8)
    p = {}
    p["w1"], p["b1"] = linear(keys[0], 2, HIDDEN)
    p["w2"], p["b2"] = linear(keys[1], HIDDEN, HIDDEN)
    p["w3"], p["b3"] = linear(keys[2], HIDDEN, HIDDEN)
    p["w4"], p["b4"] = linear(keys[3], HIDDEN, 1)
    p["w1c"], p["b1c"] = linear(keys[4], 2, HIDDEN)
    p["w2c"], p["b2c"] = linear(keys[5], HIDDEN, HIDDEN)
    p["w3c"], p["b3c"] = linear(keys[6], 2 * HIDDEN, HIDDEN)
    p["w4c"], p["b4c"] = linear(keys[7], HIDDEN, 1)
    return p


# ----------------------------- pure-JAX reference (mirrors the torch code) -----------------------------
def ref_makeg(x):
    tot = x[:, 1] + x[:, 0] + EPS
    unif = _fpow(tot, 1.0 / 3.0)
    div = 1.0 / tot
    z = (x[:, 0] - x[:, 1]) * div
    t0 = unif
    t1 = (_fpow(1.0 + z, 4.0 / 3.0) + _fpow(1.0 - z, 4.0 / 3.0)) * 0.5
    t2 = jnp.sqrt(x[:, 2] + x[:, 4] + 2.0 * x[:, 3] + SMALL) / unif ** 4
    t3 = (x[:, 5] + x[:, 6]) / (C_TAUUNIF * unif ** 5) - 1.0
    return jnp.tanh(jnp.stack([t0, t1, t2, t3], axis=-1) / TANHSIGMA)


def ref_product(index, dis, dis_ij):
    rdis = jnp.roll(dis, -index, axis=1)[:, 1:]
    rdis_ij = jnp.roll(dis_ij, -index, axis=1)[:, 1:]
    denomi = jnp.prod(jnp.where(rdis_ij < EPS, 1.0, rdis), axis=1)
    numer = jnp.prod(jnp.where(rdis_ij < EPS, 1.0, rdis_ij), axis=1)
    return denomi / numer


def ref_connect(g, g0, f0, ncon, delta, forward_fn):
    dim = g.shape[1]
    f_nn = forward_fn(g).reshape(-1, 1)
    f_g0 = forward_fn(g0.reshape(-1, dim)).reshape(-1, ncon)
    dis = jnp.tanh(jnp.sum((g[:, None, :] - g0) ** 2, axis=2) / delta ** 2)
    dis_ij = jnp.tanh(jnp.sum((g0[:, :, None, :] - g0[:, None, :, :]) ** 2, axis=3) / delta ** 2)
    cs = jnp.stack([ref_product(i, dis, dis_ij[:, i, :]) for i in range(ncon)], axis=1)
    fs = f_nn - f_g0 + f0
    return jnp.sum(fs * cs, axis=1) / jnp.sum(cs, axis=1)


def ref_calc_s0(rho, sigma, tau, p):
    nt = jnp.stack([rho * 0.5, rho * 0.5, sigma * 0.25, sigma * 0.25, sigma * 0.25,
                    tau * 0.5, tau * 0.5], axis=-1)
    gx = ref_makeg(nt)[:, 2:]
    N = gx.shape[0]
    zeros = jnp.zeros(N, jnp.float32)
    ones = jnp.ones(N, jnp.float32)
    g0s = jnp.stack([jnp.stack([zeros, zeros], -1),
                     jnp.stack([ones, gx[:, 1]], -1)], axis=1)
    f0s = jnp.stack([ones, ones], -1)
    return ref_connect(gx, g0s, f0s, 2, DELTA_X, lambda t: ref_forward_x(t, p))


def ref_calc_c(rho_u, rho_d, suu, sud, sdd, tau_u, tau_d, p):
    n = jnp.stack([rho_u, rho_d, suu, sud, sdd, tau_u, tau_d], axis=-1)
    gc = ref_makeg(n)
    N = gc.shape[0]
    rho, zeta, s, tau = gc[:, 0], gc[:, 1], gc[:, 2], gc[:, 3]
    zeros = jnp.zeros(N, jnp.float32)
    ones = jnp.ones(N, jnp.float32)
    g0_1 = jnp.stack([rho, zeta, zeros, zeros], -1)
    g0_2 = jnp.stack([zeros, zeta, s, tau], -1)
    g0_3 = jnp.stack([ones, zeta, s, tau], -1)
    g0s = jnp.stack([g0_1, g0_2, g0_3], axis=1)
    g_low = jnp.stack([rho, zeros, s, tau], -1)
    g_low0 = jnp.stack([zeros, zeros, s, tau], -1)
    f_low = ref_forward_c(g_low, p) - ref_forward_c(g_low0, p) + 1.0
    f0s = jnp.stack([ones, f_low[:, 0], ones], -1)
    return ref_connect(gc, g0s, f0s, 3, DELTA_C, lambda t: ref_forward_c(t, p))


# ----------------------------- main -----------------------------
if __name__ == "__main__":
    key = jax.random.PRNGKey(0)
    kp, kd = jax.random.split(key)
    params = init_params(kp)

    N = 1024
    TILE = 512
    ks = jax.random.split(kd, 6)
    rho_u = jax.random.uniform(ks[0], (N,), jnp.float32, 0.05, 2.0)
    rho_d = jax.random.uniform(ks[1], (N,), jnp.float32, 0.05, 2.0)
    gn_u = jax.random.uniform(ks[2], (N,), jnp.float32, 0.0, 1.5)
    gn_d = jax.random.uniform(ks[3], (N,), jnp.float32, 0.0, 1.5)
    sigma_uu = gn_u * gn_u
    sigma_dd = gn_d * gn_d
    sigma_ud = gn_u * gn_d
    tau_u = jax.random.uniform(ks[4], (N,), jnp.float32, 0.05, 2.0)
    tau_d = jax.random.uniform(ks[5], (N,), jnp.float32, 0.05, 2.0)

    # spin-polarized path of get_edensityxc (sans the libxc SCAN energy densities).
    # The two exchange evaluations share all weights -> fuse into one launch
    # (halves launch / weight-DMA overhead, gives an even grid for v7x's 2 TensorCores).
    rho_x = jnp.concatenate([2.0 * rho_u, 2.0 * rho_d])
    sig_x = jnp.concatenate([4.0 * sigma_uu, 4.0 * sigma_dd])
    tau_x = jnp.concatenate([2.0 * tau_u, 2.0 * tau_d])
    fx_both = pcnn_mgga_fx(rho_x, sig_x, tau_x, params, tile=TILE)       # grid = 4
    fx1, fx2 = fx_both[:N], fx_both[N:]
    fc = pcnn_mgga_fc(rho_u, rho_d, sigma_uu, sigma_ud, sigma_dd, tau_u, tau_d,
                      params, tile=TILE)                                  # grid = 2
    jax.block_until_ready((fx1, fx2, fc))

    fx1_ref = _ssp1(ref_calc_s0(2.0 * rho_u, 4.0 * sigma_uu, 2.0 * tau_u, params))
    fx2_ref = _ssp1(ref_calc_s0(2.0 * rho_d, 4.0 * sigma_dd, 2.0 * tau_d, params))
    fc_ref = _ssp1(ref_calc_c(rho_u, rho_d, sigma_uu, sigma_ud, sigma_dd, tau_u, tau_d, params))

    for got, want in ((fx1, fx1_ref), (fx2, fx2_ref), (fc, fc_ref)):
        assert bool(jnp.all(jnp.isfinite(got)))
        assert float(jnp.max(jnp.abs(got - want))) < 1e-2

    print("KERNEL_OK")
</pallas_src>

<mosaic_0001>
module attributes {stable_mosaic.version = 11 : i64} {
  func.func @_pcnn_x_kernel(%arg0: i32, %arg1: memref<3x512xf32, #tpu.memory_space<vmem>>, %arg2: memref<128x2xf32, #tpu.memory_space<vmem>>, %arg3: memref<128x1xf32, #tpu.memory_space<vmem>>, %arg4: memref<128x128xbf16, #tpu.memory_space<vmem>>, %arg5: memref<128x1xf32, #tpu.memory_space<vmem>>, %arg6: memref<128x128xbf16, #tpu.memory_space<vmem>>, %arg7: memref<128x1xf32, #tpu.memory_space<vmem>>, %arg8: memref<128x1xf32, #tpu.memory_space<vmem>>, %arg9: memref<1x1xf32, #tpu.memory_space<vmem>>, %arg10: memref<1x1xf32, #tpu.memory_space<vmem>>, %arg11: memref<1x512xf32, #tpu.memory_space<vmem>>) attributes {dimension_semantics = [#tpu.dimension_semantics<parallel>], iteration_bounds = array<i64: 4>, scalar_prefetch = 0 : i64, scratch_operands = 0 : i64, tpu.core_type = #tpu.core_type<tc>, window_params = [{transform_indices = @transform_0, window_bounds = array<i64: 3, 512>}, {pipeline_mode = #tpu.pipeline_mode<synchronous>, transform_indices = @transform_1, window_bounds = array<i64: 128, 2>}, {pipeline_mode = #tpu.pipeline_mode<synchronous>, transform_indices = @transform_2, window_bounds = array<i64: 128, 1>}, {pipeline_mode = #tpu.pipeline_mode<synchronous>, transform_indices = @transform_3, window_bounds = array<i64: 128, 128>}, {pipeline_mode = #tpu.pipeline_mode<synchronous>, transform_indices = @transform_4, window_bounds = array<i64: 128, 1>}, {pipeline_mode = #tpu.pipeline_mode<synchronous>, transform_indices = @transform_5, window_bounds = array<i64: 128, 128>}, {pipeline_mode = #tpu.pipeline_mode<synchronous>, transform_indices = @transform_6, window_bounds = array<i64: 128, 1>}, {pipeline_mode = #tpu.pipeline_mode<synchronous>, transform_indices = @transform_7, window_bounds = array<i64: 128, 1>}, {pipeline_mode = #tpu.pipeline_mode<synchronous>, transform_indices = @transform_8, window_bounds = array<i64: 1, 1>}, {pipeline_mode = #tpu.pipeline_mode<synchronous>, transform_indices = @transform_9, window_bounds = array<i64: 1, 1>}, {transform_indices = @transform_10, window_bounds = array<i64: 1, 512>}]} {
    %c0 = arith.constant 0 : index
    %c0_0 = arith.constant 0 : index
    %0 = vector.load %arg1[%c0, %c0_0] : memref<3x512xf32, #tpu.memory_space<vmem>>, vector<3x512xf32>
    %1 = vector.extract_strided_slice %0 {offsets = [0, 0], sizes = [1, 512], strides = [1, 1]} : vector<3x512xf32> to vector<1x512xf32>
    %2 = vector.extract_strided_slice %0 {offsets = [1, 0], sizes = [1, 512], strides = [1, 1]} : vector<3x512xf32> to vector<1x512xf32>
    %3 = vector.extract_strided_slice %0 {offsets = [2, 0], sizes = [1, 512], strides = [1, 1]} : vector<3x512xf32> to vector<1x512xf32>
    %cst = arith.constant 5.000000e-01 : f32
    %4 = vector.broadcast %cst : f32 to vector<1x512xf32>
    %5 = arith.mulf %4, %1 : vector<1x512xf32>
    %cst_1 = arith.constant 2.500000e-01 : f32
    %6 = vector.broadcast %cst_1 : f32 to vector<1x512xf32>
    %7 = arith.mulf %6, %2 : vector<1x512xf32>
    %cst_2 = arith.constant 5.000000e-01 : f32
    %8 = vector.broadcast %cst_2 : f32 to vector<1x512xf32>
    %9 = arith.mulf %8, %3 : vector<1x512xf32>
    %10 = arith.addf %5, %5 : vector<1x512xf32>
    %cst_3 = arith.constant 1.000000e-07 : f32
    %11 = vector.broadcast %cst_3 : f32 to vector<1x512xf32>
    %12 = arith.addf %10, %11 : vector<1x512xf32>
    %13 = math.log %12 : vector<1x512xf32>
    %cst_4 = arith.constant 0.333333343 : f32
    %14 = vector.broadcast %cst_4 : f32 to vector<1x512xf32>
    %15 = arith.mulf %14, %13 : vector<1x512xf32>
    %16 = math.exp %15 : vector<1x512xf32>
    %17 = arith.mulf %16, %16 : vector<1x512xf32>
    %18 = arith.mulf %17, %16 : vector<1x512xf32>
    %19 = arith.mulf %18, %16 : vector<1x512xf32>
    %20 = arith.addf %7, %7 : vector<1x512xf32>
    %cst_5 = arith.constant 2.000000e+00 : f32
    %21 = vector.broadcast %cst_5 : f32 to vector<1x512xf32>
    %22 = arith.mulf %21, %7 : vector<1x512xf32>
    %23 = arith.addf %20, %22 : vector<1x512xf32>
    %cst_6 = arith.constant 2.15443469E-19 : f32
    %24 = vector.broadcast %cst_6 : f32 to vector<1x512xf32>
    %25 = arith.addf %23, %24 : vector<1x512xf32>
    %26 = math.sqrt %25 : vector<1x512xf32>
    %27 = arith.divf %26, %19 : vector<1x512xf32>
    %cst_7 = arith.constant 1.000000e+00 : f32
    %28 = vector.broadcast %cst_7 : f32 to vector<1x512xf32>
    %29 = arith.divf %27, %28 : vector<1x512xf32>
    %30 = math.tanh %29 : vector<1x512xf32>
    %31 = arith.addf %9, %9 : vector<1x512xf32>
    %cst_8 = arith.constant 2.87123394 : f32
    %32 = vector.broadcast %cst_8 : f32 to vector<1x512xf32>
    %33 = arith.mulf %32, %19 : vector<1x512xf32>
    %34 = arith.mulf %33, %16 : vector<1x512xf32>
    %35 = arith.divf %31, %34 : vector<1x512xf32>
    %cst_9 = arith.constant 1.000000e+00 : f32
    %36 = vector.broadcast %cst_9 : f32 to vector<1x512xf32>
    %37 = arith.subf %35, %36 : vector<1x512xf32>
    %cst_10 = arith.constant 1.000000e+00 : f32
    %38 = vector.broadcast %cst_10 : f32 to vector<1x512xf32>
    %39 = arith.divf %37, %38 : vector<1x512xf32>
    %40 = math.tanh %39 : vector<1x512xf32>
    %cst_11 = arith.constant 1.000000e+00 : f32
    %41 = vector.broadcast %cst_11 : f32 to vector<1x512xf32>
    %c0_12 = arith.constant 0 : index
    %c0_13 = arith.constant 0 : index
    %42 = vector.load %arg2[%c0_12, %c0_13] : memref<128x2xf32, #tpu.memory_space<vmem>>, vector<128x2xf32>
    %c0_14 = arith.constant 0 : index
    %c0_15 = arith.constant 0 : index
    %43 = vector.load %arg3[%c0_14, %c0_15] : memref<128x1xf32, #tpu.memory_space<vmem>>, vector<128x1xf32>
    %c0_16 = arith.constant 0 : index
    %c0_17 = arith.constant 0 : index
    %44 = vector.load %arg4[%c0_16, %c0_17] : memref<128x128xbf16, #tpu.memory_space<vmem>>, vector<128x128xbf16>
    %c0_18 = arith.constant 0 : index
    %c0_19 = arith.constant 0 : index
    %45 = vector.load %arg5[%c0_18, %c0_19] : memref<128x1xf32, #tpu.memory_space<vmem>>, vector<128x1xf32>
    %c0_20 = arith.constant 0 : index
    %c0_21 = arith.constant 0 : index
    %46 = vector.load %arg6[%c0_20, %c0_21] : memref<128x128xbf16, #tpu.memory_space<vmem>>, vector<128x128xbf16>
    %c0_22 = arith.constant 0 : index
    %c0_23 = arith.constant 0 : index
    %47 = vector.load %arg7[%c0_22, %c0_23] : memref<128x1xf32, #tpu.memory_space<vmem>>, vector<128x1xf32>
    %c0_24 = arith.constant 0 : index
    %c0_25 = arith.constant 0 : index
    %48 = vector.load %arg8[%c0_24, %c0_25] : memref<128x1xf32, #tpu.memory_space<vmem>>, vector<128x1xf32>
    %c0_26 = arith.constant 0 : index
    %c0_27 = arith.constant 0 : index
    %49 = vector.load %arg9[%c0_26, %c0_27] : memref<1x1xf32, #tpu.memory_space<vmem>>, vector<1x1xf32>
    %50 = vector.extract_strided_slice %42 {offsets = [0, 0], sizes = [128, 1], strides = [1, 1]} : vector<128x2xf32> to vector<128x1xf32>
    %51 = vector.broadcast %50 : vector<128x1xf32> to vector<128x512xf32>
    %52 = vector.broadcast %30 : vector<1x512xf32> to vector<128x512xf32>
    %53 = arith.mulf %51, %52 : vector<128x512xf32>
    %54 = vector.extract_strided_slice %42 {offsets = [0, 1], sizes = [128, 1], strides = [1, 1]} : vector<128x2xf32> to vector<128x1xf32>
    %55 = vector.broadcast %54 : vector<128x1xf32> to vector<128x512xf32>
    %56 = vector.broadcast %40 : vector<1x512xf32> to vector<128x512xf32>
    %57 = arith.mulf %55, %56 : vector<128x512xf32>
    %58 = arith.addf %53, %57 : vector<128x512xf32>
    %59 = vector.broadcast %43 : vector<128x1xf32> to vector<128x512xf32>
    %60 = arith.addf %58, %59 : vector<128x512xf32>
    %cst_28 = arith.constant 1.38629436 : f32
    %61 = vector.broadcast %cst_28 : f32 to vector<128x512xf32>
    %62 = arith.mulf %61, %60 : vector<128x512xf32>
    %cst_29 = arith.constant 0.000000e+00 : f32
    %63 = vector.broadcast %cst_29 : f32 to vector<128x512xf32>
    %64 = arith.maximumf %62, %63 : vector<128x512xf32>
    %65 = math.absf %62 : vector<128x512xf32>
    %cst_30 = arith.constant 0.000000e+00 : f32
    %66 = vector.broadcast %cst_30 : f32 to vector<128x512xf32>
    %67 = arith.subf %66, %65 : vector<128x512xf32>
    %68 = math.exp %67 : vector<128x512xf32>
    %cst_31 = arith.constant 1.000000e+00 : f32
    %69 = vector.broadcast %cst_31 : f32 to vector<128x512xf32>
    %70 = arith.addf %69, %68 : vector<128x512xf32>
    %71 = math.log %70 : vector<128x512xf32>
    %72 = arith.addf %64, %71 : vector<128x512xf32>
    %cst_32 = arith.constant 0.693147182 : f32
    %73 = vector.broadcast %cst_32 : f32 to vector<128x512xf32>
    %74 = arith.divf %72, %73 : vector<128x512xf32>
    %75 = arith.truncf %74 : vector<128x512xf32> to vector<128x512xbf16>
    %cst_33 = arith.constant dense<0.000000e+00> : vector<128x512xf32>
    %76 = tpu.matmul %44, %75, %cst_33 {dimension_numbers = #tpu.dot_dimension_numbers<[1], [0], [0], [1], [0, 0, 1, 1], [], []>} : vector<128x128xbf16>, vector<128x512xbf16>, vector<128x512xf32> -> vector<128x512xf32>
    %77 = vector.broadcast %45 : vector<128x1xf32> to vector<128x512xf32>
    %78 = arith.addf %76, %77 : vector<128x512xf32>
    %cst_34 = arith.constant 1.38629436 : f32
    %79 = vector.broadcast %cst_34 : f32 to vector<128x512xf32>
    %80 = arith.mulf %79, %78 : vector<128x512xf32>
    %cst_35 = arith.constant 0.000000e+00 : f32
    %81 = vector.broadcast %cst_35 : f32 to vector<128x512xf32>
    %82 = arith.maximumf %80, %81 : vector<128x512xf32>
    %83 = math.absf %80 : vector<128x512xf32>
    %cst_36 = arith.constant 0.000000e+00 : f32
    %84 = vector.broadcast %cst_36 : f32 to vector<128x512xf32>
    %85 = arith.subf %84, %83 : vector<128x512xf32>
    %86 = math.exp %85 : vector<128x512xf32>
    %cst_37 = arith.constant 1.000000e+00 : f32
    %87 = vector.broadcast %cst_37 : f32 to vector<128x512xf32>
    %88 = arith.addf %87, %86 : vector<128x512xf32>
    %89 = math.log %88 : vector<128x512xf32>
    %90 = arith.addf %82, %89 : vector<128x512xf32>
    %cst_38 = arith.constant 0.693147182 : f32
    %91 = vector.broadcast %cst_38 : f32 to vector<128x512xf32>
    %92 = arith.divf %90, %91 : vector<128x512xf32>
    %93 = arith.truncf %92 : vector<128x512xf32> to vector<128x512xbf16>
    %cst_39 = arith.constant dense<0.000000e+00> : vector<128x512xf32>
    %94 = tpu.matmul %46, %93, %cst_39 {dimension_numbers = #tpu.dot_dimension_numbers<[1], [0], [0], [1], [0, 0, 1, 1], [], []>} : vector<128x128xbf16>, vector<128x512xbf16>, vector<128x512xf32> -> vector<128x512xf32>
    %95 = vector.broadcast %47 : vector<128x1xf32> to vector<128x512xf32>
    %96 = arith.addf %94, %95 : vector<128x512xf32>
    %cst_40 = arith.constant 1.38629436 : f32
    %97 = vector.broadcast %cst_40 : f32 to vector<128x512xf32>
    %98 = arith.mulf %97, %96 : vector<128x512xf32>
    %cst_41 = arith.constant 0.000000e+00 : f32
    %99 = vector.broadcast %cst_41 : f32 to vector<128x512xf32>
    %100 = arith.maximumf %98, %99 : vector<128x512xf32>
    %101 = math.absf %98 : vector<128x512xf32>
    %cst_42 = arith.constant 0.000000e+00 : f32
    %102 = vector.broadcast %cst_42 : f32 to vector<128x512xf32>
    %103 = arith.subf %102, %101 : vector<128x512xf32>
    %104 = math.exp %103 : vector<128x512xf32>
    %cst_43 = arith.constant 1.000000e+00 : f32
    %105 = vector.broadcast %cst_43 : f32 to vector<128x512xf32>
    %106 = arith.addf %105, %104 : vector<128x512xf32>
    %107 = math.log %106 : vector<128x512xf32>
    %108 = arith.addf %100, %107 : vector<128x512xf32>
    %cst_44 = arith.constant 0.693147182 : f32
    %109 = vector.broadcast %cst_44 : f32 to vector<128x512xf32>
    %110 = arith.divf %108, %109 : vector<128x512xf32>
    %111 = arith.truncf %110 : vector<128x512xf32> to vector<128x512xbf16>
    %112 = arith.extf %111 : vector<128x512xbf16> to vector<128x512xf32>
    %113 = vector.broadcast %48 : vector<128x1xf32> to vector<128x512xf32>
    %114 = arith.mulf %112, %113 : vector<128x512xf32>
    %cst_45 = arith.constant dense<0.000000e+00> : vector<512xf32>
    %115 = vector.multi_reduction <add>, %114, %cst_45 [0] : vector<128x512xf32> to vector<512xf32>
    %116 = vector.shape_cast %115 : vector<512xf32> to vector<1x512xf32>
    %117 = vector.broadcast %49 : vector<1x1xf32> to vector<1x512xf32>
    %118 = arith.addf %116, %117 : vector<1x512xf32>
    %119 = vector.extract_strided_slice %42 {offsets = [0, 0], sizes = [128, 1], strides = [1, 1]} : vector<128x2xf32> to vector<128x1xf32>
    %120 = vector.broadcast %119 : vector<128x1xf32> to vector<128x512xf32>
    %121 = vector.broadcast %41 : vector<1x512xf32> to vector<128x512xf32>
    %122 = arith.mulf %120, %121 : vector<128x512xf32>
    %123 = vector.extract_strided_slice %42 {offsets = [0, 1], sizes = [128, 1], strides = [1, 1]} : vector<128x2xf32> to vector<128x1xf32>
    %124 = vector.broadcast %123 : vector<128x1xf32> to vector<128x512xf32>
    %125 = vector.broadcast %40 : vector<1x512xf32> to vector<128x512xf32>
    %126 = arith.mulf %124, %125 : vector<128x512xf32>
    %127 = arith.addf %122, %126 : vector<128x512xf32>
    %128 = vector.broadcast %43 : vector<128x1xf32> to vector<128x512xf32>
    %129 = arith.addf %127, %128 : vector<128x512xf32>
    %cst_46 = arith.constant 1.38629436 : f32
    %130 = vector.broadcast %cst_46 : f32 to vector<128x512xf32>
    %131 = arith.mulf %130, %129 : vector<128x512xf32>
    %cst_47 = arith.constant 0.000000e+00 : f32
    %132 = vector.broadcast %cst_47 : f32 to vector<128x512xf32>
    %133 = arith.maximumf %131, %132 : vector<128x512xf32>
    %134 = math.absf %131 : vector<128x512xf32>
    %cst_48 = arith.constant 0.000000e+00 : f32
    %135 = vector.broadcast %cst_48 : f32 to vector<128x512xf32>
    %136 = arith.subf %135, %134 : vector<128x512xf32>
    %137 = math.exp %136 : vector<128x512xf32>
    %cst_49 = arith.constant 1.000000e+00 : f32
    %138 = vector.broadcast %cst_49 : f32 to vector<128x512xf32>
    %139 = arith.addf %138, %137 : vector<128x512xf32>
    %140 = math.log %139 : vector<128x512xf32>
    %141 = arith.addf %133, %140 : vector<128x512xf32>
    %cst_50 = arith.constant 0.693147182 : f32
    %142 = vector.broadcast %cst_50 : f32 to vector<128x512xf32>
    %143 = arith.divf %141, %142 : vector<128x512xf32>
    %144 = arith.truncf %143 : vector<128x512xf32> to vector<128x512xbf16>
    %cst_51 = arith.constant dense<0.000000e+00> : vector<128x512xf32>
    %145 = tpu.matmul %44, %144, %cst_51 {dimension_numbers = #tpu.dot_dimension_numbers<[1], [0], [0], [1], [0, 0, 1, 1], [], []>} : vector<128x128xbf16>, vector<128x512xbf16>, vector<128x512xf32> -> vector<128x512xf32>
    %146 = vector.broadcast %45 : vector<128x1xf32> to vector<128x512xf32>
    %147 = arith.addf %145, %146 : vector<128x512xf32>
    %cst_52 = arith.constant 1.38629436 : f32
    %148 = vector.broadcast %cst_52 : f32 to vector<128x512xf32>
    %149 = arith.mulf %148, %147 : vector<128x512xf32>
    %cst_53 = arith.constant 0.000000e+00 : f32
    %150 = vector.broadcast %cst_53 : f32 to vector<128x512xf32>
    %151 = arith.maximumf %149, %150 : vector<128x512xf32>
    %152 = math.absf %149 : vector<128x512xf32>
    %cst_54 = arith.constant 0.000000e+00 : f32
    %153 = vector.broadcast %cst_54 : f32 to vector<128x512xf32>
    %154 = arith.subf %153, %152 : vector<128x512xf32>
    %155 = math.exp %154 : vector<128x512xf32>
    %cst_55 = arith.constant 1.000000e+00 : f32
    %156 = vector.broadcast %cst_55 : f32 to vector<128x512xf32>
    %157 = arith.addf %156, %155 : vector<128x512xf32>
    %158 = math.log %157 : vector<128x512xf32>
    %159 = arith.addf %151, %158 : vector<128x512xf32>
    %cst_56 = arith.constant 0.693147182 : f32
    %160 = vector.broadcast %cst_56 : f32 to vector<128x512xf32>
    %161 = arith.divf %159, %160 : vector<128x512xf32>
    %162 = arith.truncf %161 : vector<128x512xf32> to vector<128x512xbf16>
    %cst_57 = arith.constant dense<0.000000e+00> : vector<128x512xf32>
    %163 = tpu.matmul %46, %162, %cst_57 {dimension_numbers = #tpu.dot_dimension_numbers<[1], [0], [0], [1], [0, 0, 1, 1], [], []>} : vector<128x128xbf16>, vector<128x512xbf16>, vector<128x512xf32> -> vector<128x512xf32>
    %164 = vector.broadcast %47 : vector<128x1xf32> to vector<128x512xf32>
    %165 = arith.addf %163, %164 : vector<128x512xf32>
    %cst_58 = arith.constant 1.38629436 : f32
    %166 = vector.broadcast %cst_58 : f32 to vector<128x512xf32>
    %167 = arith.mulf %166, %165 : vector<128x512xf32>
    %cst_59 = arith.constant 0.000000e+00 : f32
    %168 = vector.broadcast %cst_59 : f32 to vector<128x512xf32>
    %169 = arith.maximumf %167, %168 : vector<128x512xf32>
    %170 = math.absf %167 : vector<128x512xf32>
    %cst_60 = arith.constant 0.000000e+00 : f32
    %171 = vector.broadcast %cst_60 : f32 to vector<128x512xf32>
    %172 = arith.subf %171, %170 : vector<128x512xf32>
    %173 = math.exp %172 : vector<128x512xf32>
    %cst_61 = arith.constant 1.000000e+00 : f32
    %174 = vector.broadcast %cst_61 : f32 to vector<128x512xf32>
    %175 = arith.addf %174, %173 : vector<128x512xf32>
    %176 = math.log %175 : vector<128x512xf32>
    %177 = arith.addf %169, %176 : vector<128x512xf32>
    %cst_62 = arith.constant 0.693147182 : f32
    %178 = vector.broadcast %cst_62 : f32 to vector<128x512xf32>
    %179 = arith.divf %177, %178 : vector<128x512xf32>
    %180 = arith.truncf %179 : vector<128x512xf32> to vector<128x512xbf16>
    %181 = arith.extf %180 : vector<128x512xbf16> to vector<128x512xf32>
    %182 = vector.broadcast %48 : vector<128x1xf32> to vector<128x512xf32>
    %183 = arith.mulf %181, %182 : vector<128x512xf32>
    %cst_63 = arith.constant dense<0.000000e+00> : vector<512xf32>
    %184 = vector.multi_reduction <add>, %183, %cst_63 [0] : vector<128x512xf32> to vector<512xf32>
    %185 = vector.shape_cast %184 : vector<512xf32> to vector<1x512xf32>
    %186 = vector.broadcast %49 : vector<1x1xf32> to vector<1x512xf32>
    %187 = arith.addf %185, %186 : vector<1x512xf32>
    %c0_64 = arith.constant 0 : index
    %c0_65 = arith.constant 0 : index
    %188 = vector.load %arg10[%c0_64, %c0_65] : memref<1x1xf32, #tpu.memory_space<vmem>>, vector<1x1xf32>
    %189 = arith.mulf %30, %30 : vector<1x512xf32>
    %190 = arith.mulf %40, %40 : vector<1x512xf32>
    %191 = arith.addf %189, %190 : vector<1x512xf32>
    %cst_66 = arith.constant 1.000000e+00 : f32
    %192 = vector.broadcast %cst_66 : f32 to vector<1x512xf32>
    %193 = arith.mulf %191, %192 : vector<1x512xf32>
    %194 = math.tanh %193 : vector<1x512xf32>
    %cst_67 = arith.constant 1.000000e+00 : f32
    %195 = vector.broadcast %cst_67 : f32 to vector<1x512xf32>
    %196 = arith.subf %30, %195 : vector<1x512xf32>
    %cst_68 = arith.constant 1.000000e+00 : f32
    %197 = vector.broadcast %cst_68 : f32 to vector<1x512xf32>
    %198 = arith.subf %30, %197 : vector<1x512xf32>
    %199 = arith.mulf %196, %198 : vector<1x512xf32>
    %cst_69 = arith.constant 1.000000e+00 : f32
    %200 = vector.broadcast %cst_69 : f32 to vector<1x512xf32>
    %201 = arith.mulf %199, %200 : vector<1x512xf32>
    %202 = math.tanh %201 : vector<1x512xf32>
    %203 = vector.broadcast %188 : vector<1x1xf32> to vector<1x512xf32>
    %204 = arith.subf %118, %203 : vector<1x512xf32>
    %cst_70 = arith.constant 1.000000e+00 : f32
    %205 = vector.broadcast %cst_70 : f32 to vector<1x512xf32>
    %206 = arith.addf %204, %205 : vector<1x512xf32>
    %207 = arith.subf %118, %187 : vector<1x512xf32>
    %cst_71 = arith.constant 1.000000e+00 : f32
    %208 = vector.broadcast %cst_71 : f32 to vector<1x512xf32>
    %209 = arith.addf %207, %208 : vector<1x512xf32>
    %210 = arith.mulf %206, %202 : vector<1x512xf32>
    %211 = arith.mulf %209, %194 : vector<1x512xf32>
    %212 = arith.addf %210, %211 : vector<1x512xf32>
    %213 = arith.addf %202, %194 : vector<1x512xf32>
    %214 = arith.divf %212, %213 : vector<1x512xf32>
    %cst_72 = arith.constant 1.000000e+00 : f32
    %215 = vector.broadcast %cst_72 : f32 to vector<1x512xf32>
    %216 = arith.subf %214, %215 : vector<1x512xf32>
    %cst_73 = arith.constant 1.38629436 : f32
    %217 = vector.broadcast %cst_73 : f32 to vector<1x512xf32>
    %218 = arith.mulf %217, %216 : vector<1x512xf32>
    %cst_74 = arith.constant 0.000000e+00 : f32
    %219 = vector.broadcast %cst_74 : f32 to vector<1x512xf32>
    %220 = arith.maximumf %218, %219 : vector<1x512xf32>
    %221 = math.absf %218 : vector<1x512xf32>
    %cst_75 = arith.constant 0.000000e+00 : f32
    %222 = vector.broadcast %cst_75 : f32 to vector<1x512xf32>
    %223 = arith.subf %222, %221 : vector<1x512xf32>
    %224 = math.exp %223 : vector<1x512xf32>
    %cst_76 = arith.constant 1.000000e+00 : f32
    %225 = vector.broadcast %cst_76 : f32 to vector<1x512xf32>
    %226 = arith.addf %225, %224 : vector<1x512xf32>
    %227 = math.log %226 : vector<1x512xf32>
    %228 = arith.addf %220, %227 : vector<1x512xf32>
    %cst_77 = arith.constant 0.693147182 : f32
    %229 = vector.broadcast %cst_77 : f32 to vector<1x512xf32>
    %230 = arith.divf %228, %229 : vector<1x512xf32>
    %c0_78 = arith.constant 0 : index
    %c0_79 = arith.constant 0 : index
    %231 = vector.load %arg11[%c0_78, %c0_79] : memref<1x512xf32, #tpu.memory_space<vmem>>, vector<1x512xf32>
    tpu.vector_store %arg11[%c0_78, %c0_79], %230 {strides = array<i32>} : memref<1x512xf32, #tpu.memory_space<vmem>>, vector<1x512xf32>,
    return
  }
  func.func @transform_0(%arg0: i32) -> (i32, i32) {
    %c0_i32 = arith.constant 0 : i32
    %c0_i32_0 = arith.constant 0 : i32
    return %c0_i32, %arg0 : i32, i32
  }
  func.func @transform_1(%arg0: i32) -> (i32, i32) {
    %c0_i32 = arith.constant 0 : i32
    %c0_i32_0 = arith.constant 0 : i32
    %c0_i32_1 = arith.constant 0 : i32
    return %c0_i32, %c0_i32_0 : i32, i32
  }
  func.func @transform_2(%arg0: i32) -> (i32, i32) {
    %c0_i32 = arith.constant 0 : i32
    %c0_i32_0 = arith.constant 0 : i32
    %c0_i32_1 = arith.constant 0 : i32
    return %c0_i32, %c0_i32_0 : i32, i32
  }
  func.func @transform_3(%arg0: i32) -> (i32, i32) {
    %c0_i32 = arith.constant 0 : i32
    %c0_i32_0 = arith.constant 0 : i32
    %c0_i32_1 = arith.constant 0 : i32
    return %c0_i32, %c0_i32_0 : i32, i32
  }
  func.func @transform_4(%arg0: i32) -> (i32, i32) {
    %c0_i32 = arith.constant 0 : i32
    %c0_i32_0 = arith.constant 0 : i32
    %c0_i32_1 = arith.constant 0 : i32
    return %c0_i32, %c0_i32_0 : i32, i32
  }
  func.func @transform_5(%arg0: i32) -> (i32, i32) {
    %c0_i32 = arith.constant 0 : i32
    %c0_i32_0 = arith.constant 0 : i32
    %c0_i32_1 = arith.constant 0 : i32
    return %c0_i32, %c0_i32_0 : i32, i32
  }
  func.func @transform_6(%arg0: i32) -> (i32, i32) {
    %c0_i32 = arith.constant 0 : i32
    %c0_i32_0 = arith.constant 0 : i32
    %c0_i32_1 = arith.constant 0 : i32
    return %c0_i32, %c0_i32_0 : i32, i32
  }
  func.func @transform_7(%arg0: i32) -> (i32, i32) {
    %c0_i32 = arith.constant 0 : i32
    %c0_i32_0 = arith.constant 0 : i32
    %c0_i32_1 = arith.constant 0 : i32
    return %c0_i32, %c0_i32_0 : i32, i32
  }
  func.func @transform_8(%arg0: i32) -> (i32, i32) {
    %c0_i32 = arith.constant 0 : i32
    %c0_i32_0 = arith.constant 0 : i32
    %c0_i32_1 = arith.constant 0 : i32
    return %c0_i32, %c0_i32_0 : i32, i32
  }
  func.func @transform_9(%arg0: i32) -> (i32, i32) {
    %c0_i32 = arith.constant 0 : i32
    %c0_i32_0 = arith.constant 0 : i32
    %c0_i32_1 = arith.constant 0 : i32
    return %c0_i32, %c0_i32_0 : i32, i32
  }
  func.func @transform_10(%arg0: i32) -> (i32, i32) {
    %c0_i32 = arith.constant 0 : i32
    %c0_i32_0 = arith.constant 0 : i32
    return %c0_i32, %arg0 : i32, i32
  }
}

</mosaic_0001>

<bundles_post_ra>
// kernel: pcnn_mgga_fx.1
= control target key start
LH: loop header
LB: loop body
LE: loop exit
PB: predicated region body
PF: predicated region fallthrough
CT: control target
= control target key end

     0   :  { %s15084_s0 = inlined_call_operand.vmem [shape: f32[3,2048], index: 0, kind: input, shape index: {}]   ;;  %s15085_s1 = inlined_call_operand.vmem [shape: f32[128,2], index: 1, kind: input, shape index: {}]   ;;  %s15086_s2 = inlined_call_operand.vmem [shape: f32[128,1], index: 2, kind: input, shape index: {}]   ;;  %s15087_s3 = inlined_call_operand.vmem [shape: bf16[128,128], index: 3, kind: input, shape index: {}]   ;;  %s15088_s4 = inlined_call_operand.vmem [shape: f32[128,1], index: 4, kind: input, shape index: {}]   ;;  %s15089_s5 = inlined_call_operand.vmem [shape: bf16[128,128], index: 5, kind: input, shape index: {}]   ;;  %s15090_s6 = inlined_call_operand.vmem [shape: f32[128,1], index: 6, kind: input, shape index: {}]   ;;  %s15091_s7 = inlined_call_operand.vmem [shape: f32[128,1], index: 7, kind: input, shape index: {}]   ;;  %s15092_s8 = inlined_call_operand.<no memory space> [shape: f32[1,1], index: 8, kind: input, shape index: {}]   ;;  %s15093_s10 = inlined_call_operand.hbm [shape: f32[1,2048], index: 10, kind: output, shape index: {}]   ;;  %s15094_s9 = inlined_call_operand.<no memory space> [shape: f32[1,1], index: 9, kind: input, shape index: {}]  }
   0x1   :  { %v15_v0 = vstv %s15092_s8  ;;  %v17_v1 = vstv %s15094_s9 }
   0x2   :  { %16 = vst [vmem:[#allocation2] sm:$0x1] %v15_v0  ;;  %18 = vst [vmem:[#allocation3] sm:$0x1] %v17_v1 }
   0x3   :  { %19 = vsyncpa [#allocation5], 0 }
   0x4   :  { %21 = vsyncpa [#allocation5 + $0x1], 0  ;;  %s9487_s17 = smov 0   ;;  %s9489_s18 = smov 0  }
   0x5   :  { %s9491_s19 = smov 0   ;;  %s9493_s20 = smov 0  }
   0x6 LB: > { %s9508_s8 = sadd.s32 4294967295, %s9420_s20   ;;  %s7631_s9 = sadd.s32 4294967294, %s9420_s20   ;;  %s9420_s20 = sphi %s9493_s20, %s16357_s20   ;;  %s9416_s19 = sphi %s9491_s19, %s16356_s19   ;;  %s9412_s18 = sphi %s9489_s18, %s16355_s18   ;;  %s9408_s17 = sphi %s9487_s17, %s16354_s17  }
   0x7   : > { %s9512_s21 = sadd.s32 1, %s9420_s20   ;;  %s249_s22 = sadd.s32 1, %s9416_s19 }
   0x8   : > { %s246_s23 = ssub.s32 %s9420_s20, %s9512_s21  ;;  %p259_p0 = scmp.ne.s32.totalorder %s9416_s19, %s9412_s18 }
   0x9   : > { %p247_p1 = scmp.eq.s32.totalorder %s246_s23, 0  ;;  %p260_p2 = scmp.eq.s32.totalorder %s9508_s8, 3 }
   0xa   : > { %p265_p3 = scmp.ne.s32.totalorder %s9412_s18, %s9408_s17  ;;  %p266_p4 = scmp.eq.s32.totalorder %s7631_s9, 3 }
   0xb   : > { %s9523_s24 = scalar_select %p247_p1, %s9416_s19, %s249_s22  }
   0xc   : > { %p9525_p5 = por %p260_p2, %p259_p0  ;;  %p9529_p6 = por %p266_p4, %p265_p3 }
   0xd   : > { %p7634_p7 = scmp.ge.s32.totalorder %s9420_s20, 1  ;;  %p320_p8 = scmp.lt.s32.totalorder %s9420_s20, 5 }
   0xf   : > { %p321_p9 = pnand %p7634_p7, %p320_p8 }
  0x11   : > { %324 = sbr.rel (%p321_p9) target bundleno = 2166 (0x876), region = 60 }
  0x18   : > { %v446_v2 = vld [vmem:[%s15085_s1 + $0x10] sm:$0xff]  ;;  %v444_v3 = vld [vmem:[%s15085_s1] sm:$0xff]  ;;  %v9422_v4 = vmov 1   ;;  %v445_v6 = vld [vmem:[%s15085_s1 + $0x8] sm:$0xff]  ;;  %v15096_v7 = vmov 0   ;;  %s7636_s14 = sshll.u32 %s9508_s8, 2 }
  0x19   : > { %7714 = vset.pattern.permute.xlu0 %v9422_v4  ;;  %7712 = vset.pattern.permute.xlu1 %v9422_v4  ;;  %v448_v5 = vld [vmem:[%s15085_s1 + $0x20] sm:$0xff]  ;;  %v450_v8 = vld [vmem:[%s15085_s1 + $0x30] sm:$0xff]  ;;  %v447_v9 = vld [vmem:[%s15085_s1 + $0x18] sm:$0xff]  ;;  %p359_p10 = scmp.lt.s32.totalorder %s7636_s14, 15  ;;  %s355_s15 = sand.u32 1, %s9412_s18  }
  0x1a   : > { %748 = vperm.xlu0 %7714, %v446_v2   ;;  %740 = vperm.xlu1 %7712, %v444_v3   ;;  %v452_v10 = vld [vmem:[%s15085_s1 + $0x40] sm:$0xff]  ;;  %v9565_v11 = vld [vmem:[%s15085_s1 + $0x50] sm:$0xff]  ;;  %v449_v15 = vld [vmem:[%s15085_s1 + $0x28] sm:$0xff]  ;;  %s7635_s16 = sshll.u32 %s355_s15, 2  ;;  %s7669_s9 = sshll.u32 %s9508_s8, 6 }
  0x1b   : > { %2010 = vmatprep.mubr.bf16.mxu0 %v15096_v7  ;;  %2123 = vmatprep.mubr.bf16.mxu1 %v15096_v7  ;;  %v460_v12 = vld [vmem:[%s15086_s2] sm:$0xff]  ;;  %v9582_v14 = vld [vmem:[%s15085_s1 + $0x70] sm:$0xff]  ;;  %s16359_s14 = smov (!%p359_p10, %s7636_s14), 15  ;;  %v461_v18 = vld [vmem:[%s15086_s2 + $0x8] sm:$0xff]  ;;  %s357_s22 = scalar_lea.vmem [#allocation4], %s7635_s16 }
  0x1c   : > { %v9574_v13 = vld [vmem:[%s15085_s1 + $0x60] sm:$0xff]  ;;  %s7637_s23 = sshll.u32 %s16359_s14, 2  ;;  %v462_v16 = vld [vmem:[%s15086_s2 + $0x10] sm:$0xff]  ;;  %v463_v22 = vld [vmem:[%s15086_s2 + $0x18] sm:$0xff]  ;;  %s15042_s29 = scalar_lea.hbm %s15093_s10, %s7669_s9 }
  0x1d   : > { %s362_s11 = scalar_lea.vmem %s15084_s0, %s7637_s23  ;;  %v451_v23 = vld [vmem:[%s15085_s1 + $0x38] sm:$0xff]  ;;  %v465_v26 = vld [vmem:[%s15086_s2 + $0x28] sm:$0xff]  ;;  %v464_v30 = vld [vmem:[%s15086_s2 + $0x20] sm:$0xff]  ;;  %s7572_s23 = sshll.u32 %s357_s22, 4  ;;  %s15044_s23 = int_to_ptr.vmem [resolvable:$true] %s7572_s23 }
  0x1e   : > { %756 = vperm.xlu0 %7714, %v448_v5   ;;  %744 = vperm.xlu1 %7712, %v445_v6   ;;  %v9597_v17 = vld [vmem:[%s362_s11] sm:$0x77]  ;;  %v9602_v19 = vld [vmem:[%s362_s11 + $0x8] sm:$0x77]  ;;  %v467_v29 = vld [vmem:[%s15086_s2 + $0x38] sm:$0xff]  ;;  %s7558_s30 = scalar_lea.sflag [#allocation5], %s355_s15 }
  0x1f   : > { %v368_v20 = vmul.f32 0.5, %v9597_v17  ;;  %v369_v21 = vmul.f32 0.5, %v9602_v19  ;;  %v469_v31 = vld [vmem:[%s15086_s2 + $0x48] sm:$0xff]  ;;  %v471_v32 = vld [vmem:[%s15086_s2 + $0x58] sm:$0xff]  ;;  %v492_v38 = vld [vmem:[%s15088_s4] sm:$0xff]  ;;  %v370_v58 = vmul.f32 0.25, %v9597_v17 }
  0x20   : > { %v453_v33 = vld [vmem:[%s15085_s1 + $0x48] sm:$0xff]  ;;  %v494_v41 = vld [vmem:[%s15088_s4 + $0x10] sm:$0xff]  ;;  %v496_v45 = vld [vmem:[%s15088_s4 + $0x20] sm:$0xff]  ;;  %v371_v60 = vmul.f32 0.25, %v9602_v19  ;;  %s9358_s11 = scalar_lea.vmem %s15044_s23, 64  ;;  %s9425_s8 = smov [#allocation4]  }
  0x21   : > { %v9612_v24 = vadd.f32 %v368_v20, %v368_v20  ;;  %v9614_v25 = vadd.f32 %v369_v21, %v369_v21  ;;  %v473_v35 = vld [vmem:[%s15086_s2 + $0x68] sm:$0xff]  ;;  %v466_v42 = vld [vmem:[%s15086_s2 + $0x30] sm:$0xff]  ;;  %v455_v48 = vld [vmem:[%s15085_s1 + $0x58] sm:$0xff]  ;;  %v392_v1 = vadd.f32 %v370_v58, %v370_v58  ;;  %p9359_p11 = scmp.ne.s32.totalorder %s15044_s23, %s9358_s11  ;;  %s9362_s12 = sshll.u32 %s9425_s8, 4  ;;  %s9363_s12 = int_to_ptr.vmem [resolvable:$false] %s9362_s12 }
  0x22   : > { %764 = vperm.xlu0 %7714, %v450_v8   ;;  %7713 = vset.pattern.permute.xlu1 %v15096_v7  ;;  %v498_v47 = vld [vmem:[%s15088_s4 + $0x30] sm:$0xff]  ;;  %v500_v49 = vld [vmem:[%s15088_s4 + $0x40] sm:$0xff]  ;;  %v457_v62 = vld [vmem:[%s15085_s1 + $0x68] sm:$0xff]  ;;  %s9364_s13 = scalar_lea.vmem %s9363_s12, 128  ;;  %p9365_p0 = scmp.lt.s32.totalorder %s15044_s23, %s9363_s12 }
  0x23   : > { %574 = vperm.xlu1 %7713, %v447_v9   ;;  %v374_v27 = vadd.f32 1e-07, %v9612_v24  ;;  %v375_v28 = vadd.f32 1e-07, %v9614_v25  ;;  %v502_v50 = vld [vmem:[%s15088_s4 + $0x50] sm:$0xff]  ;;  %v468_v53 = vld [vmem:[%s15086_s2 + $0x40] sm:$0xff]  ;;  %p9360_p12 = pnand %p9359_p11, %p9525_p5  ;;  %p9366_p1 = scmp.lt.s32.totalorder %s9364_s13, %s9358_s11 }
  0x24   : > { %v504_v54 = vld [vmem:[%s15088_s4 + $0x60] sm:$0xff]  ;;  %v506_v57 = vld [vmem:[%s15088_s4 + $0x70] sm:$0xff] }
  0x25   : > { %7746 = vlog2.f32 %v374_v27  ;;  %v524_v63 = vld [vmem:[%s15090_s6] sm:$0xff]  ;;  %v530_v20 = vld [vmem:[%s15090_s6 + $0x30] sm:$0xff]  ;;  %p9361_p13 = pneg %p9360_p12  ;;  %p9367_p2 = por %p9366_p1, %p9365_p0 }
  0x26   : > { %772 = vperm.xlu0 %7714, %v452_v10   ;;  %7748 = vlog2.f32 %v375_v28 }
  0x27   : > { %7715 = vset.pattern.permute.xlu1 %v9422_v4  ;;  %p9368_p3 = pnand %p9367_p2, %p9361_p13 }
  0x28   : > { %752 = vperm.xlu1 %7715, %v447_v9  }
  0x2a   : > { %780 = vperm.xlu0 %7714, %v9565_v11  }
  0x2c   : > { %7716 = vset.pattern.permute.xlu1 %v15096_v7 }
  0x2d   : > { %971 = vperm.xlu1 %7716, %v460_v12  }
  0x2e   : > { %788 = vperm.xlu0 %7714, %v9574_v13  }
  0x2f   : > { %v7747_v34 = vpop.eup %7746 }
  0x30   : > { %v7749_v36 = vpop.eup %7748  ;;  %v377_v37 = vmul.f32 0.6931472, %v7747_v34  ;;  %v472_v34 = vld [vmem:[%s15086_s2 + $0x60] sm:$0xff] }
  0x31   : > { %579 = vperm.xlu1 %7716, %v448_v5   ;;  %v379_v39 = vmul.f32 0.6931472, %v7749_v36  ;;  %v393_v5 = vadd.f32 %v371_v60, %v371_v60 }
  0x32   : > { %796 = vperm.xlu0 %7714, %v9582_v14   ;;  %v380_v40 = vmul.f32 0.33333334, %v377_v37  ;;  %v538_v37 = vld [vmem:[%s15090_s6 + $0x70] sm:$0xff] }
  0x33   : > { %v381_v43 = vmul.f32 0.33333334, %v379_v39 }
  0x34   : > { %v382_v44 = vmul.f32 1.442695, %v380_v40 }
  0x35   : > { %584 = vperm.xlu1 %7716, %v449_v15   ;;  %v384_v46 = vmul.f32 1.442695, %v381_v43 }
  0x36   : > { %7727 = vset.pattern.permute.xlu0 %v15096_v7  ;;  %7750 = vpow2.f32 %v382_v44  ;;  %v474_v44 = vld [vmem:[%s15086_s2 + $0x70] sm:$0xff] }
  0x37   : > { %559 = vperm.xlu0 %7727, %v444_v3   ;;  %7752 = vpow2.f32 %v384_v46 }
  0x39   : > { %7717 = vset.pattern.permute.xlu1 %v9422_v4 }
  0x3a   : > { %760 = vperm.xlu1 %7717, %v449_v15   ;;  %v470_v15 = vld [vmem:[%s15086_s2 + $0x50] sm:$0xff] }
  0x3b   : > { %564 = vperm.xlu0 %7727, %v445_v6   ;;  %v395_v6 = vmul.f32 2.0, %v371_v60  ;;  %v493_v60 = vld [vmem:[%s15088_s4 + $0x8] sm:$0xff] }
  0x3e   : > { %7718 = vset.pattern.permute.xlu1 %v15096_v7 }
  0x3f   : > { %569 = vperm.xlu0 %7727, %v446_v2   ;;  %981 = vperm.xlu1 %7718, %v462_v16   ;;  %v394_v2 = vmul.f32 2.0, %v370_v58  ;;  %v15095_v58 = vlaneseq }
  0x40   : > { %v7751_v51 = vpop.eup %7750 }
  0x41   : > { %v7753_v52 = vpop.eup %7752  ;;  %v386_v55 = vmul.f32 %v7751_v51, %v7751_v51  ;;  %v396_v9 = vadd.f32 %v394_v2, %v392_v1  ;;  %v546_v2 = vld [vmem:[%s15091_s7 + $0x30] sm:$0xff] }
  0x42   : > { %v387_v56 = vmul.f32 %v7753_v52, %v7753_v52 }
  0x43   : > { %976 = vperm.xlu0 %7727, %v461_v18   ;;  %589 = vperm.xlu1 %7718, %v450_v8   ;;  %v388_v59 = vmul.f32 %v7751_v51, %v386_v55  ;;  %v526_v8 = vld [vmem:[%s15090_s6 + $0x10] sm:$0xff]  ;;  %v398_v16 = vadd.f32 2.1544347e-19, %v396_v9 }
  0x44   : > { %v389_v61 = vmul.f32 %v7753_v52, %v387_v56  ;;  %v542_v55 = vld [vmem:[%s15091_s7 + $0x10] sm:$0xff] }
  0x45   : > { %v390_v0 = vmul.f32 %v7751_v51, %v388_v59  ;;  %7754 = vrsqrt.f32 %v398_v16  ;;  %vm402_vm0 = vcmp.eq.f32.partialorder %v398_v16, inf  ;;  %vm404_vm2 = vcmp.eq.f32.partialorder %v398_v16, 0.0 }
  0x46   : > { %v391_v3 = vmul.f32 %v7753_v52, %v389_v61  ;;  %v544_v61 = vld [vmem:[%s15091_s7 + $0x20] sm:$0xff] }
  0x47   : > { %986 = vperm.xlu0 %7727, %v463_v22   ;;  %594 = vperm.xlu1 %7718, %v451_v23   ;;  %v416_v27 = vrot.slane %v390_v0, 7 }
  0x48   : > { %v427_v12 = vmul.f32 2.871234, %v391_v3  ;;  %v417_v28 = vrot.slane %v391_v3, 7 }
  0x4a   : > { %v429_v19 = vmul.f32 %v7753_v52, %v427_v12 }
  0x4b   : > { %996 = vperm.xlu0 %7727, %v465_v26   ;;  %7719 = vset.pattern.permute.xlu1 %v9422_v4  ;;  %v459_v26 = vld [vmem:[%s15085_s1 + $0x78] sm:$0xff] }
  0x4c   : > { %768 = vperm.xlu1 %7719, %v451_v23   ;;  %v433_v22 = vrot.slane %v429_v19, 6  ;;  %v532_v23 = vld [vmem:[%s15090_s6 + $0x40] sm:$0xff] }
  0x4f   : > { %1006 = vperm.xlu0 %7727, %v467_v29   ;;  %v534_v29 = vld [vmem:[%s15090_s6 + $0x50] sm:$0xff] }
  0x50   : > { %7720 = vset.pattern.permute.xlu1 %v15096_v7 }
  0x51   : > { %991 = vperm.xlu1 %7720, %v464_v30   ;;  %v7755_v30 = vpop.eup %7754 }
  0x53   : > { %1016 = vperm.xlu0 %7727, %v469_v31   ;;  %v536_v31 = vld [vmem:[%s15090_s6 + $0x60] sm:$0xff] }
  0x55   : > { %599 = vperm.xlu1 %7720, %v452_v10   ;;  %v426_v10 = vmul.f32 2.871234, %v390_v0  ;;  %v495_v0 = vld [vmem:[%s15088_s4 + $0x18] sm:$0xff] }
  0x57   : > { %1026 = vperm.xlu0 %7727, %v471_v32   ;;  %v428_v17 = vmul.f32 %v7751_v51, %v426_v10  ;;  %v401_v32 = vmul.f32 %v7755_v30, %v398_v16 }
  0x59   : > { %604 = vperm.xlu1 %7720, %v453_v33   ;;  %v432_v21 = vrot.slane %v428_v17, 6 }
  0x5b   : > { %1036 = vperm.xlu0 %7727, %v473_v35  }
  0x5d   : > { %7721 = vset.pattern.permute.xlu1 %v9422_v4 }
  0x5e   : > { %776 = vperm.xlu1 %7721, %v453_v33  }
  0x5f   : > { %1852 = vperm.xlu0 %7727, %v492_v38  }
  0x62   : > { %7722 = vset.pattern.permute.xlu1 %v15096_v7 }
  0x63   : > { %1862 = vperm.xlu0 %7727, %v494_v41   ;;  %1001 = vperm.xlu1 %7722, %v466_v42   ;;  %v403_v42 = vsel %vm402_vm0, %v398_v16, %v401_v32 }
  0x67   : > { %1872 = vperm.xlu0 %7727, %v496_v45   ;;  %609 = vperm.xlu1 %7722, %v9565_v11   ;;  %v397_v11 = vadd.f32 %v395_v6, %v393_v5  ;;  %v497_v6 = vld [vmem:[%s15088_s4 + $0x28] sm:$0xff] }
  0x69   : > { %v399_v18 = vadd.f32 2.1544347e-19, %v397_v11  ;;  %v548_v11 = vld [vmem:[%s15091_s7 + $0x40] sm:$0xff] }
  0x6b   : > { %1882 = vperm.xlu0 %7727, %v498_v47   ;;  %614 = vperm.xlu1 %7722, %v455_v48   ;;  %7756 = vrsqrt.f32 %v399_v18  ;;  %vm409_vm1 = vcmp.eq.f32.partialorder %v399_v18, inf  ;;  %v412_v39 = vand.u32 2147483648, %v399_v18  ;;  %vm411_vm3 = vcmp.eq.f32.partialorder %v399_v18, 0.0  ;;  %v540_v47 = vld [vmem:[%s15091_s7] sm:$0xff] }
  0x6c   : > { %7758 = vrcp.f32 %v432_v21 }
  0x6d   : > { %7760 = vrcp.f32 %v433_v22 }
  0x6e   : > { %7762 = vrcp.f32 %v416_v27 }
  0x6f   : > { %1892 = vperm.xlu0 %7727, %v500_v49   ;;  %7723 = vset.pattern.permute.xlu1 %v9422_v4  ;;  %7764 = vrcp.f32 %v417_v28 }
  0x70   : > { %784 = vperm.xlu1 %7723, %v455_v48  }
  0x73   : > { %1902 = vperm.xlu0 %7727, %v502_v50  }
  0x74   : > { %7724 = vset.pattern.permute.xlu1 %v15096_v7 }
  0x75   : > { %1011 = vperm.xlu1 %7724, %v468_v53   ;;  %v475_v53 = vld [vmem:[%s15086_s2 + $0x78] sm:$0xff] }
  0x77   : > { %1912 = vperm.xlu0 %7727, %v504_v54  }
  0x79   : > { %619 = vperm.xlu1 %7724, %v9574_v13   ;;  %v528_v13 = vld [vmem:[%s15090_s6 + $0x20] sm:$0xff] }
  0x7b   : > { %1922 = vperm.xlu0 %7727, %v506_v57  }
  0x7d   : > { %624 = vperm.xlu1 %7724, %v457_v62  }
  0x7f   : > { %2942 = vperm.xlu0 %7727, %v524_v63   ;;  %v9758_v63 = vshrl.u32 %v15095_v58, 7 }
  0x81   : > { %7725 = vset.pattern.permute.xlu1 %v9422_v4  ;;  %15389 = vst [vmem:[#allocation8_spill] sm:$0xff] %v9758_v63  ;;  %v811_v5 = vsub.s32 6, %v9758_v63 }
  0x82   : > { %792 = vperm.xlu1 %7725, %v457_v62  }
  0x83   : > { %2952 = vperm.xlu0 %7727, %v526_v8  }
  0x86   : > { %7726 = vset.pattern.permute.xlu1 %v15096_v7 }
  0x87   : > { %2962 = vperm.xlu0 %7727, %v528_v13   ;;  %1021 = vperm.xlu1 %7726, %v470_v15   ;;  %v9786_v13 = vsub.s32 1, %v9758_v63  ;;  %v807_v15 = vsub.s32 2, %v9758_v63 }
  0x89   : > { %15394 = vst [vmem:[#allocation13_spill] sm:$0xff] %v9786_v13 }
  0x8b   : > { %2972 = vperm.xlu0 %7727, %v530_v20   ;;  %629 = vperm.xlu1 %7726, %v9582_v14   ;;  %v7757_v14 = vpop.eup %7756  ;;  %v499_v20 = vld [vmem:[%s15088_s4 + $0x38] sm:$0xff] }
  0x8c   : > { %v7759_v33 = vpop.eup %7758  ;;  %v408_v35 = vmul.f32 %v7757_v14, %v399_v18 }
  0x8d   : > { %v7761_v36 = vpop.eup %7760  ;;  %v437_v40 = vmul.f32 %v7759_v33, %v9612_v24 }
  0x8e   : > { %v439_v43 = vmul.f32 %v7761_v36, %v9614_v25  ;;  %v410_v45 = vsel %vm409_vm1, %v399_v18, %v408_v35  ;;  %v7763_v46 = vpop.eup %7762 }
  0x8f   : > { %2982 = vperm.xlu0 %7727, %v532_v23   ;;  %634 = vperm.xlu1 %7726, %v459_v26   ;;  %v7765_v24 = vpop.eup %7764  ;;  %v7638_v49 = vadd.f32 -1.0, %v437_v40  ;;  %v413_v25 = vsel %vm411_vm3, %v412_v39, %v410_v45  ;;  %v550_v23 = vld [vmem:[%s15091_s7 + $0x50] sm:$0xff] }
  0x90   : > { %v7639_v52 = vadd.f32 -1.0, %v439_v43  ;;  %v423_v56 = vmul.f32 %v7765_v24, %v413_v25  ;;  %v554_v24 = vld [vmem:[%s15091_s7 + $0x70] sm:$0xff] }
  0x91   : > { %7766 = vtanh.f32 %v7638_v49 }
  0x92   : > { %7768 = vtanh.f32 %v7639_v52 }
  0x93   : > { %2992 = vperm.xlu0 %7727, %v534_v29   ;;  %7728 = vset.pattern.permute.xlu1 %v9422_v4  ;;  %v405_v4 = vand.u32 2147483648, %v398_v16  ;;  %v9790_v16 = vsub.s32 5, %v9758_v63 }
  0x94   : > { %800 = vperm.xlu1 %7728, %v459_v26  }
  0x95   : > { %v406_v48 = vsel %vm404_vm2, %v405_v4, %v403_v42  ;;  %15395 = vst [vmem:[#allocation14_spill] sm:$0xff] %v9790_v16  ;;  %v503_v42 = vld [vmem:[%s15088_s4 + $0x58] sm:$0xff] }
  0x96   : > { %v421_v54 = vmul.f32 %v7763_v46, %v406_v48 }
  0x97   : > { %3002 = vperm.xlu0 %7727, %v536_v31   ;;  %v501_v31 = vld [vmem:[%s15088_s4 + $0x48] sm:$0xff] }
  0x98   : > { %7729 = vset.pattern.permute.xlu1 %v15096_v7  ;;  %7770 = vtanh.f32 %v421_v54 }
  0x99   : > { %1031 = vperm.xlu1 %7729, %v472_v34   ;;  %v9723_v38 = vpop.permute.xlu1 %740  ;;  %v9726_v41 = vpop.permute.xlu0 %748  ;;  %7772 = vtanh.f32 %v423_v56  ;;  %v552_v34 = vld [vmem:[%s15091_s7 + $0x60] sm:$0xff] }
  0x9b   : > { %3012 = vperm.xlu0 %7727, %v538_v37   ;;  %v9774_v8 = vpop.eup %7766 }
  0x9c   : > { %15390 = vst [vmem:[#allocation9_spill] sm:$0xff] %v9774_v8  ;;  %v9776_v9 = vpop.eup %7768  ;;  %v812_v19 = vrot.slane %v9774_v8, %v811_v5  ;;  %v808_v26 = vrot.slane %v9774_v8, %v807_v15 }
  0x9d   : > { %1041 = vperm.xlu1 %7729, %v474_v44   ;;  %v9735_v50 = vpop.permute.xlu1 %744  ;;  %v9737_v51 = vpop.permute.xlu0 %756  ;;  %15391 = vst [vmem:[#allocation10_spill] sm:$0xff] %v9776_v9  ;;  %v820_v21 = vrot.slane %v9776_v9, %v811_v5  ;;  %v556_v5 = vld [vmem:[#allocation2] sm:$0x1] }
  0x9e   : > { %v9815_v14 = vrot.slane %v812_v19, %v807_v15  ;;  %v9827_v35 = vrot.slane %v808_v26, %v807_v15 }
  0x9f   : > { %4096 = vperm.xlu0 %7727, %v540_v47   ;;  %v9820_v32 = vrot.slane %v820_v21, %v807_v15  ;;  %v816_v47 = vrot.slane %v9776_v9, %v807_v15 }
  0xa0   : > { %v9840_v39 = vmul.f32 %v9815_v14, %v9723_v38  ;;  %v9865_v49 = vmul.f32 %v9827_v35, %v9723_v38  ;;  %v9890_v19 = vmul.f32 %v9815_v14, %v9735_v50  ;;  %v10015_v8 = vmul.f32 %v9827_v35, %v9726_v41 }
  0xa1   : > { %1046 = vperm.xlu1 %7729, %v475_v53   ;;  %v9745_v57 = vpop.permute.xlu0 %764  ;;  %v9849_v43 = vmul.f32 %v9820_v32, %v9723_v38 }
  0xa2   : > { %v9747_v59 = vpop.permute.xlu1 %574  ;;  %v9783_v12 = vpop.eup %7770  ;;  %15401 = vst [vmem:[#allocation20_spill] sm:$0xff] %v9840_v39  ;;  %15404 = vst [vmem:[#allocation23_spill] sm:$0xff] %v9865_v49 }
  0xa3   : > { %15388 = vst [vmem:[#allocation7_spill] sm:$0xff] %v9747_v59  ;;  %4106 = vperm.xlu0 %7727, %v542_v55   ;;  %15393 = vst [vmem:[#allocation12_spill] sm:$0xff] %v9783_v12  ;;  %v9794_v18 = vpop.eup %7772  ;;  %v642_v27 = vrot.slane %v9783_v12, %v9786_v13  ;;  %v646_v28 = vrot.slane %v9783_v12, %v9790_v16  ;;  %v505_v55 = vld [vmem:[%s15088_s4 + $0x68] sm:$0xff] }
  0xa4   : > { %15397 = vst [vmem:[#allocation16_spill] sm:$0xff] %v9794_v18  ;;  %v654_v29 = vrot.slane %v9794_v18, %v9790_v16  ;;  %15403 = vst [vmem:[#allocation22_spill] sm:$0xff] %v9849_v43  ;;  %v650_v48 = vrot.slane %v9794_v18, %v9786_v13 }
  0xa5   : > { %1857 = vperm.xlu1 %7729, %v493_v60   ;;  %v9755_v62 = vpop.permute.xlu0 %772  ;;  %v9830_v36 = vrot.slane %v642_v27, %v9786_v13  ;;  %v9833_v4 = vrot.slane %v646_v28, %v9786_v13  ;;  %15406 = vst [vmem:[#allocation25_spill] sm:$0xff] %v9890_v19  ;;  %v9907_v28 = vmul.f32 %v9827_v35, %v9735_v50  ;;  %15425 = vst [vmem:[#allocation44_spill] sm:$0xff] %v10015_v8 }
  0xa6   : > { %v9836_v37 = vrot.slane %v654_v29, %v9786_v13  ;;  %v9911_v29 = vmul.f32 %v9820_v32, %v9735_v50 }
  0xa7   : > { %4116 = vperm.xlu0 %7727, %v544_v61   ;;  %v9763_v1 = vpop.permute.xlu1 %752  ;;  %15409 = vst [vmem:[#allocation28_spill] sm:$0xff] %v9907_v28 }
  0xa8   : > { %15410 = vst [vmem:[#allocation29_spill] sm:$0xff] %v9911_v29 }
  0xa9   : > { %1867 = vperm.xlu1 %7729, %v495_v0   ;;  %v9768_v3 = vpop.permute.xlu0 %780  ;;  %v9879_v0 = vrot.slane %v816_v47, %v807_v15  ;;  %v507_v15 = vld [vmem:[%s15088_s4 + $0x78] sm:$0xff] }
  0xab   : > { %4126 = vperm.xlu0 %7727, %v546_v2   ;;  %v9882_v2 = vrot.slane %v650_v48, %v9786_v13 }
  0xac   : > { %v9778_v10 = vpop.permute.xlu1 %971 }
  0xad   : > { %15392 = vst [vmem:[#allocation11_spill] sm:$0xff] %v9778_v10  ;;  %1877 = vperm.xlu1 %7729, %v497_v6   ;;  %v9792_v17 = vpop.permute.xlu0 %788 }
  0xae   : > { %15396 = vst [vmem:[#allocation15_spill] sm:$0xff] %v9792_v17 }
  0xaf   : > { %4136 = vperm.xlu0 %7727, %v548_v11  }
  0xb0   : > { %v9801_v22 = vpop.permute.xlu1 %579 }
  0xb1   : > { %15398 = vst [vmem:[#allocation17_spill] sm:$0xff] %v9801_v22  ;;  %1887 = vperm.xlu1 %7729, %v499_v20   ;;  %v9813_v30 = vpop.permute.xlu0 %796 }
  0xb2   : > { %15399 = vst [vmem:[#allocation18_spill] sm:$0xff] %v9813_v30 }
  0xb3   : > { %4146 = vperm.xlu0 %7727, %v550_v23  }
  0xb4   : > { %v9822_v33 = vpop.permute.xlu1 %584 }
  0xb5   : > { %15400 = vst [vmem:[#allocation19_spill] sm:$0xff] %v9822_v33  ;;  %1897 = vperm.xlu1 %7729, %v501_v31  }
  0xb6   : > { %v9842_v40 = vpop.permute.xlu0 %559 }
  0xb7   : > { %15402 = vst [vmem:[#allocation21_spill] sm:$0xff] %v9842_v40  ;;  %4156 = vperm.xlu0 %7727, %v552_v34   ;;  %v676_v44 = vmul.f32 %v9833_v4, %v9842_v40  ;;  %v678_v45 = vmul.f32 %v9836_v37, %v9842_v40  ;;  %v675_v46 = vmul.f32 %v9830_v36, %v9842_v40 }
  0xb8   : > { %v677_v27 = vmul.f32 %v9882_v2, %v9842_v40  ;;  %v10091_v40 = vmul.f32 %v9820_v32, %v9763_v1 }
  0xb9   : > { %1907 = vperm.xlu1 %7729, %v503_v42   ;;  %v9867_v25 = vpop.permute.xlu1 %760  ;;  %v906_v52 = vadd.f32 %v9840_v39, %v676_v44  ;;  %v908_v53 = vadd.f32 %v9849_v43, %v678_v45  ;;  %v905_v61 = vadd.f32 %v9865_v49, %v675_v46  ;;  %v9918_v42 = vmul.f32 %v9879_v0, %v9723_v38 }
  0xba   : > { %v9871_v54 = vpop.permute.xlu0 %564  ;;  %v9931_v38 = vmul.f32 %v9879_v0, %v9735_v50  ;;  %v10065_v43 = vmul.f32 %v9879_v0, %v9745_v57  ;;  %15440 = vst [vmem:[#allocation59_spill] sm:$0xff] %v10091_v40 }
  0xbb   : > { %15405 = vst [vmem:[#allocation24_spill] sm:$0xff] %v9871_v54  ;;  %4166 = vperm.xlu0 %7727, %v554_v24   ;;  %v1050_v56 = vadd.f32 %v9778_v10, %v906_v52  ;;  %v1052_v60 = vadd.f32 %v9778_v10, %v908_v53  ;;  %v680_v6 = vmul.f32 %v9833_v4, %v9871_v54  ;;  %15411 = vst [vmem:[#allocation30_spill] sm:$0xff] %v9918_v42 }
  0xbc   : > { %v682_v11 = vmul.f32 %v9836_v37, %v9871_v54  ;;  %v679_v31 = vmul.f32 %v9830_v36, %v9871_v54  ;;  %v1049_v34 = vadd.f32 %v9778_v10, %v905_v61  ;;  %v681_v52 = vmul.f32 %v9882_v2, %v9871_v54  ;;  %15412 = vst [vmem:[#allocation31_spill] sm:$0xff] %v9931_v38 }
  0xbd   : > { %1917 = vperm.xlu1 %7729, %v505_v55   ;;  %v9899_v23 = vmul.f32 1.3862944, %v1050_v56  ;;  %v9901_v26 = vmul.f32 1.3862944, %v1052_v60  ;;  %v910_v44 = vadd.f32 %v9890_v19, %v680_v6  ;;  %v525_v56 = vld [vmem:[%s15090_s6 + $0x8] sm:$0xff]  ;;  %v907_v61 = vadd.f32 %v9918_v42, %v677_v27  ;;  %15436 = vst [vmem:[#allocation55_spill] sm:$0xff] %v10065_v43 }
  0xbe   : > { %v9892_v20 = vpop.permute.xlu0 %569  ;;  %v9894_v21 = vpop.permute.xlu1 %981  ;;  %v912_v47 = vadd.f32 %v9911_v29, %v682_v11  ;;  %v909_v48 = vadd.f32 %v9907_v28, %v679_v31  ;;  %v9925_v24 = vmul.f32 1.3862944, %v1049_v34  ;;  %v10054_v29 = vmul.f32 %v9827_v35, %v9745_v57 }
  0xbf   : > { %15407 = vst [vmem:[#allocation26_spill] sm:$0xff] %v9892_v20  ;;  %15408 = vst [vmem:[#allocation27_spill] sm:$0xff] %v9894_v21  ;;  %4324 = vperm.xlu0 %7727, %v556_v5   ;;  %v1242_v45 = vand.u32 2147483647, %v9899_v23  ;;  %v1244_v46 = vand.u32 2147483647, %v9901_v26  ;;  %v687_v19 = vmul.f32 %v9830_v36, %v9747_v59  ;;  %v10081_v54 = vmul.f32 %v9882_v2, %v9747_v59 }
  0xc0   : > { %v1241_v31 = vand.u32 2147483647, %v9925_v24  ;;  %15434 = vst [vmem:[#allocation53_spill] sm:$0xff] %v10054_v29  ;;  %v10098_v43 = vmul.f32 %v9827_v35, %v9755_v62 }
  0xc1   : > { %1927 = vperm.xlu1 %7729, %v507_v15   ;;  %v1306_v60 = vsub.f32 0.0, %v1242_v45  ;;  %v1308_v11 = vsub.f32 0.0, %v1244_v46  ;;  %v911_v45 = vadd.f32 %v9931_v38, %v681_v52  ;;  %v529_v52 = vld [vmem:[%s15090_s6 + $0x28] sm:$0xff]  ;;  %v688_v38 = vmul.f32 %v9833_v4, %v9747_v59 }
  0xc2   : > { %v9933_v53 = vpop.permute.xlu0 %976  ;;  %v9935_v55 = vpop.permute.xlu1 %589  ;;  %v1305_v46 = vsub.f32 0.0, %v1241_v31  ;;  %15441 = vst [vmem:[#allocation60_spill] sm:$0xff] %v10098_v43 }
  0xc3   : > { %15413 = vst [vmem:[#allocation32_spill] sm:$0xff] %v9933_v53  ;;  %15414 = vst [vmem:[#allocation33_spill] sm:$0xff] %v9935_v55  ;;  %v1054_v5 = vadd.f32 %v9933_v53, %v910_v44  ;;  %v1056_v6 = vadd.f32 %v9933_v53, %v912_v47  ;;  %v1053_v15 = vadd.f32 %v9933_v53, %v909_v48  ;;  %v1371_v50 = vmul.f32 1.442695, %v1306_v60  ;;  %v527_v44 = vld [vmem:[%s15090_s6 + $0x18] sm:$0xff] }
  0xc4   : > { %v1051_v47 = vadd.f32 %v9778_v10, %v907_v61  ;;  %v1375_v48 = vmul.f32 1.442695, %v1308_v11  ;;  %v1369_v31 = vmul.f32 1.442695, %v1305_v46 }
  0xc5   : > { %2947 = vperm.xlu1 %7729, %v525_v56   ;;  %v9945_v34 = vmul.f32 1.3862944, %v1054_v5  ;;  %v9947_v58 = vmul.f32 1.3862944, %v1056_v6  ;;  %v9949_v7 = vmul.f32 1.3862944, %v1053_v15  ;;  %v1055_v56 = vadd.f32 %v9933_v53, %v911_v45 }
  0xc6   : > { %v9952_v27 = vpop.permute.xlu1 %594  ;;  %7774 = vpow2.f32 %v1371_v50  ;;  %v9965_v13 = vmul.f32 1.3862944, %v1051_v47 }
  0xc7   : > { %v1246_v60 = vand.u32 2147483647, %v9945_v34  ;;  %v1248_v5 = vand.u32 2147483647, %v9947_v58  ;;  %v1245_v6 = vand.u32 2147483647, %v9949_v7  ;;  %7776 = vpow2.f32 %v1375_v48 }
  0xc8   : > { %v9967_v45 = vmul.f32 1.3862944, %v1055_v56  ;;  %v684_v48 = vmul.f32 %v9833_v4, %v9892_v20  ;;  %v9985_v56 = vmul.f32 %v9815_v14, %v9726_v41  ;;  %7778 = vpow2.f32 %v1369_v31  ;;  %v10007_v31 = vpop.permute.xlu0 %986 }
  0xc9   : > { %2957 = vperm.xlu1 %7729, %v527_v44   ;;  %v1310_v15 = vsub.f32 0.0, %v1246_v60  ;;  %v1312_v16 = vsub.f32 0.0, %v1248_v5  ;;  %v1309_v11 = vsub.f32 0.0, %v1245_v6  ;;  %v531_v5 = vld [vmem:[%s15090_s6 + $0x38] sm:$0xff]  ;;  %v1243_v18 = vand.u32 2147483647, %v9965_v13 }
  0xca   : > { %15418 = vst [vmem:[#allocation37_spill] sm:$0xff] %v9985_v56  ;;  %15423 = vst [vmem:[#allocation42_spill] sm:$0xff] %v10007_v31  ;;  %v1247_v9 = vand.u32 2147483647, %v9967_v45  ;;  %v914_v12 = vadd.f32 %v9985_v56, %v684_v48  ;;  %v10046_v56 = vmul.f32 %v9820_v32, %v9737_v51 }
  0xcb   : > { %v769_v61 = vpop.permute.xlu1 %768  ;;  %v1379_v46 = vmul.f32 1.442695, %v1310_v15  ;;  %v1383_v47 = vmul.f32 1.442695, %v1312_v16  ;;  %v1377_v6 = vmul.f32 1.442695, %v1309_v11 }
  0xcc   : > { %v9970_v63 = vmul.f32 %v9827_v35, %v769_v61  ;;  %v9973_v44 = vmul.f32 %v9815_v14, %v769_v61  ;;  %v9976_v50 = vmul.f32 %v9879_v0, %v769_v61  ;;  %v9979_v60 = vmul.f32 %v9820_v32, %v769_v61  ;;  %15432 = vst [vmem:[#allocation51_spill] sm:$0xff] %v10046_v56  ;;  %v10072_v10 = vpop.permute.xlu0 %996 }
  0xcd   : > { %2967 = vperm.xlu1 %7729, %v529_v52   ;;  %7780 = vpow2.f32 %v1379_v46  ;;  %v10027_v46 = vmul.f32 %v9815_v14, %v9763_v1  ;;  %v1311_v28 = vsub.f32 0.0, %v1247_v9  ;;  %v10069_v9 = vmul.f32 %v9820_v32, %v9745_v57  ;;  %15438 = vst [vmem:[#allocation57_spill] sm:$0xff] %v10072_v10 }
  0xce   : > { %15415 = vst [vmem:[#allocation34_spill] sm:$0xff] %v9973_v44  ;;  %15416 = vst [vmem:[#allocation35_spill] sm:$0xff] %v9976_v50  ;;  %v9993_v52 = vadd.f32 %v9970_v63, %v9952_v27  ;;  %v9997_v16 = vadd.f32 %v9973_v44, %v9952_v27  ;;  %v10001_v15 = vadd.f32 %v9976_v50, %v9952_v27  ;;  %7782 = vpow2.f32 %v1383_v47  ;;  %v533_v47 = vld [vmem:[%s15090_s6 + $0x48] sm:$0xff] }
  0xcf   : > { %15417 = vst [vmem:[#allocation36_spill] sm:$0xff] %v9979_v60  ;;  %v10005_v61 = vadd.f32 %v9979_v60, %v9952_v27  ;;  %15428 = vst [vmem:[#allocation47_spill] sm:$0xff] %v10027_v46  ;;  %7784 = vpow2.f32 %v1377_v6  ;;  %v1058_v6 = vadd.f32 %v9894_v21, %v914_v12  ;;  %v918_v53 = vadd.f32 %v10027_v46, %v688_v38 }
  0xd0   : > { %15419 = vst [vmem:[#allocation38_spill] sm:$0xff] %v9993_v52  ;;  %15420 = vst [vmem:[#allocation39_spill] sm:$0xff] %v9997_v16  ;;  %v10009_v11 = vpop.permute.xlu1 %991  ;;  %v10023_v52 = vmul.f32 %v9820_v32, %v9726_v41  ;;  %v7775_v48 = vpop.eup %7774  ;;  %v10042_v16 = vmul.f32 %v9879_v0, %v9737_v51  ;;  %v690_v46 = vmul.f32 %v9836_v37, %v9747_v59 }
  0xd1   : > { %15421 = vst [vmem:[#allocation40_spill] sm:$0xff] %v10001_v15  ;;  %15422 = vst [vmem:[#allocation41_spill] sm:$0xff] %v10005_v61  ;;  %2977 = vperm.xlu1 %7729, %v531_v5   ;;  %v10019_v15 = vmul.f32 %v9879_v0, %v9726_v41  ;;  %v10034_v5 = vmul.f32 %v9827_v35, %v9737_v51  ;;  %v10038_v61 = vmul.f32 %v9815_v14, %v9737_v51  ;;  %v7777_v49 = vpop.eup %7776  ;;  %v10126_v43 = vpop.permute.xlu0 %1006 }
  0xd2   : > { %15424 = vst [vmem:[#allocation43_spill] sm:$0xff] %v10009_v11  ;;  %15427 = vst [vmem:[#allocation46_spill] sm:$0xff] %v10023_v52  ;;  %v1307_v41 = vsub.f32 0.0, %v1243_v18  ;;  %v10058_v18 = vmul.f32 %v9815_v14, %v9745_v57  ;;  %v686_v51 = vmul.f32 %v9836_v37, %v9892_v20  ;;  %v1498_v12 = vadd.f32 1.0, %v7775_v48  ;;  %v7779_v38 = vpop.eup %7778 }
  0xd3   : > { %15426 = vst [vmem:[#allocation45_spill] sm:$0xff] %v10019_v15  ;;  %15429 = vst [vmem:[#allocation48_spill] sm:$0xff] %v10034_v5  ;;  %v10085_v57 = vmul.f32 %v9827_v35, %v9763_v1  ;;  %v1062_v30 = vadd.f32 %v10007_v31, %v918_v53  ;;  %v1500_v29 = vadd.f32 1.0, %v7777_v49  ;;  %v10113_v53 = vmul.f32 %v9820_v32, %v9755_v62  ;;  %v537_v49 = vld [vmem:[%s15090_s6 + $0x68] sm:$0xff] }
  0xd4   : > { %15430 = vst [vmem:[#allocation49_spill] sm:$0xff] %v10038_v61  ;;  %15431 = vst [vmem:[#allocation50_spill] sm:$0xff] %v10042_v16  ;;  %v10050_v42 = vpop.permute.xlu1 %599  ;;  %v1373_v39 = vmul.f32 1.442695, %v1307_v41  ;;  %v10100_v41 = vmul.f32 1.3862944, %v1058_v6  ;;  %7786 = vlog2.f32 %v1498_v12  ;;  %v693_v44 = vmul.f32 %v9882_v2, %v9801_v22 }
  0xd5   : > { %15433 = vst [vmem:[#allocation52_spill] sm:$0xff] %v10050_v42  ;;  %15435 = vst [vmem:[#allocation54_spill] sm:$0xff] %v10058_v18  ;;  %2987 = vperm.xlu1 %7729, %v533_v47   ;;  %v535_v47 = vld [vmem:[%s15090_s6 + $0x58] sm:$0xff]  ;;  %v1381_v42 = vmul.f32 1.442695, %v1311_v28  ;;  %v10105_v18 = vmul.f32 %v9815_v14, %v9755_v62  ;;  %v10109_v28 = vmul.f32 %v9879_v0, %v9755_v62  ;;  %v1497_v62 = vadd.f32 1.0, %v7779_v38  ;;  %v10163_v60 = vpop.permute.xlu0 %1016 }
  0xd6   : > { %15437 = vst [vmem:[#allocation56_spill] sm:$0xff] %v10069_v9  ;;  %15439 = vst [vmem:[#allocation58_spill] sm:$0xff] %v10085_v57  ;;  %v916_v9 = vadd.f32 %v10023_v52, %v686_v51  ;;  %v10120_v51 = vmul.f32 %v9879_v0, %v9763_v1  ;;  %7788 = vpow2.f32 %v1373_v39  ;;  %v1250_v1 = vand.u32 2147483647, %v10100_v41 }
  0xd7   : > { %v7781_v59 = vpop.eup %7780  ;;  %15442 = vst [vmem:[#allocation61_spill] sm:$0xff] %v10105_v18  ;;  %15443 = vst [vmem:[#allocation62_spill] sm:$0xff] %v10109_v28  ;;  %v920_v28 = vadd.f32 %v10091_v40, %v690_v46  ;;  %7790 = vpow2.f32 %v1381_v42  ;;  %v692_v42 = vmul.f32 %v9833_v4, %v9801_v22  ;;  %v691_v38 = vmul.f32 %v9830_v36, %v9801_v22 }
  0xd8   : > { %v10093_v48 = vpop.permute.xlu1 %604  ;;  %15444 = vst [vmem:[#allocation63_spill] sm:$0xff] %v10113_v53  ;;  %v7783_v6 = vpop.eup %7782  ;;  %15445 = vst [vmem:[#allocation64_spill] sm:$0xff] %v10120_v51  ;;  %v1502_v52 = vadd.f32 1.0, %v7781_v59  ;;  %v10128_v53 = vmul.f32 1.3862944, %v1062_v30  ;;  %7792 = vlog2.f32 %v1500_v29  ;;  %v539_v29 = vld [vmem:[%s15090_s6 + $0x78] sm:$0xff] }
  0xd9   : > { %2997 = vperm.xlu1 %7729, %v535_v47   ;;  %v10123_v47 = vadd.f32 %v10085_v57, %v687_v19  ;;  %15446 = vst [vmem:[#allocation65_spill] sm:$0xff] %v10126_v43  ;;  %v7785_v18 = vpop.eup %7784  ;;  %v1504_v55 = vadd.f32 1.0, %v7783_v6  ;;  %v1060_v19 = vadd.f32 %v9894_v21, %v916_v9  ;;  %v694_v9 = vmul.f32 %v9836_v37, %v9801_v22 }
  0xda   : > { %15447 = vst [vmem:[#allocation66_spill] sm:$0xff] %v10128_v53  ;;  %7794 = vlog2.f32 %v1502_v52  ;;  %v1254_v6 = vand.u32 2147483647, %v10128_v53 }
  0xdb   : > { %7796 = vlog2.f32 %v1497_v62  ;;  %v1314_v62 = vsub.f32 0.0, %v1250_v1  ;;  %v10170_v50 = vmul.f32 1.3862944, %v1060_v19  ;;  %v10192_v1 = vmul.f32 %v9827_v35, %v9768_v3 }
  0xdc   : > { %7798 = vlog2.f32 %v1504_v55  ;;  %v10188_v55 = vadd.f32 %v10120_v51, %v10081_v54  ;;  %v1318_v19 = vsub.f32 0.0, %v1254_v6  ;;  %v10210_v51 = vmul.f32 %v9827_v35, %v9792_v17  ;;  %v543_v6 = vld [vmem:[%s15091_s7 + $0x18] sm:$0xff] }
  0xdd   : > { %3007 = vperm.xlu1 %7729, %v537_v49   ;;  %v777_v12 = vpop.permute.xlu1 %776  ;;  %v1501_v49 = vadd.f32 1.0, %v7785_v18  ;;  %15453 = vst [vmem:[#allocation72_spill] sm:$0xff] %v10192_v1  ;;  %v545_v1 = vld [vmem:[%s15091_s7 + $0x28] sm:$0xff] }
  0xde   : > { %v10133_v59 = vmul.f32 %v9827_v35, %v777_v12  ;;  %v10136_v39 = vmul.f32 %v9815_v14, %v777_v12  ;;  %v10139_v46 = vmul.f32 %v9879_v0, %v777_v12  ;;  %v10142_v30 = vmul.f32 %v9820_v32, %v777_v12  ;;  %v7787_v53 = vpop.eup %7786  ;;  %15457 = vst [vmem:[#allocation76_spill] sm:$0xff] %v10210_v51 }
  0xdf   : > { %v1064_v12 = vadd.f32 %v10007_v31, %v920_v28  ;;  %v541_v28 = vld [vmem:[%s15091_s7 + $0x8] sm:$0xff]  ;;  %7800 = vlog2.f32 %v1501_v49  ;;  %v10232_v51 = vadd.f32 %v10042_v16, %v693_v44 }
  0xe0   : > { %v4371_v40 = vadd.f32 %v10133_v59, %v10093_v48  ;;  %v4372_v52 = vadd.f32 %v10136_v39, %v10093_v48  ;;  %v4373_v57 = vadd.f32 %v10139_v46, %v10093_v48  ;;  %v4374_v43 = vadd.f32 %v10142_v30, %v10093_v48 }
  0xe1   : > { %3017 = vperm.xlu1 %7729, %v539_v29   ;;  %v10206_v54 = vmul.f32 1.3862944, %v1064_v12  ;;  %v10224_v12 = vmul.f32 %v9830_v36, %v9822_v33  ;;  %15462 = vst [vmem:[#allocation81_spill] sm:$0xff] %v10232_v51 }
  0xe2   : > { %v10165_v18 = vpop.permute.xlu1 %1001  ;;  %v10175_v10 = vadd.f32 %v4371_v40, %v10163_v60  ;;  %v10178_v29 = vadd.f32 %v4372_v52, %v10163_v60  ;;  %v10181_v11 = vadd.f32 %v4373_v57, %v10163_v60  ;;  %v10196_v40 = vmul.f32 %v9815_v14, %v9768_v3  ;;  %v7789_v52 = vpop.eup %7788 }
  0xe3   : > { %15448 = vst [vmem:[#allocation67_spill] sm:$0xff] %v10165_v18  ;;  %v10184_v18 = vadd.f32 %v4374_v43, %v10163_v60  ;;  %v10200_v57 = vmul.f32 %v9879_v0, %v9768_v3  ;;  %v10204_v43 = vmul.f32 %v9820_v32, %v9768_v3  ;;  %v7791_v22 = vpop.eup %7790  ;;  %v10220_v3 = vadd.f32 %v10046_v56, %v694_v9 }
  0xe4   : > { %15449 = vst [vmem:[#allocation68_spill] sm:$0xff] %v10175_v10  ;;  %15450 = vst [vmem:[#allocation69_spill] sm:$0xff] %v10178_v29  ;;  %v7793_v49 = vpop.eup %7792  ;;  %v1387_v29 = vmul.f32 1.442695, %v1314_v62  ;;  %v10229_v10 = vadd.f32 %v10034_v5, %v691_v38  ;;  %v10240_v9 = vmul.f32 %v9882_v2, %v9822_v33  ;;  %v1564_v56 = vmul.f32 0.6931472, %v7787_v53 }
  0xe5   : > { %15451 = vst [vmem:[#allocation70_spill] sm:$0xff] %v10181_v11  ;;  %15452 = vst [vmem:[#allocation71_spill] sm:$0xff] %v10184_v18  ;;  %4101 = vperm.xlu1 %7729, %v541_v28   ;;  %v1252_v18 = vand.u32 2147483647, %v10170_v50  ;;  %v10217_v11 = vadd.f32 %v10038_v61, %v692_v42  ;;  %v10236_v42 = vmul.f32 %v9833_v4, %v9822_v33  ;;  %v1395_v61 = vmul.f32 1.442695, %v1318_v19 }
  0xe6   : > { %15454 = vst [vmem:[#allocation73_spill] sm:$0xff] %v10196_v40  ;;  %15455 = vst [vmem:[#allocation74_spill] sm:$0xff] %v10200_v57  ;;  %v10226_v28 = vpop.permute.xlu1 %609  ;;  %v7795_v57 = vpop.eup %7794  ;;  %v1178_v62 = vmax.f32 %v9899_v23, 0.0  ;;  %v1180_v38 = vmax.f32 %v9901_v26, 0.0  ;;  %v1177_v5 = vmax.f32 %v9925_v24, 0.0  ;;  %v1184_v53 = vmax.f32 %v9947_v58, 0.0 }
  0xe7   : > { %15456 = vst [vmem:[#allocation75_spill] sm:$0xff] %v10204_v43  ;;  %15458 = vst [vmem:[#allocation77_spill] sm:$0xff] %v10217_v11  ;;  %v1256_v44 = vand.u32 2147483647, %v10206_v54  ;;  %v7797_v16 = vpop.eup %7796  ;;  %v1182_v43 = vmax.f32 %v9945_v34, 0.0  ;;  %v1499_v19 = vadd.f32 1.0, %v7789_v52  ;;  %v711_v23 = vmul.f32 %v9830_v36, %v10093_v48 }
  0xe8   : > { %15459 = vst [vmem:[#allocation78_spill] sm:$0xff] %v10220_v3  ;;  %15460 = vst [vmem:[#allocation79_spill] sm:$0xff] %v10226_v28  ;;  %v1316_v40 = vsub.f32 0.0, %v1252_v18  ;;  %v712_v26 = vmul.f32 %v9833_v4, %v10093_v48  ;;  %v1181_v24 = vmax.f32 %v9949_v7, 0.0  ;;  %7802 = vpow2.f32 %v1387_v29 }
  0xe9   : > { %15461 = vst [vmem:[#allocation80_spill] sm:$0xff] %v10229_v10  ;;  %4111 = vperm.xlu1 %7729, %v543_v6   ;;  %v7799_v6 = vpop.eup %7798  ;;  %v713_v28 = vmul.f32 %v9882_v2, %v10093_v48  ;;  %v1572_v17 = vmul.f32 0.6931472, %v7795_v57  ;;  %v1690_v51 = vadd.f32 %v1564_v56, %v1178_v62  ;;  %7804 = vpow2.f32 %v1395_v61  ;;  %v547_v57 = vld [vmem:[%s15091_s7 + $0x38] sm:$0xff] }
  0xea   : > { %v714_v58 = vmul.f32 %v9836_v37, %v10093_v48  ;;  %v941_v34 = vadd.f32 %v10133_v59, %v711_v23  ;;  %v942_v18 = vadd.f32 %v10136_v39, %v712_v26  ;;  %v10262_v52 = vpop.permute.xlu1 %614  ;;  %v1320_v10 = vsub.f32 0.0, %v1256_v44  ;;  %v7801_v61 = vpop.eup %7800 }
  0xeb   : > { %v1694_v7 = vadd.f32 %v1572_v17, %v1182_v43  ;;  %v1568_v29 = vmul.f32 0.6931472, %v7793_v49  ;;  %7806 = vlog2.f32 %v1499_v19  ;;  %v1391_v56 = vmul.f32 1.442695, %v1316_v40 }
  0xec   : > { %v943_v62 = vadd.f32 %v10139_v46, %v713_v28  ;;  %v1576_v48 = vmul.f32 0.6931472, %v7799_v6  ;;  %v1562_v3 = vmul.f32 0.6931472, %v7797_v16  ;;  %v1503_v59 = vadd.f32 1.0, %v7791_v22  ;;  %v549_v22 = vld [vmem:[%s15091_s7 + $0x48] sm:$0xff] }
  0xed   : > { %4121 = vperm.xlu1 %7729, %v545_v1   ;;  %v1755_v23 = vmul.f32 1.442695, %v1690_v51  ;;  %v1759_v39 = vmul.f32 1.442695, %v1694_v7  ;;  %v1692_v26 = vadd.f32 %v1568_v29, %v1180_v38  ;;  %v1570_v11 = vmul.f32 0.6931472, %v7801_v61 }
  0xee   : > { %v1085_v1 = vadd.f32 %v10163_v60, %v941_v34  ;;  %v1086_v17 = vadd.f32 %v10163_v60, %v942_v18  ;;  %v1696_v43 = vadd.f32 %v1576_v48, %v1184_v53  ;;  %v1689_v49 = vadd.f32 %v1562_v3, %v1177_v5 }
  0xef   : > { %v10272_v40 = vmul.f32 %v9836_v37, %v9822_v33  ;;  %v1819_v44 = vpack.c.bf16 %v1759_v39, %v1755_v23  ;;  %v1693_v46 = vadd.f32 %v1570_v11, %v1181_v24  ;;  %7808 = vpow2.f32 %v1391_v56  ;;  %v785_v3 = vpop.permute.xlu1 %784  ;;  %v551_v56 = vld [vmem:[%s15091_s7 + $0x58] sm:$0xff] }
  0xf0   : > { %v10279_v16 = vmul.f32 %v9827_v35, %v9867_v25  ;;  %v944_v51 = vadd.f32 %v10142_v30, %v714_v58  ;;  %v1757_v28 = vmul.f32 1.442695, %v1692_v26  ;;  %v1761_v5 = vmul.f32 1.442695, %v1696_v43 }
  0xf1   : > { %4131 = vperm.xlu1 %7729, %v547_v57   ;;  %v1087_v38 = vadd.f32 %v10163_v60, %v943_v62  ;;  %1978 = vmatprep.subr.bf16.mxu0 %v1819_v44  ;;  %v1754_v53 = vmul.f32 1.442695, %v1689_v49  ;;  %v1758_v19 = vmul.f32 1.442695, %v1693_v46  ;;  %7810 = vlog2.f32 %v1503_v59 }
  0xf2   : > { %15463 = vst [vmem:[#allocation82_spill] sm:$0xff] %v10279_v16  ;;  %v7803_v11 = vpop.eup %7802  ;;  %v10283_v24 = vmul.f32 1.3862944, %v1085_v1  ;;  %v10285_v6 = vmul.f32 1.3862944, %v1086_v17  ;;  %v1821_v34 = vpack.c.bf16 %v1761_v5, %v1757_v28  ;;  %v10288_v30 = vmul.f32 %v9827_v35, %v785_v3  ;;  %v10317_v17 = vpop.permute.xlu0 %1026  ;;  %v553_v28 = vld [vmem:[%s15091_s7 + $0x68] sm:$0xff] }
  0xf3   : > { %v1399_v18 = vmul.f32 1.442695, %v1320_v10  ;;  %v7805_v7 = vpop.eup %7804  ;;  %v1818_v29 = vpack.c.bf16 %v1758_v19, %v1754_v53  ;;  %v10291_v58 = vmul.f32 %v9815_v14, %v785_v3  ;;  %v10294_v57 = vmul.f32 %v9879_v0, %v785_v3 }
  0xf4   : > { %v10301_v61 = vmul.f32 %v9815_v14, %v9867_v25  ;;  %v10305_v10 = vmul.f32 %v9879_v0, %v9867_v25  ;;  %2091 = vmatprep.subr.bf16.mxu1 %v1821_v34  ;;  %v10308_v62 = vmul.f32 %v9820_v32, %v785_v3  ;;  %v683_v48 = vmul.f32 %v9830_v36, %v9892_v20 }
  0xf5   : > { %4141 = vperm.xlu1 %7729, %v549_v22   ;;  %v7807_v59 = vpop.eup %7806  ;;  %v1088_v23 = vadd.f32 %v10163_v60, %v944_v51  ;;  %v10313_v39 = vmul.f32 1.3862944, %v1087_v38  ;;  %1979 = vmatpush1.bf16.msra.mxu0 %v1818_v29  ;;  %v4379_v26 = vadd.f32 %v10288_v30, %v10262_v52  ;;  %v1506_v1 = vadd.f32 1.0, %v7803_v11 }
  0xf6   : > { %15464 = vst [vmem:[#allocation83_spill] sm:$0xff] %v10301_v61  ;;  %15465 = vst [vmem:[#allocation84_spill] sm:$0xff] %v10305_v10  ;;  %v4380_v43 = vadd.f32 %v10291_v58, %v10262_v52  ;;  %v4381_v49 = vadd.f32 %v10294_v57, %v10262_v52  ;;  %v4382_v44 = vadd.f32 %v10308_v62, %v10262_v52  ;;  %v1510_v46 = vadd.f32 1.0, %v7805_v7 }
  0xf7   : > { %v1277_v60 = vand.u32 2147483647, %v10283_v24  ;;  %v1278_v22 = vand.u32 2147483647, %v10285_v6  ;;  %v10328_v51 = vadd.f32 %v4379_v26, %v10317_v17  ;;  %7812 = vpow2.f32 %v1399_v18 }
  0xf8   : > { %v1566_v5 = vmul.f32 0.6931472, %v7807_v59  ;;  %v10334_v3 = vadd.f32 %v4380_v43, %v10317_v17  ;;  %v10337_v38 = vadd.f32 %v4381_v49, %v10317_v17  ;;  %v10340_v53 = vadd.f32 %v4382_v44, %v10317_v17 }
  0xf9   : > { %4151 = vperm.xlu1 %7729, %v551_v56   ;;  %15466 = vst [vmem:[#allocation85_spill] sm:$0xff] %v10328_v51  ;;  %v7809_v19 = vpop.eup %7808  ;;  %v10344_v11 = vmul.f32 %v9820_v32, %v9867_v25  ;;  %v10348_v34 = vadd.f32 %v10279_v16, %v10224_v12  ;;  %7814 = vlog2.f32 %v1506_v1  ;;  %v913_v18 = vadd.f32 %v10015_v8, %v683_v48  ;;  %v15517_v51 = vld [vmem:[#allocation63_spill] sm:$0xff] }
  0xfa   : > { %15467 = vst [vmem:[#allocation86_spill] sm:$0xff] %v10334_v3  ;;  %15468 = vst [vmem:[#allocation87_spill] sm:$0xff] %v10337_v38  ;;  %v1179_v7 = vmax.f32 %v9965_v13, 0.0  ;;  %v1183_v29 = vmax.f32 %v9967_v45, 0.0  ;;  %7816 = vlog2.f32 %v1510_v46  ;;  %v1061_v56 = vadd.f32 %v10007_v31, %v10123_v47  ;;  %v555_v13 = vld [vmem:[%s15091_s7 + $0x78] sm:$0xff] }
  0xfb   : > { %15469 = vst [vmem:[#allocation88_spill] sm:$0xff] %v10340_v53  ;;  %15470 = vst [vmem:[#allocation89_spill] sm:$0xff] %v10344_v11  ;;  %v7811_v59 = vpop.eup %7810  ;;  %v10355_v26 = vmul.f32 1.3862944, %v1088_v23  ;;  %v1279_v25 = vand.u32 2147483647, %v10313_v39  ;;  %v685_v12 = vmul.f32 %v9882_v2, %v9892_v20  ;;  %v10365_v47 = vadd.f32 %v10301_v61, %v10236_v42 }
  0xfc   : > { %v1341_v43 = vsub.f32 0.0, %v1277_v60  ;;  %v1342_v48 = vsub.f32 0.0, %v1278_v22  ;;  %v1574_v45 = vmul.f32 0.6931472, %v7811_v59  ;;  %v1691_v1 = vadd.f32 %v1566_v5, %v1179_v7  ;;  %v7339_v5 = vld [vmem:[#allocation3] sm:$0x1] }
  0xfd   : > { %4161 = vperm.xlu1 %7729, %v553_v28   ;;  %v1508_v49 = vadd.f32 1.0, %v7809_v19  ;;  %v10369_v23 = vadd.f32 %v10305_v10, %v10240_v9  ;;  %v10373_v44 = vadd.f32 %v10344_v11, %v10272_v40  ;;  %v1057_v46 = vadd.f32 %v9894_v21, %v913_v18 }
  0xfe   : > { %v703_v60 = vmul.f32 %v9830_v36, %v9952_v27  ;;  %v10380_v22 = vmul.f32 %v9833_v4, %v9952_v27  ;;  %v1695_v28 = vadd.f32 %v1574_v45, %v1183_v29  ;;  %v10382_v42 = vmul.f32 1.3862944, %v1061_v56 }
  0xff   : > { %v1280_v9 = vand.u32 2147483647, %v10355_v26  ;;  %v1343_v19 = vsub.f32 0.0, %v1279_v25  ;;  %v1441_v7 = vmul.f32 1.442695, %v1341_v43  ;;  %v915_v40 = vadd.f32 %v10019_v15, %v685_v12 }
 0x100   : > { %v1443_v59 = vmul.f32 1.442695, %v1342_v48  ;;  %v1756_v18 = vmul.f32 1.442695, %v1691_v1  ;;  %v1760_v11 = vmul.f32 1.442695, %v1695_v28  ;;  %7818 = vlog2.f32 %v1508_v49 }
 0x101   : > { %4171 = vperm.xlu1 %7729, %v555_v13   ;;  %v7813_v10 = vpop.eup %7812  ;;  %v10388_v61 = vmul.f32 %v9882_v2, %v9952_v27  ;;  %v10392_v29 = vmul.f32 %v9836_v37, %v9952_v27  ;;  %v10395_v56 = vadd.f32 %v9970_v63, %v703_v60  ;;  %v10397_v25 = vmul.f32 1.3862944, %v1057_v46  ;;  %v15471_v13 = vld [vmem:[#allocation66_spill] sm:$0xff] }
 0x102   : > { %v1820_v43 = vpack.c.bf16 %v1760_v11, %v1756_v18  ;;  %v1186_v12 = vmax.f32 %v10100_v41, 0.0  ;;  %v1190_v48 = vmax.f32 %v15471_v13, 0.0  ;;  %v1253_v45 = vand.u32 2147483647, %v10382_v42 }
 0x103   : > { %v7815_v1 = vpop.eup %7814  ;;  %7820 = vpow2.f32 %v1441_v7  ;;  %v1059_v28 = vadd.f32 %v9894_v21, %v915_v40  ;;  %v10405_v60 = vsub.f32 0.0, %v1280_v9  ;;  %v10407_v11 = vmul.f32 1.442695, %v1343_v19 }
 0x104   : > { %v7817_v63 = vpop.eup %7816  ;;  %7822 = vpow2.f32 %v1443_v59  ;;  %2092 = vmatpush1.bf16.msra.mxu1 %v1820_v43  ;;  %v1580_v41 = vmul.f32 0.6931472, %v7815_v1  ;;  %v1512_v18 = vadd.f32 1.0, %v7813_v10  ;;  %v1063_v7 = vadd.f32 %v10007_v31, %v10188_v55 }
 0x105   : > { %7364 = vperm.xlu1 %7729, %v7339_v5   ;;  %v1588_v46 = vmul.f32 0.6931472, %v7817_v63  ;;  %v1249_v5 = vand.u32 2147483647, %v10397_v25  ;;  %v719_v13 = vmul.f32 %v9830_v36, %v10262_v52  ;;  %v720_v40 = vmul.f32 %v9833_v4, %v10262_v52 }
 0x106   : > { %v1698_v9 = vadd.f32 %v1580_v41, %v1186_v12  ;;  %v1317_v27 = vsub.f32 0.0, %v1253_v45  ;;  %v721_v19 = vmul.f32 %v9882_v2, %v10262_v52  ;;  %v10418_v1 = vmul.f32 1.3862944, %v1059_v28  ;;  %v10425_v12 = vpop.permute.xlu1 %1011 }
 0x107   : > { %v1702_v59 = vadd.f32 %v1588_v46, %v1190_v48  ;;  %v1313_v43 = vsub.f32 0.0, %v1249_v5  ;;  %v722_v10 = vmul.f32 %v9836_v37, %v10262_v52  ;;  %v949_v55 = vadd.f32 %v10288_v30, %v719_v13  ;;  %v15473_v5 = vld [vmem:[#allocation43_spill] sm:$0xff]  ;;  %v15474_v13 = vld [vmem:[#allocation57_spill] sm:$0xff] }
 0x108   : > { %v1763_v63 = vmul.f32 1.442695, %v1698_v9  ;;  %v1393_v49 = vmul.f32 1.442695, %v1317_v27  ;;  %7824 = vlog2.f32 %v1512_v18  ;;  %v10423_v33 = vmul.f32 1.3862944, %v1063_v7 }
 0x109   : > { %v1767_v15 = vmul.f32 1.442695, %v1702_v59  ;;  %v1385_v16 = vmul.f32 1.442695, %v1313_v43  ;;  %v950_v48 = vadd.f32 %v10291_v58, %v720_v40  ;;  %v951_v28 = vadd.f32 %v10294_v57, %v721_v19  ;;  %v15472_v18 = vld [vmem:[#allocation77_spill] sm:$0xff]  ;;  %v15475_v59 = vld [vmem:[#allocation78_spill] sm:$0xff] }
 0x10a   : > { %v7819_v45 = vpop.eup %7818  ;;  %7826 = vpow2.f32 %v1393_v49  ;;  %v1251_v41 = vand.u32 2147483647, %v10418_v1  ;;  %v952_v52 = vadd.f32 %v10308_v62, %v722_v10  ;;  %v1255_v27 = vand.u32 2147483647, %v10423_v33 }
 0x10b   : > { %v1823_v30 = vpack.c.bf16 %v1767_v15, %v1763_v63  ;;  %7828 = vpow2.f32 %v1385_v16  ;;  %v1066_v7 = vadd.f32 %v15473_v5, %v15472_v18  ;;  %v1070_v9 = vadd.f32 %v15474_v13, %v10365_v47  ;;  %v15476_v47 = vld [vmem:[#allocation80_spill] sm:$0xff]  ;;  %v10451_v18 = vpop.permute.xlu1 %619 }
 0x10c   : > { %v1315_v46 = vsub.f32 0.0, %v1251_v41  ;;  %v1068_v58 = vadd.f32 %v15473_v5, %v15475_v59  ;;  %v1093_v49 = vadd.f32 %v10317_v17, %v949_v55  ;;  %v1584_v62 = vmul.f32 0.6931472, %v7819_v45  ;;  %15477 = vst [vmem:[#allocation66_spill] sm:$0xff] %v10451_v18 }
 0x10d   : > { %v10438_v57 = vpop.eup %7820  ;;  %1980 = vmatprep.subr.bf16.mxu0 %v1823_v30  ;;  %v1319_v15 = vsub.f32 0.0, %v1255_v27  ;;  %v1072_v16 = vadd.f32 %v15474_v13, %v10373_v44  ;;  %v10445_v43 = vmul.f32 1.3862944, %v1066_v7  ;;  %v10447_v10 = vmul.f32 1.3862944, %v1070_v9 }
 0x10e   : > { %v10443_v40 = vpop.eup %7822  ;;  %v1389_v19 = vmul.f32 1.442695, %v1315_v46  ;;  %v1065_v63 = vadd.f32 %v15473_v5, %v15476_v47  ;;  %v10453_v55 = vmul.f32 1.3862944, %v1068_v58  ;;  %v1069_v44 = vadd.f32 %v15474_v13, %v10348_v34  ;;  %v15479_v47 = vld [vmem:[#allocation81_spill] sm:$0xff] }
 0x10f   : > { %v1397_v41 = vmul.f32 1.442695, %v1319_v15  ;;  %v10455_v45 = vmul.f32 1.3862944, %v1072_v16  ;;  %v1094_v30 = vadd.f32 %v10317_v17, %v950_v48  ;;  %v1095_v27 = vadd.f32 %v10317_v17, %v951_v28 }
 0x110   : > { %7830 = vpow2.f32 %v1389_v19  ;;  %v1258_v46 = vand.u32 2147483647, %v10445_v43  ;;  %v10462_v7 = vmul.f32 1.3862944, %v1093_v49  ;;  %v15478_v9 = vmax.f32 %v10170_v50, 0.0 }
 0x111   : > { %7832 = vpow2.f32 %v1397_v41  ;;  %v1262_v58 = vand.u32 2147483647, %v10447_v10  ;;  %v1260_v16 = vand.u32 2147483647, %v10453_v55  ;;  %v1264_v34 = vand.u32 2147483647, %v10455_v45 }
 0x112   : > { %v1700_v59 = vadd.f32 %v1584_v62, %v15478_v9  ;;  %v1322_v15 = vsub.f32 0.0, %v1258_v46  ;;  %v1067_v48 = vadd.f32 %v15473_v5, %v15479_v47  ;;  %v7825_v28 = vpop.eup %7824  ;;  %v10471_v8 = vmul.f32 1.3862944, %v1065_v63  ;;  %v10478_v5 = vpop.permute.xlu1 %624 }
 0x113   : > { %v1326_v19 = vsub.f32 0.0, %v1262_v58  ;;  %v10473_v49 = vmul.f32 1.3862944, %v1069_v44  ;;  %v1071_v50 = vadd.f32 %v15474_v13, %v10369_v23  ;;  %v1592_v41 = vmul.f32 0.6931472, %v7825_v28 }
 0x114   : > { %v7827_v62 = vpop.eup %7826  ;;  %v1403_v9 = vmul.f32 1.442695, %v1322_v15  ;;  %v1324_v46 = vsub.f32 0.0, %v1260_v16  ;;  %v1328_v31 = vsub.f32 0.0, %v1264_v34  ;;  %v1096_v20 = vadd.f32 %v10317_v17, %v952_v52 }
 0x115   : > { %v7829_v21 = vpop.eup %7828  ;;  %v1765_v53 = vmul.f32 1.442695, %v1700_v59  ;;  %v1509_v38 = vadd.f32 1.0, %v7827_v62  ;;  %v1411_v47 = vmul.f32 1.442695, %v1326_v19  ;;  %v15480_v63 = vmax.f32 %v10206_v54, 0.0 }
 0x116   : > { %v1505_v58 = vadd.f32 1.0, %v7829_v21  ;;  %7834 = vpow2.f32 %v1403_v9  ;;  %v1407_v3 = vmul.f32 1.442695, %v1324_v46  ;;  %v1415_v23 = vmul.f32 1.442695, %v1328_v31  ;;  %v10493_v46 = vpop.permute.xlu1 %792 }
 0x117   : > { %v1704_v44 = vadd.f32 %v1592_v41, %v15480_v63  ;;  %7836 = vlog2.f32 %v1509_v38  ;;  %v1257_v15 = vand.u32 2147483647, %v10471_v8  ;;  %v1261_v16 = vand.u32 2147483647, %v10473_v49 }
 0x118   : > { %7838 = vlog2.f32 %v1505_v58  ;;  %v10484_v17 = vmul.f32 1.3862944, %v1067_v48  ;;  %v10486_v52 = vmul.f32 1.3862944, %v1071_v50  ;;  %v10488_v59 = vmul.f32 1.3862944, %v1094_v30 }
 0x119   : > { %v1769_v34 = vmul.f32 1.442695, %v1704_v44  ;;  %7840 = vpow2.f32 %v1411_v47  ;;  %v1321_v54 = vsub.f32 0.0, %v1257_v15  ;;  %v1325_v28 = vsub.f32 0.0, %v1261_v16 }
 0x11a   : > { %v7831_v21 = vpop.eup %7830  ;;  %v1447_v19 = vmul.f32 1.442695, %v10405_v60  ;;  %v10491_v38 = vmul.f32 1.3862944, %v1095_v27  ;;  %7842 = vpow2.f32 %v1407_v3  ;;  %v1259_v50 = vand.u32 2147483647, %v10484_v17 }
 0x11b   : > { %v1825_v31 = vpack.c.bf16 %v1769_v34, %v1765_v53  ;;  %v7833_v62 = vpop.eup %7832  ;;  %v1507_v41 = vadd.f32 1.0, %v7831_v21  ;;  %7844 = vpow2.f32 %v1415_v23  ;;  %v1401_v9 = vmul.f32 1.442695, %v1321_v54  ;;  %v15482_v23 = vld [vmem:[#allocation35_spill] sm:$0xff] }
 0x11c   : > { %v1409_v48 = vmul.f32 1.442695, %v1325_v28  ;;  %7846 = vpow2.f32 %v10407_v11  ;;  %v1511_v30 = vadd.f32 1.0, %v7833_v62  ;;  %v1263_v47 = vand.u32 2147483647, %v10486_v52  ;;  %v15481_v11 = vld [vmem:[#allocation34_spill] sm:$0xff] }
 0x11d   : > { %2093 = vmatprep.subr.bf16.mxu1 %v1825_v31  ;;  %v10498_v60 = vmul.f32 1.3862944, %v1096_v20  ;;  %v1285_v53 = vand.u32 2147483647, %v10462_v7  ;;  %v1286_v3 = vand.u32 2147483647, %v10488_v59  ;;  %7848 = vlog2.f32 %v1507_v41 }
 0x11e   : > { %7850 = vlog2.f32 %v1511_v30  ;;  %v1323_v27 = vsub.f32 0.0, %v1259_v50  ;;  %v1327_v63 = vsub.f32 0.0, %v1263_v47  ;;  %v10504_v44 = vmul.f32 %v9827_v35, %v10493_v46 }
 0x11f   : > { %v10508_v58 = vadd.f32 %v15481_v11, %v10380_v22  ;;  %v10512_v20 = vadd.f32 %v15482_v23, %v10388_v61  ;;  %v1189_v15 = vmax.f32 %v10382_v42, 0.0  ;;  %7852 = vpow2.f32 %v1401_v9  ;;  %v15484_v9 = vld [vmem:[#allocation36_spill] sm:$0xff] }
 0x120   : > { %v7835_v16 = vpop.eup %7834  ;;  %v1287_v34 = vand.u32 2147483647, %v10491_v38  ;;  %7854 = vpow2.f32 %v1409_v48  ;;  %v1405_v54 = vmul.f32 1.442695, %v1323_v27  ;;  %v1413_v28 = vmul.f32 1.442695, %v1327_v63 }
 0x121   : > { %v7837_v21 = vpop.eup %7836  ;;  %7856 = vpow2.f32 %v1447_v19  ;;  %v1288_v31 = vand.u32 2147483647, %v10498_v60  ;;  %v1349_v62 = vsub.f32 0.0, %v1285_v53  ;;  %v1514_v22 = vadd.f32 1.0, %v7835_v16 }
 0x122   : > { %v7839_v41 = vpop.eup %7838  ;;  %v1350_v30 = vsub.f32 0.0, %v1286_v3  ;;  %v1586_v50 = vmul.f32 0.6931472, %v7837_v21  ;;  %7858 = vpow2.f32 %v1405_v54  ;;  %v10519_v61 = vadd.f32 %v10504_v44, %v10478_v5 }
 0x123   : > { %v7841_v42 = vpop.eup %7840  ;;  %v10523_v48 = vadd.f32 %v15484_v9, %v10392_v29  ;;  %v1185_v47 = vmax.f32 %v10397_v25, 0.0  ;;  %v1578_v19 = vmul.f32 0.6931472, %v7839_v41  ;;  %7860 = vlog2.f32 %v1514_v22 }
 0x124   : > { %15483 = vst [vmem:[#allocation77_spill] sm:$0xff] %v10519_v61  ;;  %v7843_v27 = vpop.eup %7842  ;;  %v1351_v53 = vsub.f32 0.0, %v1287_v34  ;;  %v1701_v63 = vadd.f32 %v1586_v50, %v1189_v15  ;;  %v1518_v11 = vadd.f32 1.0, %v7841_v42  ;;  %7862 = vpow2.f32 %v1413_v28 }
 0x125   : > { %v7845_v3 = vpop.eup %7844  ;;  %v10526_v23 = vsub.f32 0.0, %v1288_v31  ;;  %v1457_v16 = vmul.f32 1.442695, %v1349_v62  ;;  %v1697_v54 = vadd.f32 %v1578_v19, %v1185_v47  ;;  %v1516_v21 = vadd.f32 1.0, %v7843_v27 }
 0x126   : > { %v10528_v13 = vpop.eup %7846  ;;  %v1459_v61 = vmul.f32 1.442695, %v1350_v30  ;;  %v1766_v29 = vmul.f32 1.442695, %v1701_v63  ;;  %7864 = vlog2.f32 %v1518_v11  ;;  %v1520_v9 = vadd.f32 1.0, %v7845_v3 }
 0x127   : > { %v7849_v25 = vpop.eup %7848  ;;  %v1762_v41 = vmul.f32 1.442695, %v1697_v54  ;;  %v1187_v22 = vmax.f32 %v10418_v1, 0.0  ;;  %v1191_v15 = vmax.f32 %v10423_v33, 0.0  ;;  %7866 = vlog2.f32 %v1516_v21 }
 0x128   : > { %v7851_v34 = vpop.eup %7850  ;;  %v1582_v28 = vmul.f32 0.6931472, %v7849_v25  ;;  %7868 = vlog2.f32 %v1520_v9  ;;  %v894_v31 = vmul.f32 %v9815_v14, %v10493_v46  ;;  %v895_v62 = vmul.f32 %v9879_v0, %v10493_v46 }
 0x129   : > { %v7853_v30 = vpop.eup %7852  ;;  %v1822_v50 = vpack.c.bf16 %v1766_v29, %v1762_v41  ;;  %v1590_v42 = vmul.f32 0.6931472, %v7851_v34  ;;  %v727_v47 = vmul.f32 %v9830_v36, %v10478_v5  ;;  %v896_v1 = vmul.f32 %v9820_v32, %v10493_v46 }
 0x12a   : > { %v7855_v33 = vpop.eup %7854  ;;  %7870 = vpow2.f32 %v1457_v16  ;;  %v1699_v19 = vadd.f32 %v1582_v28, %v1187_v22  ;;  %v1513_v27 = vadd.f32 1.0, %v7853_v30  ;;  %v728_v63 = vmul.f32 %v9833_v4, %v10478_v5 }
 0x12b   : > { %v10542_v11 = vpop.eup %7856  ;;  %1981 = vmatpush1.bf16.msra.mxu0 %v1822_v50  ;;  %v1703_v3 = vadd.f32 %v1590_v42, %v1191_v15  ;;  %v1517_v54 = vadd.f32 1.0, %v7855_v33  ;;  %v729_v21 = vmul.f32 %v9882_v2, %v10478_v5  ;;  %v957_v29 = vadd.f32 %v10504_v44, %v727_v47 }
 0x12c   : > { %v7859_v9 = vpop.eup %7858  ;;  %v1764_v25 = vmul.f32 1.442695, %v1699_v19  ;;  %7872 = vlog2.f32 %v1513_v27  ;;  %v10548_v46 = vadd.f32 %v894_v31, %v10478_v5  ;;  %v10551_v16 = vadd.f32 %v895_v62, %v10478_v5 }
 0x12d   : > { %v7861_v41 = vpop.eup %7860  ;;  %v1768_v22 = vmul.f32 1.442695, %v1703_v3  ;;  %7874 = vlog2.f32 %v1517_v54  ;;  %v1515_v34 = vadd.f32 1.0, %v7859_v9  ;;  %v10554_v15 = vadd.f32 %v896_v1, %v10478_v5 }
 0x12e   : > { %15485 = vst [vmem:[#allocation78_spill] sm:$0xff] %v10548_v46  ;;  %15486 = vst [vmem:[#allocation80_spill] sm:$0xff] %v10551_v16  ;;  %v7863_v28 = vpop.eup %7862  ;;  %v1194_v30 = vmax.f32 %v10445_v43, 0.0  ;;  %v1596_v44 = vmul.f32 0.6931472, %v7861_v41  ;;  %v730_v50 = vmul.f32 %v9836_v37, %v10478_v5  ;;  %v958_v42 = vadd.f32 %v894_v31, %v728_v63  ;;  %v10559_v16 = vpop.permute.xlu0 %1036 }
 0x12f   : > { %15487 = vst [vmem:[#allocation81_spill] sm:$0xff] %v10554_v15  ;;  %v1824_v47 = vpack.c.bf16 %v1768_v22, %v1764_v25  ;;  %v1519_v33 = vadd.f32 1.0, %v7863_v28  ;;  %7876 = vlog2.f32 %v1515_v34  ;;  %v959_v19 = vadd.f32 %v895_v62, %v729_v21  ;;  %15488 = vst [vmem:[#allocation34_spill] sm:$0xff] %v10559_v16 }
 0x130   : > { %v7865_v27 = vpop.eup %7864  ;;  %7878 = vpow2.f32 %v1459_v61  ;;  %v1461_v3 = vmul.f32 1.442695, %v1351_v53  ;;  %v1706_v54 = vadd.f32 %v1596_v44, %v1194_v30  ;;  %v960_v9 = vadd.f32 %v896_v1, %v730_v50 }
 0x131   : > { %v7867_v15 = vpop.eup %7866  ;;  %2094 = vmatpush1.bf16.msra.mxu1 %v1824_v47  ;;  %v1198_v43 = vmax.f32 %v10447_v10, 0.0  ;;  %v1604_v41 = vmul.f32 0.6931472, %v7865_v27  ;;  %7880 = vlog2.f32 %v1519_v33  ;;  %v1101_v5 = vadd.f32 %v10559_v16, %v957_v29 }
 0x132   : > { %v7869_v31 = vpop.eup %7868  ;;  %v1196_v63 = vmax.f32 %v10453_v55, 0.0  ;;  %v1200_v62 = vmax.f32 %v10455_v45, 0.0  ;;  %v1600_v21 = vmul.f32 0.6931472, %v7867_v15  ;;  %v1102_v25 = vadd.f32 %v10559_v16, %v958_v42  ;;  %v15490_v45 = vld [vmem:[#allocation33_spill] sm:$0xff] }
 0x133   : > { %v1710_v61 = vadd.f32 %v1604_v41, %v1198_v43  ;;  %v1771_v53 = vmul.f32 1.442695, %v1706_v54  ;;  %v1608_v22 = vmul.f32 0.6931472, %v7869_v31  ;;  %v1103_v1 = vadd.f32 %v10559_v16, %v959_v19  ;;  %v10581_v43 = vpop.permute.xlu1 %1021 }
 0x134   : > { %v10567_v34 = vpop.eup %7870  ;;  %7882 = vpow2.f32 %v1461_v3  ;;  %v1463_v10 = vmul.f32 1.442695, %v10526_v23  ;;  %v1708_v28 = vadd.f32 %v1600_v21, %v1196_v63  ;;  %v1104_v29 = vadd.f32 %v10559_v16, %v960_v9  ;;  %v15494_v63 = vld [vmem:[#allocation54_spill] sm:$0xff] }
 0x135   : > { %v1775_v30 = vmul.f32 1.442695, %v1710_v61  ;;  %v1712_v55 = vadd.f32 %v1608_v22, %v1200_v62  ;;  %v10571_v44 = vmul.f32 1.3862944, %v1101_v5  ;;  %v700_v15 = vmul.f32 %v9833_v4, %v15490_v45 }
 0x136   : > { %v7873_v50 = vpop.eup %7872  ;;  %v1773_v42 = vmul.f32 1.442695, %v1708_v28  ;;  %v1193_v47 = vmax.f32 %v10471_v8, 0.0  ;;  %v1197_v33 = vmax.f32 %v10473_v49, 0.0  ;;  %v10577_v19 = vmul.f32 1.3862944, %v1102_v25 }
 0x137   : > { %15489 = vst [vmem:[#allocation35_spill] sm:$0xff] %v10571_v44  ;;  %v7875_v27 = vpop.eup %7874  ;;  %v1827_v23 = vpack.c.bf16 %v1775_v30, %v1771_v53  ;;  %v1777_v3 = vmul.f32 1.442695, %v1712_v55  ;;  %v1594_v54 = vmul.f32 0.6931472, %v7873_v50  ;;  %v1195_v5 = vmax.f32 %v10484_v17, 0.0 }
 0x138   : > { %15491 = vst [vmem:[#allocation36_spill] sm:$0xff] %v10577_v19  ;;  %v10579_v9 = vmul.f32 1.3862944, %v1103_v1  ;;  %v1602_v41 = vmul.f32 0.6931472, %v7875_v27  ;;  %v930_v62 = vadd.f32 %v15494_v63, %v700_v15  ;;  %v1199_v25 = vmax.f32 %v10486_v52, 0.0 }
 0x139   : > { %v10584_v31 = vmul.f32 1.3862944, %v1104_v29  ;;  %v7877_v8 = vpop.eup %7876  ;;  %1982 = vmatprep.subr.bf16.mxu0 %v1827_v23  ;;  %v1829_v49 = vpack.c.bf16 %v1777_v3, %v1773_v42  ;;  %v1705_v21 = vadd.f32 %v1594_v54, %v1193_v47  ;;  %v1293_v61 = vand.u32 2147483647, %v10571_v44  ;;  %v15495_v30 = vld [vmem:[#allocation67_spill] sm:$0xff]  ;;  %v15496_v50 = vld [vmem:[#allocation65_spill] sm:$0xff]  ;;  %v10599_v3 = vpop.permute.xlu1 %629 }
 0x13a   : > { %15492 = vst [vmem:[#allocation90_spill] sm:$0xff] %v10579_v9  ;;  %v10589_v53 = vpop.eup %7878  ;;  %v1709_v22 = vadd.f32 %v1602_v41, %v1197_v33  ;;  %v1598_v1 = vmul.f32 0.6931472, %v7877_v8  ;;  %v1294_v28 = vand.u32 2147483647, %v10577_v19  ;;  %v1074_v17 = vadd.f32 %v15495_v30, %v930_v62  ;;  %15497 = vst [vmem:[#allocation92_spill] sm:$0xff] %v10599_v3 }
 0x13b   : > { %15493 = vst [vmem:[#allocation91_spill] sm:$0xff] %v10584_v31  ;;  %v7881_v29 = vpop.eup %7880  ;;  %2095 = vmatprep.subr.bf16.mxu1 %v1829_v49  ;;  %v1770_v55 = vmul.f32 1.442695, %v1705_v21  ;;  %v1295_v15 = vand.u32 2147483647, %v10579_v9  ;;  %v1078_v42 = vadd.f32 %v15496_v50, %v10508_v58  ;;  %v702_v52 = vmul.f32 %v9836_v37, %v15490_v45  ;;  %v15498_v62 = vld [vmem:[#allocation56_spill] sm:$0xff] }
 0x13c   : > { %v1774_v47 = vmul.f32 1.442695, %v1709_v22  ;;  %v1606_v27 = vmul.f32 0.6931472, %v7881_v29  ;;  %v1707_v23 = vadd.f32 %v1598_v1, %v1195_v5  ;;  %v1296_v33 = vand.u32 2147483647, %v10584_v31 }
 0x13d   : > { %v10601_v54 = vmul.f32 1.3862944, %v1074_v17  ;;  %v10603_v41 = vmul.f32 1.3862944, %v1078_v42  ;;  %v932_v8 = vadd.f32 %v15498_v62, %v702_v52  ;;  %v1080_v49 = vadd.f32 %v15496_v50, %v10523_v48  ;;  %v15499_v48 = vld [vmem:[#allocation53_spill] sm:$0xff] }
 0x13e   : > { %v10608_v58 = vpop.eup %7882  ;;  %v1826_v21 = vpack.c.bf16 %v1774_v47, %v1770_v55  ;;  %v1711_v63 = vadd.f32 %v1606_v27, %v1199_v25  ;;  %v1772_v22 = vmul.f32 1.442695, %v1707_v23  ;;  %v699_v5 = vmul.f32 %v9830_v36, %v15490_v45 }
 0x13f   : > { %7884 = vpow2.f32 %v1463_v10  ;;  %v1357_v1 = vsub.f32 0.0, %v1293_v61  ;;  %v1266_v17 = vand.u32 2147483647, %v10601_v54  ;;  %v1270_v29 = vand.u32 2147483647, %v10603_v41 }
 0x140   : > { %1983 = vmatpush1.bf16.msra.mxu0 %v1826_v21  ;;  %v1776_v42 = vmul.f32 1.442695, %v1711_v63  ;;  %v1076_v52 = vadd.f32 %v15495_v30, %v932_v8  ;;  %v10615_v62 = vmul.f32 1.3862944, %v1080_v49  ;;  %v929_v46 = vadd.f32 %v15499_v48, %v699_v5  ;;  %v10625_v49 = vpop.permute.xlu1 %634 }
 0x141   : > { %v1330_v55 = vsub.f32 0.0, %v1266_v17  ;;  %v1334_v25 = vsub.f32 0.0, %v1270_v29  ;;  %v1077_v47 = vadd.f32 %v15496_v50, %v10395_v56  ;;  %v701_v10 = vmul.f32 %v9882_v2, %v15490_v45  ;;  %v15500_v45 = vld [vmem:[#allocation55_spill] sm:$0xff] }
 0x142   : > { %v1828_v61 = vpack.c.bf16 %v1776_v42, %v1772_v22  ;;  %v1358_v27 = vsub.f32 0.0, %v1294_v28  ;;  %v10622_v23 = vmul.f32 1.3862944, %v1076_v52  ;;  %v1272_v63 = vand.u32 2147483647, %v10615_v62 }
 0x143   : > { %v1419_v21 = vmul.f32 1.442695, %v1330_v55  ;;  %v1427_v8 = vmul.f32 1.442695, %v1334_v25  ;;  %v1073_v5 = vadd.f32 %v15495_v30, %v929_v46  ;;  %v10628_v17 = vmul.f32 1.3862944, %v1077_v47 }
 0x144   : > { %2096 = vmatpush1.bf16.msra.mxu1 %v1828_v61  ;;  %v1359_v29 = vsub.f32 0.0, %v1295_v15  ;;  %v1268_v56 = vand.u32 2147483647, %v10622_v23  ;;  %v1336_v48 = vsub.f32 0.0, %v1272_v63  ;;  %v931_v22 = vadd.f32 %v15500_v45, %v701_v10 }
 0x145   : > { %v1473_v28 = vmul.f32 1.442695, %v1357_v1  ;;  %7886 = vpow2.f32 %v1419_v21  ;;  %v10632_v42 = vmul.f32 1.3862944, %v1073_v5  ;;  %v1269_v52 = vand.u32 2147483647, %v10628_v17 }
 0x146   : > { %7888 = vpow2.f32 %v1427_v8  ;;  %v1332_v55 = vsub.f32 0.0, %v1268_v56  ;;  %v1431_v25 = vmul.f32 1.442695, %v1336_v48  ;;  %v1075_v46 = vadd.f32 %v15495_v30, %v931_v22  ;;  %v801_v56 = vpop.permute.xlu1 %800 }
 0x147   : > { %v1360_v47 = vsub.f32 0.0, %v1296_v33  ;;  %v1265_v61 = vand.u32 2147483647, %v10632_v42  ;;  %v1333_v15 = vsub.f32 0.0, %v1269_v52  ;;  %v1079_v63 = vadd.f32 %v15496_v50, %v10512_v20  ;;  %v15501_v33 = vld [vmem:[#allocation15_spill] sm:$0xff] }
 0x148   : > { %v1475_v16 = vmul.f32 1.442695, %v1358_v27  ;;  %v1423_v10 = vmul.f32 1.442695, %v1332_v55  ;;  %7890 = vpow2.f32 %v1431_v25  ;;  %v10639_v1 = vmul.f32 1.3862944, %v1075_v46 }
 0x149   : > { %v10641_v21 = vpop.eup %7884  ;;  %7892 = vpow2.f32 %v1473_v28  ;;  %v1329_v8 = vsub.f32 0.0, %v1265_v61  ;;  %v1425_v5 = vmul.f32 1.442695, %v1333_v15  ;;  %v10643_v48 = vmul.f32 1.3862944, %v1079_v63 }
 0x14a   : > { %v10647_v22 = vmul.f32 %v9815_v14, %v15501_v33  ;;  %v1477_v52 = vmul.f32 1.442695, %v1359_v29  ;;  %7894 = vpow2.f32 %v1423_v10  ;;  %v1267_v20 = vand.u32 2147483647, %v10639_v1 }
 0x14b   : > { %v1479_v27 = vmul.f32 1.442695, %v1360_v47  ;;  %v1417_v55 = vmul.f32 1.442695, %v1329_v8  ;;  %7896 = vpow2.f32 %v1425_v5  ;;  %v1271_v25 = vand.u32 2147483647, %v10643_v48 }
 0x14c   : > { %15502 = vst [vmem:[#allocation15_spill] sm:$0xff] %v10647_v22  ;;  %7898 = vpow2.f32 %v1475_v16  ;;  %v1331_v28 = vsub.f32 0.0, %v1267_v20  ;;  %v10652_v46 = vmul.f32 %v9827_v35, %v801_v56  ;;  %v10655_v61 = vmul.f32 %v9815_v14, %v801_v56 }
 0x14d   : > { %7900 = vpow2.f32 %v1417_v55  ;;  %v1335_v15 = vsub.f32 0.0, %v1271_v25  ;;  %v10658_v29 = vmul.f32 %v9879_v0, %v801_v56  ;;  %v10661_v63 = vmul.f32 %v9820_v32, %v801_v56 }
 0x14e   : > { %v10665_v47 = vmul.f32 %v9879_v0, %v15501_v33  ;;  %7902 = vpow2.f32 %v1477_v52  ;;  %v1421_v16 = vmul.f32 1.442695, %v1331_v28  ;;  %v10669_v10 = vadd.f32 %v10652_v46, %v10625_v49 }
 0x14f   : > { %v7887_v8 = vpop.eup %7886  ;;  %v10673_v5 = vmul.f32 %v9820_v32, %v15501_v33  ;;  %7904 = vpow2.f32 %v1479_v27  ;;  %v1429_v20 = vmul.f32 1.442695, %v1335_v15  ;;  %v10677_v56 = vadd.f32 %v10655_v61, %v10625_v49  ;;  %v15511_v15 = vld [vmem:[#allocation52_spill] sm:$0xff] }
 0x150   : > { %15503 = vst [vmem:[#allocation93_spill] sm:$0xff] %v10665_v47  ;;  %15504 = vst [vmem:[#allocation94_spill] sm:$0xff] %v10669_v10  ;;  %v7889_v55 = vpop.eup %7888  ;;  %v1522_v25 = vadd.f32 1.0, %v7887_v8  ;;  %7906 = vpow2.f32 %v1421_v16  ;;  %v10681_v52 = vadd.f32 %v10658_v29, %v10625_v49  ;;  %v10685_v28 = vadd.f32 %v10661_v63, %v10625_v49  ;;  %v15509_v10 = vld [vmem:[#allocation18_spill] sm:$0xff] }
 0x151   : > { %15505 = vst [vmem:[#allocation95_spill] sm:$0xff] %v10673_v5  ;;  %15506 = vst [vmem:[#allocation96_spill] sm:$0xff] %v10677_v56  ;;  %v10689_v33 = vmul.f32 %v9827_v35, %v15509_v10  ;;  %v1526_v27 = vadd.f32 1.0, %v7889_v55  ;;  %7908 = vpow2.f32 %v1429_v20  ;;  %v708_v56 = vmul.f32 %v9833_v4, %v15511_v15 }
 0x152   : > { %15507 = vst [vmem:[#allocation97_spill] sm:$0xff] %v10681_v52  ;;  %15508 = vst [vmem:[#allocation98_spill] sm:$0xff] %v10685_v28  ;;  %v7891_v45 = vpop.eup %7890  ;;  %v10695_v16 = vmul.f32 %v9815_v14, %v15509_v10  ;;  %v10699_v8 = vmul.f32 %v9879_v0, %v15509_v10  ;;  %7910 = vlog2.f32 %v1522_v25  ;;  %v710_v52 = vmul.f32 %v9836_v37, %v15511_v15  ;;  %v15516_v28 = vld [vmem:[#allocation61_spill] sm:$0xff] }
 0x153   : > { %15510 = vst [vmem:[#allocation18_spill] sm:$0xff] %v10689_v33  ;;  %v10703_v35 = vpop.eup %7892  ;;  %v10707_v20 = vmul.f32 %v9820_v32, %v15509_v10  ;;  %7912 = vlog2.f32 %v1526_v27  ;;  %v1528_v55 = vadd.f32 1.0, %v7891_v45  ;;  %v938_v50 = vadd.f32 %v15516_v28, %v708_v56 }
 0x154   : > { %15512 = vst [vmem:[#allocation99_spill] sm:$0xff] %v10695_v16  ;;  %15513 = vst [vmem:[#allocation100_spill] sm:$0xff] %v10699_v8  ;;  %v7895_v14 = vpop.eup %7894  ;;  %v1202_v30 = vmax.f32 %v10601_v54, 0.0  ;;  %v1206_v0 = vmax.f32 %v10603_v41, 0.0  ;;  %v940_v25 = vadd.f32 %v15517_v51, %v710_v52  ;;  %v707_v9 = vmul.f32 %v9830_v36, %v15511_v15  ;;  %v15518_v41 = vld [vmem:[#allocation60_spill] sm:$0xff]  ;;  %v15521_v51 = vld [vmem:[#allocation62_spill] sm:$0xff] }
 0x155   : > { %15514 = vst [vmem:[#allocation101_spill] sm:$0xff] %v10703_v35  ;;  %15515 = vst [vmem:[#allocation102_spill] sm:$0xff] %v10707_v20  ;;  %v7897_v44 = vpop.eup %7896  ;;  %v1524_v33 = vadd.f32 1.0, %v7895_v14  ;;  %7914 = vlog2.f32 %v1528_v55  ;;  %v1082_v32 = vadd.f32 %v10425_v12, %v938_v50  ;;  %v709_v55 = vmul.f32 %v9882_v2, %v15511_v15 }
 0x156   : > { %v10717_v45 = vpop.eup %7898  ;;  %v1525_v56 = vadd.f32 1.0, %v7897_v44  ;;  %v1084_v54 = vadd.f32 %v10425_v12, %v940_v25  ;;  %v937_v27 = vadd.f32 %v15518_v41, %v707_v9 }
 0x157   : > { %v7901_v52 = vpop.eup %7900  ;;  %7916 = vlog2.f32 %v1524_v33  ;;  %v10723_v28 = vmul.f32 1.3862944, %v1082_v32  ;;  %v735_v33 = vmul.f32 %v9830_v36, %v10625_v49  ;;  %v939_v10 = vadd.f32 %v15521_v51, %v709_v55 }
 0x158   : > { %v10727_v14 = vpop.eup %7902  ;;  %v1521_v50 = vadd.f32 1.0, %v7901_v52  ;;  %7918 = vlog2.f32 %v1525_v56  ;;  %v10729_v8 = vmul.f32 1.3862944, %v1084_v54  ;;  %v1081_v44 = vadd.f32 %v10425_v12, %v937_v27 }
 0x159   : > { %15519 = vst [vmem:[#allocation103_spill] sm:$0xff] %v10727_v14  ;;  %v10732_v25 = vpop.eup %7904  ;;  %v1274_v32 = vand.u32 2147483647, %v10723_v28  ;;  %v736_v56 = vmul.f32 %v9833_v4, %v10625_v49  ;;  %v1083_v20 = vadd.f32 %v10425_v12, %v939_v10  ;;  %v1534_v55 = vadd.f32 1.0, %v10443_v40 }
 0x15a   : > { %15520 = vst [vmem:[#allocation104_spill] sm:$0xff] %v10732_v25  ;;  %v7907_v41 = vpop.eup %7906  ;;  %7920 = vlog2.f32 %v1521_v50  ;;  %v1276_v54 = vand.u32 2147483647, %v10729_v8  ;;  %v10742_v52 = vmul.f32 1.3862944, %v1081_v44  ;;  %v737_v10 = vmul.f32 %v9882_v2, %v10625_v49 }
 0x15b   : > { %v7909_v27 = vpop.eup %7908  ;;  %v1523_v9 = vadd.f32 1.0, %v7907_v41  ;;  %v1338_v31 = vsub.f32 0.0, %v1274_v32  ;;  %v10748_v44 = vmul.f32 1.3862944, %v1083_v20  ;;  %v1536_v40 = vadd.f32 1.0, %v10542_v11 }
 0x15c   : > { %v7911_v14 = vpop.eup %7910  ;;  %v1527_v35 = vadd.f32 1.0, %v7909_v27  ;;  %v1340_v51 = vsub.f32 0.0, %v1276_v54  ;;  %v1273_v50 = vand.u32 2147483647, %v10742_v52  ;;  %v1533_v20 = vadd.f32 1.0, %v10438_v57 }
 0x15d   : > { %v7913_v25 = vpop.eup %7912  ;;  %v1612_v16 = vmul.f32 0.6931472, %v7911_v14  ;;  %7922 = vlog2.f32 %v1523_v9  ;;  %v1435_v47 = vmul.f32 1.442695, %v1338_v31  ;;  %v1207_v11 = vmax.f32 %v10643_v48, 0.0 }
 0x15e   : > { %v1620_v3 = vmul.f32 0.6931472, %v7913_v25  ;;  %7924 = vlog2.f32 %v1527_v35  ;;  %v1439_v15 = vmul.f32 1.442695, %v1340_v51  ;;  %v1337_v41 = vsub.f32 0.0, %v1273_v50 }
 0x15f   : > { %v7915_v32 = vpop.eup %7914  ;;  %v1714_v19 = vadd.f32 %v1612_v16, %v1202_v30  ;;  %7926 = vpow2.f32 %v1435_v47  ;;  %v1275_v51 = vand.u32 2147483647, %v10748_v44  ;;  %v15522_v16 = vmax.f32 %v10615_v62, 0.0 }
 0x160   : > { %v1718_v54 = vadd.f32 %v1620_v3, %v1206_v0  ;;  %v1624_v27 = vmul.f32 0.6931472, %v7915_v32  ;;  %7928 = vpow2.f32 %v1439_v15  ;;  %v1433_v14 = vmul.f32 1.442695, %v1337_v41 }
 0x161   : > { %v7917_v9 = vpop.eup %7916  ;;  %v1779_v31 = vmul.f32 1.442695, %v1714_v19  ;;  %7930 = vlog2.f32 %v1534_v55  ;;  %v738_v3 = vmul.f32 %v9836_v37, %v10625_v49  ;;  %v1339_v15 = vsub.f32 0.0, %v1275_v51 }
 0x162   : > { %v7919_v35 = vpop.eup %7918  ;;  %v1783_v25 = vmul.f32 1.442695, %v1718_v54  ;;  %v1616_v30 = vmul.f32 0.6931472, %v7917_v9  ;;  %v1720_v50 = vadd.f32 %v1624_v27, %v15522_v16  ;;  %7932 = vpow2.f32 %v1433_v14  ;;  %v15525_v9 = vld [vmem:[#allocation79_spill] sm:$0xff] }
 0x163   : > { %v1618_v47 = vmul.f32 0.6931472, %v7919_v35  ;;  %v15523_v57 = vmax.f32 %v10622_v23, 0.0  ;;  %v10763_v41 = vadd.f32 %v10652_v46, %v735_v33  ;;  %7934 = vlog2.f32 %v1536_v40 }
 0x164   : > { %v7921_v19 = vpop.eup %7920  ;;  %v1831_v0 = vpack.c.bf16 %v1783_v25, %v1779_v31  ;;  %v15524_v62 = vmax.f32 %v10628_v17, 0.0  ;;  %v10768_v27 = vadd.f32 %v10655_v61, %v736_v56  ;;  %v1437_v48 = vmul.f32 1.442695, %v1339_v15 }
 0x165   : > { %v1716_v55 = vadd.f32 %v1616_v30, %v15523_v57  ;;  %v1610_v32 = vmul.f32 0.6931472, %v7921_v19  ;;  %v1785_v14 = vmul.f32 1.442695, %v1720_v50  ;;  %7936 = vlog2.f32 %v1533_v20  ;;  %v15527_v20 = vld [vmem:[#allocation73_spill] sm:$0xff] }
 0x166   : > { %v1717_v54 = vadd.f32 %v1618_v47, %v15524_v62  ;;  %1984 = vmatprep.subr.bf16.mxu0 %v1831_v0  ;;  %v716_v23 = vmul.f32 %v9833_v4, %v15525_v9  ;;  %v15526_v46 = vmax.f32 %v10632_v42, 0.0  ;;  %v10775_v40 = vadd.f32 %v10658_v29, %v737_v10 }
 0x167   : > { %v1781_v49 = vmul.f32 1.442695, %v1716_v55  ;;  %v7923_v31 = vpop.eup %7922  ;;  %7938 = vpow2.f32 %v1437_v48  ;;  %v1535_v17 = vadd.f32 1.0, %v10528_v13  ;;  %v10779_v35 = vadd.f32 %v10661_v63, %v738_v3  ;;  %v15529_v48 = vld [vmem:[#allocation75_spill] sm:$0xff] }
 0x168   : > { %v1713_v33 = vadd.f32 %v1610_v32, %v15526_v46  ;;  %v7925_v61 = vpop.eup %7924  ;;  %v1614_v51 = vmul.f32 0.6931472, %v7923_v31  ;;  %v946_v25 = vadd.f32 %v15527_v20, %v716_v23  ;;  %v1782_v50 = vmul.f32 1.442695, %v1717_v54 }
 0x169   : > { %v1833_v56 = vpack.c.bf16 %v1785_v14, %v1781_v49  ;;  %v7927_v30 = vpop.eup %7926  ;;  %v1622_v47 = vmul.f32 0.6931472, %v7925_v61  ;;  %v718_v42 = vmul.f32 %v9836_v37, %v15525_v9  ;;  %v15528_v10 = vmax.f32 %v10639_v1, 0.0 }
 0x16a   : > { %v1778_v16 = vmul.f32 1.442695, %v1713_v33  ;;  %v7929_v29 = vpop.eup %7928  ;;  %v1214_v15 = vmax.f32 %v10285_v6, 0.0  ;;  %v1530_v19 = vadd.f32 1.0, %v7927_v30  ;;  %v1090_v63 = vadd.f32 %v10581_v43, %v946_v25 }
 0x16b   : > { %2097 = vmatprep.subr.bf16.mxu1 %v1833_v56  ;;  %v1715_v13 = vadd.f32 %v1614_v51, %v15528_v10  ;;  %v7931_v3 = vpop.eup %7930  ;;  %v1719_v57 = vadd.f32 %v1622_v47, %v1207_v11  ;;  %v1532_v55 = vadd.f32 1.0, %v7929_v29  ;;  %7940 = vlog2.f32 %v1535_v17  ;;  %v15530_v29 = vld [vmem:[#allocation72_spill] sm:$0xff] }
 0x16c   : > { %v1830_v0 = vpack.c.bf16 %v1782_v50, %v1778_v16  ;;  %v7933_v32 = vpop.eup %7932  ;;  %7942 = vlog2.f32 %v1530_v19  ;;  %v10788_v54 = vmul.f32 1.3862944, %v1090_v63  ;;  %v948_v49 = vadd.f32 %v15529_v48, %v718_v42 }
 0x16d   : > { %v1780_v62 = vmul.f32 1.442695, %v1715_v13  ;;  %v1784_v1 = vmul.f32 1.442695, %v1719_v57  ;;  %v1216_v14 = vmax.f32 %v10355_v26, 0.0  ;;  %7944 = vlog2.f32 %v1532_v55  ;;  %v7935_v23 = vpop.eup %7934 }
 0x16e   : > { %1985 = vmatpush1.bf16.msra.mxu0 %v1830_v0  ;;  %v1529_v6 = vadd.f32 1.0, %v7933_v32  ;;  %v1636_v31 = vmul.f32 0.6931472, %v7931_v3  ;;  %v1282_v46 = vand.u32 2147483647, %v10788_v54  ;;  %v1092_v11 = vadd.f32 %v10581_v43, %v948_v49  ;;  %v15531_v0 = vld [vmem:[#allocation74_spill] sm:$0xff] }
 0x16f   : > { %v715_v33 = vmul.f32 %v9830_v36, %v15525_v9  ;;  %v1832_v17 = vpack.c.bf16 %v1784_v1, %v1780_v62  ;;  %v1213_v61 = vmax.f32 %v10283_v24, 0.0  ;;  %v1542_v56 = vadd.f32 1.0, %v10589_v53  ;;  %v7937_v51 = vpop.eup %7936 }
 0x170   : > { %7946 = vlog2.f32 %v1529_v6  ;;  %v1210_v26 = vmax.f32 %v10723_v28, 0.0  ;;  %v1215_v25 = vmax.f32 %v10313_v39, 0.0  ;;  %v1346_v30 = vsub.f32 0.0, %v1282_v46 }
 0x171   : > { %v10800_v16 = vmul.f32 1.3862944, %v1092_v11  ;;  %v7939_v50 = vpop.eup %7938  ;;  %2098 = vmatpush1.bf16.msra.mxu1 %v1832_v17  ;;  %v1212_v47 = vmax.f32 %v10729_v8, 0.0  ;;  %v1640_v42 = vmul.f32 0.6931472, %v7935_v23  ;;  %v945_v10 = vadd.f32 %v15530_v29, %v715_v33 }
 0x172   : > { %v717_v24 = vmul.f32 %v9882_v2, %v15525_v9  ;;  %v1726_v13 = vadd.f32 %v1636_v31, %v1214_v15  ;;  %v1531_v53 = vadd.f32 1.0, %v7939_v50  ;;  %v1451_v19 = vmul.f32 1.442695, %v1346_v30 }
 0x173   : > { %v1284_v28 = vand.u32 2147483647, %v10800_v16  ;;  %7948 = vlog2.f32 %v1542_v56  ;;  %v1544_v63 = vadd.f32 1.0, %v10641_v21  ;;  %v1089_v3 = vadd.f32 %v10581_v43, %v945_v10  ;;  %v10816_v21 = vpop.permute.xlu1 %1031 }
 0x174   : > { %v947_v57 = vadd.f32 %v15531_v0, %v717_v24  ;;  %v1634_v55 = vmul.f32 0.6931472, %v7937_v51  ;;  %7950 = vlog2.f32 %v1531_v53  ;;  %v724_v32 = vmul.f32 %v9833_v4, %v10451_v18  ;;  %15532 = vst [vmem:[#allocation79_spill] sm:$0xff] %v10816_v21 }
 0x175   : > { %v1348_v8 = vsub.f32 0.0, %v1284_v28  ;;  %v7941_v62 = vpop.eup %7940  ;;  %7952 = vpow2.f32 %v1451_v19  ;;  %v10812_v15 = vmul.f32 1.3862944, %v1089_v3  ;;  %v1541_v49 = vadd.f32 1.0, %v10567_v34 }
 0x176   : > { %v1091_v1 = vadd.f32 %v10581_v43, %v947_v57  ;;  %v7943_v6 = vpop.eup %7942  ;;  %v1791_v23 = vmul.f32 1.442695, %v1726_v13  ;;  %v1728_v31 = vadd.f32 %v1640_v42, %v1216_v14  ;;  %v1209_v46 = vmax.f32 %v10742_v52, 0.0 }
 0x177   : > { %v1455_v11 = vmul.f32 1.442695, %v1348_v8  ;;  %v7945_v33 = vpop.eup %7944  ;;  %v1628_v17 = vmul.f32 0.6931472, %v7943_v6  ;;  %7954 = vlog2.f32 %v1544_v63  ;;  %v1281_v56 = vand.u32 2147483647, %v10812_v15 }
 0x178   : > { %v954_v51 = vadd.f32 %v10647_v22, %v724_v32  ;;  %v1632_v30 = vmul.f32 0.6931472, %v7945_v33  ;;  %v1725_v50 = vadd.f32 %v1634_v55, %v1213_v61  ;;  %v10821_v34 = vmul.f32 1.3862944, %v1091_v1  ;;  %v15612_v22 = vld [vmem:[#allocation57_spill] sm:$0xff] }
 0x179   : > { %7956 = vpow2.f32 %v1455_v11  ;;  %v1722_v24 = vadd.f32 %v1628_v17, %v1210_v26  ;;  %v1345_v53 = vsub.f32 0.0, %v1281_v56  ;;  %v1793_v42 = vmul.f32 1.442695, %v1728_v31 }
 0x17a   : > { %v7947_v10 = vpop.eup %7946  ;;  %7958 = vlog2.f32 %v1541_v49  ;;  %v1098_v14 = vadd.f32 %v10816_v21, %v954_v51  ;;  %v1724_v52 = vadd.f32 %v1632_v30, %v1212_v47  ;;  %v1638_v19 = vmul.f32 0.6931472, %v7941_v62 }
 0x17b   : > { %v1626_v13 = vmul.f32 0.6931472, %v7947_v10  ;;  %v1787_v28 = vmul.f32 1.442695, %v1722_v24  ;;  %v1211_v63 = vmax.f32 %v10748_v44, 0.0  ;;  %v1543_v57 = vadd.f32 1.0, %v10608_v58 }
 0x17c   : > { %v1449_v3 = vmul.f32 1.442695, %v1345_v53  ;;  %v1789_v61 = vmul.f32 1.442695, %v1724_v52  ;;  %v1222_v8 = vmax.f32 %v10488_v59, 0.0  ;;  %v726_v44 = vmul.f32 %v9836_v37, %v10451_v18 }
 0x17d   : > { %v1721_v55 = vadd.f32 %v1626_v13, %v1209_v46  ;;  %v1283_v26 = vand.u32 2147483647, %v10821_v34  ;;  %v7949_v32 = vpop.eup %7948  ;;  %v1835_v49 = vpack.c.bf16 %v1791_v23, %v1787_v28  ;;  %v1790_v1 = vmul.f32 1.442695, %v1725_v50 }
 0x17e   : > { %7960 = vpow2.f32 %v1449_v3  ;;  %v10828_v47 = vmul.f32 1.3862944, %v1098_v14  ;;  %v7951_v6 = vpop.eup %7950  ;;  %v1837_v62 = vpack.c.bf16 %v1793_v42, %v1789_v61  ;;  %v1727_v59 = vadd.f32 %v1638_v19, %v1215_v25  ;;  %v10841_v42 = vpop.permute.xlu1 %1041 }
 0x17f   : > { %v1786_v31 = vmul.f32 1.442695, %v1721_v55  ;;  %v1347_v11 = vsub.f32 0.0, %v1283_v26  ;;  %v7953_v58 = vpop.eup %7952  ;;  %1986 = vmatprep.subr.bf16.mxu0 %v1835_v49  ;;  %v1630_v46 = vmul.f32 0.6931472, %v7951_v6  ;;  %v1224_v33 = vmax.f32 %v10498_v60, 0.0 }
 0x180   : > { %7962 = vlog2.f32 %v1543_v57  ;;  %2099 = vmatprep.subr.bf16.mxu1 %v1837_v62  ;;  %v1218_v17 = vmax.f32 %v10788_v54, 0.0  ;;  %v1538_v56 = vadd.f32 1.0, %v7953_v58  ;;  %v1221_v10 = vmax.f32 %v10462_v7, 0.0  ;;  %15533 = vst [vmem:[#allocation73_spill] sm:$0xff] %v10841_v42 }
 0x181   : > { %v1834_v23 = vpack.c.bf16 %v1790_v1, %v1786_v31  ;;  %v1453_v51 = vmul.f32 1.442695, %v1347_v11  ;;  %v7955_v30 = vpop.eup %7954  ;;  %v1723_v50 = vadd.f32 %v1630_v46, %v1211_v63  ;;  %v1223_v24 = vmax.f32 %v10491_v38, 0.0  ;;  %v15534_v31 = vld [vmem:[#allocation36_spill] sm:$0xff] }
 0x182   : > { %v1290_v53 = vand.u32 2147483647, %v10828_v47  ;;  %7964 = vlog2.f32 %v1538_v56  ;;  %v1652_v39 = vmul.f32 0.6931472, %v7949_v32  ;;  %v1220_v60 = vmax.f32 %v10800_v16, 0.0 }
 0x183   : > { %v7957_v14 = vpop.eup %7956  ;;  %1987 = vmatpush1.bf16.msra.mxu0 %v1834_v23  ;;  %v956_v25 = vadd.f32 %v10673_v5, %v726_v44  ;;  %v1788_v13 = vmul.f32 1.442695, %v1723_v50  ;;  %v1792_v19 = vmul.f32 1.442695, %v1727_v59  ;;  %7966 = vpow2.f32 %v1453_v51  ;;  %v15535_v44 = vld [vmem:[#allocation76_spill] sm:$0xff]  ;;  %v15611_v5 = vld [vmem:[#allocation43_spill] sm:$0xff] }
 0x184   : > { %v7959_v52 = vpop.eup %7958  ;;  %v1540_v28 = vadd.f32 1.0, %v7957_v14  ;;  %v1656_v7 = vmul.f32 0.6931472, %v7955_v30  ;;  %v1354_v63 = vsub.f32 0.0, %v1290_v53  ;;  %v723_v57 = vmul.f32 %v9830_v36, %v10451_v18  ;;  %v15536_v59 = vld [vmem:[#allocation92_spill] sm:$0xff]  ;;  %v10857_v30 = vpop.permute.xlu1 %1046  ;;  %v15538_v53 = vld [vmem:[#allocation93_spill] sm:$0xff] }
 0x185   : > { %v1100_v3 = vadd.f32 %v10816_v21, %v956_v25  ;;  %v1836_v61 = vpack.c.bf16 %v1792_v19, %v1788_v13  ;;  %v1217_v55 = vmax.f32 %v10812_v15, 0.0  ;;  %v1550_v26 = vadd.f32 1.0, %v10717_v45  ;;  %15537 = vst [vmem:[#allocation75_spill] sm:$0xff] %v10857_v30 }
 0x186   : > { %7968 = vlog2.f32 %v1540_v28  ;;  %v1734_v32 = vadd.f32 %v1652_v39, %v1222_v8  ;;  %v1650_v49 = vmul.f32 0.6931472, %v7959_v52  ;;  %v1467_v1 = vmul.f32 1.442695, %v1354_v63  ;;  %v15539_v39 = vld [vmem:[#allocation99_spill] sm:$0xff] }
 0x187   : > { %v10848_v6 = vmul.f32 1.3862944, %v1100_v3  ;;  %2100 = vmatpush1.bf16.msra.mxu1 %v1836_v61  ;;  %v1230_v11 = vmax.f32 %v15534_v31, 0.0  ;;  %v953_v58 = vadd.f32 %v15535_v44, %v723_v57  ;;  %v725_v46 = vmul.f32 %v9882_v2, %v10451_v18 }
 0x188   : > { %v7961_v62 = vpop.eup %7960  ;;  %v732_v23 = vmul.f32 %v9833_v4, %v15536_v59  ;;  %v1736_v56 = vadd.f32 %v1656_v7, %v1224_v33  ;;  %7970 = vpow2.f32 %v1467_v1  ;;  %v1799_v52 = vmul.f32 1.442695, %v1734_v32 }
 0x189   : > { %v1537_v51 = vadd.f32 1.0, %v7961_v62  ;;  %v1292_v45 = vand.u32 2147483647, %v10848_v6  ;;  %7972 = vlog2.f32 %v1550_v26  ;;  %v1097_v50 = vadd.f32 %v10816_v21, %v953_v58 }
 0x18a   : > { %v7963_v8 = vpop.eup %7962  ;;  %v955_v14 = vadd.f32 %v15538_v53, %v725_v46  ;;  %v962_v25 = vadd.f32 %v15539_v39, %v732_v23  ;;  %v1733_v13 = vadd.f32 %v1650_v49, %v1221_v10  ;;  %v1219_v4 = vmax.f32 %v10821_v34, 0.0  ;;  %v15540_v49 = vld [vmem:[#allocation104_spill] sm:$0xff] }
 0x18b   : > { %7974 = vlog2.f32 %v1537_v51  ;;  %v1356_v19 = vsub.f32 0.0, %v1292_v45  ;;  %v10863_v33 = vmul.f32 1.3862944, %v1097_v50  ;;  %v1801_v3 = vmul.f32 1.442695, %v1736_v56 }
 0x18c   : > { %v1099_v28 = vadd.f32 %v10816_v21, %v955_v14  ;;  %v1106_v7 = vadd.f32 %v10841_v42, %v962_v25  ;;  %v7965_v63 = vpop.eup %7964  ;;  %v1654_v57 = vmul.f32 0.6931472, %v7963_v8  ;;  %v1110_v26 = vadd.f32 %v10857_v30, %v10768_v27 }
 0x18d   : > { %v1471_v61 = vmul.f32 1.442695, %v1356_v19  ;;  %v7967_v1 = vpop.eup %7966  ;;  %v1644_v32 = vmul.f32 0.6931472, %v7965_v63  ;;  %v1226_v10 = vmax.f32 %v10828_v47, 0.0  ;;  %v1552_v62 = vadd.f32 1.0, %v15540_v49 }
 0x18e   : > { %v1289_v58 = vand.u32 2147483647, %v10863_v33  ;;  %v10872_v46 = vmul.f32 1.442695, %v1733_v13  ;;  %v1539_v23 = vadd.f32 1.0, %v7967_v1  ;;  %v734_v50 = vmul.f32 %v9836_v37, %v15536_v59  ;;  %v15542_v1 = vld [vmem:[#allocation103_spill] sm:$0xff] }
 0x18f   : > { %7976 = vpow2.f32 %v1471_v61  ;;  %v10874_v51 = vmul.f32 1.3862944, %v1099_v28  ;;  %v1730_v45 = vadd.f32 %v1644_v32, %v1218_v17  ;;  %v10878_v27 = vmul.f32 1.3862944, %v1106_v7  ;;  %v15541_v7 = vld [vmem:[#allocation101_spill] sm:$0xff] }
 0x190   : > { %v7969_v56 = vpop.eup %7968  ;;  %v1353_v8 = vsub.f32 0.0, %v1289_v58  ;;  %7978 = vlog2.f32 %v1539_v23  ;;  %v1735_v25 = vadd.f32 %v1654_v57, %v1223_v24  ;;  %v10884_v13 = vmul.f32 1.3862944, %v1110_v26  ;;  %v15543_v57 = vld [vmem:[#allocation102_spill] sm:$0xff] }
 0x191   : > { %v1648_v14 = vmul.f32 0.6931472, %v7969_v56  ;;  %v1795_v19 = vmul.f32 1.442695, %v1730_v45  ;;  %7980 = vlog2.f32 %v1552_v62  ;;  %v1291_v63 = vand.u32 2147483647, %v10874_v51 }
 0x192   : > { %v1465_v28 = vmul.f32 1.442695, %v1353_v8  ;;  %v7971_v54 = vpop.eup %7970  ;;  %v1549_v61 = vadd.f32 1.0, %v15541_v7  ;;  %v1551_v37 = vadd.f32 1.0, %v15542_v1  ;;  %v1298_v32 = vand.u32 2147483647, %v10878_v27 }
 0x193   : > { %v1732_v17 = vadd.f32 %v1648_v14, %v1220_v60  ;;  %v7973_v49 = vpop.eup %7972  ;;  %v1839_v38 = vpack.c.bf16 %v1799_v52, %v1795_v19  ;;  %v1546_v24 = vadd.f32 1.0, %v7971_v54  ;;  %v964_v26 = vadd.f32 %v15543_v57, %v734_v50  ;;  %v15544_v7 = vld [vmem:[#allocation91_spill] sm:$0xff] }
 0x194   : > { %7982 = vpow2.f32 %v1465_v28  ;;  %v1355_v23 = vsub.f32 0.0, %v1291_v63  ;;  %v1362_v56 = vsub.f32 0.0, %v1298_v32  ;;  %v1112_v16 = vadd.f32 %v10857_v30, %v10779_v35 }
 0x195   : > { %v7975_v62 = vpop.eup %7974  ;;  %v1797_v58 = vmul.f32 1.442695, %v1732_v17  ;;  %1988 = vmatprep.subr.bf16.mxu0 %v1839_v38  ;;  %7984 = vlog2.f32 %v1546_v24  ;;  %v1302_v45 = vand.u32 2147483647, %v10884_v13  ;;  %v1108_v8 = vadd.f32 %v10841_v42, %v964_v26 }
 0x196   : > { %v1642_v60 = vmul.f32 0.6931472, %v7975_v62  ;;  %v1668_v52 = vmul.f32 0.6931472, %v7973_v49  ;;  %7986 = vlog2.f32 %v1549_v61  ;;  %v1469_v19 = vmul.f32 1.442695, %v1355_v23 }
 0x197   : > { %v1841_v14 = vpack.c.bf16 %v1801_v3, %v1797_v58  ;;  %v1366_v28 = vsub.f32 0.0, %v1302_v45  ;;  %v1483_v63 = vmul.f32 1.442695, %v1362_v56  ;;  %v10899_v54 = vmul.f32 1.3862944, %v1108_v8 }
 0x198   : > { %v1729_v50 = vadd.f32 %v1642_v60, %v1217_v55  ;;  %v1800_v35 = vmul.f32 1.442695, %v1735_v25  ;;  %v1232_v1 = vmax.f32 %v15544_v7, 0.0  ;;  %7988 = vpow2.f32 %v1469_v19 }
 0x199   : > { %v7977_v17 = vpop.eup %7976  ;;  %2101 = vmatprep.subr.bf16.mxu1 %v1841_v14  ;;  %v10902_v32 = vmul.f32 1.3862944, %v1112_v16  ;;  %7990 = vpow2.f32 %v1483_v63  ;;  %v1491_v61 = vmul.f32 1.442695, %v1366_v28  ;;  %v1742_v15 = vadd.f32 %v1668_v52, %v1230_v11  ;;  %v15545_v14 = vld [vmem:[#allocation18_spill] sm:$0xff]  ;;  %v15546_v28 = vld [vmem:[#allocation100_spill] sm:$0xff] }
 0x19a   : > { %v1794_v38 = vmul.f32 1.442695, %v1729_v50  ;;  %v1548_v3 = vadd.f32 1.0, %v7977_v17  ;;  %v7979_v49 = vpop.eup %7978  ;;  %v1228_v55 = vmax.f32 %v10848_v6, 0.0  ;;  %7992 = vlog2.f32 %v1551_v37 }
 0x19b   : > { %v1300_v24 = vand.u32 2147483647, %v10899_v54  ;;  %v7981_v26 = vpop.eup %7980  ;;  %v1646_v62 = vmul.f32 0.6931472, %v7979_v49  ;;  %v1304_v58 = vand.u32 2147483647, %v10902_v32  ;;  %v731_v56 = vmul.f32 %v9830_v36, %v15536_v59 }
 0x19c   : > { %v1838_v25 = vpack.c.bf16 %v10872_v46, %v1794_v38  ;;  %7994 = vlog2.f32 %v1548_v3  ;;  %v1109_v31 = vadd.f32 %v10857_v30, %v10763_v41  ;;  %v733_v46 = vmul.f32 %v9882_v2, %v15536_v59 }
 0x19d   : > { %7996 = vpow2.f32 %v1491_v61  ;;  %v1364_v23 = vsub.f32 0.0, %v1300_v24  ;;  %v1731_v37 = vadd.f32 %v1646_v62, %v1219_v4  ;;  %v1368_v16 = vsub.f32 0.0, %v1304_v58 }
 0x19e   : > { %v7983_v11 = vpop.eup %7982  ;;  %1989 = vmatpush1.bf16.msra.mxu0 %v1838_v25  ;;  %v1111_v60 = vadd.f32 %v10857_v30, %v10775_v40  ;;  %v961_v52 = vadd.f32 %v15545_v14, %v731_v56  ;;  %v10921_v36 = vmul.f32 1.3862944, %v1109_v31  ;;  %v963_v63 = vadd.f32 %v15546_v28, %v733_v46 }
 0x19f   : > { %v1545_v45 = vadd.f32 1.0, %v7983_v11  ;;  %v1487_v8 = vmul.f32 1.442695, %v1364_v23  ;;  %v7985_v19 = vpop.eup %7984  ;;  %v1796_v41 = vmul.f32 1.442695, %v1731_v37 }
 0x1a0   : > { %v1495_v50 = vmul.f32 1.442695, %v1368_v16  ;;  %v10924_v34 = vmul.f32 1.3862944, %v1111_v60  ;;  %v7987_v4 = vpop.eup %7986  ;;  %v1660_v17 = vmul.f32 0.6931472, %v7985_v19  ;;  %v1105_v2 = vadd.f32 %v10841_v42, %v961_v52 }
 0x1a1   : > { %v1672_v7 = vmul.f32 0.6931472, %v7981_v26  ;;  %7998 = vlog2.f32 %v1545_v45  ;;  %v1840_v40 = vpack.c.bf16 %v1800_v35, %v1796_v41  ;;  %v1301_v38 = vand.u32 2147483647, %v10921_v36 }
 0x1a2   : > { %8000 = vpow2.f32 %v1487_v8  ;;  %v1107_v3 = vadd.f32 %v10841_v42, %v963_v63  ;;  %v7989_v61 = vpop.eup %7988  ;;  %v1738_v49 = vadd.f32 %v1660_v17, %v1226_v10  ;;  %v1807_v24 = vmul.f32 1.442695, %v1742_v15  ;;  %v15547_v17 = vld [vmem:[#allocation35_spill] sm:$0xff] }
 0x1a3   : > { %8002 = vpow2.f32 %v1495_v50  ;;  %v10931_v25 = vmul.f32 1.3862944, %v1105_v2  ;;  %v7991_v62 = vpop.eup %7990  ;;  %2102 = vmatpush1.bf16.msra.mxu1 %v1840_v40  ;;  %v1547_v26 = vadd.f32 1.0, %v7989_v61  ;;  %v1365_v58 = vsub.f32 0.0, %v1301_v38 }
 0x1a4   : > { %v10933_v23 = vmul.f32 1.3862944, %v1107_v3  ;;  %v1303_v35 = vand.u32 2147483647, %v10924_v34  ;;  %v7993_v56 = vpop.eup %7992  ;;  %v1803_v31 = vmul.f32 1.442695, %v1738_v49  ;;  %v1744_v11 = vadd.f32 %v1672_v7, %v1232_v1 }
 0x1a5   : > { %v1554_v37 = vadd.f32 1.0, %v7991_v62  ;;  %v1297_v16 = vand.u32 2147483647, %v10931_v25  ;;  %v1666_v10 = vmul.f32 0.6931472, %v7987_v4  ;;  %8004 = vlog2.f32 %v1547_v26 }
 0x1a6   : > { %v7995_v47 = vpop.eup %7994  ;;  %v1489_v15 = vmul.f32 1.442695, %v1365_v58  ;;  %v1299_v46 = vand.u32 2147483647, %v10933_v23  ;;  %v1843_v45 = vpack.c.bf16 %v1807_v24, %v1803_v31  ;;  %v1367_v50 = vsub.f32 0.0, %v1303_v35  ;;  %v15548_v31 = vld [vmem:[#allocation90_spill] sm:$0xff] }
 0x1a7   : > { %v7997_v60 = vpop.eup %7996  ;;  %v1664_v8 = vmul.f32 0.6931472, %v7995_v47  ;;  %8006 = vlog2.f32 %v1554_v37  ;;  %v1361_v52 = vsub.f32 0.0, %v1297_v16  ;;  %v1229_v4 = vmax.f32 %v15547_v17, 0.0 }
 0x1a8   : > { %v1558_v19 = vadd.f32 1.0, %v7997_v60  ;;  %8008 = vpow2.f32 %v1489_v15  ;;  %v1363_v41 = vsub.f32 0.0, %v1299_v46  ;;  %1990 = vmatprep.subr.bf16.mxu0 %v1843_v45  ;;  %v1493_v2 = vmul.f32 1.442695, %v1367_v50 }
 0x1a9   : > { %v1740_v1 = vadd.f32 %v1664_v8, %v1228_v55  ;;  %v1481_v63 = vmul.f32 1.442695, %v1361_v52  ;;  %v1809_v3 = vmul.f32 1.442695, %v1744_v11  ;;  %v1225_v61 = vmax.f32 %v10863_v33, 0.0 }
 0x1aa   : > { %8010 = vlog2.f32 %v1558_v19  ;;  %v1485_v7 = vmul.f32 1.442695, %v1363_v41  ;;  %v1741_v62 = vadd.f32 %v1666_v10, %v1229_v4  ;;  %v1670_v26 = vmul.f32 0.6931472, %v7993_v56 }
 0x1ab   : > { %v7999_v40 = vpop.eup %7998  ;;  %v1805_v38 = vmul.f32 1.442695, %v1740_v1  ;;  %8012 = vpow2.f32 %v1481_v63  ;;  %v1231_v37 = vmax.f32 %v15548_v31, 0.0  ;;  %v1227_v10 = vmax.f32 %v10874_v51, 0.0 }
 0x1ac   : > { %v8001_v49 = vpop.eup %8000  ;;  %v1658_v24 = vmul.f32 0.6931472, %v7999_v40  ;;  %8014 = vpow2.f32 %v1485_v7  ;;  %v1806_v15 = vmul.f32 1.442695, %v1741_v62  ;;  %v1234_v19 = vmax.f32 %v10878_v27, 0.0 }
 0x1ad   : > { %v8003_v58 = vpop.eup %8002  ;;  %v1845_v6 = vpack.c.bf16 %v1809_v3, %v1805_v38  ;;  %v1556_v55 = vadd.f32 1.0, %v8001_v49  ;;  %8016 = vpow2.f32 %v1493_v2  ;;  %v1743_v33 = vadd.f32 %v1670_v26, %v1231_v37 }
 0x1ae   : > { %v1737_v35 = vadd.f32 %v1658_v24, %v1225_v61  ;;  %v1560_v16 = vadd.f32 1.0, %v8003_v58  ;;  %v1238_v63 = vmax.f32 %v10884_v13, 0.0  ;;  %v1236_v13 = vmax.f32 %v10899_v54, 0.0 }
 0x1af   : > { %2103 = vmatprep.subr.bf16.mxu1 %v1845_v6  ;;  %8018 = vlog2.f32 %v1556_v55  ;;  %v8005_v47 = vpop.eup %8004  ;;  %v1808_v1 = vmul.f32 1.442695, %v1743_v33  ;;  %v1237_v33 = vmax.f32 %v10921_v36, 0.0  ;;  %v1233_v54 = vmax.f32 %v10931_v25, 0.0  ;;  %v7730_v25 = vld [vmem:[%s15087_s3] sm:$0xff]  }
 0x1b0   : > { %v1802_v11 = vmul.f32 1.442695, %v1737_v35  ;;  %8020 = vlog2.f32 %v1560_v16  ;;  %v1662_v56 = vmul.f32 0.6931472, %v8005_v47  ;;  %v1240_v35 = vmax.f32 %v10902_v32, 0.0 }
 0x1b1   : > { %v8007_v46 = vpop.eup %8006  ;;  %v1235_v32 = vmax.f32 %v10933_v23, 0.0  ;;  %v15549_v23 = vmov 0  }
 0x1b2   : > { %v8009_v60 = vpop.eup %8008  ;;  %v1842_v45 = vpack.c.bf16 %v1806_v15, %v1802_v11  ;;  %v1676_v8 = vmul.f32 0.6931472, %v8007_v46  ;;  %v1739_v52 = vadd.f32 %v1662_v56, %v1227_v10 }
 0x1b3   : > { %v1557_v41 = vadd.f32 1.0, %v8009_v60 }
 0x1b4   : > { %v8011_v50 = vpop.eup %8010  ;;  %1991 = vmatpush1.bf16.msra.mxu0 %v1842_v45  ;;  %v1804_v4 = vmul.f32 1.442695, %v1739_v52  ;;  %v1746_v2 = vadd.f32 %v1676_v8, %v1234_v19 }
 0x1b5   : > { %v8013_v17 = vpop.eup %8012  ;;  %v1684_v7 = vmul.f32 0.6931472, %v8011_v50  ;;  %8022 = vlog2.f32 %v1557_v41 }
 0x1b6   : > { %v8015_v40 = vpop.eup %8014  ;;  %v1553_v51 = vadd.f32 1.0, %v8013_v17  ;;  %v1844_v3 = vpack.c.bf16 %v1808_v1, %v1804_v4  ;;  %v1811_v62 = vmul.f32 1.442695, %v1746_v2  ;;  %v1239_v1 = vmax.f32 %v10924_v34, 0.0  ;;  %v7731_v34 = vld [vmem:[%s15087_s3 + $0x8] sm:$0xff]  }
 0x1b7   : > { %v8017_v38 = vpop.eup %8016  ;;  %v1750_v61 = vadd.f32 %v1684_v7, %v1238_v63  ;;  %v1555_v49 = vadd.f32 1.0, %v8015_v40 }
 0x1b8   : > { %8024 = vlog2.f32 %v1553_v51  ;;  %v1559_v24 = vadd.f32 1.0, %v8017_v38  ;;  %2104 = vmatpush1.bf16.msra.mxu1 %v1844_v3  ;;  %v7732_v38 = vld [vmem:[%s15087_s3 + $0x10] sm:$0xff]   ;;  %v7733_v3 = vld [vmem:[%s15087_s3 + $0x18] sm:$0xff]  }
 0x1b9   : > { %v8019_v27 = vpop.eup %8018  ;;  %v1815_v26 = vmul.f32 1.442695, %v1750_v61  ;;  %8026 = vlog2.f32 %v1555_v49  ;;  %v7734_v61 = vld [vmem:[%s15087_s3 + $0x20] sm:$0xff]   ;;  %v7735_v49 = vld [vmem:[%s15087_s3 + $0x28] sm:$0xff]  }
 0x1ba   : > { %v8021_v58 = vpop.eup %8020  ;;  %v1680_v6 = vmul.f32 0.6931472, %v8019_v27  ;;  %8028 = vlog2.f32 %v1559_v24  ;;  %v15550_v24 = vld [vmem:[#allocation21_spill] sm:$0xff]  ;;  %v15551_v27 = vld [vmem:[#allocation20_spill] sm:$0xff] }
 0x1bb   : > { %v1847_v55 = vpack.c.bf16 %v1815_v26, %v1811_v62  ;;  %v1688_v31 = vmul.f32 0.6931472, %v8021_v58  ;;  %v4336_v62 = vadd.f32 %v15551_v27, %v15550_v24  ;;  %v15552_v26 = vld [vmem:[#allocation24_spill] sm:$0xff]  ;;  %v15553_v58 = vld [vmem:[#allocation25_spill] sm:$0xff] }
 0x1bc   : > { %v1748_v37 = vadd.f32 %v1680_v6, %v1236_v13  ;;  %v4340_v13 = vadd.f32 %v15553_v58, %v15552_v26  ;;  %v15554_v6 = vld [vmem:[#allocation11_spill] sm:$0xff]  ;;  %v15565_v27 = vld [vmem:[#allocation85_spill] sm:$0xff] }
 0x1bd   : > { %1992 = vmatprep.subr.bf16.mxu0 %v1847_v55  ;;  %v1752_v16 = vadd.f32 %v1688_v31, %v1240_v35  ;;  %v4400_v55 = vadd.f32 %v4336_v62, %v15554_v6  ;;  %v7736_v35 = vld [vmem:[%s15087_s3 + $0x30] sm:$0xff]   ;;  %v11034_v62 = vmul.f32 1.3862944, %v15565_v27 }
 0x1be   : > { %v1813_v11 = vmul.f32 1.442695, %v1748_v37  ;;  %v15555_v31 = vld [vmem:[#allocation32_spill] sm:$0xff] }
 0x1bf   : > { %v8023_v47 = vpop.eup %8022  ;;  %v1817_v15 = vmul.f32 1.442695, %v1752_v16  ;;  %v4404_v37 = vadd.f32 %v4340_v13, %v15555_v31  ;;  %v15556_v16 = vld [vmem:[#allocation22_spill] sm:$0xff]  ;;  %15566 = vst [vmem:[#allocation101_spill] sm:$0xff] %v11034_v62 }
 0x1c0   : > { %v1682_v46 = vmul.f32 0.6931472, %v8023_v47  ;;  %v4338_v47 = vadd.f32 %v15556_v16, %v15550_v24 }
 0x1c1   : > { %v1849_v10 = vpack.c.bf16 %v1817_v15, %v1813_v11  ;;  %v10993_v11 = vmul.f32 1.3862944, %v4400_v55  ;;  %v15557_v15 = vld [vmem:[#allocation29_spill] sm:$0xff] }
 0x1c2   : > { %v8025_v56 = vpop.eup %8024  ;;  %v1749_v60 = vadd.f32 %v1682_v46, %v1237_v33  ;;  %v4342_v33 = vadd.f32 %v15557_v15, %v15552_v26  ;;  %v10998_v46 = vmul.f32 1.3862944, %v4404_v37 }
 0x1c3   : > { %v8027_v45 = vpop.eup %8026  ;;  %2105 = vmatprep.subr.bf16.mxu1 %v1849_v10  ;;  %v1674_v8 = vmul.f32 0.6931472, %v8025_v56  ;;  %v4402_v56 = vadd.f32 %v4338_v47, %v15554_v6 }
 0x1c4   : > { %v8029_v52 = vpop.eup %8028  ;;  %v1678_v19 = vmul.f32 0.6931472, %v8027_v45  ;;  %v1814_v50 = vmul.f32 1.442695, %v1749_v60  ;;  %v4406_v10 = vadd.f32 %v4342_v33, %v15555_v31  ;;  %v15558_v60 = vld [vmem:[#allocation68_spill] sm:$0xff] }
 0x1c5   : > { %v1745_v41 = vadd.f32 %v1674_v8, %v1233_v54  ;;  %v1686_v63 = vmul.f32 0.6931472, %v8029_v52  ;;  %v11003_v45 = vmul.f32 1.3862944, %v15558_v60  ;;  %v4592_v54 = vand.u32 2147483647, %v10993_v11 }
 0x1c6   : > { %v1747_v17 = vadd.f32 %v1678_v19, %v1235_v32  ;;  %v15560_v8 = vld [vmem:[#allocation69_spill] sm:$0xff]  ;;  %v15561_v32 = vld [vmem:[#allocation70_spill] sm:$0xff]  ;;  %v15571_v60 = vld [vmem:[#allocation88_spill] sm:$0xff] }
 0x1c7   : > { %v1810_v36 = vmul.f32 1.442695, %v1745_v41  ;;  %v1751_v4 = vadd.f32 %v1686_v63, %v1239_v1  ;;  %15559 = vst [vmem:[#allocation36_spill] sm:$0xff] %v11003_v45  ;;  %v11008_v52 = vmul.f32 1.3862944, %v15560_v8  ;;  %v7737_v41 = vld [vmem:[%s15087_s3 + $0x38] sm:$0xff]  }
 0x1c8   : > { %v1812_v2 = vmul.f32 1.442695, %v1747_v17  ;;  %v11011_v19 = vmul.f32 1.3862944, %v15561_v32  ;;  %v4596_v63 = vand.u32 2147483647, %v10998_v46 }
 0x1c9   : > { %v1846_v7 = vpack.c.bf16 %v1814_v50, %v1810_v36  ;;  %v1816_v40 = vmul.f32 1.442695, %v1751_v4  ;;  %v15563_v50 = vld [vmem:[#allocation71_spill] sm:$0xff]  ;;  %v11020_v17 = vmul.f32 1.3862944, %v4406_v10  ;;  %v15573_v32 = vld [vmem:[#allocation28_spill] sm:$0xff] }
 0x1ca   : > { %15562 = vst [vmem:[#allocation104_spill] sm:$0xff] %v11011_v19  ;;  %v11017_v1 = vmul.f32 1.3862944, %v15563_v50  ;;  %v11022_v36 = vmul.f32 1.3862944, %v4402_v56  ;;  %v15569_v10 = vld [vmem:[#allocation87_spill] sm:$0xff] }
 0x1cb   : > { %1993 = vmatpush1.bf16.msra.mxu0 %v1846_v7  ;;  %v1848_v51 = vpack.c.bf16 %v1816_v40, %v1812_v2  ;;  %v4627_v4 = vand.u32 2147483647, %v11003_v45  ;;  %v4656_v7 = vsub.f32 0.0, %v4592_v54  ;;  %v4628_v2 = vand.u32 2147483647, %v11008_v52 }
 0x1cc   : > { %v4629_v40 = vand.u32 2147483647, %v11011_v19  ;;  %v11042_v56 = vmul.f32 1.3862944, %v15569_v10  ;;  %v11045_v54 = vmul.f32 1.3862944, %v15571_v60 }
 0x1cd   : > { %2106 = vmatpush1.bf16.msra.mxu1 %v1848_v51  ;;  %v4660_v51 = vsub.f32 0.0, %v4596_v63  ;;  %v4721_v58 = vmul.f32 1.442695, %v4656_v7  ;;  %v4692_v13 = vsub.f32 0.0, %v4628_v2  ;;  %v4635_v63 = vand.u32 2147483647, %v11034_v62 }
 0x1ce   : > { %2011 = vmatmul.mubr.bf16.vlgmr.msra.gmra.mrb[0].mxu0 %v7730_v25  ;;  %v4693_v55 = vsub.f32 0.0, %v4629_v40  ;;  %15570 = vst [vmem:[#allocation91_spill] sm:$0xff] %v11042_v56  ;;  %15572 = vst [vmem:[#allocation35_spill] sm:$0xff] %v11045_v54  ;;  %v15575_v7 = vld [vmem:[#allocation77_spill] sm:$0xff] }
 0x1cf   : > { %2020 = vmatprep.mubr.bf16.mxu0 %v15549_v23  ;;  %v4729_v47 = vmul.f32 1.442695, %v4660_v51  ;;  %8030 = vpow2.f32 %v4721_v58  ;;  %v4793_v40 = vmul.f32 1.442695, %v4692_v13  ;;  %v4699_v58 = vsub.f32 0.0, %v4635_v63 }
 0x1d0   : > { %2124 = vmatmul.mubr.bf16.vlgmr.msra.gmra.mrb[0].mxu1 %v7730_v25  ;;  %v4630_v25 = vand.u32 2147483647, %v11017_v1 }
 0x1d1   : > { %2133 = vmatprep.mubr.bf16.mxu1 %v15549_v23  ;;  %8032 = vpow2.f32 %v4729_v47 }
 0x1d2   : > { %v4694_v16 = vsub.f32 0.0, %v4630_v25  ;;  %v4795_v25 = vmul.f32 1.442695, %v4693_v55  ;;  %v15578_v55 = vld [vmem:[#allocation30_spill] sm:$0xff] }
 0x1d4   : > { %v4797_v60 = vmul.f32 1.442695, %v4694_v16 }
 0x1d6   : > { %2021 = vmatmul.mubr.bf16.gmra.mrb[4].mxu0 %v7731_v34 }
 0x1d7   : > { %2030 = vmatprep.mubr.bf16.mxu0 %v15549_v23 }
 0x1d8   : > { %2134 = vmatmul.mubr.bf16.gmra.mrb[4].mxu1 %v7731_v34  ;;  %v4598_v34 = vand.u32 2147483647, %v11020_v17 }
 0x1d9   : > { %2143 = vmatprep.mubr.bf16.mxu1 %v15549_v23 }
 0x1da   : > { %v4662_v15 = vsub.f32 0.0, %v4598_v34 }
 0x1de   : > { %2031 = vmatmul.mubr.bf16.gmra.mrb[8].mxu0 %v7732_v38 }
 0x1df   : > { %2040 = vmatprep.mubr.bf16.mxu0 %v15549_v23 }
 0x1e0   : > { %2144 = vmatmul.mubr.bf16.gmra.mrb[8].mxu1 %v7732_v38  ;;  %v15564_v38 = vld [vmem:[#allocation23_spill] sm:$0xff] }
 0x1e1   : > { %2153 = vmatprep.mubr.bf16.mxu1 %v15549_v23 }
 0x1e6   : > { %2041 = vmatmul.mubr.bf16.gmra.mrb[12].mxu0 %v7733_v3 }
 0x1e7   : > { %2050 = vmatprep.mubr.bf16.mxu0 %v15549_v23 }
 0x1e8   : > { %2154 = vmatmul.mubr.bf16.gmra.mrb[12].mxu1 %v7733_v3  ;;  %v4335_v3 = vadd.f32 %v15564_v38, %v15550_v24  ;;  %v15576_v38 = vld [vmem:[#allocation78_spill] sm:$0xff] }
 0x1e9   : > { %2163 = vmatprep.mubr.bf16.mxu1 %v15549_v23 }
 0x1ea   : > { %v4399_v33 = vadd.f32 %v4335_v3, %v15554_v6 }
 0x1ec   : > { %v11056_v27 = vmul.f32 1.3862944, %v4399_v33 }
 0x1ee   : > { %2051 = vmatmul.mubr.bf16.gmra.mrb[16].mxu0 %v7734_v61  ;;  %v4591_v16 = vand.u32 2147483647, %v11056_v27 }
 0x1ef   : > { %2060 = vmatprep.mubr.bf16.mxu0 %v15549_v23 }
 0x1f0   : > { %2164 = vmatmul.mubr.bf16.gmra.mrb[16].mxu1 %v7734_v61  ;;  %v4594_v61 = vand.u32 2147483647, %v11022_v36 }
 0x1f1   : > { %2173 = vmatprep.mubr.bf16.mxu1 %v15549_v23 }
 0x1f2   : > { %v4658_v8 = vsub.f32 0.0, %v4594_v61  ;;  %v4733_v61 = vmul.f32 1.442695, %v4662_v15  ;;  %v15580_v15 = vld [vmem:[#allocation31_spill] sm:$0xff] }
 0x1f3   : > { %v4341_v33 = vadd.f32 %v15580_v15, %v15552_v26 }
 0x1f4   : > { %v4725_v10 = vmul.f32 1.442695, %v4658_v8 }
 0x1f6   : > { %2061 = vmatmul.mubr.bf16.gmra.mrb[20].mxu0 %v7735_v49 }
 0x1f7   : > { %2070 = vmatprep.mubr.bf16.mxu0 %v15549_v23 }
 0x1f8   : > { %2174 = vmatmul.mubr.bf16.gmra.mrb[20].mxu1 %v7735_v49  ;;  %v4691_v49 = vsub.f32 0.0, %v4627_v4  ;;  %v15574_v4 = vld [vmem:[#allocation34_spill] sm:$0xff] }
 0x1f9   : > { %2183 = vmatprep.mubr.bf16.mxu1 %v15549_v23  ;;  %v4451_v2 = vadd.f32 %v15575_v7, %v15574_v4  ;;  %v4452_v3 = vadd.f32 %v15576_v38, %v15574_v4 }
 0x1fa   : > { %v4791_v50 = vmul.f32 1.442695, %v4691_v49  ;;  %v4637_v49 = vand.u32 2147483647, %v11042_v56 }
 0x1fb   : > { %v11060_v13 = vmul.f32 1.3862944, %v4451_v2  ;;  %v15582_v2 = vld [vmem:[#allocation81_spill] sm:$0xff] }
 0x1fc   : > { %8034 = vpow2.f32 %v4791_v50  ;;  %v4701_v8 = vsub.f32 0.0, %v4637_v49  ;;  %v4807_v50 = vmul.f32 1.442695, %v4699_v58  ;;  %v4655_v58 = vsub.f32 0.0, %v4591_v16  ;;  %v15589_v16 = vld [vmem:[#allocation58_spill] sm:$0xff] }
 0x1fd   : > { %15577 = vst [vmem:[#allocation90_spill] sm:$0xff] %v11060_v13  ;;  %8036 = vpow2.f32 %v4733_v61  ;;  %v15585_v61 = vld [vmem:[#allocation37_spill] sm:$0xff] }
 0x1fe   : > { %2071 = vmatmul.mubr.bf16.gmra.mrb[24].mxu0 %v7736_v35  ;;  %8038 = vpow2.f32 %v4725_v10 }
 0x1ff   : > { %2080 = vmatprep.mubr.bf16.mxu0 %v15549_v23  ;;  %8040 = vpow2.f32 %v4793_v40 }
 0x200   : > { %2184 = vmatmul.mubr.bf16.gmra.mrb[24].mxu1 %v7736_v35  ;;  %v15567_v35 = vld [vmem:[#allocation86_spill] sm:$0xff]  ;;  %8042 = vpow2.f32 %v4795_v25 }
 0x201   : > { %2193 = vmatprep.mubr.bf16.mxu1 %v15549_v23  ;;  %v11038_v37 = vmul.f32 1.3862944, %v15567_v35  ;;  %v4638_v35 = vand.u32 2147483647, %v11045_v54  ;;  %8044 = vpow2.f32 %v4797_v60 }
 0x202   : > { %8046 = vpow2.f32 %v4807_v50  ;;  %v15590_v50 = vld [vmem:[#allocation47_spill] sm:$0xff] }
 0x203   : > { %15568 = vst [vmem:[#allocation103_spill] sm:$0xff] %v11038_v37  ;;  %v4636_v51 = vand.u32 2147483647, %v11038_v37  ;;  %v4702_v63 = vsub.f32 0.0, %v4638_v35  ;;  %v8031_v35 = vpop.eup %8030 }
 0x205   : > { %v4700_v38 = vsub.f32 0.0, %v4636_v51  ;;  %v4813_v15 = vmul.f32 1.442695, %v4702_v63  ;;  %v4719_v63 = vmul.f32 1.442695, %v4655_v58 }
 0x206   : > { %2081 = vmatmul.mubr.bf16.gmra.mrb[28].mxu0 %v7737_v41 }
 0x207   : > { %3100 = vmatprep.mubr.bf16.mxu0 %v15549_v23  ;;  %v4809_v10 = vmul.f32 1.442695, %v4700_v38  ;;  %v15587_v38 = vld [vmem:[#allocation27_spill] sm:$0xff] }
 0x208   : > { %2194 = vmatmul.mubr.bf16.gmra.mrb[28].mxu1 %v7737_v41  ;;  %v4339_v41 = vadd.f32 %v15573_v32, %v15552_v26  ;;  %v4337_v32 = vadd.f32 %v15578_v55, %v15550_v24  ;;  %v4405_v24 = vadd.f32 %v4341_v33, %v15555_v31  ;;  %v4454_v55 = vadd.f32 %v15582_v2, %v15574_v4 }
 0x209   : > { %3213 = vmatprep.mubr.bf16.mxu1 %v15549_v23  ;;  %v11070_v23 = vmul.f32 1.3862944, %v4452_v3  ;;  %v15584_v3 = vld [vmem:[#allocation26_spill] sm:$0xff]  ;;  %8048 = vpow2.f32 %v4809_v10 }
 0x20a   : > { %v4403_v34 = vadd.f32 %v4339_v41, %v15555_v31  ;;  %v15579_v41 = vld [vmem:[#allocation80_spill] sm:$0xff]  ;;  %v4344_v49 = vadd.f32 %v15585_v61, %v15584_v3  ;;  %v11084_v33 = vmul.f32 1.3862944, %v4405_v24  ;;  %v11086_v40 = vmul.f32 1.3862944, %v4454_v55 }
 0x20b   : > { %v4453_v7 = vadd.f32 %v15579_v41, %v15574_v4  ;;  %15581 = vst [vmem:[#allocation21_spill] sm:$0xff] %v11070_v23  ;;  %v4401_v41 = vadd.f32 %v4337_v32, %v15554_v6  ;;  %v4644_v31 = vand.u32 2147483647, %v11070_v23  ;;  %v4811_v4 = vmul.f32 1.442695, %v4701_v8  ;;  %v8033_v6 = vpop.eup %8032  ;;  %v15588_v23 = vld [vmem:[#allocation7_spill] sm:$0xff] }
 0x20c   : > { %v11066_v47 = vmul.f32 1.3862944, %v4403_v34  ;;  %v4643_v34 = vand.u32 2147483647, %v11060_v13  ;;  %15586 = vst [vmem:[#allocation24_spill] sm:$0xff] %v11086_v40  ;;  %v4848_v61 = vadd.f32 1.0, %v8031_v35  ;;  %v4408_v13 = vadd.f32 %v4344_v49, %v15587_v38  ;;  %v11096_v24 = vpop.eup %8034 }
 0x20d   : > { %v11078_v26 = vmul.f32 1.3862944, %v4453_v7  ;;  %v11088_v7 = vmul.f32 1.3862944, %v4401_v41  ;;  %v11094_v60 = vadd.f32 %v15589_v16, %v15588_v23  ;;  %v4708_v8 = vsub.f32 0.0, %v4644_v31  ;;  %v8037_v35 = vpop.eup %8036 }
 0x20e   : > { %v4595_v51 = vand.u32 2147483647, %v11066_v47  ;;  %v4707_v32 = vsub.f32 0.0, %v4643_v34  ;;  %v4348_v55 = vadd.f32 %v15590_v50, %v15588_v23  ;;  %8050 = vpow2.f32 %v4811_v4  ;;  %v15591_v50 = vld [vmem:[#allocation42_spill] sm:$0xff] }
 0x20f   : > { %15583 = vst [vmem:[#allocation20_spill] sm:$0xff] %v11078_v26  ;;  %v4645_v2 = vand.u32 2147483647, %v11078_v26  ;;  %v4852_v34 = vadd.f32 1.0, %v8033_v6  ;;  %v4597_v41 = vand.u32 2147483647, %v11084_v33  ;;  %8052 = vpow2.f32 %v4813_v15  ;;  %v8039_v26 = vpop.eup %8038 }
 0x210   : > { %v4659_v25 = vsub.f32 0.0, %v4595_v51  ;;  %v4646_v51 = vand.u32 2147483647, %v11086_v40  ;;  %v4823_v49 = vmul.f32 1.442695, %v4707_v32  ;;  %8054 = vlog2.f32 %v4848_v61  ;;  %v15592_v6 = vld [vmem:[#allocation46_spill] sm:$0xff]  ;;  %v11108_v57 = vpop.eup %8040 }
 0x211   : > { %v4593_v16 = vand.u32 2147483647, %v11088_v7  ;;  %v4709_v10 = vsub.f32 0.0, %v4645_v2  ;;  %v11103_v58 = vmul.f32 1.3862944, %v4408_v13  ;;  %8056 = vpow2.f32 %v4719_v63  ;;  %v15593_v15 = vld [vmem:[#allocation64_spill] sm:$0xff]  ;;  %v11114_v61 = vpop.eup %8042 }
 0x212   : > { %v4727_v31 = vmul.f32 1.442695, %v4659_v25  ;;  %v4825_v56 = vmul.f32 1.442695, %v4708_v8  ;;  %v4412_v4 = vadd.f32 %v4348_v55, %v15591_v50  ;;  %v4346_v28 = vadd.f32 %v15592_v6, %v15584_v3  ;;  %v15594_v13 = vld [vmem:[#allocation59_spill] sm:$0xff]  ;;  %v11118_v55 = vpop.eup %8044 }
 0x213   : > { %v11112_v32 = vadd.f32 %v15593_v15, %v15588_v23  ;;  %8058 = vlog2.f32 %v4852_v34  ;;  %v4854_v40 = vadd.f32 1.0, %v8037_v35  ;;  %v4661_v2 = vsub.f32 0.0, %v4597_v41  ;;  %v11121_v15 = vpop.eup %8046  ;;  %v15596_v35 = vld [vmem:[#allocation44_spill] sm:$0xff] }
 0x214   : > { %v4350_v25 = vadd.f32 %v15594_v13, %v15588_v23  ;;  %8060 = vpow2.f32 %v4823_v49  ;;  %v4850_v8 = vadd.f32 1.0, %v8039_v26  ;;  %v4657_v63 = vsub.f32 0.0, %v4593_v16  ;;  %15595 = vst [vmem:[#allocation25_spill] sm:$0xff] %v11121_v15  ;;  %v15597_v49 = vld [vmem:[#allocation19_spill] sm:$0xff]  ;;  %v15598_v26 = vld [vmem:[#allocation82_spill] sm:$0xff] }
 0x215   : > { %v4710_v6 = vsub.f32 0.0, %v4646_v51  ;;  %v4827_v14 = vmul.f32 1.442695, %v4709_v10  ;;  %8062 = vpow2.f32 %v4727_v31  ;;  %v4600_v62 = vand.u32 2147483647, %v11103_v58  ;;  %v11133_v31 = vpop.eup %8048  ;;  %v15600_v13 = vld [vmem:[#allocation83_spill] sm:$0xff] }
 0x216   : > { %8064 = vpow2.f32 %v4825_v56  ;;  %v11123_v34 = vmul.f32 1.3862944, %v4412_v4  ;;  %v4410_v41 = vadd.f32 %v4346_v28, %v15587_v38  ;;  %v4343_v23 = vadd.f32 %v15596_v35, %v15584_v3  ;;  %15599 = vst [vmem:[#allocation11_spill] sm:$0xff] %v11133_v31  ;;  %v15601_v4 = vld [vmem:[#allocation84_spill] sm:$0xff] }
 0x217   : > { %v11130_v16 = vadd.f32 %v15598_v26, %v15597_v49  ;;  %8066 = vlog2.f32 %v4854_v40  ;;  %v4731_v51 = vmul.f32 1.442695, %v4661_v2  ;;  %v4414_v10 = vadd.f32 %v4350_v25, %v15591_v50  ;;  %v15603_v26 = vld [vmem:[#allocation89_spill] sm:$0xff] }
 0x218   : > { %v11137_v56 = vadd.f32 %v15600_v13, %v15597_v49  ;;  %v11141_v28 = vadd.f32 %v15601_v4, %v15597_v49  ;;  %8068 = vlog2.f32 %v4850_v8  ;;  %v4723_v35 = vmul.f32 1.442695, %v4657_v63  ;;  %v11143_v30 = vpop.eup %8050 }
 0x219   : > { %15602 = vst [vmem:[#allocation32_spill] sm:$0xff] %v11143_v30  ;;  %v11147_v40 = vadd.f32 %v15603_v26, %v15597_v49  ;;  %8070 = vpow2.f32 %v4827_v14  ;;  %v4829_v2 = vmul.f32 1.442695, %v4710_v6  ;;  %v4664_v25 = vsub.f32 0.0, %v4600_v62  ;;  %v11149_v42 = vpop.eup %8052  ;;  %v15605_v14 = vld [vmem:[#allocation45_spill] sm:$0xff] }
 0x21a   : > { %15604 = vst [vmem:[#allocation22_spill] sm:$0xff] %v11149_v42  ;;  %v4528_v13 = vmax.f32 %v10993_v11, 0.0  ;;  %v4604_v39 = vand.u32 2147483647, %v11123_v34  ;;  %v11153_v59 = vmul.f32 1.3862944, %v4410_v41  ;;  %v4407_v8 = vadd.f32 %v4343_v23, %v15587_v38  ;;  %v8055_v63 = vpop.eup %8054 }
 0x21b   : > { %v4532_v4 = vmax.f32 %v10998_v46, 0.0  ;;  %8072 = vpow2.f32 %v4731_v51  ;;  %v11157_v53 = vmul.f32 1.3862944, %v4414_v10  ;;  %v4345_v6 = vadd.f32 %v15605_v14, %v15584_v3  ;;  %v8057_v62 = vpop.eup %8056  ;;  %v15610_v3 = vld [vmem:[#allocation49_spill] sm:$0xff] }
 0x21c   : > { %v4534_v11 = vmax.f32 %v11020_v17, 0.0  ;;  %8074 = vpow2.f32 %v4723_v35  ;;  %v4411_v41 = vadd.f32 %v11094_v60, %v15591_v50  ;;  %v4737_v10 = vmul.f32 1.442695, %v4664_v25 }
 0x21d   : > { %v8059_v26 = vpop.eup %8058  ;;  %v4668_v14 = vsub.f32 0.0, %v4604_v39  ;;  %v4602_v49 = vand.u32 2147483647, %v11153_v59  ;;  %v11172_v17 = vmul.f32 1.3862944, %v4407_v8  ;;  %v4847_v15 = vadd.f32 1.0, %v8057_v62 }
 0x21e   : > { %v11168_v30 = vpop.eup %8060  ;;  %v4606_v23 = vand.u32 2147483647, %v11157_v53  ;;  %v4409_v46 = vadd.f32 %v4345_v6, %v15587_v38  ;;  %8076 = vpow2.f32 %v4829_v2  ;;  %v4914_v25 = vmul.f32 0.6931472, %v8055_v63 }
 0x21f   : > { %15606 = vst [vmem:[#allocation29_spill] sm:$0xff] %v11168_v30  ;;  %v8063_v35 = vpop.eup %8062  ;;  %v4922_v51 = vmul.f32 0.6931472, %v8059_v26  ;;  %v11179_v30 = vmul.f32 1.3862944, %v4411_v41  ;;  %8078 = vpow2.f32 %v4737_v10  ;;  %v4413_v62 = vadd.f32 %v11112_v32, %v15591_v50  ;;  %v15609_v26 = vld [vmem:[#allocation17_spill] sm:$0xff] }
 0x220   : > { %v11177_v42 = vpop.eup %8064  ;;  %v4851_v54 = vadd.f32 1.0, %v8063_v35  ;;  %v4745_v21 = vmul.f32 1.442695, %v4668_v14  ;;  %v4666_v38 = vsub.f32 0.0, %v4602_v49  ;;  %v4599_v6 = vand.u32 2147483647, %v11172_v17 }
 0x221   : > { %15607 = vst [vmem:[#allocation68_spill] sm:$0xff] %v11177_v42  ;;  %v8067_v39 = vpop.eup %8066  ;;  %8080 = vlog2.f32 %v4847_v15  ;;  %v4670_v63 = vsub.f32 0.0, %v4606_v23  ;;  %v11188_v41 = vmul.f32 1.3862944, %v4409_v46  ;;  %v4352_v10 = vadd.f32 %v15610_v3, %v15609_v26 }
 0x222   : > { %v8069_v60 = vpop.eup %8068  ;;  %v5040_v42 = vadd.f32 %v4914_v25, %v4528_v13  ;;  %v5044_v8 = vadd.f32 %v4922_v51, %v4532_v4  ;;  %v4926_v44 = vmul.f32 0.6931472, %v8067_v39  ;;  %v4603_v50 = vand.u32 2147483647, %v11179_v30  ;;  %v15613_v51 = vld [vmem:[#allocation51_spill] sm:$0xff] }
 0x223   : > { %v11186_v2 = vpop.eup %8070  ;;  %v4918_v35 = vmul.f32 0.6931472, %v8069_v60  ;;  %v11194_v14 = vmul.f32 1.3862944, %v4413_v62  ;;  %8082 = vlog2.f32 %v4851_v54  ;;  %v4741_v23 = vmul.f32 1.442695, %v4666_v38 }
 0x224   : > { %15608 = vst [vmem:[#allocation69_spill] sm:$0xff] %v11186_v2  ;;  %v4416_v2 = vadd.f32 %v4352_v10, %v15611_v5  ;;  %v4663_v46 = vsub.f32 0.0, %v4599_v6  ;;  %v4420_v3 = vadd.f32 %v11137_v56, %v15612_v22  ;;  %8084 = vpow2.f32 %v4745_v21 }
 0x225   : > { %v8073_v32 = vpop.eup %8072  ;;  %v4749_v13 = vmul.f32 1.442695, %v4670_v63  ;;  %v4601_v4 = vand.u32 2147483647, %v11188_v41  ;;  %v4354_v60 = vadd.f32 %v15613_v51, %v15609_v26  ;;  %v11202_v25 = vmul.f32 1.442695, %v5040_v42 }
 0x226   : > { %v8075_v15 = vpop.eup %8074  ;;  %v5046_v39 = vadd.f32 %v4926_v44, %v4534_v11  ;;  %v4853_v62 = vadd.f32 1.0, %v8073_v32  ;;  %v4667_v49 = vsub.f32 0.0, %v4603_v50  ;;  %v4605_v54 = vand.u32 2147483647, %v11194_v14 }
 0x227   : > { %15614 = vst [vmem:[#allocation70_spill] sm:$0xff] %v11202_v25  ;;  %v4849_v10 = vadd.f32 1.0, %v8075_v15  ;;  %v11205_v38 = vmul.f32 1.3862944, %v4416_v2  ;;  %v4418_v6 = vadd.f32 %v4354_v60, %v15611_v5  ;;  %8086 = vpow2.f32 %v4741_v23  ;;  %v15619_v23 = vld [vmem:[#allocation48_spill] sm:$0xff] }
 0x228   : > { %v11208_v56 = vpop.eup %8076  ;;  %v4735_v21 = vmul.f32 1.442695, %v4663_v46  ;;  %v11210_v63 = vmul.f32 1.3862944, %v4420_v3  ;;  %v4422_v42 = vadd.f32 %v11147_v40, %v15612_v22  ;;  %v11214_v44 = vmul.f32 1.442695, %v5044_v8 }
 0x229   : > { %15615 = vst [vmem:[#allocation71_spill] sm:$0xff] %v11208_v56  ;;  %v8079_v51 = vpop.eup %8078  ;;  %v15617_v11 = vmax.f32 %v11022_v36, 0.0  ;;  %8088 = vpow2.f32 %v4749_v13  ;;  %v4665_v2 = vsub.f32 0.0, %v4601_v4  ;;  %v11218_v32 = vmul.f32 1.442695, %v5046_v39 }
 0x22a   : > { %15616 = vst [vmem:[#allocation23_spill] sm:$0xff] %v11214_v44  ;;  %8090 = vlog2.f32 %v4853_v62  ;;  %v4743_v15 = vmul.f32 1.442695, %v4667_v49  ;;  %v4351_v46 = vadd.f32 %v15619_v23, %v15609_v26  ;;  %v4669_v60 = vsub.f32 0.0, %v4605_v54 }
 0x22b   : > { %v5042_v50 = vadd.f32 %v4918_v35, %v15617_v11  ;;  %15618 = vst [vmem:[#allocation85_spill] sm:$0xff] %v11218_v32  ;;  %v8081_v3 = vpop.eup %8080  ;;  %8092 = vlog2.f32 %v4849_v10  ;;  %v4608_v40 = vand.u32 2147483647, %v11205_v38  ;;  %v11223_v56 = vmul.f32 1.3862944, %v4418_v6 }
 0x22c   : > { %8094 = vpow2.f32 %v4735_v21  ;;  %v4612_v36 = vand.u32 2147483647, %v11210_v63  ;;  %v11226_v8 = vmul.f32 1.3862944, %v4422_v42  ;;  %v4415_v35 = vadd.f32 %v4351_v46, %v15611_v5 }
 0x22d   : > { %v11231_v13 = vmul.f32 1.442695, %v5042_v50  ;;  %v4739_v39 = vmul.f32 1.442695, %v4665_v2  ;;  %v8083_v62 = vpop.eup %8082  ;;  %v4912_v10 = vmul.f32 0.6931472, %v8081_v3  ;;  %8096 = vpow2.f32 %v4743_v15 }
 0x22e   : > { %v4856_v54 = vadd.f32 1.0, %v8079_v51  ;;  %v8085_v21 = vpop.eup %8084  ;;  %v4747_v11 = vmul.f32 1.442695, %v4669_v60  ;;  %v4672_v23 = vsub.f32 0.0, %v4608_v40  ;;  %v4610_v46 = vand.u32 2147483647, %v11223_v56 }
 0x22f   : > { %15620 = vst [vmem:[#allocation86_spill] sm:$0xff] %v11231_v13  ;;  %v4676_v49 = vsub.f32 0.0, %v4612_v36  ;;  %v4614_v50 = vand.u32 2147483647, %v11226_v8  ;;  %v11239_v25 = vmul.f32 1.3862944, %v4415_v35  ;;  %8098 = vpow2.f32 %v4739_v39 }
 0x230   : > { %v15621_v2 = vld [vmem:[#allocation50_spill] sm:$0xff]  ;;  %v4920_v51 = vmul.f32 0.6931472, %v8083_v62  ;;  %v4419_v15 = vadd.f32 %v11130_v16, %v15612_v22  ;;  %v15622_v60 = vmax.f32 %v11056_v27, 0.0  ;;  %v4860_v4 = vadd.f32 1.0, %v8085_v21 }
 0x231   : > { %v4353_v3 = vadd.f32 %v15621_v2, %v15609_v26  ;;  %v8087_v42 = vpop.eup %8086  ;;  %8100 = vlog2.f32 %v4856_v54  ;;  %v4753_v13 = vmul.f32 1.442695, %v4672_v23  ;;  %v4674_v32 = vsub.f32 0.0, %v4610_v46 }
 0x232   : > { %v5039_v40 = vadd.f32 %v4912_v10, %v15622_v60  ;;  %8102 = vpow2.f32 %v4747_v11  ;;  %v4421_v26 = vadd.f32 %v11141_v28, %v15612_v22  ;;  %v4761_v2 = vmul.f32 1.442695, %v4676_v49 }
 0x233   : > { %v4417_v36 = vadd.f32 %v4353_v3, %v15611_v5  ;;  %v8089_v35 = vpop.eup %8088  ;;  %v4678_v16 = vsub.f32 0.0, %v4614_v50  ;;  %v4607_v6 = vand.u32 2147483647, %v11239_v25  ;;  %v15623_v10 = vmax.f32 %v11066_v47, 0.0 }
 0x234   : > { %v8091_v62 = vpop.eup %8090  ;;  %v4858_v21 = vadd.f32 1.0, %v8087_v42  ;;  %v11256_v11 = vmul.f32 1.3862944, %v4419_v15  ;;  %v11258_v46 = vmul.f32 1.442695, %v5039_v40  ;;  %8104 = vlog2.f32 %v4860_v4 }
 0x235   : > { %v8093_v27 = vpop.eup %8092  ;;  %v5043_v54 = vadd.f32 %v4920_v51, %v15623_v10  ;;  %v4862_v22 = vadd.f32 1.0, %v8089_v35  ;;  %v11260_v28 = vmul.f32 1.3862944, %v4417_v36  ;;  %v4924_v49 = vmul.f32 0.6931472, %v8091_v62  ;;  %v15625_v51 = vld [vmem:[#allocation33_spill] sm:$0xff] }
 0x236   : > { %v8095_v23 = vpop.eup %8094  ;;  %15624 = vst [vmem:[#allocation87_spill] sm:$0xff] %v11258_v46  ;;  %8106 = vpow2.f32 %v4753_v13  ;;  %v4757_v50 = vmul.f32 1.442695, %v4674_v32  ;;  %v11262_v3 = vmul.f32 1.3862944, %v4421_v26  ;;  %v4671_v42 = vsub.f32 0.0, %v4607_v6 }
 0x237   : > { %v8097_v60 = vpop.eup %8096  ;;  %8108 = vpow2.f32 %v4761_v2  ;;  %v4765_v47 = vmul.f32 1.442695, %v4678_v16  ;;  %v15626_v10 = vld [vmem:[#allocation54_spill] sm:$0xff]  ;;  %v4916_v5 = vmul.f32 0.6931472, %v8093_v27  ;;  %v4855_v40 = vadd.f32 1.0, %v8095_v23 }
 0x238   : > { %v4360_v15 = vadd.f32 %v15626_v10, %v15625_v51  ;;  %8110 = vlog2.f32 %v4858_v21  ;;  %v4611_v4 = vand.u32 2147483647, %v11256_v11  ;;  %v11267_v35 = vmul.f32 1.442695, %v5043_v54  ;;  %v15628_v32 = vld [vmem:[#allocation67_spill] sm:$0xff]  ;;  %v15629_v2 = vld [vmem:[#allocation65_spill] sm:$0xff] }
 0x239   : > { %8112 = vlog2.f32 %v4862_v22  ;;  %v4609_v13 = vand.u32 2147483647, %v11260_v28  ;;  %v8099_v26 = vpop.eup %8098  ;;  %v4859_v62 = vadd.f32 1.0, %v8097_v60  ;;  %v4613_v6 = vand.u32 2147483647, %v11262_v3  ;;  %v15630_v16 = vld [vmem:[#allocation39_spill] sm:$0xff] }
 0x23a   : > { %15627 = vst [vmem:[#allocation88_spill] sm:$0xff] %v11267_v35  ;;  %v4424_v36 = vadd.f32 %v4360_v15, %v15628_v32  ;;  %8114 = vpow2.f32 %v4757_v50  ;;  %v4428_v10 = vadd.f32 %v15630_v16, %v15629_v2  ;;  %v15631_v21 = vmax.f32 %v11084_v33, 0.0  ;;  %v15632_v22 = vld [vmem:[#allocation56_spill] sm:$0xff] }
 0x23b   : > { %v8101_v27 = vpop.eup %8100  ;;  %8116 = vpow2.f32 %v4765_v47  ;;  %v4751_v54 = vmul.f32 1.442695, %v4671_v42  ;;  %v4362_v39 = vadd.f32 %v15632_v22, %v15625_v51  ;;  %v15633_v15 = vmax.f32 %v11088_v7, 0.0  ;;  %v15634_v42 = vld [vmem:[#allocation41_spill] sm:$0xff] }
 0x23c   : > { %v5045_v23 = vadd.f32 %v4924_v49, %v15631_v21  ;;  %v8103_v44 = vpop.eup %8102  ;;  %8118 = vlog2.f32 %v4855_v40  ;;  %v4675_v60 = vsub.f32 0.0, %v4611_v4  ;;  %v4857_v37 = vadd.f32 1.0, %v8099_v26 }
 0x23d   : > { %v5041_v18 = vadd.f32 %v4916_v5, %v15633_v15  ;;  %v4673_v0 = vsub.f32 0.0, %v4609_v13  ;;  %v11281_v16 = vmul.f32 1.3862944, %v4424_v36  ;;  %v4426_v33 = vadd.f32 %v4362_v39, %v15628_v32 }
 0x23e   : > { %8120 = vlog2.f32 %v4859_v62  ;;  %v4677_v49 = vsub.f32 0.0, %v4613_v6  ;;  %v11284_v47 = vmul.f32 1.3862944, %v4428_v10  ;;  %v4430_v21 = vadd.f32 %v15634_v42, %v15629_v2  ;;  %v8105_v22 = vpop.eup %8104  ;;  %v15637_v42 = vld [vmem:[#allocation53_spill] sm:$0xff] }
 0x23f   : > { %v11288_v7 = vmul.f32 1.442695, %v5045_v23  ;;  %v4930_v5 = vmul.f32 0.6931472, %v8101_v27  ;;  %v4861_v40 = vadd.f32 1.0, %v8103_v44  ;;  %8122 = vpow2.f32 %v4751_v54 }
 0x240   : > { %v8107_v4 = vpop.eup %8106  ;;  %v11292_v36 = vmul.f32 1.442695, %v5041_v18  ;;  %v4759_v26 = vmul.f32 1.442695, %v4675_v60  ;;  %8124 = vlog2.f32 %v4857_v37  ;;  %v4755_v6 = vmul.f32 1.442695, %v4673_v0 }
 0x241   : > { %15635 = vst [vmem:[#allocation28_spill] sm:$0xff] %v11288_v7  ;;  %v8109_v62 = vpop.eup %8108  ;;  %v4616_v10 = vand.u32 2147483647, %v11281_v16  ;;  %v11296_v15 = vmul.f32 1.3862944, %v4426_v33  ;;  %v4359_v18 = vadd.f32 %v15637_v42, %v15625_v51  ;;  %v15638_v37 = vmax.f32 %v11103_v58, 0.0 }
 0x242   : > { %15636 = vst [vmem:[#allocation34_spill] sm:$0xff] %v11292_v36  ;;  %v8111_v23 = vpop.eup %8110  ;;  %v4763_v27 = vmul.f32 1.442695, %v4677_v49  ;;  %v4620_v44 = vand.u32 2147483647, %v11284_v47  ;;  %8126 = vlog2.f32 %v4861_v40  ;;  %v4864_v39 = vadd.f32 1.0, %v8107_v4 }
 0x243   : > { %v11299_v54 = vmul.f32 1.3862944, %v4430_v21  ;;  %v8113_v13 = vpop.eup %8112  ;;  %v5048_v0 = vadd.f32 %v4930_v5, %v15638_v37  ;;  %v4868_v50 = vadd.f32 1.0, %v8109_v62  ;;  %8128 = vpow2.f32 %v4759_v26  ;;  %v15639_v5 = vld [vmem:[#allocation38_spill] sm:$0xff] }
 0x244   : > { %v8115_v33 = vpop.eup %8114  ;;  %v4423_v21 = vadd.f32 %v4359_v18, %v15628_v32  ;;  %v4938_v35 = vmul.f32 0.6931472, %v8105_v22  ;;  %8130 = vpow2.f32 %v4755_v6  ;;  %v4680_v42 = vsub.f32 0.0, %v4616_v10 }
 0x245   : > { %v8117_v46 = vpop.eup %8116  ;;  %v4618_v29 = vand.u32 2147483647, %v11296_v15  ;;  %8132 = vpow2.f32 %v4763_v27  ;;  %v4684_v60 = vsub.f32 0.0, %v4620_v44  ;;  %v4622_v58 = vand.u32 2147483647, %v11299_v54 }
 0x246   : > { %v8119_v19 = vpop.eup %8118  ;;  %v4427_v40 = vadd.f32 %v15639_v5, %v15629_v2  ;;  %v4934_v4 = vmul.f32 0.6931472, %v8111_v23  ;;  %v4942_v62 = vmul.f32 0.6931472, %v8113_v13  ;;  %8134 = vlog2.f32 %v4864_v39  ;;  %v15642_v13 = vld [vmem:[#allocation55_spill] sm:$0xff] }
 0x247   : > { %v4866_v26 = vadd.f32 1.0, %v8115_v33  ;;  %v11313_v18 = vmul.f32 1.442695, %v5048_v0  ;;  %8136 = vlog2.f32 %v4868_v50  ;;  %v4870_v22 = vadd.f32 1.0, %v8117_v46 }
 0x248   : > { %v8121_v37 = vpop.eup %8120  ;;  %v11315_v6 = vmul.f32 1.3862944, %v4423_v21  ;;  %v15641_v27 = vmax.f32 %v11123_v34, 0.0  ;;  %v4928_v49 = vmul.f32 0.6931472, %v8119_v19  ;;  %v4682_v7 = vsub.f32 0.0, %v4618_v29 }
 0x249   : > { %15640 = vst [vmem:[#allocation77_spill] sm:$0xff] %v11313_v18  ;;  %v8123_v10 = vpop.eup %8122  ;;  %v4769_v36 = vmul.f32 1.442695, %v4680_v42  ;;  %v4777_v45 = vmul.f32 1.442695, %v4684_v60  ;;  %v4686_v5 = vsub.f32 0.0, %v4622_v58  ;;  %v4361_v39 = vadd.f32 %v15642_v13, %v15625_v51 }
 0x24a   : > { %v5052_v44 = vadd.f32 %v4938_v35, %v15641_v27  ;;  %v11319_v23 = vmul.f32 1.3862944, %v4427_v40  ;;  %v8125_v0 = vpop.eup %8124  ;;  %v15643_v50 = vmax.f32 %v11153_v59, 0.0  ;;  %v15644_v33 = vmax.f32 %v11157_v53, 0.0  ;;  %v15645_v42 = vld [vmem:[#allocation40_spill] sm:$0xff] }
 0x24b   : > { %v4936_v31 = vmul.f32 0.6931472, %v8121_v37  ;;  %8138 = vlog2.f32 %v4866_v26  ;;  %v4863_v19 = vadd.f32 1.0, %v8123_v10  ;;  %v4615_v29 = vand.u32 2147483647, %v11315_v6 }
 0x24c   : > { %v5050_v46 = vadd.f32 %v4934_v4, %v15643_v50  ;;  %v5054_v21 = vadd.f32 %v4942_v62, %v15644_v33  ;;  %8140 = vlog2.f32 %v4870_v22  ;;  %v4425_v34 = vadd.f32 %v4361_v39, %v15628_v32  ;;  %v8127_v35 = vpop.eup %8126 }
 0x24d   : > { %v4543_v60 = vmax.f32 %v11239_v25, 0.0  ;;  %8142 = vpow2.f32 %v4769_v36  ;;  %v4773_v51 = vmul.f32 1.442695, %v4682_v7  ;;  %v4429_v59 = vadd.f32 %v15645_v42, %v15629_v2  ;;  %v8129_v58 = vpop.eup %8128 }
 0x24e   : > { %v15646_v53 = vmax.f32 %v11172_v17, 0.0  ;;  %8144 = vpow2.f32 %v4777_v45  ;;  %v4781_v4 = vmul.f32 1.442695, %v4686_v5  ;;  %v4619_v62 = vand.u32 2147483647, %v11319_v23  ;;  %v8131_v26 = vpop.eup %8130 }
 0x24f   : > { %v11335_v37 = vmul.f32 1.442695, %v5052_v44  ;;  %v11337_v32 = vmul.f32 1.442695, %v5050_v46  ;;  %v15649_v22 = vmax.f32 %v11179_v30, 0.0  ;;  %v4547_v7 = vmax.f32 %v11256_v11, 0.0  ;;  %v8133_v10 = vpop.eup %8132 }
 0x250   : > { %v5047_v40 = vadd.f32 %v4928_v49, %v15646_v53  ;;  %v11342_v2 = vmul.f32 1.442695, %v5054_v21  ;;  %8146 = vlog2.f32 %v4863_v19  ;;  %v4679_v17 = vsub.f32 0.0, %v4615_v29  ;;  %v8135_v45 = vpop.eup %8134 }
 0x251   : > { %15647 = vst [vmem:[#allocation78_spill] sm:$0xff] %v11335_v37  ;;  %15648 = vst [vmem:[#allocation30_spill] sm:$0xff] %v11337_v32  ;;  %v5051_v36 = vadd.f32 %v4936_v31, %v15649_v22  ;;  %v11344_v49 = vmul.f32 1.3862944, %v4425_v34  ;;  %v4940_v27 = vmul.f32 0.6931472, %v8127_v35  ;;  %8148 = vpow2.f32 %v4773_v51  ;;  %v8137_v13 = vpop.eup %8136 }
 0x252   : > { %15650 = vst [vmem:[#allocation80_spill] sm:$0xff] %v11342_v2  ;;  %v4867_v5 = vadd.f32 1.0, %v8129_v58  ;;  %v11346_v44 = vmul.f32 1.3862944, %v4429_v59  ;;  %v11348_v39 = vmul.f32 1.442695, %v5047_v40  ;;  %8150 = vpow2.f32 %v4781_v4 }
 0x253   : > { %v4865_v30 = vadd.f32 1.0, %v8131_v26  ;;  %v4683_v31 = vsub.f32 0.0, %v4619_v62  ;;  %v11350_v50 = vmul.f32 1.442695, %v5051_v36  ;;  %v4932_v46 = vmul.f32 0.6931472, %v8125_v0 }
 0x254   : > { %15651 = vst [vmem:[#allocation31_spill] sm:$0xff] %v11348_v39  ;;  %v4869_v21 = vadd.f32 1.0, %v8133_v10  ;;  %v4946_v29 = vmul.f32 0.6931472, %v8135_v45  ;;  %v4767_v34 = vmul.f32 1.442695, %v4679_v17  ;;  %8152 = vlog2.f32 %v4867_v5 }
 0x255   : > { %15652 = vst [vmem:[#allocation81_spill] sm:$0xff] %v11350_v50  ;;  %v4617_v35 = vand.u32 2147483647, %v11344_v49  ;;  %v8139_v51 = vpop.eup %8138  ;;  %v15653_v42 = vmax.f32 %v11194_v14, 0.0  ;;  %v4954_v58 = vmul.f32 0.6931472, %v8137_v13  ;;  %8154 = vlog2.f32 %v4865_v30 }
 0x256   : > { %v4621_v53 = vand.u32 2147483647, %v11346_v44  ;;  %v8141_v40 = vpop.eup %8140  ;;  %v4775_v4 = vmul.f32 1.442695, %v4683_v31  ;;  %v15654_v62 = vld [vmem:[#allocation52_spill] sm:$0xff]  ;;  %v15655_v26 = vld [vmem:[#allocation61_spill] sm:$0xff]  ;;  %8156 = vlog2.f32 %v4869_v21 }
 0x257   : > { %v5053_v59 = vadd.f32 %v4940_v27, %v15653_v42  ;;  %v4368_v22 = vadd.f32 %v15655_v26, %v15654_v62  ;;  %v8143_v36 = vpop.eup %8142  ;;  %v15656_v17 = vmax.f32 %v11188_v41, 0.0  ;;  %v15657_v5 = vmax.f32 %v11205_v38, 0.0 }
 0x258   : > { %v8145_v27 = vpop.eup %8144  ;;  %8158 = vpow2.f32 %v4767_v34  ;;  %v4681_v30 = vsub.f32 0.0, %v4617_v35  ;;  %v15659_v26 = vmax.f32 %v11210_v63, 0.0  ;;  %v4950_v19 = vmul.f32 0.6931472, %v8139_v51 }
 0x259   : > { %v5049_v45 = vadd.f32 %v4932_v46, %v15656_v17  ;;  %v5056_v13 = vadd.f32 %v4946_v29, %v15657_v5  ;;  %v4432_v31 = vadd.f32 %v4368_v22, %v10425_v12  ;;  %v11371_v42 = vmul.f32 1.442695, %v5053_v59  ;;  %v15660_v46 = vld [vmem:[#allocation63_spill] sm:$0xff] }
 0x25a   : > { %v5060_v10 = vadd.f32 %v4954_v58, %v15659_v26  ;;  %v4685_v0 = vsub.f32 0.0, %v4621_v53  ;;  %v8147_v14 = vpop.eup %8146  ;;  %v4958_v33 = vmul.f32 0.6931472, %v8141_v40  ;;  %v4872_v41 = vadd.f32 1.0, %v8143_v36 }
 0x25b   : > { %15658 = vst [vmem:[#allocation26_spill] sm:$0xff] %v11371_v42  ;;  %8160 = vpow2.f32 %v4775_v4  ;;  %v4370_v21 = vadd.f32 %v15660_v46, %v15654_v62  ;;  %v8149_v38 = vpop.eup %8148  ;;  %v11377_v29 = vmul.f32 1.442695, %v5049_v45  ;;  %v4552_v34 = vmax.f32 %v11281_v16, 0.0 }
 0x25c   : > { %v4876_v59 = vadd.f32 1.0, %v8145_v27  ;;  %v8151_v22 = vpop.eup %8150  ;;  %v11381_v63 = vmul.f32 1.442695, %v5056_v13  ;;  %v4771_v51 = vmul.f32 1.442695, %v4681_v30  ;;  %v4554_v36 = vmax.f32 %v11296_v15, 0.0 }
 0x25d   : > { %15661 = vst [vmem:[#allocation37_spill] sm:$0xff] %v11377_v29  ;;  %v11383_v58 = vmul.f32 1.3862944, %v4432_v31  ;;  %v4434_v53 = vadd.f32 %v4370_v21, %v10425_v12  ;;  %v11388_v4 = vmul.f32 1.442695, %v5060_v10  ;;  %v15665_v45 = vmax.f32 %v11223_v56, 0.0 }
 0x25e   : > { %15662 = vst [vmem:[#allocation27_spill] sm:$0xff] %v11381_v63  ;;  %v4779_v17 = vmul.f32 1.442695, %v4685_v0  ;;  %v15666_v27 = vmax.f32 %v11226_v8, 0.0  ;;  %8162 = vlog2.f32 %v4872_v41  ;;  %v4874_v30 = vadd.f32 1.0, %v8149_v38  ;;  %v8153_v31 = vpop.eup %8152  ;;  %v15667_v21 = vld [vmem:[#allocation60_spill] sm:$0xff] }
 0x25f   : > { %15663 = vst [vmem:[#allocation7_spill] sm:$0xff] %v11383_v58  ;;  %15664 = vst [vmem:[#allocation58_spill] sm:$0xff] %v11388_v4  ;;  %v5058_v5 = vadd.f32 %v4950_v19, %v15665_v45  ;;  %v4944_v26 = vmul.f32 0.6931472, %v8147_v14  ;;  %8164 = vlog2.f32 %v4876_v59  ;;  %v4878_v46 = vadd.f32 1.0, %v8151_v22  ;;  %v8155_v10 = vpop.eup %8154 }
 0x260   : > { %v5062_v13 = vadd.f32 %v4958_v33, %v15666_v27  ;;  %v4367_v40 = vadd.f32 %v15667_v21, %v15654_v62  ;;  %v4558_v35 = vmax.f32 %v11299_v54, 0.0  ;;  %8166 = vpow2.f32 %v4771_v51  ;;  %v8157_v19 = vpop.eup %8156 }
 0x261   : > { %v4624_v0 = vand.u32 2147483647, %v11383_v58  ;;  %v11399_v56 = vmul.f32 1.3862944, %v4434_v53  ;;  %8168 = vpow2.f32 %v4779_v17  ;;  %v11405_v38 = vmul.f32 1.442695, %v5058_v5 }
 0x262   : > { %v4431_v14 = vadd.f32 %v4367_v40, %v10425_v12  ;;  %v8159_v41 = vpop.eup %8158  ;;  %v11407_v59 = vmul.f32 1.442695, %v5062_v13  ;;  %v4952_v22 = vmul.f32 0.6931472, %v8153_v31  ;;  %8170 = vlog2.f32 %v4874_v30  ;;  %v15671_v5 = vld [vmem:[#allocation62_spill] sm:$0xff] }
 0x263   : > { %15668 = vst [vmem:[#allocation47_spill] sm:$0xff] %v11399_v56  ;;  %15669 = vst [vmem:[#allocation42_spill] sm:$0xff] %v11405_v38  ;;  %v5055_v51 = vadd.f32 %v4944_v26, %v4543_v60  ;;  %v4948_v53 = vmul.f32 0.6931472, %v8155_v10  ;;  %8172 = vlog2.f32 %v4878_v46  ;;  %v4884_v45 = vadd.f32 1.0, %v11108_v57 }
 0x264   : > { %15670 = vst [vmem:[#allocation46_spill] sm:$0xff] %v11407_v59  ;;  %v4688_v21 = vsub.f32 0.0, %v4624_v0  ;;  %v4626_v17 = vand.u32 2147483647, %v11399_v56  ;;  %v4886_v40 = vadd.f32 1.0, %v11118_v55  ;;  %v4369_v8 = vadd.f32 %v15671_v5, %v15654_v62 }
 0x265   : > { %v8161_v27 = vpop.eup %8160  ;;  %v4956_v13 = vmul.f32 0.6931472, %v8157_v19  ;;  %v4555_v31 = vmax.f32 %v11319_v23, 0.0  ;;  %v4871_v30 = vadd.f32 1.0, %v8159_v41  ;;  %v11417_v33 = vmul.f32 1.3862944, %v4431_v14 }
 0x266   : > { %v5059_v57 = vadd.f32 %v4952_v22, %v4547_v7  ;;  %v4553_v60 = vmax.f32 %v11344_v49, 0.0  ;;  %v4433_v26 = vadd.f32 %v4369_v8, %v10425_v12  ;;  %v11425_v55 = vmul.f32 1.442695, %v5055_v51 }
 0x267   : > { %15672 = vst [vmem:[#allocation64_spill] sm:$0xff] %v11417_v33  ;;  %v15674_v62 = vmax.f32 %v11260_v28, 0.0  ;;  %v4875_v10 = vadd.f32 1.0, %v8161_v27  ;;  %8174 = vlog2.f32 %v4884_v45  ;;  %v4785_v19 = vmul.f32 1.442695, %v4688_v21 }
 0x268   : > { %15673 = vst [vmem:[#allocation59_spill] sm:$0xff] %v11425_v55  ;;  %v8163_v0 = vpop.eup %8162  ;;  %v4690_v14 = vsub.f32 0.0, %v4626_v17  ;;  %8176 = vlog2.f32 %v4886_v40  ;;  %v4376_v41 = vadd.f32 %v15527_v20, %v15525_v9  ;;  %v15675_v7 = vmax.f32 %v11262_v3, 0.0 }
 0x269   : > { %v5057_v46 = vadd.f32 %v4948_v53, %v15674_v62  ;;  %v8165_v11 = vpop.eup %8164  ;;  %8178 = vlog2.f32 %v4871_v30  ;;  %v4557_v12 = vmax.f32 %v11346_v44, 0.0  ;;  %v4623_v8 = vand.u32 2147483647, %v11417_v33 }
 0x26a   : > { %v5061_v22 = vadd.f32 %v4956_v13, %v15675_v7  ;;  %v8167_v28 = vpop.eup %8166  ;;  %v11435_v51 = vmul.f32 1.442695, %v5059_v57  ;;  %v4883_v53 = vadd.f32 1.0, %v11096_v24  ;;  %v11438_v45 = vmul.f32 1.3862944, %v4433_v26 }
 0x26b   : > { %v4440_v27 = vadd.f32 %v4376_v41, %v10581_v43  ;;  %v8169_v21 = vpop.eup %8168  ;;  %8180 = vlog2.f32 %v4875_v10  ;;  %v4564_v20 = vmax.f32 %v11008_v52, 0.0  ;;  %v4885_v3 = vadd.f32 1.0, %v11114_v61 }
 0x26c   : > { %15676 = vst [vmem:[#allocation44_spill] sm:$0xff] %v11435_v51  ;;  %15677 = vst [vmem:[#allocation19_spill] sm:$0xff] %v11438_v45  ;;  %v4378_v17 = vadd.f32 %v15529_v48, %v15525_v9  ;;  %v8171_v40 = vpop.eup %8170  ;;  %v11447_v13 = vmul.f32 1.442695, %v5057_v46  ;;  %8182 = vpow2.f32 %v4785_v19  ;;  %v4789_v24 = vmul.f32 1.442695, %v4690_v14 }
 0x26d   : > { %v8173_v30 = vpop.eup %8172  ;;  %v11449_v57 = vmul.f32 1.442695, %v5061_v22  ;;  %v4873_v26 = vadd.f32 1.0, %v8167_v28  ;;  %v4687_v62 = vsub.f32 0.0, %v4623_v8  ;;  %v4877_v10 = vadd.f32 1.0, %v8169_v21  ;;  %v15682_v21 = vld [vmem:[#allocation11_spill] sm:$0xff] }
 0x26e   : > { %15678 = vst [vmem:[#allocation82_spill] sm:$0xff] %v11447_v13  ;;  %v4442_v52 = vadd.f32 %v4378_v17, %v10581_v43  ;;  %8184 = vlog2.f32 %v4883_v53  ;;  %v4625_v61 = vand.u32 2147483647, %v11438_v45  ;;  %v11453_v48 = vmul.f32 1.3862944, %v4440_v27  ;;  %v15685_v8 = vld [vmem:[#allocation104_spill] sm:$0xff] }
 0x26f   : > { %15679 = vst [vmem:[#allocation83_spill] sm:$0xff] %v11449_v57  ;;  %v4962_v41 = vmul.f32 0.6931472, %v8163_v0  ;;  %v4970_v7 = vmul.f32 0.6931472, %v8165_v11  ;;  %8186 = vlog2.f32 %v4885_v3  ;;  %v4566_v14 = vmax.f32 %v11017_v1, 0.0 }
 0x270   : > { %15680 = vst [vmem:[#allocation84_spill] sm:$0xff] %v11453_v48  ;;  %v4966_v25 = vmul.f32 0.6931472, %v8171_v40  ;;  %v4974_v46 = vmul.f32 0.6931472, %v8173_v30  ;;  %8188 = vpow2.f32 %v4789_v24  ;;  %v4689_v0 = vsub.f32 0.0, %v4625_v61 }
 0x271   : > { %v8175_v22 = vpop.eup %8174  ;;  %8190 = vlog2.f32 %v4873_v26  ;;  %v4783_v28 = vmul.f32 1.442695, %v4687_v62  ;;  %v11459_v53 = vmul.f32 1.3862944, %v4442_v52  ;;  %v4632_v11 = vand.u32 2147483647, %v11453_v48 }
 0x272   : > { %v8177_v27 = vpop.eup %8176  ;;  %8192 = vlog2.f32 %v4877_v10  ;;  %v4892_v3 = vadd.f32 1.0, %v15682_v21  ;;  %v5064_v1 = vadd.f32 %v4962_v41, %v4552_v34  ;;  %v15683_v40 = vmax.f32 %v11284_v47, 0.0  ;;  %v15684_v26 = vld [vmem:[#allocation36_spill] sm:$0xff] }
 0x273   : > { %15681 = vst [vmem:[#allocation89_spill] sm:$0xff] %v11459_v53  ;;  %v8179_v17 = vpop.eup %8178  ;;  %v5066_v30 = vadd.f32 %v4966_v25, %v4554_v36  ;;  %v4563_v62 = vmax.f32 %v15684_v26, 0.0  ;;  %v5070_v52 = vadd.f32 %v4974_v46, %v4558_v35  ;;  %v4986_v10 = vmul.f32 0.6931472, %v8175_v22 }
 0x274   : > { %v5068_v24 = vadd.f32 %v4970_v7, %v15683_v40  ;;  %v4565_v21 = vmax.f32 %v15685_v8, 0.0  ;;  %v4990_v19 = vmul.f32 0.6931472, %v8177_v27  ;;  %8194 = vpow2.f32 %v4783_v28  ;;  %v15689_v7 = vld [vmem:[#allocation72_spill] sm:$0xff] }
 0x275   : > { %v8181_v5 = vpop.eup %8180  ;;  %v4634_v47 = vand.u32 2147483647, %v11459_v53  ;;  %v4960_v15 = vmul.f32 0.6931472, %v8179_v17  ;;  %v4787_v36 = vmul.f32 1.442695, %v4689_v0  ;;  %8196 = vlog2.f32 %v4892_v3 }
 0x276   : > { %v8183_v34 = vpop.eup %8182  ;;  %v4696_v25 = vsub.f32 0.0, %v4632_v11  ;;  %v11476_v41 = vmul.f32 1.442695, %v5064_v1  ;;  %v11478_v54 = vmul.f32 1.442695, %v5068_v24  ;;  %v4375_v46 = vadd.f32 %v15689_v7, %v15525_v9  ;;  %v15692_v7 = vld [vmem:[#allocation74_spill] sm:$0xff] }
 0x277   : > { %v11480_v35 = vmul.f32 1.442695, %v5066_v30  ;;  %v11484_v8 = vmul.f32 1.442695, %v5070_v52  ;;  %v4968_v28 = vmul.f32 0.6931472, %v8181_v5  ;;  %v5076_v27 = vadd.f32 %v4986_v10, %v4564_v20 }
 0x278   : > { %15686 = vst [vmem:[#allocation45_spill] sm:$0xff] %v11476_v41  ;;  %15687 = vst [vmem:[#allocation17_spill] sm:$0xff] %v11478_v54  ;;  %v8185_v22 = vpop.eup %8184  ;;  %v4880_v0 = vadd.f32 1.0, %v8183_v34  ;;  %v5078_v11 = vadd.f32 %v4990_v19, %v4566_v14  ;;  %v4698_v3 = vsub.f32 0.0, %v4634_v47  ;;  %v4439_v1 = vadd.f32 %v4375_v46, %v10581_v43  ;;  %v15693_v14 = vld [vmem:[#allocation103_spill] sm:$0xff]  ;;  %v15745_v54 = vld [vmem:[#allocation29_spill] sm:$0xff] }
 0x279   : > { %15688 = vst [vmem:[#allocation49_spill] sm:$0xff] %v11480_v35  ;;  %15690 = vst [vmem:[#allocation43_spill] sm:$0xff] %v11484_v8  ;;  %v8187_v17 = vpop.eup %8186  ;;  %v15691_v30 = vmax.f32 %v11315_v6, 0.0  ;;  %8198 = vpow2.f32 %v4787_v36  ;;  %v4801_v16 = vmul.f32 1.442695, %v4696_v25  ;;  %v4377_v52 = vadd.f32 %v15692_v7, %v15525_v9  ;;  %v15718_v35 = vld [vmem:[#allocation99_spill] sm:$0xff] }
 0x27a   : > { %v8189_v24 = vpop.eup %8188  ;;  %v4984_v19 = vmul.f32 0.6931472, %v8185_v22  ;;  %v4572_v10 = vmax.f32 %v15693_v14, 0.0  ;;  %v5067_v6 = vadd.f32 %v4968_v28, %v4555_v31  ;;  %v11499_v34 = vmul.f32 1.442695, %v5076_v27  ;;  %v15698_v31 = vld [vmem:[#allocation66_spill] sm:$0xff] }
 0x27b   : > { %v5063_v26 = vadd.f32 %v4960_v15, %v15691_v30  ;;  %v8191_v61 = vpop.eup %8190  ;;  %v4988_v15 = vmul.f32 0.6931472, %v8187_v17  ;;  %v4441_v36 = vadd.f32 %v4377_v52, %v10581_v43  ;;  %8200 = vlog2.f32 %v4880_v0  ;;  %v15699_v28 = vld [vmem:[#allocation15_spill] sm:$0xff] }
 0x27c   : > { %v8193_v47 = vpop.eup %8192  ;;  %15694 = vst [vmem:[#allocation57_spill] sm:$0xff] %v11499_v34  ;;  %v11502_v9 = vmul.f32 1.442695, %v5078_v11  ;;  %v4805_v25 = vmul.f32 1.442695, %v4698_v3  ;;  %v4882_v7 = vadd.f32 1.0, %v8189_v24  ;;  %8202 = vpow2.f32 %v4801_v16 }
 0x27d   : > { %v11504_v46 = vmul.f32 1.3862944, %v4439_v1  ;;  %v11506_v30 = vmul.f32 1.442695, %v5063_v26  ;;  %v4964_v22 = vmul.f32 0.6931472, %v8191_v61  ;;  %v5075_v23 = vadd.f32 %v4984_v19, %v4563_v62 }
 0x27e   : > { %15695 = vst [vmem:[#allocation51_spill] sm:$0xff] %v11502_v9  ;;  %v8195_v14 = vpop.eup %8194  ;;  %v4972_v5 = vmul.f32 0.6931472, %v8193_v47  ;;  %v4384_v27 = vadd.f32 %v15699_v28, %v15698_v31  ;;  %v15700_v17 = vld [vmem:[#allocation95_spill] sm:$0xff]  ;;  %v5077_v11 = vadd.f32 %v4988_v15, %v4565_v21  ;;  %v11513_v1 = vmul.f32 1.3862944, %v4441_v36 }
 0x27f   : > { %15696 = vst [vmem:[#allocation48_spill] sm:$0xff] %v11504_v46  ;;  %15697 = vst [vmem:[#allocation50_spill] sm:$0xff] %v11506_v30  ;;  %v4386_v43 = vadd.f32 %v15700_v17, %v15698_v31  ;;  %v8197_v0 = vpop.eup %8196  ;;  %v15702_v26 = vld [vmem:[#allocation76_spill] sm:$0xff]  ;;  %8204 = vpow2.f32 %v4805_v25  ;;  %v4631_v16 = vand.u32 2147483647, %v11504_v46  ;;  %v15703_v24 = vld [vmem:[#allocation79_spill] sm:$0xff]  ;;  %v5065_v47 = vadd.f32 %v4964_v22, %v4553_v60 }
 0x280   : > { %15701 = vst [vmem:[#allocation33_spill] sm:$0xff] %v11513_v1  ;;  %v4383_v61 = vadd.f32 %v15702_v26, %v15698_v31  ;;  %v4448_v62 = vadd.f32 %v4384_v27, %v15703_v24  ;;  %v11520_v19 = vmul.f32 1.442695, %v5067_v6  ;;  %8206 = vlog2.f32 %v4882_v7  ;;  %v15708_v6 = vld [vmem:[#allocation22_spill] sm:$0xff] }
 0x281   : > { %v4450_v52 = vadd.f32 %v4386_v43, %v15703_v24  ;;  %v5069_v15 = vadd.f32 %v4972_v5, %v4557_v12  ;;  %v4879_v36 = vadd.f32 1.0, %v8195_v14  ;;  %v11527_v28 = vmul.f32 1.442695, %v5075_v23  ;;  %v15712_v14 = vld [vmem:[#allocation25_spill] sm:$0xff] }
 0x282   : > { %15704 = vst [vmem:[#allocation54_spill] sm:$0xff] %v11520_v19  ;;  %v4447_v21 = vadd.f32 %v4383_v61, %v15703_v24  ;;  %v5002_v25 = vmul.f32 0.6931472, %v8197_v0  ;;  %v11529_v26 = vmul.f32 1.442695, %v5077_v11  ;;  %v4894_v20 = vadd.f32 1.0, %v15708_v6 }
 0x283   : > { %15705 = vst [vmem:[#allocation67_spill] sm:$0xff] %v11527_v28  ;;  %v8199_v17 = vpop.eup %8198  ;;  %v4633_v49 = vand.u32 2147483647, %v11513_v1  ;;  %v4695_v22 = vsub.f32 0.0, %v4631_v16  ;;  %v11536_v7 = vmul.f32 1.3862944, %v4448_v62  ;;  %8208 = vlog2.f32 %v4879_v36 }
 0x284   : > { %15706 = vst [vmem:[#allocation65_spill] sm:$0xff] %v11529_v26  ;;  %v11538_v44 = vmul.f32 1.3862944, %v4450_v52  ;;  %v11540_v12 = vmul.f32 1.442695, %v5065_v47  ;;  %v4891_v23 = vadd.f32 1.0, %v15712_v14  ;;  %v5084_v3 = vadd.f32 %v5002_v25, %v4572_v10 }
 0x285   : > { %15709 = vst [vmem:[#allocation39_spill] sm:$0xff] %v11536_v7  ;;  %v11544_v0 = vmul.f32 1.3862944, %v4447_v21  ;;  %v8201_v11 = vpop.eup %8200  ;;  %v11546_v61 = vmul.f32 1.442695, %v5069_v15  ;;  %v4881_v6 = vadd.f32 1.0, %v8199_v17  ;;  %8210 = vlog2.f32 %v4894_v20 }
 0x286   : > { %15710 = vst [vmem:[#allocation56_spill] sm:$0xff] %v11538_v44  ;;  %15711 = vst [vmem:[#allocation41_spill] sm:$0xff] %v11540_v12  ;;  %v8203_v60 = vpop.eup %8202  ;;  %v4697_v16 = vsub.f32 0.0, %v4633_v49  ;;  %v15715_v62 = vld [vmem:[#allocation32_spill] sm:$0xff]  ;;  %v15716_v47 = vld [vmem:[#allocation93_spill] sm:$0xff]  ;;  %8212 = vlog2.f32 %v4891_v23  ;;  %v4899_v29 = vadd.f32 1.0, %v15745_v54 }
 0x287   : > { %15713 = vst [vmem:[#allocation53_spill] sm:$0xff] %v11544_v0  ;;  %15714 = vst [vmem:[#allocation38_spill] sm:$0xff] %v11546_v61  ;;  %v4893_v52 = vadd.f32 1.0, %v15715_v62  ;;  %v4385_v43 = vadd.f32 %v15716_v47, %v15698_v31  ;;  %v4799_v40 = vmul.f32 1.442695, %v4695_v22  ;;  %v15717_v14 = vld [vmem:[#allocation92_spill] sm:$0xff]  ;;  %8214 = vlog2.f32 %v4881_v6 }
 0x288   : > { %v4640_v5 = vand.u32 2147483647, %v11536_v7  ;;  %v4642_v21 = vand.u32 2147483647, %v11538_v44  ;;  %v4392_v15 = vadd.f32 %v15718_v35, %v15717_v14  ;;  %v15719_v36 = vld [vmem:[#allocation68_spill] sm:$0xff]  ;;  %v4888_v49 = vadd.f32 1.0, %v8203_v60 }
 0x289   : > { %v4900_v17 = vadd.f32 1.0, %v15719_v36  ;;  %v4639_v10 = vand.u32 2147483647, %v11544_v0  ;;  %v4449_v20 = vadd.f32 %v4385_v43, %v15703_v24  ;;  %v8205_v25 = vpop.eup %8204  ;;  %v15720_v62 = vld [vmem:[#allocation73_spill] sm:$0xff]  ;;  %v15721_v22 = vld [vmem:[#allocation75_spill] sm:$0xff]  ;;  %v15722_v47 = vld [vmem:[#allocation96_spill] sm:$0xff]  ;;  %8216 = vlog2.f32 %v4893_v52 }
 0x28a   : > { %v4456_v31 = vadd.f32 %v4392_v15, %v15720_v62  ;;  %v4460_v8 = vadd.f32 %v15722_v47, %v15721_v22  ;;  %v11561_v13 = vpop.eup %8206  ;;  %v4803_v36 = vmul.f32 1.442695, %v4697_v16  ;;  %v11566_v30 = vmul.f32 0.6931472, %v8201_v11  ;;  %v15730_v11 = vld [vmem:[#allocation71_spill] sm:$0xff] }
 0x28b   : > { %15723 = vst [vmem:[#allocation55_spill] sm:$0xff] %v11561_v13  ;;  %8218 = vpow2.f32 %v4799_v40  ;;  %v4704_v24 = vsub.f32 0.0, %v4640_v5  ;;  %v4706_v43 = vsub.f32 0.0, %v4642_v21  ;;  %v4890_v60 = vadd.f32 1.0, %v8205_v25  ;;  %v15731_v40 = vld [vmem:[#allocation98_spill] sm:$0xff] }
 0x28c   : > { %15725 = vst [vmem:[#allocation40_spill] sm:$0xff] %v11566_v30  ;;  %8220 = vlog2.f32 %v4900_v17  ;;  %v4703_v6 = vsub.f32 0.0, %v4639_v10  ;;  %v11568_v15 = vmul.f32 1.3862944, %v4449_v20  ;;  %v11570_v47 = vmul.f32 1.442695, %v5084_v3  ;;  %v11582_v17 = vpop.permute.xlu0 %1852 }
 0x28d   : > { %8222 = vlog2.f32 %v4888_v49  ;;  %v11572_v19 = vmul.f32 1.3862944, %v4456_v31  ;;  %v11574_v35 = vmul.f32 1.3862944, %v4460_v8  ;;  %v4902_v52 = vadd.f32 1.0, %v15730_v11  ;;  %v11580_v21 = vpop.eup %8208  ;;  %15733 = vst [vmem:[#allocation11_spill] sm:$0xff] %v11582_v17  ;;  %v11592_v11 = vpop.permute.xlu1 %1857 }
 0x28e   : > { %15726 = vst [vmem:[#allocation52_spill] sm:$0xff] %v11568_v15  ;;  %15727 = vst [vmem:[#allocation61_spill] sm:$0xff] %v11570_v47  ;;  %8224 = vpow2.f32 %v4803_v36  ;;  %v4462_v5 = vadd.f32 %v15731_v40, %v15721_v22  ;;  %v4817_v20 = vmul.f32 1.442695, %v4704_v24  ;;  %v11584_v3 = vmul.f32 1.442695, %v4706_v43 }
 0x28f   : > { %15728 = vst [vmem:[#allocation63_spill] sm:$0xff] %v11572_v19  ;;  %15729 = vst [vmem:[#allocation60_spill] sm:$0xff] %v11574_v35  ;;  %v15735_v25 = vld [vmem:[#allocation18_spill] sm:$0xff]  ;;  %v11590_v36 = vpop.eup %8210  ;;  %8226 = vlog2.f32 %v4890_v60  ;;  %v11595_v57 = vmul.f32 1.442695, %v4703_v6 }
 0x290   : > { %15732 = vst [vmem:[#allocation62_spill] sm:$0xff] %v11580_v21  ;;  %15734 = vst [vmem:[#allocation36_spill] sm:$0xff] %v11584_v3  ;;  %v4391_v8 = vadd.f32 %v15735_v25, %v15717_v14  ;;  %v15736_v49 = vld [vmem:[#allocation94_spill] sm:$0xff]  ;;  %v4641_v24 = vand.u32 2147483647, %v11568_v15  ;;  %v11602_v0 = vpop.eup %8212  ;;  %8228 = vpow2.f32 %v4817_v20 }
 0x291   : > { %v4459_v31 = vadd.f32 %v15736_v49, %v15721_v22  ;;  %15737 = vst [vmem:[#allocation104_spill] sm:$0xff] %v11590_v36  ;;  %15738 = vst [vmem:[#allocation72_spill] sm:$0xff] %v11592_v11  ;;  %v11608_v59 = vmul.f32 1.3862944, %v4462_v5  ;;  %8230 = vlog2.f32 %v4902_v52 }
 0x292   : > { %15739 = vst [vmem:[#allocation74_spill] sm:$0xff] %v11595_v57  ;;  %v4455_v47 = vadd.f32 %v4391_v8, %v15720_v62  ;;  %15740 = vst [vmem:[#allocation103_spill] sm:$0xff] %v11602_v0  ;;  %8232 = vlog2.f32 %v4899_v29  ;;  %v11647_v53 = vsub.f32 0.0, %v4641_v24 }
 0x293   : > { %15741 = vst [vmem:[#allocation66_spill] sm:$0xff] %v11608_v59  ;;  %v11615_v8 = vmul.f32 1.3862944, %v4459_v31 }
 0x294   : > { %v11629_v20 = vmul.f32 1.3862944, %v4455_v47  ;;  %15751 = vst [vmem:[#allocation92_spill] sm:$0xff] %v11647_v53 }
 0x295   : > { %15743 = vst [vmem:[#allocation95_spill] sm:$0xff] %v11615_v8 }
 0x296   : > { %15747 = vst [vmem:[#allocation22_spill] sm:$0xff] %v11629_v20 }
 0x2a1   : > { %v2012_v10 = vpop.f32.mrb[0].mxu0 }
 0x2a2   : > { %v2013_v40 = vadd.f32 %v2012_v10, %v11582_v17  ;;  %v2014_v16 = vpop.f32.mrb[1].mxu0 }
 0x2a3   : > { %v2125_v43 = vpop.f32.mrb[0].mxu1  ;;  %v2015_v12 = vadd.f32 %v2014_v16, %v11582_v17  ;;  %v2016_v61 = vpop.f32.mrb[2].mxu0 }
 0x2a4   : > { %v11604_v38 = vmul.f32 1.3862944, %v2013_v40  ;;  %v2126_v60 = vadd.f32 %v2125_v43, %v11582_v17  ;;  %v2127_v6 = vpop.f32.mrb[1].mxu1  ;;  %v2017_v10 = vadd.f32 %v2016_v61, %v11592_v11  ;;  %v2018_v15 = vpop.f32.mrb[3].mxu0 }
 0x2a5   : > { %v11610_v16 = vpop.eup %8214  ;;  %v11612_v46 = vmul.f32 1.3862944, %v2015_v12  ;;  %v2128_v25 = vadd.f32 %v2127_v6, %v11582_v17  ;;  %v2129_v49 = vpop.f32.mrb[2].mxu1 }
 0x2a6   : > { %15742 = vst [vmem:[#allocation15_spill] sm:$0xff] %v11610_v16  ;;  %v11617_v40 = vpop.eup %8216  ;;  %v2332_v43 = vand.u32 2147483647, %v11604_v38  ;;  %v11620_v41 = vmul.f32 1.3862944, %v2126_v60  ;;  %v2130_v61 = vadd.f32 %v2129_v49, %v11592_v11  ;;  %v2131_v5 = vpop.f32.mrb[3].mxu1  ;;  %v2019_v49 = vadd.f32 %v2018_v15, %v11592_v11 }
 0x2a7   : > { %15744 = vst [vmem:[#allocation76_spill] sm:$0xff] %v11617_v40  ;;  %v11624_v42 = vpop.eup %8218  ;;  %v2333_v12 = vand.u32 2147483647, %v11612_v46  ;;  %v11627_v6 = vmul.f32 1.3862944, %v2128_v25  ;;  %v2132_v52 = vadd.f32 %v2131_v5, %v11592_v11 }
 0x2a8   : > { %15746 = vst [vmem:[#allocation79_spill] sm:$0xff] %v11624_v42  ;;  %v11631_v31 = vpop.eup %8220  ;;  %v2396_v17 = vsub.f32 0.0, %v2332_v43  ;;  %v2334_v60 = vand.u32 2147483647, %v11620_v41  ;;  %v11634_v26 = vmul.f32 1.3862944, %v2017_v10 }
 0x2a9   : > { %15748 = vst [vmem:[#allocation25_spill] sm:$0xff] %v11631_v31  ;;  %v11637_v55 = vpop.eup %8222  ;;  %v2397_v54 = vsub.f32 0.0, %v2333_v12  ;;  %v2335_v51 = vand.u32 2147483647, %v11627_v6  ;;  %v11640_v28 = vmul.f32 1.3862944, %v2130_v61 }
 0x2aa   : > { %15749 = vst [vmem:[#allocation32_spill] sm:$0xff] %v11637_v55  ;;  %v11643_v47 = vpop.eup %8224  ;;  %v2460_v25 = vmul.f32 1.442695, %v2396_v17  ;;  %v2398_v32 = vsub.f32 0.0, %v2334_v60  ;;  %v2336_v43 = vand.u32 2147483647, %v11634_v26 }
 0x2ab   : > { %15750 = vst [vmem:[#allocation93_spill] sm:$0xff] %v11643_v47  ;;  %v2462_v10 = vmul.f32 1.442695, %v2397_v54  ;;  %v2399_v2 = vsub.f32 0.0, %v2335_v51  ;;  %v2338_v15 = vand.u32 2147483647, %v11640_v28  ;;  %v11649_v12 = vpop.eup %8226  ;;  %v11655_v54 = vpop.permute.xlu0 %1862 }
 0x2ac   : > { %15752 = vst [vmem:[#allocation99_spill] sm:$0xff] %v11649_v12  ;;  %8234 = vpow2.f32 %v2460_v25  ;;  %v2464_v61 = vmul.f32 1.442695, %v2398_v32  ;;  %v2400_v63 = vsub.f32 0.0, %v2336_v43  ;;  %v11651_v4 = vmul.f32 1.3862944, %v2019_v49  ;;  %v11659_v32 = vpop.eup %8228  ;;  %v11661_v49 = vpop.permute.xlu1 %1867 }
 0x2ad   : > { %v2022_v5 = vpop.f32.mrb[4].mxu0  ;;  %8236 = vpow2.f32 %v2462_v10  ;;  %v2466_v17 = vmul.f32 1.442695, %v2399_v2  ;;  %v2402_v60 = vsub.f32 0.0, %v2338_v15  ;;  %v11653_v11 = vmul.f32 1.3862944, %v2132_v52  ;;  %v11667_v50 = vpop.eup %8230 }
 0x2ae   : > { %v2135_v29 = vpop.f32.mrb[4].mxu1  ;;  %15753 = vst [vmem:[#allocation68_spill] sm:$0xff] %v11655_v54  ;;  %8238 = vpow2.f32 %v2464_v61  ;;  %v2468_v24 = vmul.f32 1.442695, %v2400_v63  ;;  %v2337_v48 = vand.u32 2147483647, %v11651_v4  ;;  %v2023_v51 = vadd.f32 %v2022_v5, %v11655_v54 }
 0x2af   : > { %v2024_v25 = vpop.f32.mrb[5].mxu0  ;;  %15754 = vst [vmem:[#allocation75_spill] sm:$0xff] %v11659_v32  ;;  %15755 = vst [vmem:[#allocation96_spill] sm:$0xff] %v11661_v49  ;;  %8240 = vpow2.f32 %v2466_v17  ;;  %v2472_v2 = vmul.f32 1.442695, %v2402_v60  ;;  %v2137_v10 = vpop.f32.mrb[5].mxu1  ;;  %v2136_v63 = vadd.f32 %v2135_v29, %v11655_v54 }
 0x2b0   : > { %v2339_v52 = vand.u32 2147483647, %v11653_v11  ;;  %8242 = vpow2.f32 %v2468_v24  ;;  %v2401_v15 = vsub.f32 0.0, %v2337_v48  ;;  %v2026_v61 = vpop.f32.mrb[6].mxu0  ;;  %v2139_v39 = vpop.f32.mrb[6].mxu1  ;;  %15756 = vst [vmem:[#allocation71_spill] sm:$0xff] %v11667_v50  ;;  %v2025_v31 = vadd.f32 %v2024_v25, %v11655_v54 }
 0x2b1   : > { %8244 = vpow2.f32 %v2472_v2  ;;  %v2138_v17 = vadd.f32 %v2137_v10, %v11655_v54  ;;  %v2028_v60 = vpop.f32.mrb[7].mxu0  ;;  %v11671_v43 = vpop.f32.mrb[7].mxu1  ;;  %v11673_v24 = vmul.f32 1.3862944, %v2023_v51  ;;  %v11675_v48 = vmul.f32 1.3862944, %v2136_v63 }
 0x2b2   : > { %v2403_v44 = vsub.f32 0.0, %v2339_v52  ;;  %v2470_v23 = vmul.f32 1.442695, %v2401_v15  ;;  %v2027_v5 = vadd.f32 %v2026_v61, %v11661_v49  ;;  %v11678_v7 = vmul.f32 1.3862944, %v2025_v31  ;;  %v11683_v25 = vpop.eup %8232  ;;  %v2032_v15 = vpop.f32.mrb[8].mxu0 }
 0x2b3   : > { %v11680_v50 = vmul.f32 1.3862944, %v2138_v17  ;;  %v2140_v2 = vadd.f32 %v2139_v39, %v11661_v49  ;;  %15757 = vst [vmem:[#allocation98_spill] sm:$0xff] %v11683_v25  ;;  %v2340_v51 = vand.u32 2147483647, %v11673_v24  ;;  %v2145_v63 = vpop.f32.mrb[8].mxu1  ;;  %v11709_v9 = vpop.permute.xlu0 %1872 }
 0x2b4   : > { %v2474_v29 = vmul.f32 1.442695, %v2403_v44  ;;  %8246 = vpow2.f32 %v2470_v23  ;;  %v2342_v44 = vand.u32 2147483647, %v11675_v48  ;;  %v2341_v31 = vand.u32 2147483647, %v11678_v7 }
 0x2b5   : > { %v11691_v17 = vpop.f32.mrb[9].mxu0  ;;  %v2404_v52 = vsub.f32 0.0, %v2340_v51  ;;  %v2343_v10 = vand.u32 2147483647, %v11680_v50  ;;  %v11695_v23 = vmul.f32 1.3862944, %v2027_v5 }
 0x2b6   : > { %8248 = vpow2.f32 %v2474_v29  ;;  %v8235_v39 = vpop.eup %8234  ;;  %v2406_v61 = vsub.f32 0.0, %v2342_v44  ;;  %v11698_v29 = vmul.f32 1.3862944, %v2140_v2  ;;  %v11700_v18 = vpop.f32.mrb[9].mxu1  ;;  %v2405_v12 = vsub.f32 0.0, %v2341_v31  ;;  %15758 = vst [vmem:[#allocation18_spill] sm:$0xff] %v11709_v9 }
 0x2b7   : > { %v8237_v25 = vpop.eup %8236  ;;  %v2588_v40 = vadd.f32 1.0, %v8235_v39  ;;  %v11705_v45 = vpop.f32.mrb[10].mxu0  ;;  %v2476_v0 = vmul.f32 1.442695, %v2404_v52  ;;  %v2344_v55 = vand.u32 2147483647, %v11695_v23 }
 0x2b8   : > { %v8239_v37 = vpop.eup %8238  ;;  %v2589_v27 = vadd.f32 1.0, %v8237_v25  ;;  %v11707_v44 = vpop.f32.mrb[10].mxu1  ;;  %v2480_v33 = vmul.f32 1.442695, %v2406_v61  ;;  %v2407_v36 = vsub.f32 0.0, %v2343_v10  ;;  %v2142_v10 = vadd.f32 %v11671_v43, %v11661_v49 }
 0x2b9   : > { %v8241_v5 = vpop.eup %8240  ;;  %8250 = vlog2.f32 %v2588_v40  ;;  %v2590_v39 = vadd.f32 1.0, %v8239_v37  ;;  %v11712_v54 = vpop.f32.mrb[11].mxu0  ;;  %v2346_v37 = vand.u32 2147483647, %v11698_v29  ;;  %v2408_v16 = vsub.f32 0.0, %v2344_v55 }
 0x2ba   : > { %v8243_v2 = vpop.eup %8242  ;;  %8252 = vlog2.f32 %v2589_v27  ;;  %v2591_v25 = vadd.f32 1.0, %v8241_v5  ;;  %v11715_v40 = vpop.f32.mrb[11].mxu1  ;;  %v2029_v27 = vadd.f32 %v2028_v60, %v11661_v49  ;;  %v2478_v21 = vmul.f32 1.442695, %v2405_v12 }
 0x2bb   : > { %v8245_v51 = vpop.eup %8244  ;;  %8254 = vlog2.f32 %v2590_v39  ;;  %v2592_v34 = vadd.f32 1.0, %v8243_v2  ;;  %v11717_v52 = vpop.f32.mrb[12].mxu0  ;;  %v2033_v39 = vadd.f32 %v2032_v15, %v11709_v9  ;;  %v2410_v55 = vsub.f32 0.0, %v2346_v37 }
 0x2bc   : > { %8256 = vlog2.f32 %v2591_v25  ;;  %v2594_v31 = vadd.f32 1.0, %v8245_v51  ;;  %v11720_v61 = vpop.f32.mrb[12].mxu1  ;;  %v11722_v5 = vpop.f32.mrb[13].mxu0  ;;  %v11731_v51 = vmul.f32 1.3862944, %v2029_v27  ;;  %v2146_v60 = vadd.f32 %v2145_v63, %v11709_v9 }
 0x2bd   : > { %8258 = vlog2.f32 %v2592_v34  ;;  %v11727_v2 = vpop.f32.mrb[13].mxu1  ;;  %v11729_v32 = vpop.f32.mrb[14].mxu0  ;;  %v2482_v43 = vmul.f32 1.442695, %v2407_v36  ;;  %v11738_v15 = vmul.f32 1.3862944, %v2142_v10 }
 0x2be   : > { %v8247_v25 = vpop.eup %8246  ;;  %8260 = vlog2.f32 %v2594_v31  ;;  %v11734_v47 = vpop.f32.mrb[14].mxu1  ;;  %v2484_v31 = vmul.f32 1.442695, %v2408_v16  ;;  %v2345_v37 = vand.u32 2147483647, %v11731_v51  ;;  %v15763_v3 = vmax.f32 %v11620_v41, 0.0 }
 0x2bf   : > { %v11736_v34 = vpop.f32.mrb[15].mxu0  ;;  %v2593_v56 = vadd.f32 1.0, %v8247_v25  ;;  %8262 = vpow2.f32 %v2476_v0  ;;  %v11740_v49 = vpop.f32.mrb[15].mxu1  ;;  %v2347_v27 = vand.u32 2147483647, %v11738_v15  ;;  %v15771_v58 = vmax.f32 %v11634_v26, 0.0 }
 0x2c0   : > { %v8249_v12 = vpop.eup %8248  ;;  %8264 = vpow2.f32 %v2480_v33  ;;  %v11745_v1 = vmul.f32 1.3862944, %v2033_v39  ;;  %v2488_v0 = vmul.f32 1.442695, %v2410_v55  ;;  %v2409_v36 = vsub.f32 0.0, %v2345_v37 }
 0x2c1   : > { %v2595_v42 = vadd.f32 1.0, %v8249_v12  ;;  %8266 = vlog2.f32 %v2593_v56  ;;  %v11747_v20 = vpop.f32.mrb[16].mxu0  ;;  %v11749_v10 = vmul.f32 1.3862944, %v2146_v60  ;;  %v2411_v56 = vsub.f32 0.0, %v2347_v27 }
 0x2c2   : > { %v11751_v25 = vpop.f32.mrb[17].mxu0  ;;  %v2348_v12 = vand.u32 2147483647, %v11745_v1  ;;  %v2486_v55 = vmul.f32 1.442695, %v2409_v36 }
 0x2c3   : > { %8268 = vlog2.f32 %v2595_v42  ;;  %v8251_v33 = vpop.eup %8250  ;;  %v11755_v63 = vpop.f32.mrb[16].mxu1  ;;  %v2350_v13 = vand.u32 2147483647, %v11749_v10 }
 0x2c4   : > { %8270 = vpow2.f32 %v2478_v21  ;;  %v11757_v39 = vpop.f32.mrb[18].mxu0  ;;  %v8253_v19 = vpop.eup %8252  ;;  %v2653_v59 = vmul.f32 0.6931472, %v8251_v33  ;;  %v2490_v21 = vmul.f32 1.442695, %v2411_v56  ;;  %v2412_v16 = vsub.f32 0.0, %v2348_v12 }
 0x2c5   : > { %8272 = vpow2.f32 %v2482_v43  ;;  %v11760_v60 = vpop.f32.mrb[17].mxu1  ;;  %v8255_v37 = vpop.eup %8254  ;;  %v2655_v53 = vmul.f32 0.6931472, %v8253_v19  ;;  %v2035_v43 = vadd.f32 %v11691_v17, %v11709_v9  ;;  %v15761_v19 = vmax.f32 %v11604_v38, 0.0 }
 0x2c6   : > { %8274 = vpow2.f32 %v2484_v31  ;;  %v11762_v27 = vpop.f32.mrb[18].mxu1  ;;  %v8257_v57 = vpop.eup %8256  ;;  %v2657_v8 = vmul.f32 0.6931472, %v8255_v37  ;;  %v2492_v12 = vmul.f32 1.442695, %v2412_v16  ;;  %v15762_v37 = vmax.f32 %v11612_v46, 0.0 }
 0x2c7   : > { %8276 = vpow2.f32 %v2488_v0  ;;  %v11767_v33 = vpop.f32.mrb[19].mxu0  ;;  %v11769_v36 = vpop.f32.mrb[19].mxu1  ;;  %v2780_v31 = vadd.f32 %v2653_v59, %v15761_v19  ;;  %v2659_v56 = vmul.f32 0.6931472, %v8257_v57  ;;  %v2414_v19 = vsub.f32 0.0, %v2350_v13 }
 0x2c8   : > { %15759 = vst [vmem:[#allocation94_spill] sm:$0xff] %v11767_v33  ;;  %15760 = vst [vmem:[#allocation29_spill] sm:$0xff] %v11769_v36  ;;  %v8259_v42 = vpop.eup %8258  ;;  %8278 = vpow2.f32 %v2486_v55  ;;  %v2781_v0 = vadd.f32 %v2655_v53, %v15762_v37  ;;  %v2782_v36 = vadd.f32 %v2657_v8, %v15763_v3  ;;  %v15764_v33 = vmax.f32 %v11627_v6, 0.0  ;;  %v15766_v6 = vld [vmem:[#allocation102_spill] sm:$0xff]  ;;  %v11799_v55 = vpop.permute.xlu1 %1877 }
 0x2c9   : > { %v8261_v30 = vpop.eup %8260  ;;  %8280 = vpow2.f32 %v2490_v21  ;;  %v11782_v57 = vpop.f32.mrb[20].mxu0  ;;  %v2661_v46 = vmul.f32 0.6931472, %v8259_v42  ;;  %v11787_v35 = vmul.f32 1.442695, %v2780_v31  ;;  %15768 = vst [vmem:[#allocation106_spill] sm:$0xff] %v11799_v55 }
 0x2ca   : > { %v8263_v17 = vpop.eup %8262  ;;  %v2783_v38 = vadd.f32 %v2659_v56, %v15764_v33  ;;  %8282 = vpow2.f32 %v2492_v12  ;;  %v11785_v37 = vpop.f32.mrb[21].mxu0  ;;  %v11789_v3 = vmul.f32 1.3862944, %v2035_v43  ;;  %v11795_v33 = vadd.f32 %v15766_v6, %v15717_v14 }
 0x2cb   : > { %v8265_v16 = vpop.eup %8264  ;;  %v2596_v53 = vadd.f32 1.0, %v8263_v17  ;;  %15765 = vst [vmem:[#allocation105_spill] sm:$0xff] %v11787_v35  ;;  %v11791_v8 = vpop.f32.mrb[20].mxu1  ;;  %v11797_v42 = vmul.f32 1.442695, %v2781_v0  ;;  %v2784_v0 = vadd.f32 %v2661_v46, %v15771_v58  ;;  %v2037_v43 = vadd.f32 %v11705_v45, %v11799_v55 }
 0x2cc   : > { %v8267_v21 = vpop.eup %8266  ;;  %v2598_v41 = vadd.f32 1.0, %v8265_v16  ;;  %v2665_v12 = vmul.f32 0.6931472, %v8261_v30  ;;  %v2496_v13 = vmul.f32 1.442695, %v2414_v19  ;;  %v11806_v59 = vpop.f32.mrb[21].mxu1 }
 0x2cd   : > { %v8269_v56 = vpop.eup %8268  ;;  %15767 = vst [vmem:[#allocation102_spill] sm:$0xff] %v11797_v42  ;;  %8284 = vlog2.f32 %v2596_v53  ;;  %v11801_v31 = vmul.f32 1.442695, %v2782_v36  ;;  %v11803_v16 = vmul.f32 1.442695, %v2783_v38  ;;  %v11811_v53 = vpop.f32.mrb[22].mxu0 }
 0x2ce   : > { %v8271_v17 = vpop.eup %8270  ;;  %8286 = vlog2.f32 %v2598_v41  ;;  %v2349_v30 = vand.u32 2147483647, %v11789_v3  ;;  %15772 = vst [vmem:[#allocation109_spill] sm:$0xff] %v11811_v53  ;;  %v11813_v19 = vpop.f32.mrb[22].mxu1  ;;  %v2663_v38 = vmul.f32 0.6931472, %v8267_v21  ;;  %v2148_v41 = vadd.f32 %v11700_v18, %v11709_v9 }
 0x2cf   : > { %15769 = vst [vmem:[#allocation107_spill] sm:$0xff] %v11801_v31  ;;  %15770 = vst [vmem:[#allocation108_spill] sm:$0xff] %v11803_v16  ;;  %v8273_v6 = vpop.eup %8272  ;;  %v2597_v35 = vadd.f32 1.0, %v8271_v17  ;;  %8288 = vpow2.f32 %v2496_v13  ;;  %v11819_v16 = vpop.f32.mrb[23].mxu0  ;;  %v2667_v46 = vmul.f32 0.6931472, %v8269_v56 }
 0x2d0   : > { %15773 = vst [vmem:[#allocation110_spill] sm:$0xff] %v11813_v19  ;;  %v8275_v36 = vpop.eup %8274  ;;  %v2599_v31 = vadd.f32 1.0, %v8273_v6  ;;  %15774 = vst [vmem:[#allocation111_spill] sm:$0xff] %v11819_v16  ;;  %v11821_v58 = vpop.f32.mrb[23].mxu1  ;;  %v2413_v17 = vsub.f32 0.0, %v2349_v30  ;;  %v15776_v19 = vmax.f32 %v11640_v28, 0.0 }
 0x2d1   : > { %15775 = vst [vmem:[#allocation112_spill] sm:$0xff] %v11821_v58  ;;  %v8277_v26 = vpop.eup %8276  ;;  %8290 = vlog2.f32 %v2597_v35  ;;  %v2600_v13 = vadd.f32 1.0, %v8275_v36  ;;  %v11825_v53 = vmul.f32 1.3862944, %v2148_v41  ;;  %v11827_v18 = vpop.f32.mrb[24].mxu0  ;;  %v15779_v30 = vmax.f32 %v11651_v4, 0.0 }
 0x2d2   : > { %v8279_v42 = vpop.eup %8278  ;;  %v2786_v21 = vadd.f32 %v2665_v12, %v15776_v19  ;;  %8292 = vlog2.f32 %v2599_v31  ;;  %v2602_v6 = vadd.f32 1.0, %v8277_v26  ;;  %15777 = vst [vmem:[#allocation113_spill] sm:$0xff] %v11827_v18  ;;  %v2494_v16 = vmul.f32 1.442695, %v2413_v17  ;;  %v11831_v56 = vpop.f32.mrb[25].mxu0 }
 0x2d3   : > { %v8281_v45 = vpop.eup %8280  ;;  %8294 = vlog2.f32 %v2600_v13  ;;  %v2601_v9 = vadd.f32 1.0, %v8279_v42  ;;  %v11829_v58 = vmul.f32 1.3862944, %v2037_v43  ;;  %15778 = vst [vmem:[#allocation114_spill] sm:$0xff] %v11831_v56  ;;  %v2785_v36 = vadd.f32 %v2663_v38, %v15779_v30  ;;  %v11836_v31 = vpop.f32.mrb[24].mxu1 }
 0x2d4   : > { %v8283_v35 = vpop.eup %8282  ;;  %8296 = vlog2.f32 %v2602_v6  ;;  %v2603_v28 = vadd.f32 1.0, %v8281_v45  ;;  %v2351_v12 = vand.u32 2147483647, %v11825_v53  ;;  %15780 = vst [vmem:[#allocation115_spill] sm:$0xff] %v11836_v31  ;;  %v11838_v19 = vpop.f32.mrb[26].mxu0  ;;  %v15782_v41 = vmax.f32 %v11653_v11, 0.0 }
 0x2d5   : > { %15781 = vst [vmem:[#allocation116_spill] sm:$0xff] %v11838_v19  ;;  %8298 = vlog2.f32 %v2601_v9  ;;  %v2604_v43 = vadd.f32 1.0, %v8283_v35  ;;  %v2352_v26 = vand.u32 2147483647, %v11829_v58  ;;  %v11843_v13 = vpop.f32.mrb[25].mxu1  ;;  %v11845_v17 = vpop.f32.mrb[27].mxu0  ;;  %v2150_v38 = vadd.f32 %v11707_v44, %v11799_v55 }
 0x2d6   : > { %v2787_v42 = vadd.f32 %v2667_v46, %v15782_v41  ;;  %15783 = vst [vmem:[#allocation117_spill] sm:$0xff] %v11843_v13  ;;  %15784 = vst [vmem:[#allocation118_spill] sm:$0xff] %v11845_v17  ;;  %8300 = vlog2.f32 %v2603_v28  ;;  %v2415_v4 = vsub.f32 0.0, %v2351_v12  ;;  %v2039_v6 = vadd.f32 %v11712_v54, %v11799_v55  ;;  %v11851_v45 = vpop.f32.mrb[26].mxu1 }
 0x2d7   : > { %15785 = vst [vmem:[#allocation119_spill] sm:$0xff] %v11851_v45  ;;  %v8285_v11 = vpop.eup %8284  ;;  %v11853_v46 = vmul.f32 1.442695, %v2784_v0  ;;  %v11855_v9 = vmul.f32 1.442695, %v2786_v21  ;;  %8302 = vlog2.f32 %v2604_v43  ;;  %v2416_v35 = vsub.f32 0.0, %v2352_v26 }
 0x2d8   : > { %v11857_v30 = vpop.f32.mrb[27].mxu1  ;;  %v8287_v41 = vpop.eup %8286  ;;  %v11859_v28 = vmul.f32 1.442695, %v2785_v36  ;;  %8304 = vpow2.f32 %v2494_v16  ;;  %v2498_v12 = vmul.f32 1.442695, %v2415_v4  ;;  %v11867_v0 = vadd.f32 %v11795_v33, %v15720_v62 }
 0x2d9   : > { %15786 = vst [vmem:[#allocation120_spill] sm:$0xff] %v11857_v30  ;;  %v11861_v44 = vmul.f32 1.3862944, %v2150_v38  ;;  %v8289_v17 = vpop.eup %8288  ;;  %v2669_v54 = vmul.f32 0.6931472, %v8285_v11  ;;  %v11872_v36 = vpop.f32.mrb[28].mxu0 }
 0x2da   : > { %v2500_v19 = vmul.f32 1.442695, %v2416_v35  ;;  %v11863_v45 = vmul.f32 1.3862944, %v2039_v6  ;;  %15787 = vst [vmem:[#allocation121_spill] sm:$0xff] %v11867_v0  ;;  %8306 = vpow2.f32 %v2498_v12  ;;  %15788 = vst [vmem:[#allocation122_spill] sm:$0xff] %v11872_v36  ;;  %v11879_v35 = vpop.permute.xlu0 %1882  ;;  %v2152_v12 = vadd.f32 %v11715_v40, %v11799_v55 }
 0x2db   : > { %v11869_v21 = vmul.f32 1.442695, %v2787_v42  ;;  %v2673_v43 = vmul.f32 0.6931472, %v8287_v41  ;;  %v8291_v16 = vpop.eup %8290  ;;  %v2354_v6 = vand.u32 2147483647, %v11861_v44  ;;  %v2043_v36 = vadd.f32 %v11717_v52, %v11879_v35 }
 0x2dc   : > { %8308 = vpow2.f32 %v2500_v19  ;;  %v11877_v11 = vpop.f32.mrb[29].mxu0  ;;  %v8293_v33 = vpop.eup %8292  ;;  %15790 = vst [vmem:[#allocation124_spill] sm:$0xff] %v11879_v35  ;;  %v2671_v42 = vmul.f32 0.6931472, %v8291_v16  ;;  %v2606_v41 = vadd.f32 1.0, %v8289_v17  ;;  %v15791_v4 = vmax.f32 %v11673_v24, 0.0 }
 0x2dd   : > { %15789 = vst [vmem:[#allocation123_spill] sm:$0xff] %v11877_v11  ;;  %v2353_v26 = vand.u32 2147483647, %v11863_v45  ;;  %v8295_v0 = vpop.eup %8294  ;;  %v2675_v38 = vmul.f32 0.6931472, %v8293_v33  ;;  %v2418_v19 = vsub.f32 0.0, %v2354_v6 }
 0x2de   : > { %v2788_v62 = vadd.f32 %v2669_v54, %v15791_v4  ;;  %v11888_v11 = vpop.f32.mrb[28].mxu1  ;;  %v8297_v30 = vpop.eup %8296  ;;  %v15793_v16 = vmax.f32 %v11675_v48, 0.0  ;;  %v2677_v13 = vmul.f32 0.6931472, %v8295_v0  ;;  %v15794_v24 = vmax.f32 %v11678_v7, 0.0 }
 0x2df   : > { %15792 = vst [vmem:[#allocation125_spill] sm:$0xff] %v11888_v11  ;;  %v2417_v31 = vsub.f32 0.0, %v2353_v26  ;;  %v11893_v40 = vpop.f32.mrb[29].mxu1  ;;  %v8299_v55 = vpop.eup %8298  ;;  %v15795_v4 = vmax.f32 %v11680_v50, 0.0  ;;  %v2681_v52 = vmul.f32 0.6931472, %v8297_v30  ;;  %8310 = vlog2.f32 %v2606_v41 }
 0x2e0   : > { %v2790_v17 = vadd.f32 %v2673_v43, %v15793_v16  ;;  %v2789_v54 = vadd.f32 %v2671_v42, %v15794_v24  ;;  %v2504_v33 = vmul.f32 1.442695, %v2418_v19  ;;  %v8301_v11 = vpop.eup %8300  ;;  %v15796_v18 = vmax.f32 %v11695_v23, 0.0  ;;  %v11907_v50 = vpop.f32.mrb[30].mxu0 }
 0x2e1   : > { %v2791_v6 = vadd.f32 %v2675_v38, %v15795_v4  ;;  %v2502_v0 = vmul.f32 1.442695, %v2417_v31  ;;  %v11901_v43 = vmul.f32 1.3862944, %v2152_v12  ;;  %v8303_v26 = vpop.eup %8302  ;;  %v2679_v16 = vmul.f32 0.6931472, %v8299_v55 }
 0x2e2   : > { %v2792_v48 = vadd.f32 %v2677_v13, %v15796_v18  ;;  %8312 = vpow2.f32 %v2504_v33  ;;  %v11903_v56 = vmul.f32 1.3862944, %v2043_v36  ;;  %v2156_v7 = vadd.f32 %v11720_v61, %v11879_v35  ;;  %v11909_v30 = vpop.f32.mrb[30].mxu1  ;;  %v8305_v38 = vpop.eup %8304 }
 0x2e3   : > { %v11911_v42 = vmul.f32 1.442695, %v2788_v62  ;;  %v11913_v23 = vmul.f32 1.442695, %v2790_v17  ;;  %8314 = vpow2.f32 %v2502_v0  ;;  %v2045_v18 = vadd.f32 %v11722_v5, %v11879_v35  ;;  %v11917_v55 = vpop.f32.mrb[31].mxu0  ;;  %v11919_v31 = vpop.f32.mrb[31].mxu1 }
 0x2e4   : > { %15797 = vst [vmem:[#allocation126_spill] sm:$0xff] %v11917_v55  ;;  %15798 = vst [vmem:[#allocation127_spill] sm:$0xff] %v11919_v31  ;;  %v11921_v13 = vmul.f32 1.442695, %v2789_v54  ;;  %v11923_v61 = vmul.f32 1.442695, %v2791_v6  ;;  %v8307_v62 = vpop.eup %8306 }
 0x2e5   : > { %v15799_v36 = vmax.f32 %v11698_v29, 0.0  ;;  %v2605_v12 = vadd.f32 1.0, %v8305_v38  ;;  %v11927_v19 = vmul.f32 1.442695, %v2792_v48  ;;  %v2683_v17 = vmul.f32 0.6931472, %v8301_v11 }
 0x2e6   : > { %v2355_v24 = vand.u32 2147483647, %v11901_v43  ;;  %v15800_v5 = vld [vmem:[#allocation100_spill] sm:$0xff]  ;;  %v8309_v33 = vpop.eup %8308  ;;  %v15801_v54 = vmax.f32 %v11731_v51, 0.0  ;;  %v2685_v6 = vmul.f32 0.6931472, %v8303_v26 }
 0x2e7   : > { %v2794_v41 = vadd.f32 %v2681_v52, %v15799_v36  ;;  %v11932_v4 = vadd.f32 %v15800_v5, %v15717_v14  ;;  %v2607_v31 = vadd.f32 1.0, %v8307_v62  ;;  %v2356_v29 = vand.u32 2147483647, %v11903_v56  ;;  %v11947_v62 = vpop.permute.xlu1 %1887 }
 0x2e8   : > { %v2793_v0 = vadd.f32 %v2679_v16, %v15801_v54  ;;  %8316 = vlog2.f32 %v2605_v12  ;;  %v2608_v52 = vadd.f32 1.0, %v8309_v33  ;;  %v2419_v38 = vsub.f32 0.0, %v2355_v24  ;;  %15803 = vst [vmem:[#allocation100_spill] sm:$0xff] %v11947_v62 }
 0x2e9   : > { %v11937_v48 = vmul.f32 1.3862944, %v2156_v7  ;;  %v11939_v11 = vmul.f32 1.442695, %v2794_v41  ;;  %v2420_v55 = vsub.f32 0.0, %v2356_v29  ;;  %v15802_v5 = vmax.f32 %v11738_v15, 0.0  ;;  %v8311_v24 = vpop.eup %8310 }
 0x2ea   : > { %v11942_v14 = vmul.f32 1.3862944, %v2045_v18  ;;  %8318 = vlog2.f32 %v2607_v31  ;;  %v2506_v26 = vmul.f32 1.442695, %v2419_v38  ;;  %v11949_v12 = vmul.f32 1.442695, %v2793_v0 }
 0x2eb   : > { %v2795_v51 = vadd.f32 %v2683_v17, %v15802_v5  ;;  %v2358_v16 = vand.u32 2147483647, %v11937_v48  ;;  %8320 = vlog2.f32 %v2608_v52  ;;  %v2508_v7 = vmul.f32 1.442695, %v2420_v55 }
 0x2ec   : > { %v2357_v41 = vand.u32 2147483647, %v11942_v14  ;;  %8322 = vpow2.f32 %v2506_v26  ;;  %v2158_v18 = vadd.f32 %v11727_v2, %v11879_v35  ;;  %v2047_v15 = vadd.f32 %v11729_v32, %v11947_v62  ;;  %v8313_v31 = vpop.eup %8312 }
 0x2ed   : > { %v2422_v33 = vsub.f32 0.0, %v2358_v16  ;;  %v15804_v17 = vmax.f32 %v11745_v1, 0.0  ;;  %8324 = vpow2.f32 %v2508_v7  ;;  %v2160_v55 = vadd.f32 %v11734_v47, %v11947_v62  ;;  %v8315_v29 = vpop.eup %8314  ;;  %v15805_v1 = vld [vmem:[#allocation97_spill] sm:$0xff] }
 0x2ee   : > { %v2421_v0 = vsub.f32 0.0, %v2357_v41  ;;  %v2610_v52 = vadd.f32 1.0, %v8313_v31  ;;  %v11960_v5 = vmul.f32 1.3862944, %v2158_v18  ;;  %v2049_v2 = vadd.f32 %v11736_v34, %v11947_v62 }
 0x2ef   : > { %v2796_v54 = vadd.f32 %v2685_v6, %v15804_v17  ;;  %v2512_v38 = vmul.f32 1.442695, %v2422_v33  ;;  %v2689_v26 = vmul.f32 0.6931472, %v8311_v24  ;;  %v11964_v32 = vmul.f32 1.3862944, %v2047_v15  ;;  %v11985_v33 = vpop.permute.xlu0 %1892 }
 0x2f0   : > { %v2510_v16 = vmul.f32 1.442695, %v2421_v0  ;;  %v11968_v6 = vadd.f32 %v15805_v1, %v15721_v22  ;;  %v2609_v7 = vadd.f32 1.0, %v8315_v29  ;;  %v2359_v47 = vand.u32 2147483647, %v11960_v5  ;;  %15808 = vst [vmem:[#allocation128_spill] sm:$0xff] %v11985_v33 }
 0x2f1   : > { %v11972_v31 = vmul.f32 1.3862944, %v2160_v55  ;;  %8326 = vlog2.f32 %v2610_v52  ;;  %v2360_v34 = vand.u32 2147483647, %v11964_v32  ;;  %v11976_v24 = vmul.f32 1.3862944, %v2049_v2 }
 0x2f2   : > { %15806 = vst [vmem:[#allocation97_spill] sm:$0xff] %v11968_v6  ;;  %v8317_v18 = vpop.eup %8316  ;;  %v11978_v15 = vmul.f32 1.442695, %v2795_v51  ;;  %v11980_v17 = vmul.f32 1.442695, %v2796_v54  ;;  %8328 = vpow2.f32 %v2512_v38  ;;  %v2423_v22 = vsub.f32 0.0, %v2359_v47 }
 0x2f3   : > { %v15807_v0 = vmax.f32 %v11749_v10, 0.0  ;;  %8330 = vpow2.f32 %v2510_v16  ;;  %v2424_v55 = vsub.f32 0.0, %v2360_v34  ;;  %v2362_v52 = vand.u32 2147483647, %v11972_v31 }
 0x2f4   : > { %v8319_v1 = vpop.eup %8318  ;;  %8332 = vlog2.f32 %v2609_v7  ;;  %v2514_v2 = vmul.f32 1.442695, %v2423_v22  ;;  %v2361_v41 = vand.u32 2147483647, %v11976_v24  ;;  %v2162_v51 = vadd.f32 %v11740_v49, %v11947_v62 }
 0x2f5   : > { %v2798_v29 = vadd.f32 %v2689_v26, %v15807_v0  ;;  %v8321_v54 = vpop.eup %8320  ;;  %v2687_v38 = vmul.f32 0.6931472, %v8317_v18  ;;  %v2516_v47 = vmul.f32 1.442695, %v2424_v55  ;;  %v2426_v36 = vsub.f32 0.0, %v2362_v52 }
 0x2f6   : > { %v2053_v10 = vadd.f32 %v11747_v20, %v11985_v33  ;;  %v8323_v26 = vpop.eup %8322  ;;  %8334 = vpow2.f32 %v2514_v2  ;;  %v2425_v7 = vsub.f32 0.0, %v2361_v41  ;;  %v2691_v62 = vmul.f32 0.6931472, %v8319_v1 }
 0x2f7   : > { %v8325_v22 = vpop.eup %8324  ;;  %v11994_v0 = vmul.f32 1.442695, %v2798_v29  ;;  %v2611_v35 = vadd.f32 1.0, %v8323_v26  ;;  %8336 = vpow2.f32 %v2516_v47  ;;  %v2520_v49 = vmul.f32 1.442695, %v2426_v36 }
 0x2f8   : > { %v2612_v18 = vadd.f32 1.0, %v8325_v22  ;;  %v2518_v55 = vmul.f32 1.442695, %v2425_v7  ;;  %v2166_v52 = vadd.f32 %v11755_v63, %v11985_v33  ;;  %v15810_v20 = vmax.f32 %v11789_v3, 0.0 }
 0x2f9   : > { %15809 = vst [vmem:[#allocation129_spill] sm:$0xff] %v11994_v0  ;;  %8338 = vlog2.f32 %v2611_v35  ;;  %v12000_v16 = vmul.f32 1.3862944, %v2162_v51  ;;  %v12002_v2 = vmul.f32 1.3862944, %v2053_v10  ;;  %v2055_v3 = vadd.f32 %v11751_v25, %v11985_v33 }
 0x2fa   : > { %v2797_v6 = vadd.f32 %v2687_v38, %v15810_v20  ;;  %8340 = vlog2.f32 %v2612_v18  ;;  %v12006_v36 = vmul.f32 1.3862944, %v2166_v52  ;;  %v2693_v47 = vmul.f32 0.6931472, %v8321_v54 }
 0x2fb   : > { %v8327_v1 = vpop.eup %8326  ;;  %8342 = vpow2.f32 %v2520_v49  ;;  %v2363_v63 = vand.u32 2147483647, %v12000_v16  ;;  %v15811_v51 = vmax.f32 %v11825_v53, 0.0  ;;  %v2364_v26 = vand.u32 2147483647, %v12002_v2 }
 0x2fc   : > { %v8329_v35 = vpop.eup %8328  ;;  %8344 = vpow2.f32 %v2518_v55  ;;  %v12015_v22 = vmul.f32 1.442695, %v2797_v6  ;;  %v2168_v49 = vadd.f32 %v11760_v60, %v11985_v33  ;;  %v2697_v20 = vmul.f32 0.6931472, %v8327_v1 }
 0x2fd   : > { %v2799_v38 = vadd.f32 %v2691_v62, %v15811_v51  ;;  %v8331_v7 = vpop.eup %8330  ;;  %v2614_v18 = vadd.f32 1.0, %v8329_v35  ;;  %v2427_v54 = vsub.f32 0.0, %v2363_v63  ;;  %v2428_v29 = vsub.f32 0.0, %v2364_v26 }
 0x2fe   : > { %v8333_v52 = vpop.eup %8332  ;;  %v2613_v25 = vadd.f32 1.0, %v8331_v7  ;;  %v2366_v53 = vand.u32 2147483647, %v12006_v36  ;;  %v15812_v62 = vmax.f32 %v11829_v58, 0.0  ;;  %v12022_v10 = vmul.f32 1.3862944, %v2055_v3  ;;  %v12027_v7 = vpop.permute.xlu1 %1897 }
 0x2ff   : > { %8346 = vlog2.f32 %v2614_v18  ;;  %v2522_v55 = vmul.f32 1.442695, %v2427_v54  ;;  %v12024_v41 = vmul.f32 1.442695, %v2799_v38  ;;  %v2524_v63 = vmul.f32 1.442695, %v2428_v29 }
 0x300   : > { %v2800_v51 = vadd.f32 %v2693_v47, %v15812_v62  ;;  %v8335_v6 = vpop.eup %8334  ;;  %8348 = vlog2.f32 %v2613_v25  ;;  %v2430_v35 = vsub.f32 0.0, %v2366_v53  ;;  %v2695_v34 = vmul.f32 0.6931472, %v8333_v52  ;;  %15813 = vst [vmem:[#allocation130_spill] sm:$0xff] %v12027_v7 }
 0x301   : > { %v8337_v60 = vpop.eup %8336  ;;  %v2615_v1 = vadd.f32 1.0, %v8335_v6  ;;  %8350 = vpow2.f32 %v2522_v55  ;;  %v2365_v26 = vand.u32 2147483647, %v12022_v10  ;;  %v15814_v58 = vmax.f32 %v11861_v44, 0.0 }
 0x302   : > { %8352 = vpow2.f32 %v2524_v63  ;;  %v2528_v3 = vmul.f32 1.442695, %v2430_v35  ;;  %v12031_v18 = vmul.f32 1.3862944, %v2168_v49  ;;  %v2057_v29 = vadd.f32 %v11757_v39, %v12027_v7 }
 0x303   : > { %v2802_v47 = vadd.f32 %v2697_v20, %v15814_v58  ;;  %v8339_v38 = vpop.eup %8338  ;;  %8354 = vlog2.f32 %v2615_v1  ;;  %v2429_v54 = vsub.f32 0.0, %v2365_v26  ;;  %v2170_v52 = vadd.f32 %v11762_v27, %v12027_v7 }
 0x304   : > { %v8341_v25 = vpop.eup %8340  ;;  %v12037_v53 = vmul.f32 1.442695, %v2800_v51  ;;  %v2616_v62 = vadd.f32 1.0, %v8337_v60  ;;  %v2367_v20 = vand.u32 2147483647, %v12031_v18  ;;  %v15815_v49 = vmax.f32 %v11863_v45, 0.0 }
 0x305   : > { %v8343_v55 = vpop.eup %8342  ;;  %8356 = vpow2.f32 %v2528_v3  ;;  %v2526_v63 = vmul.f32 1.442695, %v2429_v54  ;;  %v12043_v35 = vmul.f32 1.3862944, %v2057_v29  ;;  %v2699_v1 = vmul.f32 0.6931472, %v8339_v38 }
 0x306   : > { %v2801_v6 = vadd.f32 %v2695_v34, %v15815_v49  ;;  %v8345_v39 = vpop.eup %8344  ;;  %v2618_v26 = vadd.f32 1.0, %v8343_v55  ;;  %v2431_v27 = vsub.f32 0.0, %v2367_v20  ;;  %v12045_v58 = vmul.f32 1.3862944, %v2170_v52 }
 0x307   : > { %v12047_v51 = vmul.f32 1.442695, %v2802_v47  ;;  %8358 = vpow2.f32 %v2526_v63  ;;  %v2617_v45 = vadd.f32 1.0, %v8345_v39  ;;  %v2368_v3 = vand.u32 2147483647, %v12043_v35  ;;  %v15818_v63 = vld [vmem:[#allocation94_spill] sm:$0xff] }
 0x308   : > { %8360 = vlog2.f32 %v2616_v62  ;;  %v2530_v34 = vmul.f32 1.442695, %v2431_v27  ;;  %v12052_v29 = vmul.f32 1.442695, %v2801_v6  ;;  %v2701_v38 = vmul.f32 0.6931472, %v8341_v25 }
 0x309   : > { %15816 = vst [vmem:[#allocation131_spill] sm:$0xff] %v12047_v51  ;;  %v8347_v54 = vpop.eup %8346  ;;  %8362 = vlog2.f32 %v2618_v26  ;;  %v2370_v52 = vand.u32 2147483647, %v12045_v58  ;;  %v15817_v47 = vmax.f32 %v11901_v43, 0.0  ;;  %v2432_v49 = vsub.f32 0.0, %v2368_v3  ;;  %v15819_v6 = vld [vmem:[#allocation29_spill] sm:$0xff] }
 0x30a   : > { %v8349_v20 = vpop.eup %8348  ;;  %8364 = vpow2.f32 %v2530_v34  ;;  %v2059_v62 = vadd.f32 %v15818_v63, %v12027_v7  ;;  %v2705_v27 = vmul.f32 0.6931472, %v8347_v54  ;;  %v2172_v33 = vadd.f32 %v15819_v6, %v12027_v7 }
 0x30b   : > { %v2803_v55 = vadd.f32 %v2699_v1, %v15817_v47  ;;  %v8351_v39 = vpop.eup %8350  ;;  %v2703_v44 = vmul.f32 0.6931472, %v8349_v20  ;;  %v2434_v60 = vsub.f32 0.0, %v2370_v52  ;;  %8366 = vlog2.f32 %v2617_v45  ;;  %v12063_v1 = vpop.permute.xlu0 %1902 }
 0x30c   : > { %v8353_v25 = vpop.eup %8352  ;;  %v2619_v26 = vadd.f32 1.0, %v8351_v39  ;;  %v2532_v51 = vmul.f32 1.442695, %v2432_v49  ;;  %v12061_v0 = vmul.f32 1.3862944, %v2059_v62  ;;  %15820 = vst [vmem:[#allocation94_spill] sm:$0xff] %v12063_v1  ;;  %v2063_v45 = vadd.f32 %v11782_v57, %v12063_v1 }
 0x30d   : > { %v8355_v43 = vpop.eup %8354  ;;  %v2620_v34 = vadd.f32 1.0, %v8353_v25  ;;  %v2536_v47 = vmul.f32 1.442695, %v2434_v60  ;;  %v12066_v63 = vmul.f32 1.3862944, %v2172_v33  ;;  %v15821_v54 = vmax.f32 %v11903_v56, 0.0 }
 0x30e   : > { %8368 = vlog2.f32 %v2619_v26  ;;  %v15822_v62 = vmax.f32 %v11937_v48, 0.0  ;;  %v2369_v60 = vand.u32 2147483647, %v12061_v0  ;;  %v12077_v33 = vmul.f32 1.442695, %v2803_v55 }
 0x30f   : > { %v2804_v52 = vadd.f32 %v2701_v38, %v15821_v54  ;;  %v8357_v49 = vpop.eup %8356  ;;  %8370 = vlog2.f32 %v2620_v34  ;;  %v2707_v25 = vmul.f32 0.6931472, %v8355_v43  ;;  %v15823_v26 = vmax.f32 %v11942_v14, 0.0 }
 0x310   : > { %v2806_v39 = vadd.f32 %v2705_v27, %v15822_v62  ;;  %v2622_v56 = vadd.f32 1.0, %v8357_v49  ;;  %8372 = vpow2.f32 %v2532_v51  ;;  %v2433_v57 = vsub.f32 0.0, %v2369_v60 }
 0x311   : > { %v8359_v38 = vpop.eup %8358  ;;  %v2805_v54 = vadd.f32 %v2703_v44, %v15823_v26  ;;  %8374 = vpow2.f32 %v2536_v47  ;;  %v2371_v20 = vand.u32 2147483647, %v12066_v63  ;;  %v12082_v27 = vmul.f32 1.442695, %v2804_v52 }
 0x312   : > { %v8361_v48 = vpop.eup %8360  ;;  %v12086_v55 = vmul.f32 1.3862944, %v2063_v45  ;;  %v12088_v49 = vmul.f32 1.442695, %v2806_v39  ;;  %v2621_v51 = vadd.f32 1.0, %v8359_v38  ;;  %v2176_v14 = vadd.f32 %v11791_v8, %v12063_v1 }
 0x313   : > { %v8363_v43 = vpop.eup %8362  ;;  %v2534_v6 = vmul.f32 1.442695, %v2433_v57  ;;  %v15825_v47 = vmax.f32 %v11960_v5, 0.0  ;;  %8376 = vlog2.f32 %v2622_v56  ;;  %v2435_v26 = vsub.f32 0.0, %v2371_v20 }
 0x314   : > { %15824 = vst [vmem:[#allocation29_spill] sm:$0xff] %v12088_v49  ;;  %v8365_v44 = vpop.eup %8364  ;;  %v12095_v34 = vmul.f32 1.442695, %v2805_v54  ;;  %v2709_v45 = vmul.f32 0.6931472, %v8361_v48  ;;  %v2065_v8 = vadd.f32 %v11785_v37, %v12063_v1  ;;  %v2178_v20 = vadd.f32 %v11806_v59, %v12063_v1 }
 0x315   : > { %v2807_v60 = vadd.f32 %v2707_v25, %v15825_v47  ;;  %8378 = vpow2.f32 %v2534_v6  ;;  %v2372_v39 = vand.u32 2147483647, %v12086_v55  ;;  %v8367_v62 = vpop.eup %8366  ;;  %v2623_v38 = vadd.f32 1.0, %v8365_v44 }
 0x316   : > { %v2538_v57 = vmul.f32 1.442695, %v2435_v26  ;;  %v12098_v3 = vmul.f32 1.3862944, %v2176_v14  ;;  %v2713_v5 = vmul.f32 0.6931472, %v8363_v43  ;;  %8380 = vlog2.f32 %v2621_v51 }
 0x317   : > { %v2436_v25 = vsub.f32 0.0, %v2372_v39  ;;  %v12104_v54 = vmul.f32 1.442695, %v2807_v60  ;;  %v15826_v14 = vmax.f32 %v11964_v32, 0.0  ;;  %v2711_v26 = vmul.f32 0.6931472, %v8367_v62  ;;  %v12112_v39 = vpop.permute.xlu1 %1907 }
 0x318   : > { %v8369_v56 = vpop.eup %8368  ;;  %8382 = vpow2.f32 %v2538_v57  ;;  %v2374_v48 = vand.u32 2147483647, %v12098_v3  ;;  %v12110_v43 = vmul.f32 1.3862944, %v2065_v8  ;;  %15827 = vst [vmem:[#allocation132_spill] sm:$0xff] %v12112_v39  ;;  %v15828_v57 = vmax.f32 %v11972_v31, 0.0 }
 0x319   : > { %v8371_v44 = vpop.eup %8370  ;;  %v2808_v47 = vadd.f32 %v2709_v45, %v15826_v14  ;;  %v2540_v37 = vmul.f32 1.442695, %v2436_v25  ;;  %v2715_v59 = vmul.f32 0.6931472, %v8369_v56  ;;  %8384 = vlog2.f32 %v2623_v38  ;;  %v15829_v32 = vld [vmem:[#allocation109_spill] sm:$0xff]  ;;  %v15830_v14 = vld [vmem:[#allocation110_spill] sm:$0xff] }
 0x31a   : > { %v8373_v51 = vpop.eup %8372  ;;  %v2438_v60 = vsub.f32 0.0, %v2374_v48  ;;  %v12114_v52 = vmul.f32 1.3862944, %v2178_v20  ;;  %v2810_v1 = vadd.f32 %v2713_v5, %v15828_v57  ;;  %v2067_v62 = vadd.f32 %v15829_v32, %v12112_v39 }
 0x31b   : > { %v8375_v6 = vpop.eup %8374  ;;  %v2624_v7 = vadd.f32 1.0, %v8373_v51  ;;  %8386 = vpow2.f32 %v2540_v37  ;;  %v2373_v25 = vand.u32 2147483647, %v12110_v43  ;;  %v2180_v56 = vadd.f32 %v15830_v14, %v12112_v39 }
 0x31c   : > { %v2626_v45 = vadd.f32 1.0, %v8375_v6  ;;  %v2544_v8 = vmul.f32 1.442695, %v2438_v60  ;;  %v12123_v38 = vmul.f32 1.442695, %v2808_v47  ;;  %v15832_v20 = vmax.f32 %v11976_v24, 0.0 }
 0x31d   : > { %v2717_v49 = vmul.f32 0.6931472, %v8371_v44  ;;  %8388 = vlog2.f32 %v2624_v7  ;;  %v8377_v31 = vpop.eup %8376  ;;  %v15833_v5 = vmax.f32 %v12000_v16, 0.0  ;;  %v2437_v51 = vsub.f32 0.0, %v2373_v25 }
 0x31e   : > { %15831 = vst [vmem:[#allocation109_spill] sm:$0xff] %v12123_v38  ;;  %v2809_v48 = vadd.f32 %v2711_v26, %v15832_v20  ;;  %8390 = vlog2.f32 %v2626_v45  ;;  %v2375_v6 = vand.u32 2147483647, %v12114_v52  ;;  %v12130_v57 = vmul.f32 1.442695, %v2810_v1 }
 0x31f   : > { %v2811_v37 = vadd.f32 %v2715_v59, %v15833_v5  ;;  %v8379_v60 = vpop.eup %8378  ;;  %8392 = vpow2.f32 %v2544_v8  ;;  %v12133_v47 = vmul.f32 1.3862944, %v2067_v62  ;;  %v2542_v26 = vmul.f32 1.442695, %v2437_v51  ;;  %v15836_v59 = vld [vmem:[#allocation111_spill] sm:$0xff] }
 0x320   : > { %15834 = vst [vmem:[#allocation110_spill] sm:$0xff] %v12130_v57  ;;  %v2625_v24 = vadd.f32 1.0, %v8379_v60  ;;  %v2439_v44 = vsub.f32 0.0, %v2375_v6  ;;  %v12135_v7 = vmul.f32 1.3862944, %v2180_v56  ;;  %v8381_v14 = vpop.eup %8380  ;;  %v15835_v62 = vmax.f32 %v12002_v2, 0.0 }
 0x321   : > { %v12137_v16 = vmul.f32 1.442695, %v2809_v48  ;;  %v2376_v1 = vand.u32 2147483647, %v12133_v47  ;;  %v12142_v20 = vmul.f32 1.442695, %v2811_v37  ;;  %v2069_v32 = vadd.f32 %v15836_v59, %v12112_v39 }
 0x322   : > { %v8383_v25 = vpop.eup %8382  ;;  %v2812_v8 = vadd.f32 %v2717_v49, %v15835_v62  ;;  %8394 = vlog2.f32 %v2625_v24  ;;  %v2546_v5 = vmul.f32 1.442695, %v2439_v44  ;;  %v2721_v51 = vmul.f32 0.6931472, %v8377_v31  ;;  %v15837_v2 = vld [vmem:[#allocation112_spill] sm:$0xff]  ;;  %v15838_v24 = vld [vmem:[#allocation102_spill] sm:$0xff] }
 0x323   : > { %v2627_v56 = vadd.f32 1.0, %v8383_v25  ;;  %8396 = vpow2.f32 %v2542_v26  ;;  %v2440_v6 = vsub.f32 0.0, %v2376_v1  ;;  %v8385_v48 = vpop.eup %8384  ;;  %v2378_v45 = vand.u32 2147483647, %v12135_v7  ;;  %v15839_v59 = vld [vmem:[#allocation108_spill] sm:$0xff] }
 0x324   : > { %8398 = vpow2.f32 %v2546_v5  ;;  %v2719_v57 = vmul.f32 0.6931472, %v8381_v14  ;;  %v2182_v49 = vadd.f32 %v15837_v2, %v12112_v39  ;;  %v2909_v31 = vpack.c.bf16 %v11859_v28, %v15838_v24  ;;  %v12171_v24 = vpop.permute.xlu0 %1912 }
 0x325   : > { %v8387_v37 = vpop.eup %8386  ;;  %v2548_v38 = vmul.f32 1.442695, %v2440_v6  ;;  %8400 = vlog2.f32 %v2627_v56  ;;  %v2442_v44 = vsub.f32 0.0, %v2378_v45  ;;  %v12154_v1 = vmul.f32 1.3862944, %v2069_v32  ;;  %v15840_v6 = vld [vmem:[#allocation105_spill] sm:$0xff] }
 0x326   : > { %v2628_v26 = vadd.f32 1.0, %v8387_v37  ;;  %v2723_v62 = vmul.f32 0.6931472, %v8385_v48  ;;  %v12156_v5 = vmul.f32 1.3862944, %v2182_v49  ;;  %3068 = vmatprep.subr.bf16.mxu0 %v2909_v31  ;;  %v2911_v14 = vpack.c.bf16 %v11869_v21, %v15839_v59  ;;  %v15843_v21 = vld [vmem:[#allocation107_spill] sm:$0xff] }
 0x327   : > { %v8389_v25 = vpop.eup %8388  ;;  %v2908_v60 = vpack.c.bf16 %v11853_v46, %v15840_v6  ;;  %v12162_v39 = vmul.f32 1.442695, %v2812_v8  ;;  %v15841_v28 = vmax.f32 %v12006_v36, 0.0  ;;  %8402 = vpow2.f32 %v2548_v38  ;;  %15844 = vst [vmem:[#allocation111_spill] sm:$0xff] %v12171_v24 }
 0x328   : > { %v8391_v2 = vpop.eup %8390  ;;  %v2552_v32 = vmul.f32 1.442695, %v2442_v44  ;;  %v15842_v48 = vmax.f32 %v12022_v10, 0.0  ;;  %8404 = vlog2.f32 %v2628_v26  ;;  %v2377_v49 = vand.u32 2147483647, %v12154_v1  ;;  %3181 = vmatprep.subr.bf16.mxu1 %v2911_v14 }
 0x329   : > { %v2814_v56 = vadd.f32 %v2721_v51, %v15841_v28  ;;  %v8393_v45 = vpop.eup %8392  ;;  %3069 = vmatpush1.bf16.msra.mxu0 %v2908_v60  ;;  %v2910_v46 = vpack.c.bf16 %v11855_v9, %v15843_v21  ;;  %v2725_v8 = vmul.f32 0.6931472, %v8389_v25  ;;  %v2379_v36 = vand.u32 2147483647, %v12156_v5  ;;  %v15847_v60 = vld [vmem:[#allocation115_spill] sm:$0xff] }
 0x32a   : > { %v2813_v37 = vadd.f32 %v2719_v57, %v15842_v48  ;;  %v2630_v31 = vadd.f32 1.0, %v8393_v45  ;;  %8406 = vpow2.f32 %v2552_v32  ;;  %v15845_v38 = vmax.f32 %v12031_v18, 0.0  ;;  %v15846_v57 = vld [vmem:[#allocation113_spill] sm:$0xff] }
 0x32b   : > { %v2441_v10 = vsub.f32 0.0, %v2377_v49  ;;  %3182 = vmatpush1.bf16.msra.mxu1 %v2910_v46  ;;  %v2073_v26 = vadd.f32 %v15846_v57, %v12171_v24  ;;  %v2186_v44 = vadd.f32 %v15847_v60, %v12171_v24  ;;  %v12180_v9 = vmul.f32 1.442695, %v2814_v56 }
 0x32c   : > { %v2815_v51 = vadd.f32 %v2723_v62, %v15845_v38  ;;  %v8395_v59 = vpop.eup %8394  ;;  %v2729_v14 = vmul.f32 0.6931472, %v8391_v2  ;;  %8408 = vlog2.f32 %v2630_v31  ;;  %v2443_v25 = vsub.f32 0.0, %v2379_v36 }
 0x32d   : > { %15848 = vst [vmem:[#allocation112_spill] sm:$0xff] %v12180_v9  ;;  %v8397_v6 = vpop.eup %8396  ;;  %v12182_v28 = vmul.f32 1.442695, %v2813_v37  ;;  %v2550_v32 = vmul.f32 1.442695, %v2441_v10  ;;  %v15849_v48 = vmax.f32 %v12043_v35, 0.0 }
 0x32e   : > { %v8399_v45 = vpop.eup %8398  ;;  %v2629_v21 = vadd.f32 1.0, %v8397_v6  ;;  %v2554_v46 = vmul.f32 1.442695, %v2443_v25  ;;  %v12188_v38 = vmul.f32 1.3862944, %v2073_v26  ;;  %v15850_v37 = vld [vmem:[#allocation114_spill] sm:$0xff] }
 0x32f   : > { %v2816_v49 = vadd.f32 %v2725_v8, %v15849_v48  ;;  %v12190_v56 = vmul.f32 1.442695, %v2815_v51  ;;  %8410 = vpow2.f32 %v2550_v32  ;;  %v12192_v2 = vmul.f32 1.3862944, %v2186_v44  ;;  %v8401_v36 = vpop.eup %8400  ;;  %v15852_v8 = vld [vmem:[#allocation117_spill] sm:$0xff]  ;;  %v12203_v32 = vpop.permute.xlu1 %1917 }
 0x330   : > { %v2075_v31 = vadd.f32 %v15850_v37, %v12171_v24  ;;  %v15851_v57 = vmax.f32 %v12045_v58, 0.0  ;;  %v2380_v35 = vand.u32 2147483647, %v12188_v38  ;;  %v2188_v26 = vadd.f32 %v15852_v8, %v12171_v24  ;;  %15853 = vst [vmem:[#allocation102_spill] sm:$0xff] %v12203_v32 }
 0x331   : > { %v2727_v25 = vmul.f32 0.6931472, %v8395_v59  ;;  %8412 = vlog2.f32 %v2629_v21  ;;  %v2631_v51 = vadd.f32 1.0, %v8399_v45  ;;  %v2382_v44 = vand.u32 2147483647, %v12192_v2  ;;  %v8403_v6 = vpop.eup %8402  ;;  %v15855_v59 = vld [vmem:[#allocation116_spill] sm:$0xff] }
 0x332   : > { %v2818_v10 = vadd.f32 %v2729_v14, %v15851_v57  ;;  %v12205_v48 = vmul.f32 1.442695, %v2816_v49  ;;  %8414 = vpow2.f32 %v2554_v46  ;;  %v2444_v14 = vsub.f32 0.0, %v2380_v35  ;;  %v8405_v37 = vpop.eup %8404  ;;  %v15857_v49 = vld [vmem:[#allocation119_spill] sm:$0xff] }
 0x333   : > { %v2731_v57 = vmul.f32 0.6931472, %v8401_v36  ;;  %v2446_v60 = vsub.f32 0.0, %v2382_v44  ;;  %v12208_v62 = vmul.f32 1.3862944, %v2075_v31  ;;  %v2077_v21 = vadd.f32 %v15855_v59, %v12203_v32 }
 0x334   : > { %15854 = vst [vmem:[#allocation108_spill] sm:$0xff] %v12205_v48  ;;  %v8407_v45 = vpop.eup %8406  ;;  %v12212_v8 = vmul.f32 1.442695, %v2818_v10  ;;  %v2556_v18 = vmul.f32 1.442695, %v2444_v14  ;;  %v2190_v9 = vadd.f32 %v15857_v49, %v12203_v32  ;;  %v15858_v46 = vmax.f32 %v12061_v0, 0.0 }
 0x335   : > { %v12214_v24 = vmul.f32 1.3862944, %v2188_v26  ;;  %8416 = vlog2.f32 %v2631_v51  ;;  %v2632_v36 = vadd.f32 1.0, %v8403_v6  ;;  %v2560_v44 = vmul.f32 1.442695, %v2446_v60 }
 0x336   : > { %15856 = vst [vmem:[#allocation105_spill] sm:$0xff] %v12212_v8  ;;  %v2817_v35 = vadd.f32 %v2727_v25, %v15858_v46  ;;  %v8409_v31 = vpop.eup %8408  ;;  %v2634_v58 = vadd.f32 1.0, %v8407_v45  ;;  %8418 = vpow2.f32 %v2556_v18  ;;  %v2381_v59 = vand.u32 2147483647, %v12208_v62  ;;  %v15860_v45 = vld [vmem:[#allocation118_spill] sm:$0xff] }
 0x337   : > { %v2383_v10 = vand.u32 2147483647, %v12214_v24  ;;  %v15859_v14 = vmax.f32 %v12066_v63, 0.0  ;;  %v2733_v8 = vmul.f32 0.6931472, %v8405_v37  ;;  %8420 = vpow2.f32 %v2560_v44 }
 0x338   : > { %v12225_v49 = vmul.f32 1.3862944, %v2077_v21  ;;  %v2445_v0 = vsub.f32 0.0, %v2381_v59  ;;  %v12227_v51 = vmul.f32 1.3862944, %v2190_v9  ;;  %8422 = vlog2.f32 %v2632_v36 }
 0x339   : > { %v2819_v26 = vadd.f32 %v2731_v57, %v15859_v14  ;;  %v2447_v25 = vsub.f32 0.0, %v2383_v10  ;;  %v8411_v60 = vpop.eup %8410  ;;  %v2737_v6 = vmul.f32 0.6931472, %v8409_v31  ;;  %v2079_v46 = vadd.f32 %v15860_v45, %v12203_v32 }
 0x33a   : > { %v2384_v18 = vand.u32 2147483647, %v12225_v49  ;;  %8424 = vlog2.f32 %v2634_v58  ;;  %v2633_v63 = vadd.f32 1.0, %v8411_v60  ;;  %v2558_v37 = vmul.f32 1.442695, %v2445_v0  ;;  %v15862_v58 = vld [vmem:[#allocation120_spill] sm:$0xff] }
 0x33b   : > { %v2562_v57 = vmul.f32 1.442695, %v2447_v25  ;;  %v8413_v14 = vpop.eup %8412  ;;  %v12232_v21 = vmul.f32 1.442695, %v2817_v35  ;;  %v15861_v44 = vmax.f32 %v12086_v55, 0.0  ;;  %v2192_v60 = vadd.f32 %v15862_v58, %v12203_v32 }
 0x33c   : > { %v2448_v10 = vsub.f32 0.0, %v2384_v18  ;;  %v8415_v31 = vpop.eup %8414  ;;  %8426 = vlog2.f32 %v2633_v63  ;;  %v2386_v36 = vand.u32 2147483647, %v12227_v51  ;;  %v12238_v48 = vmul.f32 1.3862944, %v2079_v46 }
 0x33d   : > { %v2820_v59 = vadd.f32 %v2733_v8, %v15861_v44  ;;  %v12242_v0 = vmul.f32 1.442695, %v2819_v26  ;;  %v2635_v25 = vadd.f32 1.0, %v8415_v31  ;;  %8428 = vpow2.f32 %v2558_v37 }
 0x33e   : > { %v2564_v35 = vmul.f32 1.442695, %v2448_v10  ;;  %v15863_v55 = vmax.f32 %v12098_v3, 0.0  ;;  %v2317_v45 = vmax.f32 %v12208_v62, 0.0  ;;  %8430 = vpow2.f32 %v2562_v57 }
 0x33f   : > { %v2450_v18 = vsub.f32 0.0, %v2386_v36  ;;  %v8417_v63 = vpop.eup %8416  ;;  %v2735_v44 = vmul.f32 0.6931472, %v8413_v14  ;;  %8432 = vlog2.f32 %v2635_v25  ;;  %v2385_v9 = vand.u32 2147483647, %v12238_v48 }
 0x340   : > { %v2822_v8 = vadd.f32 %v2737_v6, %v15863_v55  ;;  %v8419_v58 = vpop.eup %8418  ;;  %v12249_v26 = vmul.f32 1.442695, %v2820_v59  ;;  %8434 = vpow2.f32 %v2564_v35  ;;  %v12251_v10 = vmul.f32 1.3862944, %v2192_v60  ;;  %v12262_v6 = vpop.permute.xlu0 %1922 }
 0x341   : > { %v2568_v37 = vmul.f32 1.442695, %v2450_v18  ;;  %v2636_v3 = vadd.f32 1.0, %v8419_v58  ;;  %v2449_v31 = vsub.f32 0.0, %v2385_v9  ;;  %v2913_v57 = vpack.c.bf16 %v11949_v12, %v11921_v13  ;;  %v8421_v14 = vpop.eup %8420  ;;  %15865 = vst [vmem:[#allocation107_spill] sm:$0xff] %v12262_v6 }
 0x342   : > { %v12256_v36 = vmul.f32 1.442695, %v2822_v8  ;;  %v2387_v59 = vand.u32 2147483647, %v12251_v10  ;;  %v8423_v55 = vpop.eup %8422  ;;  %v15864_v35 = vmax.f32 %v12110_v43, 0.0  ;;  %v2638_v58 = vadd.f32 1.0, %v8421_v14 }
 0x343   : > { %8436 = vpow2.f32 %v2568_v37  ;;  %v2739_v18 = vmul.f32 0.6931472, %v8417_v63  ;;  %v2566_v46 = vmul.f32 1.442695, %v2449_v31  ;;  %3070 = vmatprep.subr.bf16.mxu0 %v2913_v57  ;;  %v2915_v12 = vpack.c.bf16 %v11978_v15, %v11923_v61  ;;  %v15866_v63 = vld [vmem:[#allocation122_spill] sm:$0xff]  ;;  %v15867_v37 = vld [vmem:[#allocation125_spill] sm:$0xff] }
 0x344   : > { %v2821_v60 = vadd.f32 %v2735_v44, %v15864_v35  ;;  %v8425_v9 = vpop.eup %8424  ;;  %8438 = vlog2.f32 %v2636_v3  ;;  %v2451_v13 = vsub.f32 0.0, %v2387_v59  ;;  %v2912_v8 = vpack.c.bf16 %v11927_v19, %v11911_v42  ;;  %v15868_v61 = vld [vmem:[#allocation123_spill] sm:$0xff] }
 0x345   : > { %8440 = vlog2.f32 %v2638_v58  ;;  %v2914_v43 = vpack.c.bf16 %v11939_v11, %v11913_v23  ;;  %v2083_v44 = vadd.f32 %v15866_v63, %v12262_v6  ;;  %v2196_v31 = vadd.f32 %v15867_v37, %v12262_v6  ;;  %3183 = vmatprep.subr.bf16.mxu1 %v2915_v12 }
 0x346   : > { %v8427_v57 = vpop.eup %8426  ;;  %v2741_v14 = vmul.f32 0.6931472, %v8423_v55  ;;  %8442 = vpow2.f32 %v2566_v46  ;;  %v2570_v3 = vmul.f32 1.442695, %v2451_v13  ;;  %3071 = vmatpush1.bf16.msra.mxu0 %v2912_v8  ;;  %v2085_v15 = vadd.f32 %v15868_v61, %v12262_v6 }
 0x347   : > { %v8429_v42 = vpop.eup %8428  ;;  %v15869_v19 = vmax.f32 %v12114_v52, 0.0  ;;  %v2745_v23 = vmul.f32 0.6931472, %v8425_v9  ;;  %3184 = vmatpush1.bf16.msra.mxu1 %v2914_v43  ;;  %v12278_v11 = vmul.f32 1.3862944, %v2083_v44  ;;  %v15870_v43 = vmax.f32 %v12133_v47, 0.0 }
 0x348   : > { %v12280_v35 = vmul.f32 1.3862944, %v2196_v31  ;;  %v8431_v58 = vpop.eup %8430  ;;  %v2637_v63 = vadd.f32 1.0, %v8429_v42  ;;  %8444 = vpow2.f32 %v2570_v3  ;;  %v12283_v55 = vmul.f32 1.3862944, %v2085_v15  ;;  %v12293_v3 = vpop.permute.xlu1 %1927 }
 0x349   : > { %v2823_v59 = vadd.f32 %v2739_v18, %v15869_v19  ;;  %v8433_v13 = vpop.eup %8432  ;;  %v12285_v12 = vmul.f32 1.442695, %v2821_v60  ;;  %v2639_v8 = vadd.f32 1.0, %v8431_v58  ;;  %v2388_v52 = vand.u32 2147483647, %v12278_v11  ;;  %15871 = vst [vmem:[#allocation113_spill] sm:$0xff] %v12293_v3 }
 0x34a   : > { %v2198_v18 = vadd.f32 %v11893_v40, %v12262_v6  ;;  %v8435_v9 = vpop.eup %8434  ;;  %v2824_v44 = vadd.f32 %v2741_v14, %v15870_v43  ;;  %v2743_v37 = vmul.f32 0.6931472, %v8427_v57  ;;  %8446 = vlog2.f32 %v2637_v63 }
 0x34b   : > { %v2390_v31 = vand.u32 2147483647, %v12280_v35  ;;  %v15872_v61 = vmax.f32 %v12135_v7, 0.0  ;;  %8448 = vlog2.f32 %v2639_v8  ;;  %v2640_v15 = vadd.f32 1.0, %v8435_v9 }
 0x34c   : > { %v2452_v42 = vsub.f32 0.0, %v2388_v52  ;;  %v2747_v58 = vmul.f32 0.6931472, %v8433_v13  ;;  %v2389_v40 = vand.u32 2147483647, %v12283_v55  ;;  %v2087_v47 = vadd.f32 %v11907_v50, %v12293_v3 }
 0x34d   : > { %v2826_v60 = vadd.f32 %v2745_v23, %v15872_v61  ;;  %v8437_v19 = vpop.eup %8436  ;;  %v2454_v46 = vsub.f32 0.0, %v2390_v31  ;;  %8450 = vlog2.f32 %v2640_v15  ;;  %v12300_v63 = vmul.f32 1.3862944, %v2198_v18 }
 0x34e   : > { %v2642_v57 = vadd.f32 1.0, %v8437_v19  ;;  %v2572_v14 = vmul.f32 1.442695, %v2452_v42  ;;  %v8439_v43 = vpop.eup %8438  ;;  %v12302_v25 = vmul.f32 1.442695, %v2823_v59  ;;  %v15873_v23 = vmax.f32 %v12154_v1, 0.0 }
 0x34f   : > { %v12304_v7 = vmul.f32 1.442695, %v2824_v44  ;;  %v2576_v13 = vmul.f32 1.442695, %v2454_v46  ;;  %v8441_v52 = vpop.eup %8440  ;;  %v2453_v9 = vsub.f32 0.0, %v2389_v40  ;;  %v2200_v50 = vadd.f32 %v11909_v30, %v12293_v3 }
 0x350   : > { %v2825_v8 = vadd.f32 %v2743_v37, %v15873_v23  ;;  %8452 = vlog2.f32 %v2642_v57  ;;  %v2391_v31 = vand.u32 2147483647, %v12300_v63  ;;  %v8443_v61 = vpop.eup %8442  ;;  %v12311_v18 = vmul.f32 1.442695, %v2826_v60 }
 0x351   : > { %v15874_v59 = vmax.f32 %v12156_v5, 0.0  ;;  %8454 = vpow2.f32 %v2572_v14  ;;  %v12315_v44 = vmul.f32 1.3862944, %v2087_v47  ;;  %v2749_v1 = vmul.f32 0.6931472, %v8439_v43  ;;  %v15875_v43 = vld [vmem:[#allocation126_spill] sm:$0xff] }
 0x352   : > { %v2641_v37 = vadd.f32 1.0, %v8443_v61  ;;  %8456 = vpow2.f32 %v2576_v13  ;;  %v2574_v46 = vmul.f32 1.442695, %v2453_v9  ;;  %v8445_v42 = vpop.eup %8444  ;;  %v12317_v19 = vmul.f32 1.442695, %v2825_v8 }
 0x353   : > { %v2827_v15 = vadd.f32 %v2747_v58, %v15874_v59  ;;  %v2455_v57 = vsub.f32 0.0, %v2391_v31  ;;  %v2392_v30 = vand.u32 2147483647, %v12315_v44  ;;  %v2753_v60 = vmul.f32 0.6931472, %v8441_v52 }
 0x354   : > { %8458 = vlog2.f32 %v2641_v37  ;;  %v2643_v23 = vadd.f32 1.0, %v8445_v42  ;;  %v12321_v5 = vmul.f32 1.3862944, %v2200_v50  ;;  %v8447_v58 = vpop.eup %8446  ;;  %v2089_v13 = vadd.f32 %v15875_v43, %v12293_v3  ;;  %v15877_v42 = vld [vmem:[#allocation73_spill] sm:$0xff] }
 0x355   : > { %v12323_v47 = vmul.f32 1.442695, %v2827_v15  ;;  %8460 = vpow2.f32 %v2574_v46  ;;  %v2456_v14 = vsub.f32 0.0, %v2392_v30  ;;  %v8449_v8 = vpop.eup %8448  ;;  %v15876_v9 = vmax.f32 %v12188_v38, 0.0  ;;  %v15879_v38 = vld [vmem:[#allocation127_spill] sm:$0xff] }
 0x356   : > { %v2751_v31 = vmul.f32 0.6931472, %v8447_v58  ;;  %8462 = vlog2.f32 %v2643_v23  ;;  %v2394_v52 = vand.u32 2147483647, %v12321_v5  ;;  %v2578_v59 = vmul.f32 1.442695, %v2455_v57 }
 0x357   : > { %v2828_v61 = vadd.f32 %v2749_v1, %v15876_v9  ;;  %v2580_v37 = vmul.f32 1.442695, %v2456_v14  ;;  %v12330_v50 = vmul.f32 1.3862944, %v2089_v13  ;;  %v12334_v15 = vadd.f32 %v11932_v4, %v15877_v42  ;;  %v8451_v46 = vpop.eup %8450 }
 0x358   : > { %v15878_v30 = vmax.f32 %v12192_v2, 0.0  ;;  %v2458_v40 = vsub.f32 0.0, %v2394_v52  ;;  %v2202_v1 = vadd.f32 %v15879_v38, %v12293_v3  ;;  %v2917_v23 = vpack.c.bf16 %v12052_v29, %v12015_v22 }
 0x359   : > { %v2829_v57 = vadd.f32 %v2751_v31, %v2317_v45  ;;  %v2755_v58 = vmul.f32 0.6931472, %v8449_v8  ;;  %v2757_v14 = vmul.f32 0.6931472, %v8451_v46  ;;  %8464 = vpow2.f32 %v2580_v37 }
 0x35a   : > { %v2830_v43 = vadd.f32 %v2753_v60, %v15878_v30  ;;  %v8453_v13 = vpop.eup %8452  ;;  %v12344_v4 = vmul.f32 1.442695, %v2828_v61  ;;  %v2584_v9 = vmul.f32 1.442695, %v2458_v40  ;;  %v2393_v2 = vand.u32 2147483647, %v12330_v50  ;;  %3072 = vmatprep.subr.bf16.mxu0 %v2917_v23 }
 0x35b   : > { %v2919_v60 = vpack.c.bf16 %v12077_v33, %v12024_v41  ;;  %v8455_v52 = vpop.eup %8454  ;;  %v15880_v42 = vmax.f32 %v12225_v49, 0.0  ;;  %v2761_v29 = vmul.f32 0.6931472, %v8453_v13  ;;  %8466 = vpow2.f32 %v2578_v59  ;;  %v15883_v23 = vld [vmem:[#allocation129_spill] sm:$0xff] }
 0x35c   : > { %v12351_v62 = vmul.f32 1.3862944, %v2202_v1  ;;  %v8457_v45 = vpop.eup %8456  ;;  %v2644_v8 = vadd.f32 1.0, %v8455_v52  ;;  %8468 = vpow2.f32 %v2584_v9  ;;  %v2457_v61 = vsub.f32 0.0, %v2393_v2 }
 0x35d   : > { %v2832_v22 = vadd.f32 %v2757_v14, %v15880_v42  ;;  %3185 = vmatprep.subr.bf16.mxu1 %v2919_v60  ;;  %v2916_v40 = vpack.c.bf16 %v12037_v53, %v11980_v17  ;;  %v12355_v31 = vmul.f32 1.442695, %v2830_v43  ;;  %v12357_v37 = vmul.f32 1.442695, %v2829_v57  ;;  %v15884_v14 = vld [vmem:[#allocation131_spill] sm:$0xff]  ;;  %v15886_v42 = vld [vmem:[#allocation109_spill] sm:$0xff] }
 0x35e   : > { %v15881_v41 = vmax.f32 %v12214_v24, 0.0  ;;  %v15882_v49 = vmax.f32 %v12227_v51, 0.0  ;;  %v8459_v46 = vpop.eup %8458  ;;  %v2646_v30 = vadd.f32 1.0, %v8457_v45  ;;  %v2582_v38 = vmul.f32 1.442695, %v2457_v61  ;;  %v15888_v45 = vld [vmem:[#allocation110_spill] sm:$0xff] }
 0x35f   : > { %v2395_v1 = vand.u32 2147483647, %v12351_v62  ;;  %3073 = vmatpush1.bf16.msra.mxu0 %v2916_v40  ;;  %v2918_v13 = vpack.c.bf16 %v15884_v14, %v15883_v23  ;;  %v8461_v17 = vpop.eup %8460  ;;  %v12366_v53 = vmul.f32 1.442695, %v2832_v22  ;;  %v2759_v43 = vmul.f32 0.6931472, %v8459_v46 }
 0x360   : > { %v2831_v33 = vadd.f32 %v2755_v58, %v15881_v41  ;;  %v2834_v59 = vadd.f32 %v2761_v29, %v15882_v49  ;;  %8470 = vlog2.f32 %v2644_v8  ;;  %v2921_v24 = vpack.c.bf16 %v12137_v16, %v12095_v34  ;;  %v8463_v57 = vpop.eup %8462  ;;  %v15887_v29 = vld [vmem:[#allocation29_spill] sm:$0xff] }
 0x361   : > { %8472 = vpow2.f32 %v2582_v38  ;;  %v2459_v58 = vsub.f32 0.0, %v2395_v1  ;;  %3186 = vmatpush1.bf16.msra.mxu1 %v2918_v13  ;;  %v2923_v9 = vpack.c.bf16 %v12142_v20, %v12104_v54  ;;  %v15885_v2 = vmax.f32 %v12238_v48, 0.0  ;;  %v15892_v38 = vld [vmem:[#allocation105_spill] sm:$0xff] }
 0x362   : > { %v12370_v51 = vmul.f32 1.442695, %v2834_v59  ;;  %v2763_v52 = vmul.f32 0.6931472, %v8463_v57  ;;  %3074 = vmatprep.subr.bf16.mxu0 %v2921_v24  ;;  %v2920_v22 = vpack.c.bf16 %v15886_v42, %v12082_v27  ;;  %v2922_v34 = vpack.c.bf16 %v15888_v45, %v15887_v29  ;;  %v15890_v27 = vld [vmem:[#allocation108_spill] sm:$0xff]  ;;  %v15904_v42 = vld [vmem:[#allocation66_spill] sm:$0xff] }
 0x363   : > { %v2833_v60 = vadd.f32 %v2759_v43, %v15885_v2  ;;  %8474 = vlog2.f32 %v2646_v30  ;;  %v2645_v16 = vadd.f32 1.0, %v8461_v17  ;;  %v2586_v8 = vmul.f32 1.442695, %v2459_v58  ;;  %3187 = vmatprep.subr.bf16.mxu1 %v2923_v9  ;;  %v8465_v40 = vpop.eup %8464  ;;  %v15891_v30 = vld [vmem:[#allocation112_spill] sm:$0xff]  ;;  %v15902_v2 = vld [vmem:[#allocation74_spill] sm:$0xff]  ;;  %v15905_v29 = vld [vmem:[#allocation97_spill] sm:$0xff] }
 0x364   : > { %v2925_v61 = vpack.c.bf16 %v12232_v21, %v12182_v28  ;;  %v15889_v20 = vmax.f32 %v12251_v10, 0.0  ;;  %3075 = vmatpush1.bf16.msra.mxu0 %v2920_v22  ;;  %v2927_v41 = vpack.c.bf16 %v12242_v0, %v12190_v56  ;;  %v2924_v49 = vpack.c.bf16 %v15890_v27, %v12162_v39  ;;  %v15899_v43 = vld [vmem:[#allocation40_spill] sm:$0xff] }
 0x365   : > { %v2897_v54 = vmul.f32 1.442695, %v2833_v60  ;;  %v2895_v59 = vmul.f32 1.442695, %v2831_v33  ;;  %v2648_v46 = vadd.f32 1.0, %v8465_v40  ;;  %3188 = vmatpush1.bf16.msra.mxu1 %v2922_v34  ;;  %v2926_v1 = vpack.c.bf16 %v15892_v38, %v15891_v30  ;;  %v8467_v21 = vpop.eup %8466  ;;  %v15903_v60 = vld [vmem:[#allocation92_spill] sm:$0xff] }
 0x366   : > { %v2835_v48 = vadd.f32 %v2763_v52, %v15889_v20  ;;  %3076 = vmatprep.subr.bf16.mxu0 %v2925_v61  ;;  %v2929_v28 = vpack.c.bf16 %v12317_v19, %v12285_v12  ;;  %8476 = vpow2.f32 %v2586_v8  ;;  %3189 = vmatprep.subr.bf16.mxu1 %v2927_v41  ;;  %v2931_v56 = vpack.c.bf16 %v12323_v47, %v12302_v25  ;;  %v8469_v0 = vpop.eup %8468  ;;  %v15908_v40 = vld [vmem:[#allocation22_spill] sm:$0xff]  ;;  %v15909_v41 = vld [vmem:[#allocation91_spill] sm:$0xff]  ;;  %v15910_v30 = vld [vmem:[#allocation33_spill] sm:$0xff] }
 0x367   : > { %v2928_v39 = vpack.c.bf16 %v12304_v7, %v12249_v26  ;;  %8478 = vlog2.f32 %v2648_v46  ;;  %v2930_v33 = vpack.c.bf16 %v12311_v18, %v12256_v36  ;;  %v2933_v23 = vpack.c.bf16 %v2897_v54, %v12357_v37  ;;  %v15893_v26 = vld [vmem:[#allocation36_spill] sm:$0xff]  ;;  %v15896_v18 = vld [vmem:[#allocation121_spill] sm:$0xff] }
 0x368   : > { %v2899_v10 = vmul.f32 1.442695, %v2835_v48  ;;  %v2932_v12 = vpack.c.bf16 %v12366_v53, %v12344_v4  ;;  %8480 = vlog2.f32 %v2645_v16  ;;  %v2650_v19 = vadd.f32 1.0, %v8469_v0  ;;  %3077 = vmatpush1.bf16.msra.mxu0 %v2924_v49  ;;  %v15894_v7 = vld [vmem:[#allocation60_spill] sm:$0xff]  ;;  %v15897_v4 = vld [vmem:[#allocation7_spill] sm:$0xff] }
 0x369   : > { %v2934_v25 = vpack.c.bf16 %v12370_v51, %v12355_v31  ;;  %v2647_v47 = vadd.f32 1.0, %v8467_v21  ;;  %3190 = vmatpush1.bf16.msra.mxu1 %v2926_v1  ;;  %3078 = vmatprep.subr.bf16.mxu0 %v2929_v28  ;;  %8482 = vpow2.f32 %v15893_v26  ;;  %v15895_v13 = vand.u32 2147483647, %v15894_v7  ;;  %v15900_v31 = vld [vmem:[#allocation55_spill] sm:$0xff] }
 0x36a   : > { %v2935_v14 = vpack.c.bf16 %v2899_v10, %v2895_v59  ;;  %v12407_v37 = vmul.f32 1.3862944, %v15896_v18  ;;  %v8471_v17 = vpop.eup %8470  ;;  %8484 = vlog2.f32 %v2650_v19  ;;  %3191 = vmatprep.subr.bf16.mxu1 %v2931_v56  ;;  %v15898_v53 = vmax.f32 %v15897_v4, 0.0  ;;  %v15901_v51 = vld [vmem:[#allocation95_spill] sm:$0xff] }
 0x36b   : > { %v4716_v36 = vsub.f32 0.0, %v15895_v13  ;;  %v12415_v57 = vmul.f32 0.6931472, %v15900_v31  ;;  %v4651_v58 = vand.u32 2147483647, %v15901_v51  ;;  %v8473_v9 = vpop.eup %8472  ;;  %8486 = vpow2.f32 %v15902_v2  ;;  %v15906_v16 = vld [vmem:[#allocation63_spill] sm:$0xff] }
 0x36c   : > { %v12412_v24 = vadd.f32 %v15899_v43, %v15898_v53  ;;  %v4819_v52 = vmul.f32 1.442695, %v15903_v60  ;;  %v4654_v22 = vand.u32 2147483647, %v15904_v42  ;;  %v12422_v45 = vmul.f32 1.3862944, %v15905_v29  ;;  %3079 = vmatpush1.bf16.msra.mxu0 %v2928_v39 }
 0x36d   : > { %v2649_v34 = vadd.f32 1.0, %v8473_v9  ;;  %v15907_v8 = vand.u32 2147483647, %v15906_v16  ;;  %v4647_v54 = vand.u32 2147483647, %v15908_v40  ;;  %v8475_v48 = vpop.eup %8474  ;;  %8488 = vlog2.f32 %v2647_v47  ;;  %3192 = vmatpush1.bf16.msra.mxu1 %v2930_v33  ;;  %3080 = vmatprep.subr.bf16.mxu0 %v2933_v23  ;;  %v15911_v28 = vld [vmem:[#allocation79_spill] sm:$0xff] }
 0x36e   : > { %v12428_v20 = vmul.f32 1.3862944, %v12334_v15  ;;  %v4573_v27 = vmax.f32 %v15909_v41, 0.0  ;;  %v4841_v49 = vmul.f32 1.442695, %v4716_v36  ;;  %3193 = vmatprep.subr.bf16.mxu1 %v2935_v14  ;;  %v4569_v38 = vmax.f32 %v15910_v30, 0.0 }
 0x36f   : > { %v4712_v61 = vsub.f32 0.0, %v15907_v8  ;;  %v4650_v59 = vand.u32 2147483647, %v12407_v37  ;;  %v2765_v46 = vmul.f32 0.6931472, %v8471_v17  ;;  %8490 = vlog2.f32 %v2649_v34 }
 0x370   : > { %v4715_v1 = vsub.f32 0.0, %v4651_v58  ;;  %v12434_v21 = vadd.f32 1.0, %v15911_v28  ;;  %8492 = vpow2.f32 %v4819_v52  ;;  %v4718_v15 = vsub.f32 0.0, %v4654_v22  ;;  %v8477_v56 = vpop.eup %8476  ;;  %3081 = vmatpush1.bf16.msra.mxu0 %v2932_v12 }
 0x371   : > { %v4653_v10 = vand.u32 2147483647, %v12422_v45  ;;  %v2324_v39 = vmax.f32 %v12278_v11, 0.0  ;;  %v4833_v0 = vmul.f32 1.442695, %v4712_v61  ;;  %v4711_v33 = vsub.f32 0.0, %v4647_v54  ;;  %v8479_v19 = vpop.eup %8478  ;;  %3194 = vmatpush1.bf16.msra.mxu1 %v2934_v25 }
 0x372   : > { %v4649_v23 = vand.u32 2147483647, %v12428_v20  ;;  %v2769_v14 = vmul.f32 0.6931472, %v8475_v48  ;;  %v2651_v47 = vadd.f32 1.0, %v8477_v56  ;;  %8494 = vpow2.f32 %v4841_v49  ;;  %v8481_v13 = vpop.eup %8480 }
 0x373   : > { %v4714_v26 = vsub.f32 0.0, %v4650_v59  ;;  %v2836_v36 = vadd.f32 %v2765_v46, %v2324_v39  ;;  %v2328_v18 = vmax.f32 %v12315_v44, 0.0  ;;  %v2773_v17 = vmul.f32 0.6931472, %v8479_v19  ;;  %v8483_v53 = vpop.eup %8482 }
 0x374   : > { %v4839_v4 = vmul.f32 1.442695, %v4715_v1  ;;  %v2326_v11 = vmax.f32 %v12280_v35, 0.0  ;;  %8496 = vlog2.f32 %v2651_v47  ;;  %v4845_v12 = vmul.f32 1.442695, %v4718_v15  ;;  %v8485_v31 = vpop.eup %8484  ;;  %v15914_v47 = vld [vmem:[#allocation93_spill] sm:$0xff] }
 0x375   : > { %v4717_v43 = vsub.f32 0.0, %v4653_v10  ;;  %v2840_v58 = vadd.f32 %v2773_v17, %v2328_v18  ;;  %8498 = vpow2.f32 %v4833_v0  ;;  %v4831_v9 = vmul.f32 1.442695, %v4711_v33  ;;  %v8487_v25 = vpop.eup %8486  ;;  %v15916_v18 = vld [vmem:[#allocation75_spill] sm:$0xff] }
 0x376   : > { %v4713_v2 = vsub.f32 0.0, %v4649_v23  ;;  %v2838_v60 = vadd.f32 %v2769_v14, %v2326_v11  ;;  %v2767_v52 = vmul.f32 0.6931472, %v8481_v13  ;;  %v2330_v22 = vmax.f32 %v12321_v5, 0.0 }
 0x377   : > { %v2777_v29 = vmul.f32 0.6931472, %v8485_v31  ;;  %v2900_v44 = vmul.f32 1.442695, %v2836_v36  ;;  %v2904_v34 = vmul.f32 1.442695, %v2840_v58  ;;  %8500 = vpow2.f32 %v4839_v4  ;;  %v8489_v61 = vpop.eup %8488 }
 0x378   : > { %v4837_v8 = vmul.f32 1.442695, %v4714_v26  ;;  %v2325_v35 = vmax.f32 %v12283_v55, 0.0  ;;  %8502 = vpow2.f32 %v4845_v12  ;;  %v4843_v48 = vmul.f32 1.442695, %v4717_v43  ;;  %v15912_v55 = vld [vmem:[#allocation47_spill] sm:$0xff] }
 0x379   : > { %v2842_v54 = vadd.f32 %v2777_v29, %v2330_v22  ;;  %v8491_v49 = vpop.eup %8490  ;;  %v2329_v59 = vmax.f32 %v12330_v50, 0.0  ;;  %v2936_v46 = vpack.c.bf16 %v2904_v34, %v2900_v44  ;;  %8504 = vpow2.f32 %v4831_v9  ;;  %v15915_v36 = vld [vmem:[#allocation21_spill] sm:$0xff]  ;;  %v15918_v44 = vld [vmem:[#allocation62_spill] sm:$0xff] }
 0x37a   : > { %v4835_v1 = vmul.f32 1.442695, %v4713_v2  ;;  %v8493_v28 = vpop.eup %8492  ;;  %v12444_v15 = vmul.f32 1.442695, %v2838_v60  ;;  %v2837_v5 = vadd.f32 %v2767_v52, %v2325_v35  ;;  %v2775_v56 = vmul.f32 0.6931472, %v8491_v49 }
 0x37b   : > { %v12446_v10 = vmul.f32 1.442695, %v2842_v54  ;;  %v2771_v39 = vmul.f32 0.6931472, %v8489_v61  ;;  %v12449_v0 = vmul.f32 1.442695, %v12412_v24  ;;  %8506 = vpow2.f32 %v4837_v8 }
 0x37c   : > { %v15913_v33 = vmax.f32 %v15912_v55, 0.0  ;;  %v8495_v50 = vpop.eup %8494  ;;  %v2841_v19 = vadd.f32 %v2775_v56, %v2329_v59  ;;  %v4889_v26 = vadd.f32 1.0, %v15914_v47  ;;  %8508 = vpow2.f32 %v4843_v48  ;;  %v15917_v12 = vld [vmem:[#allocation69_spill] sm:$0xff]  ;;  %v15926_v47 = vld [vmem:[#allocation64_spill] sm:$0xff] }
 0x37d   : > { %v2938_v14 = vpack.c.bf16 %v12446_v10, %v12444_v15  ;;  %v2327_v13 = vmax.f32 %v12300_v63, 0.0  ;;  %8510 = vlog2.f32 %v12434_v21  ;;  %v4580_v24 = vmax.f32 %v15915_v36, 0.0  ;;  %v7738_v35 = vld [vmem:[%s15089_s5] sm:$0xff]  }
 0x37e   : > { %v5074_v23 = vadd.f32 %v12415_v57, %v15913_v33  ;;  %v4896_v17 = vadd.f32 1.0, %v15916_v18  ;;  %v8497_v4 = vpop.eup %8496  ;;  %v2901_v11 = vmul.f32 1.442695, %v2837_v5  ;;  %v2905_v57 = vmul.f32 1.442695, %v2841_v19  ;;  %v15921_v5 = vld [vmem:[#allocation23_spill] sm:$0xff] }
 0x37f   : > { %v4901_v43 = vadd.f32 1.0, %v15917_v12  ;;  %8512 = vpow2.f32 %v4835_v1  ;;  %v8499_v31 = vpop.eup %8498  ;;  %v2839_v58 = vadd.f32 %v2771_v39, %v2327_v13  ;;  %v2331_v9 = vmax.f32 %v12351_v62, 0.0  ;;  %v15919_v62 = vld [vmem:[#allocation15_spill] sm:$0xff]  ;;  %v15922_v10 = vld [vmem:[#allocation70_spill] sm:$0xff]  ;;  %v15924_v39 = vld [vmem:[#allocation57_spill] sm:$0xff] }
 0x380   : > { %v2779_v2 = vmul.f32 0.6931472, %v8497_v4  ;;  %v4898_v60 = vadd.f32 1.0, %v8483_v53  ;;  %v2937_v52 = vpack.c.bf16 %v2905_v57, %v2901_v11  ;;  %v12463_v63 = vmul.f32 1.442695, %v5074_v23  ;;  %v15920_v53 = vld [vmem:[#allocation104_spill] sm:$0xff] }
 0x381   : > { %8514 = vlog2.f32 %v4889_v26  ;;  %v4895_v21 = vadd.f32 1.0, %v8487_v25  ;;  %v8501_v22 = vpop.eup %8500  ;;  %v4976_v34 = vmul.f32 0.6931472, %v15918_v44  ;;  %v4908_v8 = vadd.f32 1.0, %v8495_v50  ;;  %v15925_v33 = vld [vmem:[#allocation24_spill] sm:$0xff]  ;;  %v15929_v11 = vld [vmem:[#allocation103_spill] sm:$0xff] }
 0x382   : > { %v2843_v29 = vadd.f32 %v2779_v2, %v2331_v9  ;;  %8516 = vlog2.f32 %v4896_v17  ;;  %v8503_v61 = vpop.eup %8502  ;;  %3082 = vmatprep.subr.bf16.mxu0 %v2937_v52  ;;  %v4980_v54 = vmul.f32 0.6931472, %v15919_v62  ;;  %v5006_v48 = vmul.f32 0.6931472, %v15920_v53  ;;  %v15928_v17 = vld [vmem:[#allocation51_spill] sm:$0xff]  ;;  %v15939_v62 = vld [vmem:[#allocation77_spill] sm:$0xff] }
 0x383   : > { %v4897_v49 = vadd.f32 1.0, %v8493_v28  ;;  %8518 = vlog2.f32 %v4901_v43  ;;  %v8505_v59 = vpop.eup %8504  ;;  %v2903_v25 = vmul.f32 1.442695, %v2839_v58  ;;  %3083 = vmatpush1.bf16.msra.mxu0 %v2936_v46  ;;  %v4904_v15 = vadd.f32 1.0, %v8499_v31  ;;  %v15930_v31 = vld [vmem:[#allocation88_spill] sm:$0xff]  ;;  %v15931_v58 = vld [vmem:[#allocation87_spill] sm:$0xff] }
 0x384   : > { %v2907_v1 = vmul.f32 1.442695, %v2843_v29  ;;  %8520 = vlog2.f32 %v4898_v60  ;;  %v15923_v56 = vpack.c.bf16 %v15921_v5, %v15922_v10  ;;  %v5184_v55 = vpack.c.bf16 %v15924_v39, %v12449_v0  ;;  %v15933_v2 = vld [vmem:[#allocation19_spill] sm:$0xff]  ;;  %v15943_v10 = vld [vmem:[#allocation85_spill] sm:$0xff] }
 0x385   : > { %v4582_v23 = vmax.f32 %v15925_v33, 0.0  ;;  %8522 = vlog2.f32 %v4895_v21  ;;  %v4907_v50 = vadd.f32 1.0, %v8501_v22  ;;  %v8507_v19 = vpop.eup %8506  ;;  %v15927_v26 = vmax.f32 %v15926_v47, 0.0  ;;  %v15935_v21 = vld [vmem:[#allocation32_spill] sm:$0xff]  ;;  %v15936_v29 = vld [vmem:[#allocation35_spill] sm:$0xff]  ;;  %v15978_v36 = vld [vmem:[#allocation37_spill] sm:$0xff] }
 0x386   : > { %5199 = vmatprep.subr.bf16.mxu0 %v15923_v56  ;;  %v2939_v28 = vpack.c.bf16 %v2907_v1, %v2903_v25  ;;  %8524 = vlog2.f32 %v4908_v8  ;;  %v4910_v46 = vadd.f32 1.0, %v8503_v61  ;;  %v8509_v18 = vpop.eup %8508  ;;  %3101 = vmatmul.mubr.bf16.vlgmr.msra.gmra.mrb[32].mxu0 %v7738_v35  ;;  %v5186_v4 = vpack.c.bf16 %v15928_v17, %v12463_v63  ;;  %v15938_v61 = vld [vmem:[#allocation78_spill] sm:$0xff]  ;;  %v15942_v25 = vld [vmem:[#allocation76_spill] sm:$0xff] }
 0x387   : > { %v5071_v13 = vadd.f32 %v4976_v34, %v15927_v26  ;;  %v5000_v57 = vmul.f32 0.6931472, %v15929_v11  ;;  %8526 = vlog2.f32 %v4897_v49  ;;  %v4903_v12 = vadd.f32 1.0, %v8505_v59  ;;  %v8511_v43 = vpop.eup %8510  ;;  %v15941_v49 = vld [vmem:[#allocation99_spill] sm:$0xff] }
 0x388   : > { %3195 = vmatprep.subr.bf16.mxu1 %v2939_v28  ;;  %v15932_v9 = vpack.c.bf16 %v15930_v31, %v15931_v58  ;;  %v15934_v60 = vmax.f32 %v15933_v2, 0.0  ;;  %v4994_v22 = vmul.f32 0.6931472, %v15935_v21  ;;  %v15937_v44 = vmax.f32 %v15936_v29, 0.0  ;;  %v7739_v11 = vld [vmem:[%s15089_s5 + $0x8] sm:$0xff]   ;;  %v15948_v31 = vld [vmem:[#allocation101_spill] sm:$0xff] }
 0x389   : > { %8528 = vlog2.f32 %v4904_v15  ;;  %v8513_v8 = vpop.eup %8512  ;;  %3196 = vmatpush1.bf16.msra.mxu1 %v2938_v14  ;;  %v15940_v53 = vpack.c.bf16 %v15938_v61, %v15939_v62  ;;  %v4998_v59 = vmul.f32 0.6931472, %v15941_v49  ;;  %v5004_v1 = vmul.f32 0.6931472, %v15942_v25  ;;  %v15947_v15 = vld [vmem:[#allocation39_spill] sm:$0xff]  ;;  %v15950_v58 = vld [vmem:[#allocation25_spill] sm:$0xff] }
 0x38a   : > { %5200 = vmatpush1.bf16.msra.mxu0 %v15932_v9  ;;  %v5073_v52 = vadd.f32 %v4980_v54, %v15934_v60  ;;  %v5086_v34 = vadd.f32 %v5006_v48, %v15937_v44  ;;  %v4906_v5 = vadd.f32 1.0, %v8507_v19  ;;  %8530 = vlog2.f32 %v4907_v50  ;;  %v15944_v54 = vld [vmem:[#allocation86_spill] sm:$0xff]  ;;  %v15951_v2 = vld [vmem:[#allocation56_spill] sm:$0xff]  ;;  %v15953_v29 = vld [vmem:[#allocation31_spill] sm:$0xff] }
 0x38b   : > { %5201 = vmatprep.subr.bf16.mxu0 %v15940_v53  ;;  %v15945_v56 = vpack.c.bf16 %v15943_v10, %v15944_v54  ;;  %v15946_v28 = vmov 0   ;;  %v12499_v48 = vmul.f32 1.442695, %v5071_v13  ;;  %v4576_v14 = vmax.f32 %v15947_v15, 0.0  ;;  %v8515_v26 = vpop.eup %8514  ;;  %v15952_v13 = vld [vmem:[#allocation81_spill] sm:$0xff]  ;;  %v15957_v25 = vld [vmem:[#allocation28_spill] sm:$0xff] }
 0x38c   : > { %3110 = vmatprep.mubr.bf16.mxu0 %v15946_v28  ;;  %8532 = vlog2.f32 %v4910_v46  ;;  %v4909_v47 = vadd.f32 1.0, %v8509_v18  ;;  %v15949_v19 = vmax.f32 %v15948_v31, 0.0  ;;  %v5018_v9 = vmul.f32 0.6931472, %v15950_v58  ;;  %v8517_v21 = vpop.eup %8516  ;;  %3214 = vmatmul.mubr.bf16.vlgmr.msra.gmra.mrb[32].mxu1 %v7738_v35  ;;  %v15955_v18 = vld [vmem:[#allocation84_spill] sm:$0xff]  ;;  %v15958_v10 = vld [vmem:[#allocation34_spill] sm:$0xff] }
 0x38d   : > { %5312 = vmatprep.subr.bf16.mxu1 %v15945_v56  ;;  %v4578_v60 = vmax.f32 %v15951_v2, 0.0  ;;  %8534 = vlog2.f32 %v4903_v12  ;;  %v15954_v44 = vpack.c.bf16 %v15952_v13, %v15953_v29  ;;  %v12512_v46 = vmul.f32 1.442695, %v5073_v52  ;;  %v15960_v12 = vld [vmem:[#allocation58_spill] sm:$0xff]  ;;  %v15961_v35 = vld [vmem:[#allocation27_spill] sm:$0xff]  ;;  %v15963_v15 = vld [vmem:[#allocation89_spill] sm:$0xff]  ;;  %3223 = vmatprep.mubr.bf16.mxu1 %v15946_v28 }
 0x38e   : > { %v5083_v50 = vadd.f32 %v5000_v57, %v15949_v19  ;;  %v15956_v61 = vmax.f32 %v15955_v18, 0.0  ;;  %v12516_v53 = vmul.f32 1.442695, %v5086_v34  ;;  %v4905_v49 = vadd.f32 1.0, %v8513_v8  ;;  %v12518_v57 = vpop.eup %8518  ;;  %v15965_v8 = vld [vmem:[#allocation80_spill] sm:$0xff]  ;;  %v15966_v58 = vld [vmem:[#allocation30_spill] sm:$0xff]  ;;  %3111 = vmatmul.mubr.bf16.gmra.mrb[36].mxu0 %v7739_v11 }
 0x38f   : > { %5202 = vmatpush1.bf16.msra.mxu0 %v15954_v44  ;;  %v15959_v54 = vpack.c.bf16 %v15957_v25, %v15958_v10  ;;  %v15962_v56 = vpack.c.bf16 %v15960_v12, %v15961_v35  ;;  %v15964_v31 = vmax.f32 %v15963_v15, 0.0  ;;  %v4992_v19 = vmul.f32 0.6931472, %v8511_v43  ;;  %v8521_v34 = vpop.eup %8520  ;;  %v15968_v29 = vld [vmem:[#allocation67_spill] sm:$0xff]  ;;  %v15970_v25 = vld [vmem:[#allocation98_spill] sm:$0xff]  ;;  %v15972_v12 = vld [vmem:[#allocation44_spill] sm:$0xff]  ;;  %3120 = vmatprep.mubr.bf16.mxu0 %v15946_v28 }
 0x390   : > { %v5080_v62 = vadd.f32 %v4994_v22, %v15956_v61  ;;  %v5085_v22 = vadd.f32 %v5004_v1, %v4573_v27  ;;  %8536 = vlog2.f32 %v4906_v5  ;;  %v15967_v13 = vpack.c.bf16 %v15965_v8, %v15966_v58  ;;  %v15969_v18 = vld [vmem:[#allocation71_spill] sm:$0xff]  ;;  %v8523_v43 = vpop.eup %8522  ;;  %v15971_v1 = vld [vmem:[#allocation90_spill] sm:$0xff]  ;;  %v15981_v58 = vld [vmem:[#allocation45_spill] sm:$0xff] }
 0x391   : > { %5313 = vmatpush1.bf16.msra.mxu1 %v15959_v54  ;;  %5203 = vmatprep.subr.bf16.mxu0 %v15962_v56  ;;  %v5082_v52 = vadd.f32 %v4998_v59, %v15964_v31  ;;  %v5183_v44 = vpack.c.bf16 %v15968_v29, %v12499_v48  ;;  %v5022_v61 = vmul.f32 0.6931472, %v15969_v18  ;;  %v5016_v10 = vmul.f32 0.6931472, %v15970_v25  ;;  %v8525_v54 = vpop.eup %8524  ;;  %v15973_v35 = vld [vmem:[#allocation59_spill] sm:$0xff]  ;;  %v15975_v48 = vld [vmem:[#allocation65_spill] sm:$0xff] }
 0x392   : > { %5314 = vmatprep.subr.bf16.mxu1 %v15967_v13  ;;  %8538 = vlog2.f32 %v4909_v47  ;;  %v12538_v41 = vmul.f32 1.442695, %v5083_v50  ;;  %v5010_v27 = vmul.f32 0.6931472, %v8517_v21  ;;  %v5092_v59 = vadd.f32 %v5018_v9, %v4580_v24  ;;  %v15976_v31 = vld [vmem:[#allocation20_spill] sm:$0xff]  ;;  %v8527_v21 = vpop.eup %8526  ;;  %v15977_v8 = vld [vmem:[#allocation26_spill] sm:$0xff] }
 0x393   : > { %v4579_v5 = vmax.f32 %v15971_v1, 0.0  ;;  %v15974_v56 = vpack.c.bf16 %v15972_v12, %v15973_v35  ;;  %v5144_v15 = vmul.f32 1.442695, %v5080_v62  ;;  %8540 = vlog2.f32 %v4905_v49  ;;  %v15980_v9 = vld [vmem:[#allocation17_spill] sm:$0xff]  ;;  %v15983_v18 = vld [vmem:[#allocation48_spill] sm:$0xff]  ;;  %v8529_v62 = vpop.eup %8528  ;;  %v15986_v49 = vld [vmem:[#allocation42_spill] sm:$0xff] }
 0x394   : > { %v15979_v24 = vpack.c.bf16 %v15977_v8, %v15978_v36  ;;  %v15982_v13 = vpack.c.bf16 %v15980_v9, %v15981_v58  ;;  %v12556_v29 = vmul.f32 1.442695, %v5082_v52  ;;  %v15984_v25 = vmax.f32 %v15983_v18, 0.0  ;;  %v15988_v36 = vld [vmem:[#allocation53_spill] sm:$0xff]  ;;  %v8531_v52 = vpop.eup %8530  ;;  %3224 = vmatmul.mubr.bf16.gmra.mrb[36].mxu1 %v7739_v11 }
 0x395   : > { %5204 = vmatpush1.bf16.msra.mxu0 %v15974_v56  ;;  %v4996_v12 = vmul.f32 0.6931472, %v8515_v26  ;;  %v12560_v35 = vmul.f32 1.442695, %v5085_v22  ;;  %v15985_v56 = vld [vmem:[#allocation46_spill] sm:$0xff]  ;;  %v5094_v8 = vadd.f32 %v5022_v61, %v4582_v23  ;;  %v5091_v58 = vadd.f32 %v5016_v10, %v4579_v5  ;;  %v15993_v23 = vld [vmem:[#allocation61_spill] sm:$0xff]  ;;  %3233 = vmatprep.mubr.bf16.mxu1 %v15946_v28 }
 0x396   : > { %5315 = vmatpush1.bf16.msra.mxu1 %v15979_v24  ;;  %5205 = vmatprep.subr.bf16.mxu0 %v15982_v13  ;;  %v5079_v1 = vadd.f32 %v4992_v19, %v15984_v25  ;;  %v15987_v50 = vpack.c.bf16 %v15985_v56, %v15986_v49  ;;  %v4575_v24 = vmax.f32 %v15988_v36, 0.0  ;;  %v5008_v9 = vmul.f32 0.6931472, %v8523_v43  ;;  %v7740_v19 = vld [vmem:[%s15089_s5 + $0x10] sm:$0xff]   ;;  %v8533_v47 = vpop.eup %8532  ;;  %v15991_v56 = vld [vmem:[#allocation50_spill] sm:$0xff] }
 0x397   : > { %v5088_v26 = vadd.f32 %v5010_v27, %v4576_v14  ;;  %v5156_v22 = vmul.f32 1.442695, %v5092_v59  ;;  %v15989_v13 = vld [vmem:[#allocation52_spill] sm:$0xff]  ;;  %v5034_v25 = vmul.f32 0.6931472, %v8525_v54  ;;  %v5188_v61 = vpack.c.bf16 %v15993_v23, %v5144_v15  ;;  %v8535_v49 = vpop.eup %8534  ;;  %v15994_v36 = vld [vmem:[#allocation83_spill] sm:$0xff]  ;;  %3121 = vmatmul.mubr.bf16.gmra.mrb[40].mxu0 %v7740_v19 }
 0x398   : > { %5316 = vmatprep.subr.bf16.mxu1 %v15987_v50  ;;  %v4577_v18 = vmax.f32 %v15989_v13, 0.0  ;;  %v15990_v50 = vld [vmem:[#allocation54_spill] sm:$0xff]  ;;  %v5014_v43 = vmul.f32 0.6931472, %v8521_v34  ;;  %v4584_v10 = vmax.f32 %v15906_v16, 0.0  ;;  %v4588_v5 = vmax.f32 %v15894_v7, 0.0  ;;  %3130 = vmatprep.mubr.bf16.mxu0 %v15946_v28 }
 0x399   : > { %v15992_v33 = vpack.c.bf16 %v15990_v50, %v15991_v56  ;;  %v15995_v14 = vld [vmem:[#allocation82_spill] sm:$0xff]  ;;  %v5190_v11 = vpack.c.bf16 %v12516_v53, %v12556_v29  ;;  %v5143_v59 = vmul.f32 1.442695, %v5079_v1  ;;  %v5081_v34 = vadd.f32 %v4996_v12, %v4569_v38  ;;  %v15997_v16 = vld [vmem:[#allocation43_spill] sm:$0xff]  ;;  %v15998_v15 = vld [vmem:[#allocation49_spill] sm:$0xff] }
 0x39a   : > { %v15996_v27 = vpack.c.bf16 %v15994_v36, %v15995_v14  ;;  %v5026_v54 = vmul.f32 0.6931472, %v8529_v62  ;;  %v15999_v7 = vpack.c.bf16 %v15997_v16, %v15998_v15  ;;  %v12592_v13 = vmul.f32 1.442695, %v5094_v8  ;;  %v8537_v39 = vpop.eup %8536 }
 0x39b   : > { %5206 = vmatpush1.bf16.msra.mxu0 %v15992_v33  ;;  %v5087_v50 = vadd.f32 %v5008_v9, %v4575_v24  ;;  %v5155_v56 = vmul.f32 1.442695, %v5091_v58  ;;  %v5032_v0 = vmul.f32 0.6931472, %v8531_v52  ;;  %v5012_v53 = vmul.f32 0.6931472, %v8527_v21 }
 0x39c   : > { %5317 = vmatpush1.bf16.msra.mxu1 %v15996_v27  ;;  %5207 = vmatprep.subr.bf16.mxu0 %v5184_v55  ;;  %v5152_v55 = vmul.f32 1.442695, %v5088_v26  ;;  %v5020_v29 = vmul.f32 0.6931472, %v12518_v57  ;;  %v5100_v30 = vadd.f32 %v5034_v25, %v4588_v5  ;;  %v8539_v38 = vpop.eup %8538  ;;  %v5090_v1 = vadd.f32 %v5014_v43, %v4578_v60  ;;  %v16000_v24 = vld [vmem:[#allocation38_spill] sm:$0xff]  ;;  %v16001_v9 = vld [vmem:[#allocation41_spill] sm:$0xff] }
 0x39d   : > { %5318 = vmatprep.subr.bf16.mxu1 %v15999_v7  ;;  %v5038_v12 = vmul.f32 0.6931472, %v8533_v47  ;;  %v4587_v62 = vmax.f32 %v15901_v51, 0.0  ;;  %v5024_v8 = vmul.f32 0.6931472, %v8535_v49  ;;  %v16002_v58 = vpack.c.bf16 %v16000_v24, %v16001_v9  ;;  %v8541_v26 = vpop.eup %8540  ;;  %v7741_v33 = vld [vmem:[%s15089_s5 + $0x18] sm:$0xff]   ;;  %3234 = vmatmul.mubr.bf16.gmra.mrb[40].mxu1 %v7740_v19  ;;  %v12686_v24 = vpop.permute.xlu1 %2947 }
 0x39e   : > { %v5187_v21 = vpack.c.bf16 %v12538_v41, %v5143_v59  ;;  %v5145_v57 = vmul.f32 1.442695, %v5081_v34  ;;  %v5096_v52 = vadd.f32 %v5026_v54, %v4584_v10  ;;  %v5151_v2 = vmul.f32 1.442695, %v5087_v50  ;;  %3243 = vmatprep.mubr.bf16.mxu1 %v15946_v28  ;;  %16006 = vst [vmem:[#allocation114_spill] sm:$0xff] %v12686_v24 }
 0x39f   : > { %5208 = vmatpush1.bf16.msra.mxu0 %v5183_v44  ;;  %v4590_v44 = vmax.f32 %v15904_v42, 0.0  ;;  %v5030_v60 = vmul.f32 0.6931472, %v8537_v39  ;;  %v4583_v51 = vmax.f32 %v15908_v40, 0.0  ;;  %v5099_v47 = vadd.f32 %v5032_v0, %v4587_v62  ;;  %v7744_v0 = vld [vmem:[%s15089_s5 + $0x30] sm:$0xff]   ;;  %v7745_v39 = vld [vmem:[%s15089_s5 + $0x38] sm:$0xff]  }
 0x3a0   : > { %5319 = vmatpush1.bf16.msra.mxu1 %v16002_v58  ;;  %5209 = vmatprep.subr.bf16.mxu0 %v5188_v61  ;;  %v5192_v25 = vpack.c.bf16 %v5156_v22, %v5152_v55  ;;  %v5089_v41 = vadd.f32 %v5012_v53, %v4577_v18  ;;  %v5164_v23 = vmul.f32 1.442695, %v5100_v30  ;;  %v5036_v61 = vmul.f32 0.6931472, %v8539_v38  ;;  %v9342_v55 = vld [vmem:[%s15087_s3] sm:$0xff]   ;;  %v9343_v53 = vld [vmem:[%s15087_s3 + $0x8] sm:$0xff]  }
 0x3a1   : > { %5320 = vmatprep.subr.bf16.mxu1 %v5186_v4  ;;  %v5154_v42 = vmul.f32 1.442695, %v5090_v1  ;;  %v4586_v43 = vmax.f32 %v12407_v37, 0.0  ;;  %v5102_v63 = vadd.f32 %v5038_v12, %v4590_v44  ;;  %v5095_v17 = vadd.f32 %v5024_v8, %v4583_v51  ;;  %3131 = vmatmul.mubr.bf16.gmra.mrb[44].mxu0 %v7741_v33  ;;  %v9345_v30 = vld [vmem:[%s15087_s3 + $0x18] sm:$0xff]   ;;  %v9346_v38 = vld [vmem:[%s15087_s3 + $0x20] sm:$0xff]   ;;  %v9347_v1 = vld [vmem:[%s15087_s3 + $0x28] sm:$0xff]   ;;  %v12684_v8 = vpop.permute.xlu0 %2942  ;;  %v12695_v51 = vpop.permute.xlu1 %2957 }
 0x3a2   : > { %v16003_v4 = vpack.c.bf16 %v15975_v48, %v12512_v46  ;;  %v16004_v40 = vmax.f32 %v15976_v31, 0.0  ;;  %v5160_v10 = vmul.f32 1.442695, %v5096_v52  ;;  %v4589_v18 = vmax.f32 %v12422_v45, 0.0  ;;  %3140 = vmatprep.mubr.bf16.mxu0 %v15946_v28  ;;  %v9348_v12 = vld [vmem:[%s15087_s3 + $0x30] sm:$0xff]   ;;  %v9349_v62 = vld [vmem:[%s15087_s3 + $0x38] sm:$0xff]  }
 0x3a3   : > { %5210 = vmatpush1.bf16.msra.mxu0 %v5187_v21  ;;  %v5028_v5 = vmul.f32 0.6931472, %v8541_v26  ;;  %v5189_v19 = vpack.c.bf16 %v12560_v35, %v5145_v57  ;;  %v5191_v37 = vpack.c.bf16 %v5155_v56, %v5151_v2  ;;  %v5098_v49 = vadd.f32 %v5030_v60, %v4586_v43  ;;  %v7743_v56 = vld [vmem:[%s15089_s5 + $0x28] sm:$0xff]   ;;  %16005 = vst [vmem:[#allocation115_spill] sm:$0xff] %v12684_v8 }
 0x3a4   : > { %5321 = vmatpush1.bf16.msra.mxu1 %v16003_v4  ;;  %5211 = vmatprep.subr.bf16.mxu0 %v5192_v25  ;;  %v5093_v22 = vadd.f32 %v5020_v29, %v16004_v40  ;;  %v5163_v36 = vmul.f32 1.442695, %v5099_v47  ;;  %v5153_v14 = vmul.f32 1.442695, %v5089_v41  ;;  %v5196_v46 = vpack.c.bf16 %v5164_v23, %v5160_v10  ;;  %v9344_v29 = vld [vmem:[%s15087_s3 + $0x10] sm:$0xff]   ;;  %16008 = vst [vmem:[#allocation116_spill] sm:$0xff] %v12695_v51 }
 0x3a5   : > { %5322 = vmatprep.subr.bf16.mxu1 %v5190_v11  ;;  %v4585_v48 = vmax.f32 %v12428_v20, 0.0  ;;  %v5101_v27 = vadd.f32 %v5036_v61, %v4589_v18  ;;  %v5194_v31 = vpack.c.bf16 %v12592_v13, %v5154_v42  ;;  %v5166_v59 = vmul.f32 1.442695, %v5102_v63  ;;  %v7742_v20 = vld [vmem:[%s15089_s5 + $0x20] sm:$0xff]   ;;  %3244 = vmatmul.mubr.bf16.gmra.mrb[44].mxu1 %v7741_v33  ;;  %v12690_v44 = vpop.permute.xlu0 %2952 }
 0x3a6   : > { %v5159_v45 = vmul.f32 1.442695, %v5095_v17  ;;  %v5157_v35 = vmul.f32 1.442695, %v5093_v22  ;;  %v5162_v34 = vmul.f32 1.442695, %v5098_v49  ;;  %3253 = vmatprep.mubr.bf16.mxu1 %v15946_v28 }
 0x3a7   : > { %5212 = vmatpush1.bf16.msra.mxu0 %v5191_v37  ;;  %v5097_v11 = vadd.f32 %v5028_v5, %v4585_v48  ;;  %v5165_v15 = vmul.f32 1.442695, %v5101_v27  ;;  %16007 = vst [vmem:[#allocation117_spill] sm:$0xff] %v12690_v44 }
 0x3a8   : > { %5323 = vmatpush1.bf16.msra.mxu1 %v5189_v19  ;;  %5213 = vmatprep.subr.bf16.mxu0 %v5196_v46  ;;  %v5195_v54 = vpack.c.bf16 %v5163_v36, %v5159_v45  ;;  %v5193_v16 = vpack.c.bf16 %v5157_v35, %v5153_v14  ;;  %v5198_v7 = vpack.c.bf16 %v5166_v59, %v5162_v34 }
 0x3a9   : > { %5324 = vmatprep.subr.bf16.mxu1 %v5194_v31  ;;  %v5161_v13 = vmul.f32 1.442695, %v5097_v11  ;;  %3141 = vmatmul.mubr.bf16.gmra.mrb[48].mxu0 %v7742_v20  ;;  %v12712_v49 = vpop.permute.xlu0 %2962  ;;  %v12717_v31 = vpop.permute.xlu1 %2967 }
 0x3aa   : > { %3150 = vmatprep.mubr.bf16.mxu0 %v15946_v28  ;;  %16009 = vst [vmem:[#allocation119_spill] sm:$0xff] %v12712_v49  ;;  %16010 = vst [vmem:[#allocation118_spill] sm:$0xff] %v12717_v31 }
 0x3ab   : > { %5214 = vmatpush1.bf16.msra.mxu0 %v5195_v54  ;;  %v5197_v50 = vpack.c.bf16 %v5165_v15, %v5161_v13 }
 0x3ac   : > { %5325 = vmatpush1.bf16.msra.mxu1 %v5193_v16 }
 0x3ad   : > { %5326 = vmatprep.subr.bf16.mxu1 %v5198_v7  ;;  %3254 = vmatmul.mubr.bf16.gmra.mrb[48].mxu1 %v7742_v20 }
 0x3ae   : > { %3263 = vmatprep.mubr.bf16.mxu1 %v15946_v28 }
 0x3b0   : > { %5327 = vmatpush1.bf16.msra.mxu1 %v5197_v50 }
 0x3b1   : > { %3151 = vmatmul.mubr.bf16.gmra.mrb[52].mxu0 %v7743_v56 }
 0x3b2   : > { %3160 = vmatprep.mubr.bf16.mxu0 %v15946_v28 }
 0x3b5   : > { %3264 = vmatmul.mubr.bf16.gmra.mrb[52].mxu1 %v7743_v56 }
 0x3b6   : > { %3273 = vmatprep.mubr.bf16.mxu1 %v15946_v28 }
 0x3b9   : > { %3161 = vmatmul.mubr.bf16.gmra.mrb[56].mxu0 %v7744_v0 }
 0x3ba   : > { %3170 = vmatprep.mubr.bf16.mxu0 %v15946_v28 }
 0x3bd   : > { %3274 = vmatmul.mubr.bf16.gmra.mrb[56].mxu1 %v7744_v0 }
 0x3be   : > { %3283 = vmatprep.mubr.bf16.mxu1 %v15946_v28 }
 0x3c1   : > { %3171 = vmatmul.mubr.bf16.gmra.mrb[60].mxu0 %v7745_v39 }
 0x3c2   : > { %5231 = vmatprep.mubr.bf16.mxu0 %v15946_v28 }
 0x3c5   : > { %3284 = vmatmul.mubr.bf16.gmra.mrb[60].mxu1 %v7745_v39 }
 0x3c6   : > { %5344 = vmatprep.mubr.bf16.mxu1 %v15946_v28 }
 0x3c9   : > { %5232 = vmatmul.mubr.bf16.vlgmr.msra.gmra.mrb[64].mxu0 %v9342_v55 }
 0x3ca   : > { %5241 = vmatprep.mubr.bf16.mxu0 %v15946_v28 }
 0x3cd   : > { %5345 = vmatmul.mubr.bf16.vlgmr.msra.gmra.mrb[64].mxu1 %v9342_v55 }
 0x3ce   : > { %5354 = vmatprep.mubr.bf16.mxu1 %v15946_v28 }
 0x3d1   : > { %5242 = vmatmul.mubr.bf16.gmra.mrb[68].mxu0 %v9343_v53 }
 0x3d2   : > { %5251 = vmatprep.mubr.bf16.mxu0 %v15946_v28 }
 0x3d5   : > { %5355 = vmatmul.mubr.bf16.gmra.mrb[68].mxu1 %v9343_v53 }
 0x3d6   : > { %5364 = vmatprep.mubr.bf16.mxu1 %v15946_v28 }
 0x3d9   : > { %5252 = vmatmul.mubr.bf16.gmra.mrb[72].mxu0 %v9344_v29 }
 0x3da   : > { %5261 = vmatprep.mubr.bf16.mxu0 %v15946_v28 }
 0x3dd   : > { %5365 = vmatmul.mubr.bf16.gmra.mrb[72].mxu1 %v9344_v29  ;;  %v12732_v29 = vpop.permute.xlu0 %2972 }
 0x3de   : > { %5374 = vmatprep.mubr.bf16.mxu1 %v15946_v28  ;;  %16011 = vst [vmem:[#allocation120_spill] sm:$0xff] %v12732_v29 }
 0x3e1   : > { %5262 = vmatmul.mubr.bf16.gmra.mrb[76].mxu0 %v9345_v30 }
 0x3e2   : > { %5271 = vmatprep.mubr.bf16.mxu0 %v15946_v28 }
 0x3e5   : > { %5375 = vmatmul.mubr.bf16.gmra.mrb[76].mxu1 %v9345_v30 }
 0x3e6   : > { %5384 = vmatprep.mubr.bf16.mxu1 %v15946_v28 }
 0x3e9   : > { %5272 = vmatmul.mubr.bf16.gmra.mrb[80].mxu0 %v9346_v38 }
 0x3ea   : > { %5281 = vmatprep.mubr.bf16.mxu0 %v15946_v28 }
 0x3ed   : > { %5385 = vmatmul.mubr.bf16.gmra.mrb[80].mxu1 %v9346_v38 }
 0x3ee   : > { %5394 = vmatprep.mubr.bf16.mxu1 %v15946_v28 }
 0x3f1   : > { %5282 = vmatmul.mubr.bf16.gmra.mrb[84].mxu0 %v9347_v1 }
 0x3f2   : > { %5291 = vmatprep.mubr.bf16.mxu0 %v15946_v28 }
 0x3f5   : > { %5395 = vmatmul.mubr.bf16.gmra.mrb[84].mxu1 %v9347_v1 }
 0x3f6   : > { %5404 = vmatprep.mubr.bf16.mxu1 %v15946_v28 }
 0x3f9   : > { %5292 = vmatmul.mubr.bf16.gmra.mrb[88].mxu0 %v9348_v12 }
 0x3fa   : > { %5301 = vmatprep.mubr.bf16.mxu0 %v15946_v28 }
 0x3fd   : > { %5405 = vmatmul.mubr.bf16.gmra.mrb[88].mxu1 %v9348_v12  ;;  %v12736_v12 = vpop.permute.xlu1 %2977 }
 0x3fe   : > { %5414 = vmatprep.mubr.bf16.mxu1 %v15946_v28  ;;  %16012 = vst [vmem:[#allocation122_spill] sm:$0xff] %v12736_v12 }
 0x401   : > { %5302 = vmatmul.mubr.bf16.gmra.mrb[92].mxu0 %v9349_v62 }
 0x402   : > { %6193 = vmatprep.mubr.bf16.mxu0 %v15946_v28 }
 0x405   : > { %5415 = vmatmul.mubr.bf16.gmra.mrb[92].mxu1 %v9349_v62 }
 0x406   : > { %6306 = vmatprep.mubr.bf16.mxu1 %v15946_v28 }
 0x459   : > { %v3102_v9 = vpop.f32.mrb[32].mxu0 }
 0x45a   : > { %v3103_v58 = vadd.f32 %v3102_v9, %v12684_v8  ;;  %v3104_v21 = vpop.f32.mrb[33].mxu0 }
 0x45b   : > { %v3105_v57 = vadd.f32 %v3104_v21, %v12684_v8  ;;  %v3106_v52 = vpop.f32.mrb[34].mxu0 }
 0x45c   : > { %v12692_v26 = vmul.f32 1.3862944, %v3103_v58  ;;  %v3107_v2 = vadd.f32 %v3106_v52, %v12686_v24  ;;  %v3108_v60 = vpop.f32.mrb[35].mxu0 }
 0x45d   : > { %v12697_v47 = vmul.f32 1.3862944, %v3105_v57  ;;  %v3109_v25 = vadd.f32 %v3108_v60, %v12686_v24 }
 0x45e   : > { %v3422_v33 = vand.u32 2147483647, %v12692_v26  ;;  %v12701_v23 = vmul.f32 1.3862944, %v3107_v2  ;;  %v16019_v30 = vmax.f32 %v12692_v26, 0.0 }
 0x45f   : > { %v3215_v41 = vpop.f32.mrb[32].mxu1  ;;  %v3423_v42 = vand.u32 2147483647, %v12697_v47  ;;  %v12707_v22 = vmul.f32 1.3862944, %v3109_v25 }
 0x460   : > { %v3216_v61 = vadd.f32 %v3215_v41, %v12684_v8  ;;  %v3217_v43 = vpop.f32.mrb[33].mxu1  ;;  %v3486_v63 = vsub.f32 0.0, %v3422_v33  ;;  %v3426_v4 = vand.u32 2147483647, %v12701_v23  ;;  %v16021_v26 = vmax.f32 %v12701_v23, 0.0 }
 0x461   : > { %v3218_v17 = vadd.f32 %v3217_v43, %v12684_v8  ;;  %v3219_v40 = vpop.f32.mrb[34].mxu1  ;;  %v3487_v18 = vsub.f32 0.0, %v3423_v42  ;;  %v3112_v37 = vpop.f32.mrb[36].mxu0  ;;  %v3427_v7 = vand.u32 2147483647, %v12707_v22 }
 0x462   : > { %v12709_v10 = vmul.f32 1.3862944, %v3216_v61  ;;  %v3220_v5 = vadd.f32 %v3219_v40, %v12686_v24  ;;  %v3221_v19 = vpop.f32.mrb[35].mxu1  ;;  %v3550_v36 = vmul.f32 1.442695, %v3486_v63  ;;  %v3490_v46 = vsub.f32 0.0, %v3426_v4 }
 0x463   : > { %v12714_v14 = vmul.f32 1.3862944, %v3218_v17  ;;  %v3222_v48 = vadd.f32 %v3221_v19, %v12686_v24  ;;  %v3114_v27 = vpop.f32.mrb[37].mxu0  ;;  %v3552_v45 = vmul.f32 1.442695, %v3487_v18  ;;  %v3113_v35 = vadd.f32 %v3112_v37, %v12690_v44 }
 0x464   : > { %v3424_v59 = vand.u32 2147483647, %v12709_v10  ;;  %v3116_v11 = vpop.f32.mrb[38].mxu0  ;;  %8542 = vpow2.f32 %v3550_v36  ;;  %v3558_v54 = vmul.f32 1.442695, %v3490_v46  ;;  %v3491_v53 = vsub.f32 0.0, %v3427_v7 }
 0x465   : > { %v3425_v34 = vand.u32 2147483647, %v12714_v14  ;;  %v12722_v16 = vpop.f32.mrb[39].mxu0  ;;  %8544 = vpow2.f32 %v3552_v45  ;;  %v12724_v20 = vmul.f32 1.3862944, %v3220_v5  ;;  %v3115_v2 = vadd.f32 %v3114_v27, %v12690_v44 }
 0x466   : > { %v3488_v15 = vsub.f32 0.0, %v3424_v59  ;;  %8546 = vpow2.f32 %v3558_v54  ;;  %v12727_v50 = vmul.f32 1.3862944, %v3222_v48  ;;  %v12729_v56 = vmul.f32 1.3862944, %v3113_v35 }
 0x467   : > { %v3489_v13 = vsub.f32 0.0, %v3425_v34  ;;  %v3225_v0 = vpop.f32.mrb[36].mxu1  ;;  %v3428_v55 = vand.u32 2147483647, %v12724_v20  ;;  %v3560_v9 = vmul.f32 1.442695, %v3491_v53  ;;  %v3117_v40 = vadd.f32 %v3116_v11, %v12695_v51 }
 0x468   : > { %v3554_v39 = vmul.f32 1.442695, %v3488_v15  ;;  %v3429_v1 = vand.u32 2147483647, %v12727_v50  ;;  %v3430_v58 = vand.u32 2147483647, %v12729_v56  ;;  %v3226_v52 = vadd.f32 %v3225_v0, %v12690_v44  ;;  %v12771_v0 = vpop.permute.xlu1 %2987 }
 0x469   : > { %v3556_v38 = vmul.f32 1.442695, %v3489_v13  ;;  %v3492_v62 = vsub.f32 0.0, %v3428_v55  ;;  %v3227_v21 = vpop.f32.mrb[37].mxu1  ;;  %v12750_v4 = vmul.f32 1.3862944, %v3115_v2  ;;  %v12769_v13 = vpop.permute.xlu0 %2982 }
 0x46a   : > { %8548 = vpow2.f32 %v3554_v39  ;;  %v3493_v57 = vsub.f32 0.0, %v3429_v1  ;;  %v3229_v60 = vpop.f32.mrb[38].mxu1  ;;  %v12741_v25 = vpop.f32.mrb[40].mxu0  ;;  %v3494_v41 = vsub.f32 0.0, %v3430_v58  ;;  %v3228_v61 = vadd.f32 %v3227_v21, %v12690_v44  ;;  %16013 = vst [vmem:[#allocation125_spill] sm:$0xff] %v12769_v13  ;;  %16014 = vst [vmem:[#allocation123_spill] sm:$0xff] %v12771_v0 }
 0x46b   : > { %8550 = vpow2.f32 %v3556_v38  ;;  %v3562_v33 = vmul.f32 1.442695, %v3492_v62  ;;  %v12744_v42 = vpop.f32.mrb[39].mxu1  ;;  %v12746_v43 = vpop.f32.mrb[41].mxu0  ;;  %v12748_v17 = vmul.f32 1.3862944, %v3226_v52  ;;  %v3230_v19 = vadd.f32 %v3229_v60, %v12695_v51 }
 0x46c   : > { %8552 = vpow2.f32 %v3560_v9  ;;  %v3564_v63 = vmul.f32 1.442695, %v3493_v57  ;;  %v3566_v18 = vmul.f32 1.442695, %v3494_v41  ;;  %v12753_v5 = vmul.f32 1.3862944, %v3228_v61 }
 0x46d   : > { %8554 = vpow2.f32 %v3562_v33  ;;  %v12756_v37 = vpop.f32.mrb[42].mxu0  ;;  %v3432_v27 = vand.u32 2147483647, %v12748_v17  ;;  %v3431_v54 = vand.u32 2147483647, %v12750_v4 }
 0x46e   : > { %v8543_v36 = vpop.eup %8542  ;;  %8556 = vpow2.f32 %v3564_v63  ;;  %v12763_v45 = vpop.f32.mrb[43].mxu0  ;;  %v3433_v53 = vand.u32 2147483647, %v12753_v5  ;;  %v12774_v38 = vmul.f32 1.3862944, %v3117_v40 }
 0x46f   : > { %v8545_v35 = vpop.eup %8544  ;;  %v3678_v11 = vadd.f32 1.0, %v8543_v36  ;;  %8558 = vpow2.f32 %v3566_v18  ;;  %v3496_v55 = vsub.f32 0.0, %v3432_v27  ;;  %v3495_v62 = vsub.f32 0.0, %v3431_v54 }
 0x470   : > { %v12761_v59 = vpop.f32.mrb[40].mxu1  ;;  %v8547_v7 = vpop.eup %8546  ;;  %v3679_v39 = vadd.f32 1.0, %v8545_v35  ;;  %v12776_v9 = vmul.f32 1.3862944, %v3230_v19  ;;  %v3497_v2 = vsub.f32 0.0, %v3433_v53 }
 0x471   : > { %v12767_v15 = vpop.f32.mrb[41].mxu1  ;;  %8560 = vlog2.f32 %v3678_v11  ;;  %v3682_v1 = vadd.f32 1.0, %v8547_v7  ;;  %v3570_v52 = vmul.f32 1.442695, %v3496_v55  ;;  %v3568_v63 = vmul.f32 1.442695, %v3495_v62  ;;  %v12796_v53 = vpop.permute.xlu0 %2992 }
 0x472   : > { %v12778_v58 = vpop.f32.mrb[42].mxu1  ;;  %8562 = vlog2.f32 %v3679_v39  ;;  %v3434_v40 = vand.u32 2147483647, %v12774_v38  ;;  %v3572_v27 = vmul.f32 1.442695, %v3497_v2  ;;  %v3119_v55 = vadd.f32 %v12722_v16, %v12695_v51  ;;  %16015 = vst [vmem:[#allocation126_spill] sm:$0xff] %v12796_v53 }
 0x473   : > { %v12783_v60 = vpop.f32.mrb[43].mxu1  ;;  %8564 = vlog2.f32 %v3682_v1  ;;  %v3436_v35 = vand.u32 2147483647, %v12776_v9 }
 0x474   : > { %v12780_v21 = vpop.f32.mrb[44].mxu0  ;;  %v8549_v41 = vpop.eup %8548  ;;  %8566 = vpow2.f32 %v3570_v52  ;;  %v3498_v39 = vsub.f32 0.0, %v3434_v40  ;;  %v3232_v52 = vadd.f32 %v12744_v42, %v12695_v51 }
 0x475   : > { %v12785_v33 = vpop.f32.mrb[45].mxu0  ;;  %v8551_v19 = vpop.eup %8550  ;;  %v3680_v36 = vadd.f32 1.0, %v8549_v41  ;;  %8568 = vpow2.f32 %v3568_v63  ;;  %v3500_v62 = vsub.f32 0.0, %v3436_v35  ;;  %v3123_v63 = vadd.f32 %v12741_v25, %v12712_v49 }
 0x476   : > { %v12789_v18 = vpop.f32.mrb[46].mxu0  ;;  %v8553_v54 = vpop.eup %8552  ;;  %v3681_v7 = vadd.f32 1.0, %v8551_v19  ;;  %v12803_v19 = vmul.f32 1.3862944, %v3119_v55  ;;  %v12811_v42 = vmul.f32 1.3862944, %v3232_v52 }
 0x477   : > { %v12792_v11 = vpop.f32.mrb[47].mxu0  ;;  %8570 = vlog2.f32 %v3680_v36  ;;  %v3683_v1 = vadd.f32 1.0, %v8553_v54  ;;  %v8555_v41 = vpop.eup %8554  ;;  %v3574_v54 = vmul.f32 1.442695, %v3498_v39 }
 0x478   : > { %v12800_v2 = vpop.f32.mrb[44].mxu1  ;;  %8572 = vlog2.f32 %v3681_v7  ;;  %v8557_v40 = vpop.eup %8556  ;;  %v3684_v35 = vadd.f32 1.0, %v8555_v41  ;;  %v3435_v57 = vand.u32 2147483647, %v12803_v19  ;;  %v3578_v41 = vmul.f32 1.442695, %v3500_v62 }
 0x479   : > { %v12807_v16 = vpop.f32.mrb[45].mxu1  ;;  %v12809_v36 = vpop.permute.xlu1 %2997  ;;  %8574 = vlog2.f32 %v3683_v1  ;;  %v3685_v55 = vadd.f32 1.0, %v8557_v40  ;;  %v3437_v39 = vand.u32 2147483647, %v12811_v42  ;;  %v12825_v40 = vmul.f32 1.3862944, %v3123_v63 }
 0x47a   : > { %16016 = vst [vmem:[#allocation73_spill] sm:$0xff] %v12809_v36  ;;  %v12813_v34 = vpop.f32.mrb[46].mxu1  ;;  %v8559_v7 = vpop.eup %8558  ;;  %8576 = vpow2.f32 %v3572_v27  ;;  %v3499_v61 = vsub.f32 0.0, %v3435_v57 }
 0x47b   : > { %v12817_v25 = vpop.f32.mrb[47].mxu1  ;;  %8578 = vlog2.f32 %v3684_v35  ;;  %v3686_v48 = vadd.f32 1.0, %v8559_v7  ;;  %v8561_v52 = vpop.eup %8560  ;;  %v3501_v35 = vsub.f32 0.0, %v3437_v39 }
 0x47c   : > { %v12819_v46 = vpop.f32.mrb[48].mxu0  ;;  %8580 = vlog2.f32 %v3685_v55  ;;  %v8563_v51 = vpop.eup %8562  ;;  %v3743_v24 = vmul.f32 0.6931472, %v8561_v52  ;;  %v3576_v57 = vmul.f32 1.442695, %v3499_v61 }
 0x47d   : > { %v12822_v1 = vpop.f32.mrb[49].mxu0  ;;  %v12829_v44 = vpop.permute.xlu0 %3002  ;;  %8582 = vlog2.f32 %v3686_v48  ;;  %v3745_v28 = vmul.f32 0.6931472, %v8563_v51  ;;  %v3580_v32 = vmul.f32 1.442695, %v3501_v35 }
 0x47e   : > { %v12827_v27 = vpop.f32.mrb[50].mxu0  ;;  %16017 = vst [vmem:[#allocation127_spill] sm:$0xff] %v12829_v44  ;;  %v8565_v8 = vpop.eup %8564  ;;  %8584 = vpow2.f32 %v3574_v54  ;;  %v3870_v3 = vadd.f32 %v3743_v24, %v16019_v30  ;;  %v3438_v51 = vand.u32 2147483647, %v12825_v40  ;;  %v16026_v30 = vmax.f32 %v12709_v10, 0.0 }
 0x47f   : > { %v12832_v7 = vpop.f32.mrb[51].mxu0  ;;  %v8567_v63 = vpop.eup %8566  ;;  %v3751_v6 = vmul.f32 0.6931472, %v8565_v8  ;;  %8586 = vpow2.f32 %v3578_v41  ;;  %v16029_v10 = vmax.f32 %v12707_v22, 0.0  ;;  %v16034_v22 = vmax.f32 %v12724_v20, 0.0 }
 0x480   : > { %16018 = vst [vmem:[#allocation129_spill] sm:$0xff] %v12832_v7  ;;  %v12837_v52 = vpop.f32.mrb[48].mxu1  ;;  %v8569_v48 = vpop.eup %8568  ;;  %v3688_v39 = vadd.f32 1.0, %v8567_v63  ;;  %8588 = vpow2.f32 %v3576_v57  ;;  %v16023_v63 = vmax.f32 %v12697_v47, 0.0  ;;  %v3502_v57 = vsub.f32 0.0, %v3438_v51 }
 0x481   : > { %v12839_v62 = vpop.permute.xlu1 %3007  ;;  %v12843_v54 = vpop.f32.mrb[49].mxu1  ;;  %v3874_v24 = vadd.f32 %v3751_v6, %v16021_v26  ;;  %v3687_v8 = vadd.f32 1.0, %v8569_v48  ;;  %8590 = vpow2.f32 %v3580_v32  ;;  %v3934_v23 = vmul.f32 1.442695, %v3870_v3 }
 0x482   : > { %16020 = vst [vmem:[#allocation131_spill] sm:$0xff] %v12839_v62  ;;  %v8571_v61 = vpop.eup %8570  ;;  %v12848_v41 = vpop.f32.mrb[50].mxu1  ;;  %v3871_v44 = vadd.f32 %v3745_v28, %v16023_v63  ;;  %8592 = vlog2.f32 %v3688_v39  ;;  %v3236_v32 = vadd.f32 %v12761_v59, %v12712_v49  ;;  %v3582_v28 = vmul.f32 1.442695, %v3502_v57 }
 0x483   : > { %16022 = vst [vmem:[#allocation109_spill] sm:$0xff] %v12848_v41  ;;  %v8573_v35 = vpop.eup %8572  ;;  %v3747_v55 = vmul.f32 0.6931472, %v8571_v61  ;;  %v12852_v62 = vpop.f32.mrb[51].mxu1  ;;  %v3938_v48 = vmul.f32 1.442695, %v3874_v24  ;;  %8594 = vlog2.f32 %v3687_v8 }
 0x484   : > { %16024 = vst [vmem:[#allocation29_spill] sm:$0xff] %v12852_v62  ;;  %v8575_v36 = vpop.eup %8574  ;;  %v12854_v53 = vpop.permute.xlu0 %3012  ;;  %v3749_v6 = vmul.f32 0.6931472, %v8573_v35  ;;  %v3935_v59 = vmul.f32 1.442695, %v3871_v44  ;;  %8596 = vpow2.f32 %v3582_v28 }
 0x485   : > { %16025 = vst [vmem:[#allocation110_spill] sm:$0xff] %v12854_v53  ;;  %v8577_v26 = vpop.eup %8576  ;;  %v3872_v61 = vadd.f32 %v3747_v55, %v16026_v30  ;;  %v3753_v7 = vmul.f32 0.6931472, %v8575_v36  ;;  %v3998_v39 = vpack.c.bf16 %v3938_v48, %v3934_v23  ;;  %v12862_v3 = vpop.f32.mrb[52].mxu0  ;;  %v16031_v30 = vmax.f32 %v12714_v14, 0.0 }
 0x486   : > { %v8579_v47 = vpop.eup %8578  ;;  %v3689_v51 = vadd.f32 1.0, %v8577_v26  ;;  %16027 = vst [vmem:[#allocation108_spill] sm:$0xff] %v12862_v3  ;;  %v12864_v35 = vpop.permute.xlu1 %3017  ;;  %v12872_v26 = vmul.f32 1.3862944, %v3236_v32 }
 0x487   : > { %v8581_v24 = vpop.eup %8580  ;;  %16028 = vst [vmem:[#allocation112_spill] sm:$0xff] %v12864_v35  ;;  %v3755_v62 = vmul.f32 0.6931472, %v8579_v47  ;;  %v3875_v55 = vadd.f32 %v3753_v7, %v16029_v10  ;;  %v12868_v36 = vpop.f32.mrb[53].mxu0  ;;  %v3873_v57 = vadd.f32 %v3749_v6, %v16031_v30  ;;  %v4030_v23 = vunpack.c.l.bf16 %v3998_v39 }
 0x488   : > { %16030 = vst [vmem:[#allocation105_spill] sm:$0xff] %v12868_v36  ;;  %v8583_v8 = vpop.eup %8582  ;;  %v3757_v48 = vmul.f32 0.6931472, %v8581_v24  ;;  %v12874_v53 = vpop.f32.mrb[52].mxu1  ;;  %v3936_v47 = vmul.f32 1.442695, %v3872_v61  ;;  %8598 = vlog2.f32 %v3689_v51  ;;  %v4034_v32 = vunpack.c.h.bf16 %v3998_v39 }
 0x489   : > { %16032 = vst [vmem:[#allocation36_spill] sm:$0xff] %v12874_v53  ;;  %v12876_v63 = vpop.f32.mrb[54].mxu0  ;;  %v8585_v44 = vpop.eup %8584  ;;  %v3876_v7 = vadd.f32 %v3755_v62, %v16034_v22  ;;  %v3939_v28 = vmul.f32 1.442695, %v3875_v55  ;;  %v16038_v24 = vmax.f32 %v12727_v50, 0.0  ;;  %v3125_v51 = vadd.f32 %v12746_v43, %v12712_v49 }
 0x48a   : > { %16033 = vst [vmem:[#allocation60_spill] sm:$0xff] %v12876_v63  ;;  %v12880_v10 = vpop.f32.mrb[53].mxu1  ;;  %v12882_v35 = vpop.f32.mrb[55].mxu0  ;;  %v3759_v36 = vmul.f32 0.6931472, %v8583_v8  ;;  %v3690_v63 = vadd.f32 1.0, %v8585_v44 }
 0x48b   : > { %16035 = vst [vmem:[#allocation121_spill] sm:$0xff] %v12880_v10  ;;  %16036 = vst [vmem:[#allocation7_spill] sm:$0xff] %v12882_v35  ;;  %v8587_v14 = vpop.eup %8586  ;;  %v12884_v6 = vpop.permute.xlu0 %4096  ;;  %v3877_v30 = vadd.f32 %v3757_v48, %v16038_v24  ;;  %v3940_v20 = vmul.f32 1.442695, %v3876_v7  ;;  %v3999_v62 = vpack.c.bf16 %v3939_v28, %v3935_v59  ;;  %v3937_v39 = vmul.f32 1.442695, %v3873_v57 }
 0x48c   : > { %16037 = vst [vmem:[#allocation40_spill] sm:$0xff] %v12884_v6  ;;  %v12888_v53 = vpop.f32.mrb[54].mxu1  ;;  %v8589_v61 = vpop.eup %8588  ;;  %v3692_v55 = vadd.f32 1.0, %v8587_v14  ;;  %v4174_v50 = vmul.f32 %v12884_v6, %v4030_v23  ;;  %8600 = vlog2.f32 %v3690_v63  ;;  %v16044_v63 = vmax.f32 %v12729_v56, 0.0 }
 0x48d   : > { %16039 = vst [vmem:[#allocation55_spill] sm:$0xff] %v12888_v53  ;;  %v12892_v22 = vpop.f32.mrb[55].mxu1  ;;  %v12894_v35 = vpop.f32.mrb[56].mxu0  ;;  %v3941_v48 = vmul.f32 1.442695, %v3877_v30  ;;  %v4000_v59 = vpack.c.bf16 %v3940_v20, %v3936_v47  ;;  %v4031_v7 = vunpack.c.l.bf16 %v3999_v62  ;;  %v4035_v28 = vunpack.c.h.bf16 %v3999_v62 }
 0x48e   : > { %16040 = vst [vmem:[#allocation95_spill] sm:$0xff] %v12892_v22  ;;  %16041 = vst [vmem:[#allocation74_spill] sm:$0xff] %v12894_v35  ;;  %v8591_v10 = vpop.eup %8590  ;;  %v12897_v8 = vpop.f32.mrb[57].mxu0  ;;  %v3691_v14 = vadd.f32 1.0, %v8589_v61  ;;  %8602 = vlog2.f32 %v3692_v55  ;;  %v16045_v55 = vmax.f32 %v12748_v17, 0.0 }
 0x48f   : > { %16042 = vst [vmem:[#allocation92_spill] sm:$0xff] %v12897_v8  ;;  %v8593_v44 = vpop.eup %8592  ;;  %v12899_v24 = vpop.permute.xlu1 %4101  ;;  %v4001_v22 = vpack.c.bf16 %v3941_v48, %v3937_v39  ;;  %v4032_v23 = vunpack.c.l.bf16 %v4000_v59  ;;  %v4036_v30 = vunpack.c.h.bf16 %v4000_v59  ;;  %v3878_v8 = vadd.f32 %v3759_v36, %v16044_v63 }
 0x490   : > { %16043 = vst [vmem:[#allocation66_spill] sm:$0xff] %v12899_v24  ;;  %v4178_v43 = vmul.f32 %v12899_v24, %v4034_v32  ;;  %v3763_v53 = vmul.f32 0.6931472, %v8593_v44  ;;  %v12902_v35 = vpop.f32.mrb[58].mxu0  ;;  %v8595_v57 = vpop.eup %8594  ;;  %v3693_v3 = vadd.f32 1.0, %v8591_v10  ;;  %v4175_v41 = vmul.f32 %v12884_v6, %v4031_v7 }
 0x491   : > { %v4179_v47 = vmul.f32 %v12899_v24, %v4035_v28  ;;  %v4033_v20 = vunpack.c.l.bf16 %v4001_v22  ;;  %v4037_v61 = vunpack.c.h.bf16 %v4001_v22  ;;  %v12908_v62 = vpop.f32.mrb[56].mxu1  ;;  %v8597_v32 = vpop.eup %8596  ;;  %8604 = vlog2.f32 %v3691_v14 }
 0x492   : > { %v3880_v39 = vadd.f32 %v3763_v53, %v16045_v55  ;;  %v12913_v44 = vmul.f32 1.3862944, %v3125_v51  ;;  %v12915_v56 = vpop.f32.mrb[57].mxu1  ;;  %v4176_v36 = vmul.f32 %v12884_v6, %v4032_v23  ;;  %v4180_v10 = vmul.f32 %v12899_v24, %v4036_v30  ;;  %v8599_v7 = vpop.eup %8598 }
 0x493   : > { %v3761_v59 = vmul.f32 0.6931472, %v8595_v57  ;;  %v12920_v28 = vadd.f32 %v4178_v43, %v4174_v50  ;;  %v3942_v63 = vmul.f32 1.442695, %v3878_v8  ;;  %8606 = vlog2.f32 %v3693_v3  ;;  %v12927_v23 = vpop.f32.mrb[58].mxu1 }
 0x494   : > { %v3440_v17 = vand.u32 2147483647, %v12872_v26  ;;  %v12923_v53 = vadd.f32 %v4179_v47, %v4175_v41  ;;  %v4177_v51 = vmul.f32 %v12884_v6, %v4033_v20  ;;  %v4181_v14 = vmul.f32 %v12899_v24, %v4037_v61 }
 0x495   : > { %v3694_v55 = vadd.f32 1.0, %v8597_v32  ;;  %v3944_v30 = vmul.f32 1.442695, %v3880_v39  ;;  %v3439_v22 = vand.u32 2147483647, %v12913_v44  ;;  %v3238_v50 = vadd.f32 %v12767_v15, %v12712_v49 }
 0x496   : > { %v3504_v57 = vsub.f32 0.0, %v3440_v17  ;;  %v8601_v8 = vpop.eup %8600  ;;  %v12932_v3 = vadd.f32 %v4180_v10, %v4176_v36  ;;  %v16046_v41 = vmax.f32 %v12750_v4, 0.0  ;;  %v3765_v47 = vmul.f32 0.6931472, %v8599_v7  ;;  %v12948_v7 = vpop.f32.mrb[59].mxu0 }
 0x497   : > { %v3127_v20 = vadd.f32 %v12756_v37, %v12717_v31  ;;  %v3767_v61 = vmul.f32 0.6931472, %v8601_v8  ;;  %v3503_v48 = vsub.f32 0.0, %v3439_v22  ;;  %v3240_v39 = vadd.f32 %v12778_v58, %v12717_v31 }
 0x498   : > { %v3879_v43 = vadd.f32 %v3761_v59, %v16046_v41  ;;  %v3586_v32 = vmul.f32 1.442695, %v3504_v57  ;;  %v8603_v17 = vpop.eup %8602  ;;  %v12940_v24 = vadd.f32 %v4181_v14, %v4177_v51  ;;  %8608 = vlog2.f32 %v3694_v55 }
 0x499   : > { %v12942_v15 = vmul.f32 1.3862944, %v3238_v50  ;;  %v12944_v36 = vmul.f32 1.3862944, %v3127_v20  ;;  %v16047_v4 = vmax.f32 %v12774_v38, 0.0  ;;  %v16048_v57 = vmax.f32 %v12753_v5, 0.0 }
 0x49a   : > { %v3771_v59 = vmul.f32 0.6931472, %v8603_v17  ;;  %8610 = vpow2.f32 %v3586_v32  ;;  %v3584_v37 = vmul.f32 1.442695, %v3503_v48  ;;  %v3943_v22 = vmul.f32 1.442695, %v3879_v43 }
 0x49b   : > { %v3882_v10 = vadd.f32 %v3767_v61, %v16047_v4  ;;  %v3881_v58 = vadd.f32 %v3765_v47, %v16048_v57  ;;  %v3441_v51 = vand.u32 2147483647, %v12942_v15  ;;  %v3442_v14 = vand.u32 2147483647, %v12944_v36  ;;  %v8605_v55 = vpop.eup %8604 }
 0x49c   : > { %v16049_v8 = vmax.f32 %v12776_v9, 0.0  ;;  %8612 = vpow2.f32 %v3584_v37  ;;  %v12956_v38 = vmul.f32 1.3862944, %v3240_v39  ;;  %v3769_v20 = vmul.f32 0.6931472, %v8605_v55 }
 0x49d   : > { %v3946_v50 = vmul.f32 1.442695, %v3882_v10  ;;  %v3505_v48 = vsub.f32 0.0, %v3441_v51  ;;  %v3506_v61 = vsub.f32 0.0, %v3442_v14  ;;  %v3129_v43 = vadd.f32 %v12763_v45, %v12717_v31  ;;  %v8607_v5 = vpop.eup %8606  ;;  %v12967_v45 = vpop.permute.xlu0 %4106 }
 0x49e   : > { %v3884_v41 = vadd.f32 %v3771_v59, %v16049_v8  ;;  %v3444_v17 = vand.u32 2147483647, %v12956_v38  ;;  %v3242_v4 = vadd.f32 %v12783_v60, %v12717_v31  ;;  %v16050_v9 = vmax.f32 %v12803_v19, 0.0  ;;  %v12965_v8 = vpop.f32.mrb[59].mxu1  ;;  %16051 = vst [vmem:[#allocation97_spill] sm:$0xff] %v12967_v45 }
 0x49f   : > { %v4002_v47 = vpack.c.bf16 %v3946_v50, %v3942_v63  ;;  %v3773_v59 = vmul.f32 0.6931472, %v8607_v5  ;;  %v3588_v39 = vmul.f32 1.442695, %v3505_v48  ;;  %v3590_v37 = vmul.f32 1.442695, %v3506_v61 }
 0x4a0   : > { %v3948_v32 = vmul.f32 1.442695, %v3884_v41  ;;  %v3883_v10 = vadd.f32 %v3769_v20, %v16050_v9  ;;  %v3508_v55 = vsub.f32 0.0, %v3444_v17  ;;  %v3945_v63 = vmul.f32 1.442695, %v3881_v58 }
 0x4a1   : > { %v4038_v57 = vunpack.c.l.bf16 %v4002_v47  ;;  %v4042_v51 = vunpack.c.h.bf16 %v4002_v47  ;;  %v16052_v41 = vmax.f32 %v12811_v42, 0.0  ;;  %v3133_v60 = vadd.f32 %v12780_v21, %v12732_v29 }
 0x4a2   : > { %v4004_v14 = vpack.c.bf16 %v3948_v32, %v3944_v30  ;;  %v3947_v50 = vmul.f32 1.442695, %v3883_v10  ;;  %8614 = vpow2.f32 %v3588_v39  ;;  %v8609_v61 = vpop.eup %8608  ;;  %v12974_v30 = vpop.permute.xlu1 %4111  ;;  %v12976_v32 = vmul.f32 1.3862944, %v3129_v43 }
 0x4a3   : > { %v3885_v6 = vadd.f32 %v3773_v59, %v16052_v41  ;;  %v4182_v19 = vmul.f32 %v12967_v45, %v4038_v57  ;;  %16053 = vst [vmem:[#allocation63_spill] sm:$0xff] %v12974_v30  ;;  %8616 = vpow2.f32 %v3590_v37  ;;  %v4186_v42 = vmul.f32 %v12974_v30, %v4042_v51 }
 0x4a4   : > { %v4040_v20 = vunpack.c.l.bf16 %v4004_v14  ;;  %v4044_v48 = vunpack.c.h.bf16 %v4004_v14  ;;  %v4003_v5 = vpack.c.bf16 %v3947_v50, %v3943_v22  ;;  %v8611_v58 = vpop.eup %8610  ;;  %v3594_v9 = vmul.f32 1.442695, %v3508_v55 }
 0x4a5   : > { %v3949_v47 = vmul.f32 1.442695, %v3885_v6  ;;  %v4239_v17 = vadd.f32 %v12920_v28, %v4182_v19  ;;  %v3696_v22 = vadd.f32 1.0, %v8611_v58  ;;  %v3775_v28 = vmul.f32 0.6931472, %v8609_v61 }
 0x4a6   : > { %v4184_v21 = vmul.f32 %v12967_v45, %v4040_v20  ;;  %v4188_v10 = vmul.f32 %v12974_v30, %v4044_v48  ;;  %v4039_v59 = vunpack.c.l.bf16 %v4003_v5  ;;  %v4043_v39 = vunpack.c.h.bf16 %v4003_v5  ;;  %v8613_v14 = vpop.eup %8612  ;;  %v12989_v20 = vpop.f32.mrb[60].mxu0 }
 0x4a7   : > { %v4005_v57 = vpack.c.bf16 %v3949_v47, %v3945_v63  ;;  %v12982_v41 = vadd.f32 %v4239_v17, %v4186_v42  ;;  %8618 = vpow2.f32 %v3594_v9  ;;  %v3695_v19 = vadd.f32 1.0, %v8613_v14  ;;  %v12991_v63 = vpop.f32.mrb[60].mxu1  ;;  %v12997_v58 = vpop.f32.mrb[61].mxu0 }
 0x4a8   : > { %v4281_v6 = vadd.f32 %v12932_v3, %v4184_v21  ;;  %v4183_v43 = vmul.f32 %v12967_v45, %v4039_v59  ;;  %v4187_v55 = vmul.f32 %v12974_v30, %v4043_v39  ;;  %8620 = vlog2.f32 %v3696_v22  ;;  %v12999_v61 = vpop.f32.mrb[61].mxu1 }
 0x4a9   : > { %v4041_v37 = vunpack.c.l.bf16 %v4005_v57  ;;  %v4045_v51 = vunpack.c.h.bf16 %v4005_v57  ;;  %v3443_v47 = vand.u32 2147483647, %v12976_v32  ;;  %8622 = vlog2.f32 %v3695_v19 }
 0x4aa   : > { %v12986_v50 = vadd.f32 %v4281_v6, %v4188_v10  ;;  %v4260_v48 = vadd.f32 %v12923_v53, %v4183_v43  ;;  %v13001_v42 = vmul.f32 1.3862944, %v3242_v4  ;;  %v13003_v17 = vmul.f32 1.3862944, %v3133_v60 }
 0x4ab   : > { %v4185_v3 = vmul.f32 %v12967_v45, %v4041_v37  ;;  %v4189_v5 = vmul.f32 %v12974_v30, %v4045_v51  ;;  %v3246_v21 = vadd.f32 %v12800_v2, %v12732_v29  ;;  %v3507_v10 = vsub.f32 0.0, %v3443_v47 }
 0x4ac   : > { %v13007_v9 = vadd.f32 %v4260_v48, %v4187_v55  ;;  %v3135_v59 = vadd.f32 %v12785_v33, %v12732_v29  ;;  %v8615_v39 = vpop.eup %8614  ;;  %v3376_v57 = vmax.f32 %v12872_v26, 0.0  ;;  %v3445_v60 = vand.u32 2147483647, %v13001_v42 }
 0x4ad   : > { %v4302_v53 = vadd.f32 %v12940_v24, %v4185_v3  ;;  %v8617_v6 = vpop.eup %8616  ;;  %v3592_v2 = vmul.f32 1.442695, %v3507_v10  ;;  %v3446_v43 = vand.u32 2147483647, %v13003_v17  ;;  %v13019_v24 = vmul.f32 1.3862944, %v3246_v21 }
 0x4ae   : > { %v3698_v33 = vadd.f32 1.0, %v8617_v6  ;;  %v3509_v51 = vsub.f32 0.0, %v3445_v60  ;;  %v13022_v55 = vmul.f32 1.3862944, %v3135_v59  ;;  %v16054_v26 = vmax.f32 %v12825_v40, 0.0  ;;  %v13028_v10 = vpop.f32.mrb[62].mxu0 }
 0x4af   : > { %v13016_v22 = vadd.f32 %v4302_v53, %v4189_v5  ;;  %8624 = vpow2.f32 %v3592_v2  ;;  %v3510_v48 = vsub.f32 0.0, %v3446_v43  ;;  %v3448_v3 = vand.u32 2147483647, %v13019_v24  ;;  %v13032_v40 = vpop.f32.mrb[62].mxu1 }
 0x4b0   : > { %v3886_v19 = vadd.f32 %v3775_v28, %v16054_v26  ;;  %v3697_v47 = vadd.f32 1.0, %v8615_v39  ;;  %8626 = vlog2.f32 %v3698_v33  ;;  %v3596_v53 = vmul.f32 1.442695, %v3509_v51  ;;  %v13038_v33 = vpop.f32.mrb[63].mxu0 }
 0x4b1   : > { %v8619_v5 = vpop.eup %8618  ;;  %v3447_v21 = vand.u32 2147483647, %v13022_v55  ;;  %v3598_v6 = vmul.f32 1.442695, %v3510_v48  ;;  %v3512_v60 = vsub.f32 0.0, %v3448_v3  ;;  %v3248_v59 = vadd.f32 %v12807_v16, %v12732_v29 }
 0x4b2   : > { %v3700_v4 = vadd.f32 1.0, %v8619_v5  ;;  %v8621_v28 = vpop.eup %8620  ;;  %8628 = vpow2.f32 %v3596_v53  ;;  %v3137_v39 = vadd.f32 %v12789_v18, %v12736_v12  ;;  %v3250_v43 = vadd.f32 %v12813_v34, %v12736_v12  ;;  %v13048_v34 = vpop.f32.mrb[63].mxu1 }
 0x4b3   : > { %v3511_v2 = vsub.f32 0.0, %v3447_v21  ;;  %v3779_v51 = vmul.f32 0.6931472, %v8621_v28  ;;  %v3602_v26 = vmul.f32 1.442695, %v3512_v60  ;;  %v8623_v3 = vpop.eup %8622  ;;  %v3380_v18 = vmax.f32 %v12956_v38, 0.0 }
 0x4b4   : > { %8630 = vlog2.f32 %v3700_v4  ;;  %v13040_v48 = vmul.f32 1.3862944, %v3248_v59  ;;  %v13042_v5 = vmul.f32 1.3862944, %v3137_v39  ;;  %v13044_v53 = vmul.f32 1.3862944, %v3250_v43 }
 0x4b5   : > { %8632 = vpow2.f32 %v3598_v6  ;;  %v3600_v16 = vmul.f32 1.442695, %v3511_v2  ;;  %v3950_v21 = vmul.f32 1.442695, %v3886_v19  ;;  %v3888_v59 = vadd.f32 %v3779_v51, %v3376_v57 }
 0x4b6   : > { %8634 = vpow2.f32 %v3602_v26  ;;  %v3449_v60 = vand.u32 2147483647, %v13040_v48  ;;  %v3450_v6 = vand.u32 2147483647, %v13042_v5  ;;  %v3452_v19 = vand.u32 2147483647, %v13044_v53 }
 0x4b7   : > { %8636 = vpow2.f32 %v3600_v16  ;;  %v3777_v2 = vmul.f32 0.6931472, %v8623_v3  ;;  %v3139_v43 = vadd.f32 %v12792_v11, %v12736_v12  ;;  %v3252_v57 = vadd.f32 %v12817_v25, %v12736_v12 }
 0x4b8   : > { %8638 = vlog2.f32 %v3697_v47  ;;  %v3513_v38 = vsub.f32 0.0, %v3449_v60  ;;  %v3514_v39 = vsub.f32 0.0, %v3450_v6  ;;  %v3516_v37 = vsub.f32 0.0, %v3452_v19  ;;  %v13076_v6 = vpop.f32.mrb[64].mxu1 }
 0x4b9   : > { %v8625_v26 = vpop.eup %8624  ;;  %v3143_v3 = vadd.f32 %v12819_v46, %v12769_v13  ;;  %v13064_v11 = vmul.f32 1.3862944, %v3139_v43  ;;  %v3256_v4 = vadd.f32 %v12837_v52, %v12769_v13  ;;  %v3952_v19 = vmul.f32 1.442695, %v3888_v59  ;;  %v13074_v43 = vpop.f32.mrb[64].mxu0  ;;  %16057 = vst [vmem:[#allocation22_spill] sm:$0xff] %v13076_v6 }
 0x4ba   : > { %v8627_v47 = vpop.eup %8626  ;;  %v3699_v51 = vadd.f32 1.0, %v8625_v26  ;;  %v3604_v28 = vmul.f32 1.442695, %v3513_v38  ;;  %v3606_v14 = vmul.f32 1.442695, %v3514_v39  ;;  %v16055_v30 = vmax.f32 %v12913_v44, 0.0 }
 0x4bb   : > { %v3783_v60 = vmul.f32 0.6931472, %v8627_v47  ;;  %v3610_v26 = vmul.f32 1.442695, %v3516_v37  ;;  %v16056_v39 = vmax.f32 %v12944_v36, 0.0 }
 0x4bc   : > { %v8629_v16 = vpop.eup %8628  ;;  %v3887_v25 = vadd.f32 %v3777_v2, %v16055_v30  ;;  %8640 = vlog2.f32 %v3699_v51  ;;  %v13072_v47 = vmul.f32 1.3862944, %v3252_v57  ;;  %v3451_v44 = vand.u32 2147483647, %v13064_v11 }
 0x4bd   : > { %v3890_v12 = vadd.f32 %v3783_v60, %v16056_v39  ;;  %v3701_v46 = vadd.f32 1.0, %v8629_v16  ;;  %8642 = vpow2.f32 %v3604_v28  ;;  %v13079_v30 = vmul.f32 1.3862944, %v3143_v3  ;;  %v13083_v60 = vpop.f32.mrb[65].mxu0 }
 0x4be   : > { %v8631_v38 = vpop.eup %8630  ;;  %8644 = vpow2.f32 %v3606_v14  ;;  %v13081_v2 = vmul.f32 1.3862944, %v3256_v4  ;;  %v3515_v51 = vsub.f32 0.0, %v3451_v44  ;;  %16058 = vst [vmem:[#allocation91_spill] sm:$0xff] %v13083_v60  ;;  %v3453_v3 = vand.u32 2147483647, %v13072_v47 }
 0x4bf   : > { %v8633_v52 = vpop.eup %8632  ;;  %v3787_v45 = vmul.f32 0.6931472, %v8631_v38  ;;  %v3954_v59 = vmul.f32 1.442695, %v3890_v12  ;;  %8646 = vlog2.f32 %v3701_v46  ;;  %v3951_v29 = vmul.f32 1.442695, %v3887_v25 }
 0x4c0   : > { %v8635_v37 = vpop.eup %8634  ;;  %v3702_v36 = vadd.f32 1.0, %v8633_v52  ;;  %8648 = vpow2.f32 %v3610_v26  ;;  %v3608_v12 = vmul.f32 1.442695, %v3515_v51  ;;  %v3517_v52 = vsub.f32 0.0, %v3453_v3 }
 0x4c1   : > { %v8637_v28 = vpop.eup %8636  ;;  %v3892_v16 = vadd.f32 %v3787_v45, %v3380_v18  ;;  %v3704_v57 = vadd.f32 1.0, %v8635_v37  ;;  %v4006_v38 = vpack.c.bf16 %v3954_v59, %v3950_v21  ;;  %v13086_v45 = vpop.permute.xlu0 %4116  ;;  %v3454_v21 = vand.u32 2147483647, %v13079_v30 }
 0x4c2   : > { %v8639_v39 = vpop.eup %8638  ;;  %8650 = vlog2.f32 %v3702_v36  ;;  %v3703_v14 = vadd.f32 1.0, %v8637_v28  ;;  %16059 = vst [vmem:[#allocation33_spill] sm:$0xff] %v13086_v45  ;;  %v13088_v18 = vpop.permute.xlu1 %4121  ;;  %v3612_v59 = vmul.f32 1.442695, %v3517_v52  ;;  %v3456_v36 = vand.u32 2147483647, %v13081_v2 }
 0x4c3   : > { %v3956_v31 = vmul.f32 1.442695, %v3892_v16  ;;  %8652 = vlog2.f32 %v3704_v57  ;;  %v4046_v46 = vunpack.c.l.bf16 %v4006_v38  ;;  %v4050_v4 = vunpack.c.h.bf16 %v4006_v38  ;;  %16060 = vst [vmem:[#allocation79_spill] sm:$0xff] %v13088_v18  ;;  %v13094_v28 = vpop.f32.mrb[65].mxu1 }
 0x4c4   : > { %8654 = vlog2.f32 %v3703_v14  ;;  %v3781_v26 = vmul.f32 0.6931472, %v8639_v39  ;;  %16061 = vst [vmem:[#allocation47_spill] sm:$0xff] %v13094_v28  ;;  %v3518_v38 = vsub.f32 0.0, %v3454_v21  ;;  %v3145_v39 = vadd.f32 %v12822_v1, %v12769_v13 }
 0x4c5   : > { %v4008_v44 = vpack.c.bf16 %v3956_v31, %v3952_v19  ;;  %8656 = vpow2.f32 %v3608_v12  ;;  %v4190_v37 = vmul.f32 %v13086_v45, %v4046_v46  ;;  %v4194_v25 = vmul.f32 %v13088_v18, %v4050_v4 }
 0x4c6   : > { %v8641_v16 = vpop.eup %8640  ;;  %8658 = vpow2.f32 %v3612_v59  ;;  %v3520_v3 = vsub.f32 0.0, %v3456_v36  ;;  %v16062_v46 = vmax.f32 %v12942_v15, 0.0  ;;  %v3614_v28 = vmul.f32 1.442695, %v3518_v38 }
 0x4c7   : > { %v4048_v57 = vunpack.c.l.bf16 %v4008_v44  ;;  %v4052_v51 = vunpack.c.h.bf16 %v4008_v44  ;;  %v8643_v31 = vpop.eup %8642  ;;  %v4241_v19 = vadd.f32 %v12982_v41, %v4190_v37  ;;  %v3785_v14 = vmul.f32 0.6931472, %v8641_v16 }
 0x4c8   : > { %v8645_v12 = vpop.eup %8644  ;;  %v3889_v4 = vadd.f32 %v3781_v26, %v16062_v46  ;;  %v3705_v49 = vadd.f32 1.0, %v8643_v31  ;;  %v16063_v1 = vmax.f32 %v12976_v32, 0.0  ;;  %v3618_v15 = vmul.f32 1.442695, %v3520_v3 }
 0x4c9   : > { %v4192_v52 = vmul.f32 %v13086_v45, %v4048_v57  ;;  %v8647_v60 = vpop.eup %8646  ;;  %v13102_v44 = vadd.f32 %v4241_v19, %v4194_v25  ;;  %v4196_v21 = vmul.f32 %v13088_v18, %v4052_v51  ;;  %v3706_v41 = vadd.f32 1.0, %v8645_v12 }
 0x4ca   : > { %v3891_v6 = vadd.f32 %v3785_v14, %v16063_v1  ;;  %v8649_v37 = vpop.eup %8648  ;;  %v3789_v36 = vmul.f32 0.6931472, %v8647_v60  ;;  %8660 = vlog2.f32 %v3705_v49  ;;  %v13108_v38 = vmul.f32 1.3862944, %v3145_v39  ;;  %v13118_v1 = vpop.f32.mrb[66].mxu0 }
 0x4cb   : > { %v4283_v59 = vadd.f32 %v12986_v50, %v4192_v52  ;;  %8662 = vlog2.f32 %v3706_v41  ;;  %v3708_v57 = vadd.f32 1.0, %v8649_v37  ;;  %v16064_v51 = vmax.f32 %v13001_v42, 0.0 }
 0x4cc   : > { %v8651_v26 = vpop.eup %8650  ;;  %v3955_v16 = vmul.f32 1.442695, %v3891_v6  ;;  %8664 = vpow2.f32 %v3614_v28  ;;  %v3386_v49 = vmax.f32 %v13042_v5, 0.0  ;;  %v3953_v6 = vmul.f32 1.442695, %v3889_v4 }
 0x4cd   : > { %v8653_v25 = vpop.eup %8652  ;;  %v13110_v31 = vadd.f32 %v4283_v59, %v4196_v21  ;;  %v3893_v32 = vadd.f32 %v3789_v36, %v16064_v51  ;;  %v3791_v19 = vmul.f32 0.6931472, %v8651_v26  ;;  %8666 = vlog2.f32 %v3708_v57 }
 0x4ce   : > { %v8655_v14 = vpop.eup %8654  ;;  %v4007_v12 = vpack.c.bf16 %v3955_v16, %v3951_v29  ;;  %v3795_v50 = vmul.f32 0.6931472, %v8653_v25  ;;  %v3388_v39 = vmax.f32 %v13044_v53, 0.0  ;;  %8668 = vpow2.f32 %v3618_v15 }
 0x4cf   : > { %v8657_v60 = vpop.eup %8656  ;;  %v3957_v3 = vmul.f32 1.442695, %v3893_v32  ;;  %v3258_v42 = vadd.f32 %v12843_v54, %v12769_v13  ;;  %v16065_v29 = vmax.f32 %v13003_v17, 0.0  ;;  %v3387_v5 = vmax.f32 %v13064_v11, 0.0  ;;  %v16073_v11 = vld [vmem:[#allocation29_spill] sm:$0xff] }
 0x4d0   : > { %v4047_v46 = vunpack.c.l.bf16 %v4007_v12  ;;  %v4051_v52 = vunpack.c.h.bf16 %v4007_v12  ;;  %v3707_v21 = vadd.f32 1.0, %v8657_v60  ;;  %v3455_v4 = vand.u32 2147483647, %v13108_v38  ;;  %v8659_v37 = vpop.eup %8658  ;;  %v13136_v60 = vpop.f32.mrb[66].mxu1 }
 0x4d1   : > { %v4009_v28 = vpack.c.bf16 %v3957_v3, %v3953_v6  ;;  %v3894_v41 = vadd.f32 %v3791_v19, %v16065_v29  ;;  %v16066_v59 = vmax.f32 %v13019_v24, 0.0  ;;  %v3793_v15 = vmul.f32 0.6931472, %v8655_v14  ;;  %v16067_v14 = vld [vmem:[#allocation109_spill] sm:$0xff] }
 0x4d2   : > { %v4191_v53 = vmul.f32 %v13086_v45, %v4047_v46  ;;  %8670 = vlog2.f32 %v3707_v21  ;;  %v4195_v54 = vmul.f32 %v13088_v18, %v4051_v52  ;;  %v3709_v57 = vadd.f32 1.0, %v8659_v37 }
 0x4d3   : > { %v3896_v36 = vadd.f32 %v3795_v50, %v16066_v59  ;;  %v4049_v26 = vunpack.c.l.bf16 %v4009_v28  ;;  %v4053_v16 = vunpack.c.h.bf16 %v4009_v28  ;;  %v3519_v25 = vsub.f32 0.0, %v3455_v4 }
 0x4d4   : > { %v4262_v17 = vadd.f32 %v13007_v9, %v4191_v53  ;;  %v13129_v51 = vmul.f32 1.3862944, %v3258_v42  ;;  %v3147_v32 = vadd.f32 %v12827_v27, %v12771_v0  ;;  %v8661_v19 = vpop.eup %8660  ;;  %v3958_v24 = vmul.f32 1.442695, %v3894_v41 }
 0x4d5   : > { %v4193_v12 = vmul.f32 %v13086_v45, %v4049_v26  ;;  %8672 = vlog2.f32 %v3709_v57  ;;  %v3260_v50 = vadd.f32 %v16067_v14, %v12771_v0  ;;  %v8663_v6 = vpop.eup %8662  ;;  %v4197_v9 = vmul.f32 %v13088_v18, %v4053_v16  ;;  %v13151_v57 = vpop.f32.mrb[67].mxu0  ;;  %v16088_v45 = vld [vmem:[#allocation95_spill] sm:$0xff] }
 0x4d6   : > { %v13138_v3 = vadd.f32 %v4262_v17, %v4195_v54  ;;  %v16068_v46 = vmax.f32 %v13022_v55, 0.0  ;;  %v3616_v21 = vmul.f32 1.442695, %v3519_v25  ;;  %v8665_v27 = vpop.eup %8664  ;;  %v3799_v28 = vmul.f32 0.6931472, %v8663_v6 }
 0x4d7   : > { %v4304_v42 = vadd.f32 %v13016_v22, %v4193_v12  ;;  %v3457_v29 = vand.u32 2147483647, %v13129_v51  ;;  %v13145_v41 = vmul.f32 1.3862944, %v3147_v32  ;;  %v8667_v4 = vpop.eup %8666  ;;  %v3797_v37 = vmul.f32 0.6931472, %v8661_v19 }
 0x4d8   : > { %v3895_v52 = vadd.f32 %v3793_v15, %v16068_v46  ;;  %v3710_v53 = vadd.f32 1.0, %v8665_v27  ;;  %8674 = vpow2.f32 %v3616_v21  ;;  %v13147_v59 = vmul.f32 1.3862944, %v3260_v50  ;;  %v8669_v54 = vpop.eup %8668  ;;  %v16070_v21 = vld [vmem:[#allocation129_spill] sm:$0xff] }
 0x4d9   : > { %v13149_v26 = vadd.f32 %v4304_v42, %v4197_v9  ;;  %v3898_v55 = vadd.f32 %v3799_v28, %v3386_v49  ;;  %v3803_v15 = vmul.f32 0.6931472, %v8667_v4  ;;  %v3521_v16 = vsub.f32 0.0, %v3457_v29 }
 0x4da   : > { %v3960_v22 = vmul.f32 1.442695, %v3896_v36  ;;  %v3959_v17 = vmul.f32 1.442695, %v3895_v52  ;;  %v3389_v25 = vmax.f32 %v13072_v47, 0.0  ;;  %v3712_v32 = vadd.f32 1.0, %v8669_v54 }
 0x4db   : > { %v3962_v12 = vmul.f32 1.442695, %v3898_v55  ;;  %v3900_v14 = vadd.f32 %v3803_v15, %v3388_v39  ;;  %v3620_v19 = vmul.f32 1.442695, %v3521_v16  ;;  %v3458_v6 = vand.u32 2147483647, %v13145_v41  ;;  %v13166_v55 = vpop.permute.xlu0 %4126 }
 0x4dc   : > { %v8671_v50 = vpop.eup %8670  ;;  %v16069_v46 = vmax.f32 %v13040_v48, 0.0  ;;  %8676 = vlog2.f32 %v3710_v53  ;;  %v3460_v49 = vand.u32 2147483647, %v13147_v59  ;;  %v3149_v27 = vadd.f32 %v16070_v21, %v12771_v0  ;;  %v13164_v53 = vpop.f32.mrb[67].mxu1  ;;  %16071 = vst [vmem:[#allocation93_spill] sm:$0xff] %v13166_v55 }
 0x4dd   : > { %v4010_v36 = vpack.c.bf16 %v3962_v12, %v3958_v24  ;;  %v3964_v52 = vmul.f32 1.442695, %v3900_v14  ;;  %v3801_v42 = vmul.f32 0.6931472, %v8671_v50  ;;  %8678 = vpow2.f32 %v3620_v19  ;;  %v13169_v50 = vpop.permute.xlu1 %4131 }
 0x4de   : > { %v3897_v9 = vadd.f32 %v3797_v37, %v16069_v46  ;;  %8680 = vlog2.f32 %v3712_v32  ;;  %v3522_v47 = vsub.f32 0.0, %v3458_v6  ;;  %v3524_v39 = vsub.f32 0.0, %v3460_v49  ;;  %16072 = vst [vmem:[#allocation21_spill] sm:$0xff] %v13169_v50 }
 0x4df   : > { %v13160_v28 = vmul.f32 1.3862944, %v3149_v27  ;;  %v8673_v29 = vpop.eup %8672  ;;  %v4054_v4 = vunpack.c.l.bf16 %v4010_v36  ;;  %v4058_v54 = vunpack.c.h.bf16 %v4010_v36  ;;  %v4012_v48 = vpack.c.bf16 %v3964_v52, %v3960_v22 }
 0x4e0   : > { %v3899_v37 = vadd.f32 %v3801_v42, %v3387_v5  ;;  %v3805_v24 = vmul.f32 0.6931472, %v8673_v29  ;;  %v3622_v15 = vmul.f32 1.442695, %v3522_v47  ;;  %v3626_v16 = vmul.f32 1.442695, %v3524_v39 }
 0x4e1   : > { %v3961_v12 = vmul.f32 1.442695, %v3897_v9  ;;  %v4198_v32 = vmul.f32 %v13166_v55, %v4054_v4  ;;  %v4056_v14 = vunpack.c.l.bf16 %v4012_v48  ;;  %v4060_v19 = vunpack.c.h.bf16 %v4012_v48 }
 0x4e2   : > { %v8675_v6 = vpop.eup %8674  ;;  %v3963_v46 = vmul.f32 1.442695, %v3899_v37  ;;  %v3901_v22 = vadd.f32 %v3805_v24, %v3389_v25  ;;  %8682 = vpow2.f32 %v3622_v15  ;;  %v3262_v5 = vadd.f32 %v16073_v11, %v12771_v0 }
 0x4e3   : > { %v4202_v49 = vmul.f32 %v13169_v50, %v4058_v54  ;;  %v4243_v21 = vadd.f32 %v13102_v44, %v4198_v32  ;;  %v4200_v27 = vmul.f32 %v13166_v55, %v4056_v14  ;;  %v3711_v9 = vadd.f32 1.0, %v8675_v6  ;;  %v16074_v32 = vld [vmem:[#allocation126_spill] sm:$0xff]  ;;  %v16075_v14 = vld [vmem:[#allocation108_spill] sm:$0xff] }
 0x4e4   : > { %v4011_v36 = vpack.c.bf16 %v3963_v46, %v3959_v17  ;;  %v3965_v52 = vmul.f32 1.442695, %v3901_v22  ;;  %8684 = vpow2.f32 %v3626_v16  ;;  %v3459_v42 = vand.u32 2147483647, %v13160_v28 }
 0x4e5   : > { %v13177_v47 = vadd.f32 %v4243_v21, %v4202_v49  ;;  %v4204_v25 = vmul.f32 %v13169_v50, %v4060_v19  ;;  %v4285_v39 = vadd.f32 %v13110_v31, %v4200_v27  ;;  %v3390_v29 = vmax.f32 %v13079_v30, 0.0 }
 0x4e6   : > { %v8677_v4 = vpop.eup %8676  ;;  %v4055_v54 = vunpack.c.l.bf16 %v4011_v36  ;;  %v4059_v48 = vunpack.c.h.bf16 %v4011_v36  ;;  %v4013_v44 = vpack.c.bf16 %v3965_v52, %v3961_v12  ;;  %v3523_v37 = vsub.f32 0.0, %v3459_v42 }
 0x4e7   : > { %v8679_v24 = vpop.eup %8678  ;;  %v13182_v15 = vadd.f32 %v4285_v39, %v4204_v25  ;;  %v3392_v17 = vmax.f32 %v13081_v2, 0.0  ;;  %v13185_v16 = vmul.f32 1.3862944, %v3262_v5  ;;  %v3153_v6 = vadd.f32 %v16075_v14, %v16074_v32 }
 0x4e8   : > { %v8681_v19 = vpop.eup %8680  ;;  %v4199_v31 = vmul.f32 %v13166_v55, %v4055_v54  ;;  %v4057_v46 = vunpack.c.l.bf16 %v4013_v44  ;;  %v4061_v30 = vunpack.c.h.bf16 %v4013_v44  ;;  %8686 = vlog2.f32 %v3711_v9 }
 0x4e9   : > { %v3713_v11 = vadd.f32 1.0, %v8679_v24  ;;  %v3624_v49 = vmul.f32 1.442695, %v3523_v37  ;;  %v4203_v21 = vmul.f32 %v13169_v50, %v4059_v48  ;;  %v3807_v27 = vmul.f32 0.6931472, %v8677_v4  ;;  %v16076_v48 = vld [vmem:[#allocation36_spill] sm:$0xff] }
 0x4ea   : > { %v4264_v2 = vadd.f32 %v13138_v3, %v4199_v31  ;;  %v4201_v5 = vmul.f32 %v13166_v55, %v4057_v46  ;;  %v4205_v36 = vmul.f32 %v13169_v50, %v4061_v30  ;;  %v3811_v52 = vmul.f32 0.6931472, %v8681_v19  ;;  %v13204_v3 = vpop.f32.mrb[68].mxu0  ;;  %v13206_v37 = vpop.f32.mrb[68].mxu1  ;;  %v16078_v30 = vld [vmem:[#allocation121_spill] sm:$0xff] }
 0x4eb   : > { %v3461_v42 = vand.u32 2147483647, %v13185_v16  ;;  %v13197_v25 = vmul.f32 1.3862944, %v3153_v6  ;;  %8688 = vpow2.f32 %v3624_v49  ;;  %v3266_v44 = vadd.f32 %v16076_v48, %v16074_v32  ;;  %v16079_v48 = vld [vmem:[#allocation73_spill] sm:$0xff] }
 0x4ec   : > { %v8683_v9 = vpop.eup %8682  ;;  %v13199_v39 = vadd.f32 %v4264_v2, %v4203_v21  ;;  %v4306_v54 = vadd.f32 %v13149_v26, %v4201_v5  ;;  %8690 = vlog2.f32 %v3713_v11  ;;  %v16077_v26 = vld [vmem:[#allocation105_spill] sm:$0xff]  ;;  %v3268_v49 = vadd.f32 %v16078_v30, %v16074_v32 }
 0x4ed   : > { %v3714_v4 = vadd.f32 1.0, %v8683_v9  ;;  %v3525_v24 = vsub.f32 0.0, %v3461_v42  ;;  %v3462_v14 = vand.u32 2147483647, %v13197_v25  ;;  %v13211_v31 = vmul.f32 1.3862944, %v3266_v44 }
 0x4ee   : > { %v8685_v6 = vpop.eup %8684  ;;  %v13209_v19 = vadd.f32 %v4306_v54, %v4205_v36  ;;  %v3155_v46 = vadd.f32 %v16077_v26, %v16074_v32  ;;  %v3902_v11 = vadd.f32 %v3807_v27, %v3390_v29  ;;  %v3394_v42 = vmax.f32 %v13145_v41, 0.0  ;;  %v16080_v36 = vld [vmem:[#allocation60_spill] sm:$0xff]  ;;  %v13227_v29 = vpop.f32.mrb[69].mxu0 }
 0x4ef   : > { %8692 = vlog2.f32 %v3714_v4  ;;  %v3716_v21 = vadd.f32 1.0, %v8685_v6  ;;  %v3628_v2 = vmul.f32 1.442695, %v3525_v24  ;;  %v3526_v5 = vsub.f32 0.0, %v3462_v14  ;;  %16081 = vst [vmem:[#allocation75_spill] sm:$0xff] %v13227_v29 }
 0x4f0   : > { %v3464_v9 = vand.u32 2147483647, %v13211_v31  ;;  %v3157_v54 = vadd.f32 %v16080_v36, %v16079_v48  ;;  %v13221_v12 = vmul.f32 1.3862944, %v3155_v46  ;;  %v13223_v26 = vmul.f32 1.3862944, %v3268_v49 }
 0x4f1   : > { %8694 = vlog2.f32 %v3716_v21  ;;  %v3630_v44 = vmul.f32 1.442695, %v3526_v5  ;;  %v3904_v30 = vadd.f32 %v3811_v52, %v3392_v17  ;;  %v3396_v41 = vmax.f32 %v13147_v59, 0.0  ;;  %v16082_v21 = vld [vmem:[#allocation55_spill] sm:$0xff]  ;;  %v13238_v59 = vpop.f32.mrb[69].mxu1 }
 0x4f2   : > { %v8687_v22 = vpop.eup %8686  ;;  %8696 = vpow2.f32 %v3628_v2  ;;  %v3528_v4 = vsub.f32 0.0, %v3464_v9  ;;  %v13225_v24 = vmul.f32 1.3862944, %v3157_v54  ;;  %v3463_v14 = vand.u32 2147483647, %v13221_v12  ;;  %v16083_v9 = vld [vmem:[#allocation7_spill] sm:$0xff] }
 0x4f3   : > { %8698 = vpow2.f32 %v3630_v44  ;;  %v3966_v6 = vmul.f32 1.442695, %v3902_v11  ;;  %v3465_v49 = vand.u32 2147483647, %v13223_v26  ;;  %v3270_v17 = vadd.f32 %v16082_v21, %v16079_v48  ;;  %16084 = vst [vmem:[#allocation69_spill] sm:$0xff] %v13238_v59  ;;  %v16090_v59 = vld [vmem:[#allocation74_spill] sm:$0xff] }
 0x4f4   : > { %v3634_v46 = vmul.f32 1.442695, %v3528_v4  ;;  %v3809_v52 = vmul.f32 0.6931472, %v8687_v22  ;;  %v3527_v2 = vsub.f32 0.0, %v3463_v14  ;;  %v3159_v36 = vadd.f32 %v16083_v9, %v16079_v48  ;;  %v13246_v9 = vpop.f32.mrb[70].mxu0 }
 0x4f5   : > { %v3466_v5 = vand.u32 2147483647, %v13225_v24  ;;  %v8689_v54 = vpop.eup %8688  ;;  %v3968_v44 = vmul.f32 1.442695, %v3904_v30  ;;  %v3529_v27 = vsub.f32 0.0, %v3465_v49  ;;  %16085 = vst [vmem:[#allocation62_spill] sm:$0xff] %v13246_v9  ;;  %v3272_v13 = vadd.f32 %v16088_v45, %v16079_v48 }
 0x4f6   : > { %8700 = vpow2.f32 %v3634_v46  ;;  %v13240_v11 = vmul.f32 1.3862944, %v3270_v17  ;;  %v8691_v4 = vpop.eup %8690  ;;  %v3715_v32 = vadd.f32 1.0, %v8689_v54  ;;  %v3632_v50 = vmul.f32 1.442695, %v3527_v2  ;;  %v13251_v54 = vpop.f32.mrb[70].mxu1 }
 0x4f7   : > { %v3530_v55 = vsub.f32 0.0, %v3466_v5  ;;  %v13242_v21 = vmul.f32 1.3862944, %v3159_v36  ;;  %v3636_v14 = vmul.f32 1.442695, %v3529_v27  ;;  %v16086_v30 = vmax.f32 %v13108_v38, 0.0 }
 0x4f8   : > { %v3468_v0 = vand.u32 2147483647, %v13240_v11  ;;  %8702 = vlog2.f32 %v3715_v32  ;;  %16087 = vst [vmem:[#allocation15_spill] sm:$0xff] %v13251_v54  ;;  %v3813_v2 = vmul.f32 0.6931472, %v8691_v4  ;;  %v16089_v9 = vld [vmem:[#allocation127_spill] sm:$0xff] }
 0x4f9   : > { %v8693_v18 = vpop.eup %8692  ;;  %v3903_v46 = vadd.f32 %v3809_v52, %v16086_v30  ;;  %v3638_v49 = vmul.f32 1.442695, %v3530_v55  ;;  %v3467_v17 = vand.u32 2147483647, %v13242_v21  ;;  %8704 = vpow2.f32 %v3632_v50  ;;  %v13261_v50 = vpop.f32.mrb[71].mxu0 }
 0x4fa   : > { %v3815_v5 = vmul.f32 0.6931472, %v8693_v18  ;;  %v3532_v36 = vsub.f32 0.0, %v3468_v0  ;;  %8706 = vpow2.f32 %v3636_v14  ;;  %v3163_v38 = vadd.f32 %v16090_v59, %v16089_v9 }
 0x4fb   : > { %v8695_v22 = vpop.eup %8694  ;;  %v3531_v27 = vsub.f32 0.0, %v3467_v17  ;;  %8708 = vpow2.f32 %v3638_v49  ;;  %v13257_v18 = vmul.f32 1.3862944, %v3272_v13  ;;  %v3276_v0 = vadd.f32 %v12908_v62, %v16089_v9  ;;  %v13267_v49 = vpop.f32.mrb[71].mxu1 }
 0x4fc   : > { %v8697_v52 = vpop.eup %8696  ;;  %v3906_v32 = vadd.f32 %v3815_v5, %v3394_v42  ;;  %v3819_v55 = vmul.f32 0.6931472, %v8695_v22  ;;  %v3642_v30 = vmul.f32 1.442695, %v3532_v36  ;;  %v13265_v22 = vmul.f32 1.3862944, %v3163_v38  ;;  %v13272_v38 = vpop.permute.xlu0 %4136 }
 0x4fd   : > { %v8699_v29 = vpop.eup %8698  ;;  %v3717_v54 = vadd.f32 1.0, %v8697_v52  ;;  %v3640_v4 = vmul.f32 1.442695, %v3531_v27  ;;  %v3469_v59 = vand.u32 2147483647, %v13257_v18  ;;  %16091 = vst [vmem:[#allocation104_spill] sm:$0xff] %v13267_v49  ;;  %v13274_v42 = vpop.permute.xlu1 %4141 }
 0x4fe   : > { %v3970_v14 = vmul.f32 1.442695, %v3906_v32  ;;  %v3908_v45 = vadd.f32 %v3819_v55, %v3396_v41  ;;  %v3718_v17 = vadd.f32 1.0, %v8699_v29  ;;  %8710 = vpow2.f32 %v3642_v30  ;;  %16092 = vst [vmem:[#allocation23_spill] sm:$0xff] %v13272_v38  ;;  %16093 = vst [vmem:[#allocation70_spill] sm:$0xff] %v13274_v42  ;;  %v13281_v49 = vpop.f32.mrb[72].mxu0 }
 0x4ff   : > { %8712 = vlog2.f32 %v3717_v54  ;;  %v13269_v62 = vmul.f32 1.3862944, %v3276_v0  ;;  %v3967_v27 = vmul.f32 1.442695, %v3903_v46  ;;  %v3533_v29 = vsub.f32 0.0, %v3469_v59  ;;  %16095 = vst [vmem:[#allocation57_spill] sm:$0xff] %v13281_v49 }
 0x500   : > { %v8701_v13 = vpop.eup %8700  ;;  %v4014_v5 = vpack.c.bf16 %v3970_v14, %v3966_v6  ;;  %v3972_v36 = vmul.f32 1.442695, %v3908_v45  ;;  %8714 = vlog2.f32 %v3718_v17  ;;  %v3470_v55 = vand.u32 2147483647, %v13265_v22 }
 0x501   : > { %v3720_v52 = vadd.f32 1.0, %v8701_v13  ;;  %8716 = vpow2.f32 %v3640_v4  ;;  %v16094_v6 = vmax.f32 %v13129_v51, 0.0  ;;  %v3644_v0 = vmul.f32 1.442695, %v3533_v29  ;;  %v13283_v51 = vpop.f32.mrb[72].mxu1 }
 0x502   : > { %v4062_v41 = vunpack.c.l.bf16 %v4014_v5  ;;  %v4066_v54 = vunpack.c.h.bf16 %v4014_v5  ;;  %v4016_v32 = vpack.c.bf16 %v3972_v36, %v3968_v44  ;;  %v8703_v30 = vpop.eup %8702  ;;  %v3472_v46 = vand.u32 2147483647, %v13269_v62  ;;  %16096 = vst [vmem:[#allocation24_spill] sm:$0xff] %v13283_v51 }
 0x503   : > { %v3905_v14 = vadd.f32 %v3813_v2, %v16094_v6  ;;  %8718 = vlog2.f32 %v3720_v52  ;;  %v8705_v45 = vpop.eup %8704  ;;  %v3817_v5 = vmul.f32 0.6931472, %v8703_v30  ;;  %v3534_v48 = vsub.f32 0.0, %v3470_v55 }
 0x504   : > { %v4206_v4 = vmul.f32 %v13272_v38, %v4062_v41  ;;  %v4210_v17 = vmul.f32 %v13274_v42, %v4066_v54  ;;  %v4064_v44 = vunpack.c.l.bf16 %v4016_v32  ;;  %v4068_v59 = vunpack.c.h.bf16 %v4016_v32  ;;  %v8707_v13 = vpop.eup %8706  ;;  %v13288_v54 = vpop.f32.mrb[73].mxu0 }
 0x505   : > { %v3719_v36 = vadd.f32 1.0, %v8705_v45  ;;  %8720 = vpow2.f32 %v3644_v0  ;;  %v8709_v2 = vpop.eup %8708  ;;  %v3721_v6 = vadd.f32 1.0, %v8707_v13  ;;  %16097 = vst [vmem:[#allocation64_spill] sm:$0xff] %v13288_v54  ;;  %v16098_v32 = vmax.f32 %v13160_v28, 0.0  ;;  %v13292_v45 = vpop.f32.mrb[73].mxu1  ;;  %v16099_v54 = vld [vmem:[#allocation92_spill] sm:$0xff] }
 0x506   : > { %v4245_v52 = vadd.f32 %v13177_v47, %v4206_v4  ;;  %v4208_v29 = vmul.f32 %v13272_v38, %v4064_v44  ;;  %v4212_v41 = vmul.f32 %v13274_v42, %v4068_v59  ;;  %v3722_v0 = vadd.f32 1.0, %v8709_v2 }
 0x507   : > { %v3907_v30 = vadd.f32 %v3817_v5, %v16098_v32  ;;  %8722 = vlog2.f32 %v3719_v36  ;;  %v3646_v55 = vmul.f32 1.442695, %v3534_v48  ;;  %v3536_v4 = vsub.f32 0.0, %v3472_v46  ;;  %v13304_v46 = vpop.f32.mrb[74].mxu0 }
 0x508   : > { %v8711_v49 = vpop.eup %8710  ;;  %v13294_v51 = vadd.f32 %v4245_v52, %v4210_v17  ;;  %v4287_v47 = vadd.f32 %v13182_v15, %v4208_v29  ;;  %8724 = vlog2.f32 %v3721_v6  ;;  %v3165_v28 = vadd.f32 %v16099_v54, %v16089_v9  ;;  %16100 = vst [vmem:[#allocation51_spill] sm:$0xff] %v13304_v46 }
 0x509   : > { %v8713_v44 = vpop.eup %8712  ;;  %v3971_v59 = vmul.f32 1.442695, %v3907_v30  ;;  %8726 = vlog2.f32 %v3722_v0  ;;  %v3724_v13 = vadd.f32 1.0, %v8711_v49  ;;  %v3650_v2 = vmul.f32 1.442695, %v3536_v4 }
 0x50a   : > { %v8715_v5 = vpop.eup %8714  ;;  %v13299_v36 = vadd.f32 %v4287_v47, %v4212_v41  ;;  %v3821_v48 = vmul.f32 0.6931472, %v8713_v44  ;;  %8728 = vpow2.f32 %v3646_v55  ;;  %v3400_v52 = vmax.f32 %v13211_v31, 0.0 }
 0x50b   : > { %v8717_v32 = vpop.eup %8716  ;;  %v4015_v17 = vpack.c.bf16 %v3971_v59, %v3967_v27  ;;  %8730 = vlog2.f32 %v3724_v13  ;;  %v13302_v15 = vmul.f32 1.3862944, %v3165_v28  ;;  %v16101_v49 = vmax.f32 %v13185_v16, 0.0 }
 0x50c   : > { %v3723_v6 = vadd.f32 1.0, %v8717_v32  ;;  %8732 = vpow2.f32 %v3650_v2  ;;  %v3278_v41 = vadd.f32 %v12915_v56, %v16089_v9  ;;  %v3823_v55 = vmul.f32 0.6931472, %v8715_v5  ;;  %v13316_v56 = vpop.f32.mrb[74].mxu1 }
 0x50d   : > { %v3909_v29 = vadd.f32 %v3821_v48, %v16101_v49  ;;  %v8719_v54 = vpop.eup %8718  ;;  %v4063_v30 = vunpack.c.l.bf16 %v4015_v17  ;;  %v4067_v0 = vunpack.c.h.bf16 %v4015_v17  ;;  %v3399_v27 = vmax.f32 %v13221_v12, 0.0  ;;  %16102 = vst [vmem:[#allocation103_spill] sm:$0xff] %v13316_v56 }
 0x50e   : > { %v3969_v31 = vmul.f32 1.442695, %v3905_v14  ;;  %8734 = vlog2.f32 %v3723_v6  ;;  %v3471_v4 = vand.u32 2147483647, %v13302_v15  ;;  %v3827_v59 = vmul.f32 0.6931472, %v8719_v54 }
 0x50f   : > { %v3973_v47 = vmul.f32 1.442695, %v3909_v29  ;;  %v8721_v44 = vpop.eup %8720  ;;  %v4207_v16 = vmul.f32 %v13272_v38, %v4063_v30  ;;  %v13314_v28 = vmul.f32 1.3862944, %v3278_v41  ;;  %v3402_v5 = vmax.f32 %v13225_v24, 0.0  ;;  %v13324_v54 = vpop.f32.mrb[75].mxu0 }
 0x510   : > { %v3725_v2 = vadd.f32 1.0, %v8721_v44  ;;  %v3535_v12 = vsub.f32 0.0, %v3471_v4  ;;  %v4211_v32 = vmul.f32 %v13274_v42, %v4067_v0  ;;  %v16103_v49 = vmax.f32 %v13197_v25, 0.0  ;;  %16104 = vst [vmem:[#allocation88_spill] sm:$0xff] %v13324_v54  ;;  %v13326_v41 = vpop.f32.mrb[75].mxu1 }
 0x511   : > { %v4017_v48 = vpack.c.bf16 %v3973_v47, %v3969_v31  ;;  %v8723_v14 = vpop.eup %8722  ;;  %v4266_v17 = vadd.f32 %v13199_v39, %v4207_v16  ;;  %v3404_v6 = vmax.f32 %v13240_v11, 0.0  ;;  %16105 = vst [vmem:[#allocation87_spill] sm:$0xff] %v13326_v41  ;;  %v3473_v4 = vand.u32 2147483647, %v13314_v28 }
 0x512   : > { %v3910_v29 = vadd.f32 %v3823_v55, %v16103_v49  ;;  %v8725_v30 = vpop.eup %8724  ;;  %v3825_v24 = vmul.f32 0.6931472, %v8723_v14  ;;  %v3912_v0 = vadd.f32 %v3827_v59, %v3400_v52  ;;  %8736 = vlog2.f32 %v3725_v2  ;;  %v16106_v49 = vld [vmem:[#allocation131_spill] sm:$0xff] }
 0x513   : > { %v4065_v31 = vunpack.c.l.bf16 %v4017_v48  ;;  %v4069_v47 = vunpack.c.h.bf16 %v4017_v48  ;;  %v8727_v44 = vpop.eup %8726  ;;  %v13329_v13 = vadd.f32 %v4266_v17, %v4211_v32  ;;  %v3648_v39 = vmul.f32 1.442695, %v3535_v12 }
 0x514   : > { %v8729_v25 = vpop.eup %8728  ;;  %v3831_v11 = vmul.f32 0.6931472, %v8727_v44  ;;  %v3403_v16 = vmax.f32 %v13242_v21, 0.0  ;;  %v3167_v9 = vadd.f32 %v12902_v35, %v16106_v49  ;;  %v3911_v14 = vadd.f32 %v3825_v24, %v3399_v27 }
 0x515   : > { %v4209_v55 = vmul.f32 %v13272_v38, %v4065_v31  ;;  %v8731_v41 = vpop.eup %8730  ;;  %v4213_v48 = vmul.f32 %v13274_v42, %v4069_v47  ;;  %v3405_v54 = vmax.f32 %v13257_v18, 0.0  ;;  %v3726_v32 = vadd.f32 1.0, %v8729_v25 }
 0x516   : > { %v8733_v17 = vpop.eup %8732  ;;  %v3914_v59 = vadd.f32 %v3831_v11, %v3402_v5  ;;  %v3835_v2 = vmul.f32 0.6931472, %v8731_v41  ;;  %v3537_v12 = vsub.f32 0.0, %v3473_v4  ;;  %v3974_v31 = vmul.f32 1.442695, %v3910_v29  ;;  %v13344_v4 = vpop.f32.mrb[76].mxu0 }
 0x517   : > { %v4308_v52 = vadd.f32 %v13209_v19, %v4209_v55  ;;  %v3976_v44 = vmul.f32 1.442695, %v3912_v0  ;;  %v3728_v38 = vadd.f32 1.0, %v8733_v17  ;;  %8738 = vpow2.f32 %v3648_v39  ;;  %v13346_v0 = vpop.f32.mrb[76].mxu1 }
 0x518   : > { %v8735_v21 = vpop.eup %8734  ;;  %v3978_v35 = vmul.f32 1.442695, %v3914_v59  ;;  %v3916_v46 = vadd.f32 %v3835_v2, %v3404_v6  ;;  %v13340_v47 = vmul.f32 1.3862944, %v3167_v9  ;;  %v3975_v27 = vmul.f32 1.442695, %v3911_v14  ;;  %v13359_v2 = vpop.permute.xlu1 %4151 }
 0x519   : > { %v13338_v56 = vadd.f32 %v4308_v52, %v4213_v48  ;;  %v3829_v18 = vmul.f32 0.6931472, %v8725_v30  ;;  %v3833_v24 = vmul.f32 0.6931472, %v8735_v21  ;;  %v3280_v19 = vadd.f32 %v12927_v23, %v16106_v49  ;;  %16109 = vst [vmem:[#allocation32_spill] sm:$0xff] %v13359_v2 }
 0x51a   : > { %v4018_v5 = vpack.c.bf16 %v3978_v35, %v3974_v31  ;;  %v3980_v41 = vmul.f32 1.442695, %v3916_v46  ;;  %8740 = vlog2.f32 %v3726_v32  ;;  %v3652_v29 = vmul.f32 1.442695, %v3537_v12  ;;  %v13353_v46 = vpop.permute.xlu0 %4146 }
 0x51b   : > { %v3915_v39 = vadd.f32 %v3833_v24, %v3403_v16  ;;  %8742 = vlog2.f32 %v3728_v38  ;;  %v3474_v6 = vand.u32 2147483647, %v13340_v47  ;;  %v13349_v9 = vmul.f32 1.3862944, %v3280_v19  ;;  %16107 = vst [vmem:[#allocation19_spill] sm:$0xff] %v13353_v46  ;;  %v13366_v24 = vpop.f32.mrb[77].mxu0 }
 0x51c   : > { %v4070_v25 = vunpack.c.l.bf16 %v4018_v5  ;;  %v4074_v30 = vunpack.c.h.bf16 %v4018_v5  ;;  %v4020_v55 = vpack.c.bf16 %v3980_v41, %v3976_v44  ;;  %v3169_v23 = vadd.f32 %v12948_v7, %v16106_v49  ;;  %v8737_v11 = vpop.eup %8736  ;;  %v13368_v19 = vpop.f32.mrb[77].mxu1 }
 0x51d   : > { %v16108_v48 = vmax.f32 %v13223_v26, 0.0  ;;  %v3979_v32 = vmul.f32 1.442695, %v3915_v39  ;;  %v3538_v17 = vsub.f32 0.0, %v3474_v6  ;;  %v3476_v38 = vand.u32 2147483647, %v13349_v9 }
 0x51e   : > { %v4214_v16 = vmul.f32 %v13353_v46, %v4070_v25  ;;  %v4072_v52 = vunpack.c.l.bf16 %v4020_v55  ;;  %v4076_v59 = vunpack.c.h.bf16 %v4020_v55  ;;  %8744 = vpow2.f32 %v3652_v29 }
 0x51f   : > { %v3913_v14 = vadd.f32 %v3829_v18, %v16108_v48  ;;  %v4019_v12 = vpack.c.bf16 %v3979_v32, %v3975_v27  ;;  %v3837_v31 = vmul.f32 0.6931472, %v8737_v11  ;;  %v3654_v7 = vmul.f32 1.442695, %v3538_v17 }
 0x520   : > { %v3540_v44 = vsub.f32 0.0, %v3476_v38  ;;  %v4218_v21 = vmul.f32 %v13359_v2, %v4074_v30  ;;  %v4247_v26 = vadd.f32 %v13294_v51, %v4214_v16  ;;  %v4216_v35 = vmul.f32 %v13353_v46, %v4072_v52 }
 0x521   : > { %v13364_v18 = vmul.f32 1.3862944, %v3169_v23  ;;  %v8739_v5 = vpop.eup %8738  ;;  %v4071_v41 = vunpack.c.l.bf16 %v4019_v12  ;;  %v4075_v29 = vunpack.c.h.bf16 %v4019_v12  ;;  %v3917_v39 = vadd.f32 %v3837_v31, %v3405_v54  ;;  %v13379_v54 = vpop.f32.mrb[78].mxu0 }
 0x522   : > { %8746 = vpow2.f32 %v3654_v7  ;;  %v13370_v27 = vadd.f32 %v4247_v26, %v4218_v21  ;;  %v4220_v6 = vmul.f32 %v13359_v2, %v4076_v59  ;;  %v4289_v25 = vadd.f32 %v13299_v36, %v4216_v35  ;;  %v13390_v26 = vpop.f32.mrb[78].mxu1 }
 0x523   : > { %v3282_v51 = vadd.f32 %v12965_v8, %v16106_v49  ;;  %v3977_v30 = vmul.f32 1.442695, %v3913_v14  ;;  %v4215_v55 = vmul.f32 %v13353_v46, %v4071_v41  ;;  %v3981_v23 = vmul.f32 1.442695, %v3917_v39 }
 0x524   : > { %v3658_v11 = vmul.f32 1.442695, %v3540_v44  ;;  %v8741_v48 = vpop.eup %8740  ;;  %v13377_v32 = vadd.f32 %v4289_v25, %v4220_v6  ;;  %v3727_v17 = vadd.f32 1.0, %v8739_v5  ;;  %v4219_v16 = vmul.f32 %v13359_v2, %v4075_v29  ;;  %v16110_v29 = vld [vmem:[#allocation110_spill] sm:$0xff] }
 0x525   : > { %v8743_v38 = vpop.eup %8742  ;;  %v4268_v52 = vadd.f32 %v13329_v13, %v4215_v55  ;;  %v4021_v36 = vpack.c.bf16 %v3981_v23, %v3977_v30  ;;  %v3406_v8 = vmax.f32 %v13265_v22, 0.0  ;;  %v3408_v14 = vmax.f32 %v13269_v62, 0.0 }
 0x526   : > { %8748 = vpow2.f32 %v3658_v11  ;;  %v3475_v59 = vand.u32 2147483647, %v13364_v18  ;;  %v13386_v12 = vmul.f32 1.3862944, %v3282_v51  ;;  %v3839_v21 = vmul.f32 0.6931472, %v8741_v48 }
 0x527   : > { %v13388_v31 = vadd.f32 %v4268_v52, %v4219_v16  ;;  %v4073_v7 = vunpack.c.l.bf16 %v4021_v36  ;;  %v4077_v44 = vunpack.c.h.bf16 %v4021_v36  ;;  %v3843_v5 = vmul.f32 0.6931472, %v8743_v38  ;;  %v16111_v38 = vld [vmem:[#allocation112_spill] sm:$0xff]  ;;  %v13410_v16 = vpop.f32.mrb[79].mxu0 }
 0x528   : > { %v8745_v35 = vpop.eup %8744  ;;  %8750 = vlog2.f32 %v3727_v17  ;;  %v3539_v13 = vsub.f32 0.0, %v3475_v59  ;;  %v3477_v41 = vand.u32 2147483647, %v13386_v12  ;;  %v3173_v39 = vadd.f32 %v12989_v20, %v16110_v29 }
 0x529   : > { %v4217_v22 = vmul.f32 %v13353_v46, %v4073_v7  ;;  %v4221_v62 = vmul.f32 %v13359_v2, %v4077_v44  ;;  %v3286_v6 = vadd.f32 %v12991_v63, %v16110_v29  ;;  %v3175_v30 = vadd.f32 %v12997_v58, %v16110_v29  ;;  %v13412_v63 = vpop.f32.mrb[79].mxu1 }
 0x52a   : > { %v3656_v25 = vmul.f32 1.442695, %v3539_v13  ;;  %v3541_v51 = vsub.f32 0.0, %v3477_v41  ;;  %v3288_v55 = vadd.f32 %v12999_v61, %v16110_v29  ;;  %v13404_v48 = vmul.f32 1.3862944, %v3173_v39 }
 0x52b   : > { %v4310_v11 = vadd.f32 %v13338_v56, %v4217_v22  ;;  %v13406_v17 = vmul.f32 1.3862944, %v3286_v6  ;;  %v3177_v20 = vadd.f32 %v13028_v10, %v16111_v38  ;;  %v13414_v36 = vmul.f32 1.3862944, %v3175_v30 }
 0x52c   : > { %v8747_v23 = vpop.eup %8746  ;;  %8752 = vpow2.f32 %v3656_v25  ;;  %v3660_v58 = vmul.f32 1.442695, %v3541_v51  ;;  %v3729_v59 = vadd.f32 1.0, %v8745_v35  ;;  %v3478_v7 = vand.u32 2147483647, %v13404_v48 }
 0x52d   : > { %v3730_v52 = vadd.f32 1.0, %v8747_v23  ;;  %v13416_v61 = vadd.f32 %v4310_v11, %v4221_v62  ;;  %v3918_v44 = vadd.f32 %v3839_v21, %v3406_v8  ;;  %v3920_v13 = vadd.f32 %v3843_v5, %v3408_v14 }
 0x52e   : > { %v3480_v10 = vand.u32 2147483647, %v13406_v17  ;;  %v3542_v39 = vsub.f32 0.0, %v3478_v7  ;;  %v3479_v6 = vand.u32 2147483647, %v13414_v36  ;;  %v3290_v14 = vadd.f32 %v13032_v40, %v16111_v38 }
 0x52f   : > { %8754 = vlog2.f32 %v3730_v52  ;;  %v13423_v51 = vmul.f32 1.3862944, %v3288_v55  ;;  %v13425_v30 = vmul.f32 1.3862944, %v3177_v20  ;;  %v13429_v5 = vmul.f32 1.442695, %v3918_v44 }
 0x530   : > { %v8749_v41 = vpop.eup %8748  ;;  %8756 = vpow2.f32 %v3660_v58  ;;  %v3544_v62 = vsub.f32 0.0, %v3480_v10  ;;  %v3662_v35 = vmul.f32 1.442695, %v3542_v39  ;;  %v3543_v8 = vsub.f32 0.0, %v3479_v6  ;;  %v13435_v58 = vpop.f32.mrb[80].mxu0 }
 0x531   : > { %v3732_v25 = vadd.f32 1.0, %v8749_v41  ;;  %8758 = vlog2.f32 %v3729_v59  ;;  %v13431_v23 = vmul.f32 1.442695, %v3920_v13  ;;  %v3410_v52 = vmax.f32 %v13340_v47, 0.0  ;;  %v13441_v44 = vpop.f32.mrb[80].mxu1 }
 0x532   : > { %v8751_v21 = vpop.eup %8750  ;;  %v3666_v11 = vmul.f32 1.442695, %v3544_v62  ;;  %v3664_v55 = vmul.f32 1.442695, %v3543_v8  ;;  %v3481_v20 = vand.u32 2147483647, %v13423_v51  ;;  %v3179_v47 = vadd.f32 %v13038_v33, %v16111_v38 }
 0x533   : > { %8760 = vlog2.f32 %v3732_v25  ;;  %v3412_v59 = vmax.f32 %v13349_v9, 0.0  ;;  %v3482_v40 = vand.u32 2147483647, %v13425_v30  ;;  %v13439_v7 = vmul.f32 1.3862944, %v3290_v14  ;;  %v16112_v14 = vld [vmem:[#allocation11_spill] sm:$0xff] }
 0x534   : > { %8762 = vpow2.f32 %v3662_v35  ;;  %v3545_v13 = vsub.f32 0.0, %v3481_v20  ;;  %v3292_v10 = vadd.f32 %v13048_v34, %v16111_v38  ;;  %v3841_v39 = vmul.f32 0.6931472, %v8751_v21  ;;  %v16114_v21 = vld [vmem:[#allocation22_spill] sm:$0xff] }
 0x535   : > { %8764 = vpow2.f32 %v3666_v11  ;;  %v3546_v9 = vsub.f32 0.0, %v3482_v40  ;;  %v3484_v25 = vand.u32 2147483647, %v13439_v7  ;;  %v13449_v8 = vmul.f32 1.3862944, %v3179_v47 }
 0x536   : > { %8766 = vpow2.f32 %v3664_v55  ;;  %v8753_v41 = vpop.eup %8752  ;;  %v3668_v35 = vmul.f32 1.442695, %v3545_v13  ;;  %v5234_v11 = vadd.f32 %v13074_v43, %v16112_v14  ;;  %v13453_v55 = vpop.f32.mrb[81].mxu0  ;;  %v13455_v34 = vmul.f32 1.3862944, %v3292_v10 }
 0x537   : > { %v3731_v62 = vadd.f32 1.0, %v8753_v41  ;;  %16113 = vst [vmem:[#allocation35_spill] sm:$0xff] %v13453_v55  ;;  %v3670_v20 = vmul.f32 1.442695, %v3546_v9  ;;  %v3548_v22 = vsub.f32 0.0, %v3484_v25  ;;  %v5347_v6 = vadd.f32 %v16114_v21, %v16112_v14  ;;  %v13461_v41 = vpop.f32.mrb[81].mxu1 }
 0x538   : > { %v3483_v47 = vand.u32 2147483647, %v13449_v8  ;;  %16115 = vst [vmem:[#allocation78_spill] sm:$0xff] %v13461_v41  ;;  %v3485_v21 = vand.u32 2147483647, %v13455_v34 }
 0x539   : > { %v8755_v33 = vpop.eup %8754  ;;  %8768 = vlog2.f32 %v3731_v62  ;;  %v3674_v9 = vmul.f32 1.442695, %v3548_v22  ;;  %v16116_v62 = vmax.f32 %v13302_v15, 0.0  ;;  %v13467_v13 = vmul.f32 1.3862944, %v5234_v11  ;;  %v13474_v15 = vpop.f32.mrb[82].mxu0 }
 0x53a   : > { %v8757_v40 = vpop.eup %8756  ;;  %v3847_v56 = vmul.f32 0.6931472, %v8755_v33  ;;  %8770 = vpow2.f32 %v3668_v35  ;;  %v3547_v29 = vsub.f32 0.0, %v3483_v47  ;;  %v13469_v46 = vmul.f32 1.3862944, %v5347_v6  ;;  %v16117_v47 = vld [vmem:[#allocation91_spill] sm:$0xff] }
 0x53b   : > { %v3733_v43 = vadd.f32 1.0, %v8757_v40  ;;  %v8759_v25 = vpop.eup %8758  ;;  %8772 = vpow2.f32 %v3670_v20  ;;  %v3919_v33 = vadd.f32 %v3841_v39, %v16116_v62  ;;  %v5553_v20 = vand.u32 2147483647, %v13467_v13  ;;  %16118 = vst [vmem:[#allocation77_spill] sm:$0xff] %v13474_v15 }
 0x53c   : > { %v3922_v10 = vadd.f32 %v3847_v56, %v3410_v52  ;;  %v3672_v22 = vmul.f32 1.442695, %v3547_v29  ;;  %v3549_v52 = vsub.f32 0.0, %v3485_v21  ;;  %v5236_v42 = vadd.f32 %v16117_v47, %v16112_v14  ;;  %v13481_v47 = vpop.permute.xlu0 %4156 }
 0x53d   : > { %v8761_v2 = vpop.eup %8760  ;;  %8774 = vlog2.f32 %v3733_v43  ;;  %v5617_v21 = vsub.f32 0.0, %v5553_v20  ;;  %16121 = vst [vmem:[#allocation85_spill] sm:$0xff] %v13481_v47  ;;  %v3983_v15 = vmul.f32 1.442695, %v3919_v33  ;;  %v3845_v55 = vmul.f32 0.6931472, %v8759_v25 }
 0x53e   : > { %v8763_v40 = vpop.eup %8762  ;;  %v3986_v49 = vmul.f32 1.442695, %v3922_v10  ;;  %v3851_v38 = vmul.f32 0.6931472, %v8761_v2  ;;  %8776 = vpow2.f32 %v3674_v9  ;;  %v13477_v10 = vpop.f32.mrb[82].mxu1 }
 0x53f   : > { %v8765_v35 = vpop.eup %8764  ;;  %v3734_v56 = vadd.f32 1.0, %v8763_v40  ;;  %8778 = vpow2.f32 %v3672_v22  ;;  %16119 = vst [vmem:[#allocation99_spill] sm:$0xff] %v13477_v10  ;;  %v13479_v2 = vpop.f32.mrb[83].mxu0  ;;  %v3676_v9 = vmul.f32 1.442695, %v3549_v52 }
 0x540   : > { %v8767_v39 = vpop.eup %8766  ;;  %v4022_v11 = vpack.c.bf16 %v3986_v49, %v13429_v5  ;;  %v3924_v6 = vadd.f32 %v3851_v38, %v3412_v59  ;;  %v3736_v43 = vadd.f32 1.0, %v8765_v35  ;;  %16120 = vst [vmem:[#allocation76_spill] sm:$0xff] %v13479_v2  ;;  %v5681_v49 = vmul.f32 1.442695, %v5617_v21  ;;  %v13483_v5 = vpop.permute.xlu1 %4161 }
 0x541   : > { %8780 = vlog2.f32 %v3734_v56  ;;  %v3735_v29 = vadd.f32 1.0, %v8767_v39  ;;  %16122 = vst [vmem:[#allocation86_spill] sm:$0xff] %v13483_v5  ;;  %v5555_v35 = vand.u32 2147483647, %v13469_v46  ;;  %v13490_v33 = vmul.f32 1.3862944, %v5236_v42 }
 0x542   : > { %v4078_v62 = vunpack.c.l.bf16 %v4022_v11  ;;  %v4082_v40 = vunpack.c.h.bf16 %v4022_v11  ;;  %v3988_v41 = vmul.f32 1.442695, %v3924_v6  ;;  %8782 = vlog2.f32 %v3736_v43  ;;  %v13492_v25 = vpop.f32.mrb[83].mxu1 }
 0x543   : > { %8784 = vlog2.f32 %v3735_v29  ;;  %v8769_v38 = vpop.eup %8768  ;;  %16123 = vst [vmem:[#allocation39_spill] sm:$0xff] %v13492_v25  ;;  %v5619_v10 = vsub.f32 0.0, %v5555_v35 }
 0x544   : > { %v4222_v59 = vmul.f32 %v13481_v47, %v4078_v62  ;;  %v4024_v22 = vpack.c.bf16 %v3988_v41, %v13431_v23  ;;  %8786 = vpow2.f32 %v3676_v9  ;;  %v8771_v56 = vpop.eup %8770  ;;  %v4226_v52 = vmul.f32 %v13483_v5, %v4082_v40 }
 0x545   : > { %v3849_v20 = vmul.f32 0.6931472, %v8769_v38  ;;  %v8773_v11 = vpop.eup %8772  ;;  %v3737_v21 = vadd.f32 1.0, %v8771_v56  ;;  %v16124_v41 = vmax.f32 %v13314_v28, 0.0  ;;  %v16125_v62 = vmax.f32 %v13364_v18, 0.0 }
 0x546   : > { %v4249_v6 = vadd.f32 %v13370_v27, %v4222_v59  ;;  %v4080_v43 = vunpack.c.l.bf16 %v4024_v22  ;;  %v4084_v29 = vunpack.c.h.bf16 %v4024_v22  ;;  %v3738_v38 = vadd.f32 1.0, %v8773_v11 }
 0x547   : > { %v8775_v23 = vpop.eup %8774  ;;  %v3921_v9 = vadd.f32 %v3845_v55, %v16124_v41  ;;  %v3923_v40 = vadd.f32 %v3849_v20, %v16125_v62  ;;  %8788 = vpow2.f32 %v5681_v49  ;;  %v5554_v22 = vand.u32 2147483647, %v13490_v33 }
 0x548   : > { %v8777_v39 = vpop.eup %8776  ;;  %v13499_v42 = vadd.f32 %v4249_v6, %v4226_v52  ;;  %v4224_v25 = vmul.f32 %v13481_v47, %v4080_v43  ;;  %v3853_v2 = vmul.f32 0.6931472, %v8775_v23  ;;  %8790 = vlog2.f32 %v3737_v21 }
 0x549   : > { %v3987_v27 = vmul.f32 1.442695, %v3923_v40  ;;  %v3740_v59 = vadd.f32 1.0, %v8777_v39  ;;  %v8779_v56 = vpop.eup %8778  ;;  %v4228_v28 = vmul.f32 %v13483_v5, %v4084_v29  ;;  %v16126_v55 = vmax.f32 %v13386_v12, 0.0  ;;  %v13510_v12 = vpop.f32.mrb[84].mxu0 }
 0x54a   : > { %v4291_v18 = vadd.f32 %v13377_v32, %v4224_v25  ;;  %8792 = vlog2.f32 %v3738_v38  ;;  %v3415_v11 = vmax.f32 %v13414_v36, 0.0  ;;  %v3739_v35 = vadd.f32 1.0, %v8779_v56  ;;  %v16127_v56 = vld [vmem:[#allocation47_spill] sm:$0xff] }
 0x54b   : > { %v3925_v49 = vadd.f32 %v3853_v2, %v16126_v55  ;;  %v8781_v52 = vpop.eup %8780  ;;  %v4023_v20 = vpack.c.bf16 %v3987_v27, %v3983_v15  ;;  %8794 = vlog2.f32 %v3740_v59  ;;  %v3985_v43 = vmul.f32 1.442695, %v3921_v9  ;;  %v13512_v2 = vpop.f32.mrb[84].mxu1 }
 0x54c   : > { %v8783_v6 = vpop.eup %8782  ;;  %v13508_v39 = vadd.f32 %v4291_v18, %v4228_v28  ;;  %v3855_v23 = vmul.f32 0.6931472, %v8781_v52  ;;  %8796 = vlog2.f32 %v3739_v35  ;;  %v5618_v32 = vsub.f32 0.0, %v5554_v22  ;;  %v13519_v18 = vpop.f32.mrb[85].mxu0 }
 0x54d   : > { %v3989_v21 = vmul.f32 1.442695, %v3925_v49  ;;  %v8785_v41 = vpop.eup %8784  ;;  %v4079_v29 = vunpack.c.l.bf16 %v4023_v20  ;;  %v4083_v62 = vunpack.c.h.bf16 %v4023_v20  ;;  %v3417_v36 = vmax.f32 %v13423_v51, 0.0  ;;  %v13523_v35 = vpop.f32.mrb[85].mxu1 }
 0x54e   : > { %v8787_v15 = vpop.eup %8786  ;;  %v3418_v40 = vmax.f32 %v13425_v30, 0.0  ;;  %v5685_v9 = vmul.f32 1.442695, %v5619_v10  ;;  %v3859_v27 = vmul.f32 0.6931472, %v8783_v6  ;;  %v5349_v28 = vadd.f32 %v16127_v56, %v16112_v14 }
 0x54f   : > { %v4025_v25 = vpack.c.bf16 %v3989_v21, %v3985_v43  ;;  %v4223_v38 = vmul.f32 %v13481_v47, %v4079_v29  ;;  %v3741_v59 = vadd.f32 1.0, %v8787_v15  ;;  %v16128_v49 = vmax.f32 %v13404_v48, 0.0 }
 0x550   : > { %v3857_v20 = vmul.f32 0.6931472, %v8785_v41  ;;  %v4227_v30 = vmul.f32 %v13483_v5, %v4083_v62  ;;  %v5683_v6 = vmul.f32 1.442695, %v5618_v32  ;;  %v3420_v14 = vmax.f32 %v13439_v7, 0.0  ;;  %v16130_v62 = vld [vmem:[#allocation72_spill] sm:$0xff] }
 0x551   : > { %v4081_v22 = vunpack.c.l.bf16 %v4025_v25  ;;  %v4085_v55 = vunpack.c.h.bf16 %v4025_v25  ;;  %v3926_v52 = vadd.f32 %v3855_v23, %v16128_v49  ;;  %v8789_v51 = vpop.eup %8788  ;;  %v4270_v10 = vadd.f32 %v13388_v31, %v4223_v38 }
 0x552   : > { %8798 = vlog2.f32 %v3741_v59  ;;  %v3419_v21 = vmax.f32 %v13449_v8, 0.0  ;;  %v8791_v29 = vpop.eup %8790  ;;  %v16129_v23 = vmax.f32 %v13406_v17, 0.0  ;;  %v13534_v15 = vmul.f32 1.3862944, %v5349_v28 }
 0x553   : > { %v4225_v43 = vmul.f32 %v13481_v47, %v4081_v22  ;;  %8800 = vpow2.f32 %v5685_v9  ;;  %v13530_v48 = vadd.f32 %v4270_v10, %v4227_v30  ;;  %v5238_v31 = vadd.f32 %v13118_v1, %v16130_v62 }
 0x554   : > { %v3928_v41 = vadd.f32 %v3859_v27, %v16129_v23  ;;  %v8793_v25 = vpop.eup %8792  ;;  %v4229_v32 = vmul.f32 %v13483_v5, %v4085_v55  ;;  %v3990_v7 = vmul.f32 1.442695, %v3926_v52  ;;  %v5351_v8 = vadd.f32 %v13136_v60, %v16130_v62  ;;  %v13550_v60 = vpop.f32.mrb[86].mxu0 }
 0x555   : > { %v4312_v38 = vadd.f32 %v13416_v61, %v4225_v43  ;;  %v8795_v9 = vpop.eup %8794  ;;  %v3927_v59 = vadd.f32 %v3857_v20, %v3415_v11  ;;  %v3863_v56 = vmul.f32 0.6931472, %v8793_v25  ;;  %8802 = vpow2.f32 %v5683_v6  ;;  %v13552_v11 = vpop.f32.mrb[86].mxu1 }
 0x556   : > { %v5556_v17 = vand.u32 2147483647, %v13534_v15  ;;  %v3861_v28 = vmul.f32 0.6931472, %v8791_v29  ;;  %v3867_v22 = vmul.f32 0.6931472, %v8795_v9  ;;  %v8797_v49 = vpop.eup %8796 }
 0x557   : > { %v13543_v27 = vadd.f32 %v4312_v38, %v4229_v32  ;;  %v13545_v1 = vmul.f32 1.3862944, %v5238_v31  ;;  %v3930_v55 = vadd.f32 %v3863_v56, %v3418_v40  ;;  %v3421_v61 = vmax.f32 %v13455_v34, 0.0 }
 0x558   : > { %v5620_v52 = vsub.f32 0.0, %v5556_v17  ;;  %v13548_v30 = vmul.f32 1.3862944, %v5351_v8  ;;  %v3992_v20 = vmul.f32 1.442695, %v3928_v41  ;;  %v3932_v10 = vadd.f32 %v3867_v22, %v3420_v14 }
 0x559   : > { %v3865_v6 = vmul.f32 0.6931472, %v8797_v49  ;;  %v5809_v43 = vadd.f32 1.0, %v8789_v51  ;;  %v3994_v23 = vmul.f32 1.442695, %v3930_v55  ;;  %v3929_v8 = vadd.f32 %v3861_v28, %v3417_v36 }
 0x55a   : > { %v5687_v29 = vmul.f32 1.442695, %v5620_v52  ;;  %v5557_v31 = vand.u32 2147483647, %v13545_v1  ;;  %v3991_v25 = vmul.f32 1.442695, %v3927_v59  ;;  %v5240_v51 = vadd.f32 %v13151_v57, %v16130_v62 }
 0x55b   : > { %v3996_v32 = vmul.f32 1.442695, %v3932_v10  ;;  %v3931_v40 = vadd.f32 %v3865_v6, %v3419_v21  ;;  %v5559_v34 = vand.u32 2147483647, %v13548_v30  ;;  %v4026_v9 = vpack.c.bf16 %v3994_v23, %v3990_v7  ;;  %v13558_v52 = vpop.f32.mrb[87].mxu0  ;;  %v13560_v21 = vpop.permute.xlu0 %4166 }
 0x55c   : > { %v8799_v38 = vpop.eup %8798  ;;  %8804 = vpow2.f32 %v5687_v29  ;;  %v5621_v56 = vsub.f32 0.0, %v5557_v31  ;;  %16131 = vst [vmem:[#allocation101_spill] sm:$0xff] %v13560_v21  ;;  %v13562_v6 = vpop.f32.mrb[87].mxu1  ;;  %v3993_v23 = vmul.f32 1.442695, %v3929_v8 }
 0x55d   : > { %v8801_v17 = vpop.eup %8800  ;;  %v4028_v5 = vpack.c.bf16 %v3996_v32, %v3992_v20  ;;  %v3995_v41 = vmul.f32 1.442695, %v3931_v40  ;;  %v3869_v14 = vmul.f32 0.6931472, %v8799_v38  ;;  %v4086_v22 = vunpack.c.l.bf16 %v4026_v9  ;;  %v13565_v31 = vpop.permute.xlu1 %4171 }
 0x55e   : > { %v4090_v49 = vunpack.c.h.bf16 %v4026_v9  ;;  %v5689_v55 = vmul.f32 1.442695, %v5621_v56  ;;  %v5623_v59 = vsub.f32 0.0, %v5559_v34  ;;  %8806 = vlog2.f32 %v5809_v43  ;;  %16132 = vst [vmem:[#allocation25_spill] sm:$0xff] %v13565_v31 }
 0x55f   : > { %v4088_v10 = vunpack.c.l.bf16 %v4028_v5  ;;  %v4092_v36 = vunpack.c.h.bf16 %v4028_v5  ;;  %v4027_v7 = vpack.c.bf16 %v3995_v41, %v3991_v25  ;;  %v3933_v28 = vadd.f32 %v3869_v14, %v3421_v61  ;;  %v8803_v20 = vpop.eup %8802 }
 0x560   : > { %v4230_v29 = vmul.f32 %v13560_v21, %v4086_v22  ;;  %v5811_v57 = vadd.f32 1.0, %v8801_v17  ;;  %v13568_v38 = vmul.f32 1.3862944, %v5240_v51  ;;  %v4234_v5 = vmul.f32 %v13565_v31, %v4090_v49 }
 0x561   : > { %v4232_v32 = vmul.f32 %v13560_v21, %v4088_v10  ;;  %v4087_v40 = vunpack.c.l.bf16 %v4027_v7  ;;  %v4091_v34 = vunpack.c.h.bf16 %v4027_v7  ;;  %v3997_v25 = vmul.f32 1.442695, %v3933_v28 }
 0x562   : > { %v4251_v61 = vadd.f32 %v13499_v42, %v4230_v29  ;;  %8808 = vpow2.f32 %v5689_v55  ;;  %v4236_v8 = vmul.f32 %v13565_v31, %v4092_v36  ;;  %v5693_v56 = vmul.f32 1.442695, %v5623_v59 }
 0x563   : > { %v4293_v9 = vadd.f32 %v13508_v39, %v4232_v32  ;;  %v4231_v43 = vmul.f32 %v13560_v21, %v4087_v40  ;;  %v4029_v41 = vpack.c.bf16 %v3997_v25, %v3993_v23  ;;  %v5810_v14 = vadd.f32 1.0, %v8803_v20  ;;  %v16136_v32 = vld [vmem:[#allocation68_spill] sm:$0xff]  ;;  %v13597_v25 = vpop.f32.mrb[88].mxu1 }
 0x564   : > { %v13575_v17 = vadd.f32 %v4251_v61, %v4234_v5  ;;  %v5353_v51 = vadd.f32 %v13164_v53, %v16130_v62  ;;  %v4235_v42 = vmul.f32 %v13565_v31, %v4091_v34  ;;  %8810 = vpow2.f32 %v5693_v56  ;;  %v13595_v61 = vpop.f32.mrb[88].mxu0  ;;  %16139 = vst [vmem:[#allocation34_spill] sm:$0xff] %v13597_v25  ;;  %v13604_v56 = vpop.f32.mrb[89].mxu1 }
 0x565   : > { %v13579_v22 = vadd.f32 %v4293_v9, %v4236_v8  ;;  %v4272_v49 = vadd.f32 %v13530_v48, %v4231_v43  ;;  %v4089_v10 = vunpack.c.l.bf16 %v4029_v41  ;;  %v4093_v39 = vunpack.c.h.bf16 %v4029_v41  ;;  %16138 = vst [vmem:[#allocation28_spill] sm:$0xff] %v13595_v61  ;;  %v13602_v43 = vpop.f32.mrb[89].mxu0  ;;  %16141 = vst [vmem:[#allocation27_spill] sm:$0xff] %v13604_v56 }
 0x566   : > { %16133 = vst [vmem:[#allocation56_spill] sm:$0xff] %v13575_v17  ;;  %v8805_v55 = vpop.eup %8804  ;;  %8812 = vlog2.f32 %v5811_v57  ;;  %v5558_v59 = vand.u32 2147483647, %v13568_v38  ;;  %v13589_v29 = vmul.f32 1.3862944, %v5353_v51  ;;  %v5244_v57 = vadd.f32 %v13204_v3, %v16136_v32  ;;  %16140 = vst [vmem:[#allocation58_spill] sm:$0xff] %v13602_v43 }
 0x567   : > { %16134 = vst [vmem:[#allocation81_spill] sm:$0xff] %v13579_v22  ;;  %v13584_v36 = vadd.f32 %v4272_v49, %v4235_v42  ;;  %v5812_v7 = vadd.f32 1.0, %v8805_v55  ;;  %v4233_v28 = vmul.f32 %v13560_v21, %v4089_v10  ;;  %8814 = vlog2.f32 %v5810_v14  ;;  %v13606_v42 = vpop.f32.mrb[90].mxu0 }
 0x568   : > { %v5622_v53 = vsub.f32 0.0, %v5558_v59  ;;  %v4237_v62 = vmul.f32 %v13565_v31, %v4093_v39  ;;  %v8807_v20 = vpop.eup %8806  ;;  %v5560_v8 = vand.u32 2147483647, %v13589_v29  ;;  %v13600_v9 = vmul.f32 1.3862944, %v5244_v57  ;;  %16142 = vst [vmem:[#allocation89_spill] sm:$0xff] %v13606_v42 }
 0x569   : > { %16135 = vst [vmem:[#allocation31_spill] sm:$0xff] %v13584_v36  ;;  %v4314_v23 = vadd.f32 %v13543_v27, %v4233_v28  ;;  %8816 = vlog2.f32 %v5812_v7  ;;  %v5874_v41 = vmul.f32 0.6931472, %v8807_v20  ;;  %v5489_v10 = vmax.f32 %v13467_v13, 0.0  ;;  %v13610_v59 = vpop.f32.mrb[90].mxu1 }
 0x56a   : > { %v5691_v48 = vmul.f32 1.442695, %v5622_v53  ;;  %v5624_v51 = vsub.f32 0.0, %v5560_v8  ;;  %v5561_v49 = vand.u32 2147483647, %v13600_v9  ;;  %16143 = vst [vmem:[#allocation80_spill] sm:$0xff] %v13610_v59  ;;  %v5357_v53 = vadd.f32 %v13206_v37, %v16136_v32 }
 0x56b   : > { %v13593_v34 = vadd.f32 %v4314_v23, %v4237_v62  ;;  %v6001_v20 = vadd.f32 %v5874_v41, %v5489_v10  ;;  %v5491_v23 = vmax.f32 %v13469_v46, 0.0  ;;  %v5490_v13 = vmax.f32 %v13490_v33, 0.0 }
 0x56c   : > { %v8809_v40 = vpop.eup %8808  ;;  %8818 = vpow2.f32 %v5691_v48  ;;  %v5695_v39 = vmul.f32 1.442695, %v5624_v51  ;;  %v5625_v28 = vsub.f32 0.0, %v5561_v49  ;;  %v5492_v8 = vmax.f32 %v13534_v15, 0.0 }
 0x56d   : > { %16137 = vst [vmem:[#allocation84_spill] sm:$0xff] %v13593_v34  ;;  %v5813_v5 = vadd.f32 1.0, %v8809_v40  ;;  %v13615_v40 = vmul.f32 1.3862944, %v5357_v53  ;;  %v5493_v37 = vmax.f32 %v13545_v1, 0.0  ;;  %v5495_v46 = vmax.f32 %v13548_v30, 0.0 }
 0x56e   : > { %v8811_v27 = vpop.eup %8810  ;;  %v5697_v57 = vmul.f32 1.442695, %v5625_v28  ;;  %v13622_v41 = vmul.f32 1.442695, %v6001_v20  ;;  %v16146_v28 = vld [vmem:[#allocation69_spill] sm:$0xff]  ;;  %v13632_v53 = vpop.f32.mrb[91].mxu1 }
 0x56f   : > { %8820 = vlog2.f32 %v5813_v5  ;;  %v5815_v14 = vadd.f32 1.0, %v8811_v27  ;;  %v16144_v27 = vld [vmem:[#allocation75_spill] sm:$0xff]  ;;  %v5563_v49 = vand.u32 2147483647, %v13615_v40  ;;  %16147 = vst [vmem:[#allocation67_spill] sm:$0xff] %v13632_v53  ;;  %v16149_v30 = vld [vmem:[#allocation62_spill] sm:$0xff] }
 0x570   : > { %v8813_v3 = vpop.eup %8812 }
 0x571   : > { %v8815_v55 = vpop.eup %8814  ;;  %8822 = vlog2.f32 %v5815_v14  ;;  %v5878_v7 = vmul.f32 0.6931472, %v8813_v3  ;;  %v5246_v3 = vadd.f32 %v16144_v27, %v16136_v32  ;;  %v5627_v20 = vsub.f32 0.0, %v5563_v49 }
 0x572   : > { %8824 = vpow2.f32 %v5695_v39  ;;  %v5876_v48 = vmul.f32 0.6931472, %v8815_v55  ;;  %v13626_v55 = vpop.f32.mrb[91].mxu0 }
 0x573   : > { %v8817_v62 = vpop.eup %8816  ;;  %v6003_v14 = vadd.f32 %v5878_v7, %v5491_v23  ;;  %8826 = vpow2.f32 %v5697_v57  ;;  %16145 = vst [vmem:[#allocation30_spill] sm:$0xff] %v13626_v55  ;;  %v13628_v15 = vmul.f32 1.3862944, %v5246_v3  ;;  %v5359_v7 = vadd.f32 %v16146_v28, %v16136_v32  ;;  %v16148_v23 = vld [vmem:[#allocation96_spill] sm:$0xff] }
 0x574   : > { %v5880_v51 = vmul.f32 0.6931472, %v8817_v62  ;;  %v6002_v33 = vadd.f32 %v5876_v48, %v5490_v13  ;;  %v5248_v57 = vadd.f32 %v16149_v30, %v16148_v23  ;;  %v5701_v32 = vmul.f32 1.442695, %v5627_v20 }
 0x575   : > { %v13637_v27 = vmul.f32 1.442695, %v6003_v14  ;;  %v5562_v48 = vand.u32 2147483647, %v13628_v15 }
 0x576   : > { %v8819_v5 = vpop.eup %8818  ;;  %v6004_v31 = vadd.f32 %v5880_v51, %v5492_v8  ;;  %v13643_v28 = vmul.f32 1.3862944, %v5248_v57  ;;  %v13647_v49 = vmul.f32 1.442695, %v6002_v33  ;;  %v5250_v33 = vadd.f32 %v13261_v50, %v16148_v23 }
 0x577   : > { %v5814_v39 = vadd.f32 1.0, %v8819_v5  ;;  %v13640_v5 = vmul.f32 1.3862944, %v5359_v7  ;;  %v5626_v30 = vsub.f32 0.0, %v5562_v48 }
 0x578   : > { %v13651_v34 = vmul.f32 1.442695, %v6004_v31  ;;  %v5565_v36 = vand.u32 2147483647, %v13643_v28  ;;  %v16152_v31 = vld [vmem:[#allocation18_spill] sm:$0xff] }
 0x579   : > { %v8821_v10 = vpop.eup %8820  ;;  %8828 = vlog2.f32 %v5814_v39  ;;  %v5564_v14 = vand.u32 2147483647, %v13640_v5  ;;  %v5699_v57 = vmul.f32 1.442695, %v5626_v30  ;;  %v16151_v39 = vld [vmem:[#allocation104_spill] sm:$0xff]  ;;  %v5369_v47 = vadd.f32 %v13292_v45, %v16152_v31 }
 0x57a   : > { %v5882_v1 = vmul.f32 0.6931472, %v8821_v10  ;;  %v16150_v10 = vld [vmem:[#allocation15_spill] sm:$0xff]  ;;  %8830 = vpow2.f32 %v5701_v32  ;;  %v5363_v48 = vadd.f32 %v16151_v39, %v16148_v23  ;;  %v16153_v32 = vld [vmem:[#allocation57_spill] sm:$0xff]  ;;  %v13666_v50 = vmul.f32 1.3862944, %v5250_v33 }
 0x57b   : > { %v8823_v13 = vpop.eup %8822  ;;  %v5361_v62 = vadd.f32 %v16150_v10, %v16148_v23  ;;  %v5628_v3 = vsub.f32 0.0, %v5564_v14 }
 0x57c   : > { %v8825_v8 = vpop.eup %8824  ;;  %v6005_v51 = vadd.f32 %v5882_v1, %v5493_v37  ;;  %v5886_v21 = vmul.f32 0.6931472, %v8823_v13  ;;  %v13668_v22 = vmul.f32 1.3862944, %v5363_v48  ;;  %v13681_v48 = vpop.f32.mrb[92].mxu1 }
 0x57d   : > { %v5816_v20 = vadd.f32 1.0, %v8825_v8  ;;  %v13654_v10 = vmul.f32 1.3862944, %v5361_v62  ;;  %v8827_v37 = vpop.eup %8826  ;;  %v5703_v13 = vmul.f32 1.442695, %v5628_v3  ;;  %v5254_v8 = vadd.f32 %v16153_v32, %v16152_v31  ;;  %16155 = vst [vmem:[#allocation98_spill] sm:$0xff] %v13681_v48 }
 0x57e   : > { %v13663_v30 = vmul.f32 1.442695, %v6005_v51  ;;  %v6007_v14 = vadd.f32 %v5886_v21, %v5495_v46  ;;  %v5629_v62 = vsub.f32 0.0, %v5565_v36  ;;  %v5817_v23 = vadd.f32 1.0, %v8827_v37  ;;  %v13676_v46 = vpop.f32.mrb[92].mxu0 }
 0x57f   : > { %8832 = vlog2.f32 %v5816_v20  ;;  %v5567_v7 = vand.u32 2147483647, %v13654_v10  ;;  %v13671_v3 = vmul.f32 1.3862944, %v5254_v8  ;;  %v5566_v36 = vand.u32 2147483647, %v13666_v50 }
 0x580   : > { %8834 = vpow2.f32 %v5699_v57  ;;  %v5705_v39 = vmul.f32 1.442695, %v5629_v62  ;;  %16154 = vst [vmem:[#allocation71_spill] sm:$0xff] %v13676_v46  ;;  %v13678_v57 = vmul.f32 1.442695, %v6007_v14  ;;  %v13683_v37 = vpop.f32.mrb[93].mxu0 }
 0x581   : > { %8836 = vpow2.f32 %v5703_v13  ;;  %v5631_v21 = vsub.f32 0.0, %v5567_v7  ;;  %v5568_v33 = vand.u32 2147483647, %v13668_v22  ;;  %16156 = vst [vmem:[#allocation90_spill] sm:$0xff] %v13683_v37  ;;  %v5630_v62 = vsub.f32 0.0, %v5566_v36  ;;  %v16157_v7 = vld [vmem:[#allocation24_spill] sm:$0xff] }
 0x582   : > { %8838 = vpow2.f32 %v5705_v39  ;;  %v5569_v32 = vand.u32 2147483647, %v13671_v3  ;;  %v5367_v51 = vadd.f32 %v16157_v7, %v16152_v31  ;;  %v13688_v20 = vpop.f32.mrb[93].mxu1  ;;  %v16159_v39 = vld [vmem:[#allocation64_spill] sm:$0xff]  ;;  %v13694_v48 = vpop.f32.mrb[94].mxu0 }
 0x583   : > { %v8829_v13 = vpop.eup %8828  ;;  %v5709_v8 = vmul.f32 1.442695, %v5631_v21  ;;  %16158 = vst [vmem:[#allocation44_spill] sm:$0xff] %v13688_v20  ;;  %8840 = vlog2.f32 %v5817_v23  ;;  %v5632_v14 = vsub.f32 0.0, %v5568_v33  ;;  %v5256_v17 = vadd.f32 %v16159_v39, %v16152_v31  ;;  %16160 = vst [vmem:[#allocation59_spill] sm:$0xff] %v13694_v48  ;;  %v13701_v55 = vpop.f32.mrb[94].mxu1 }
 0x584   : > { %v8831_v1 = vpop.eup %8830  ;;  %v5707_v21 = vmul.f32 1.442695, %v5630_v62  ;;  %v5633_v36 = vsub.f32 0.0, %v5569_v32  ;;  %v13696_v53 = vmul.f32 1.3862944, %v5367_v51  ;;  %16161 = vst [vmem:[#allocation65_spill] sm:$0xff] %v13701_v55 }
 0x585   : > { %v5819_v37 = vadd.f32 1.0, %v8831_v1  ;;  %8842 = vpow2.f32 %v5709_v8  ;;  %v5711_v46 = vmul.f32 1.442695, %v5632_v14  ;;  %v13698_v7 = vmul.f32 1.3862944, %v5256_v17  ;;  %v13710_v14 = vpop.f32.mrb[95].mxu0 }
 0x586   : > { %v5884_v23 = vmul.f32 0.6931472, %v8829_v13  ;;  %v5713_v39 = vmul.f32 1.442695, %v5633_v36  ;;  %v5571_v31 = vand.u32 2147483647, %v13696_v53 }
 0x587   : > { %8844 = vlog2.f32 %v5819_v37  ;;  %v13705_v32 = vmul.f32 1.3862944, %v5369_v47  ;;  %v5570_v17 = vand.u32 2147483647, %v13698_v7  ;;  %v16162_v13 = vld [vmem:[#allocation106_spill] sm:$0xff]  ;;  %v16163_v37 = vld [vmem:[#allocation51_spill] sm:$0xff] }
 0x588   : > { %8846 = vpow2.f32 %v5707_v21  ;;  %v5258_v62 = vadd.f32 %v16163_v37, %v16162_v13  ;;  %16164 = vst [vmem:[#allocation20_spill] sm:$0xff] %v13710_v14  ;;  %v5635_v33 = vsub.f32 0.0, %v5571_v31  ;;  %v16165_v1 = vld [vmem:[#allocation103_spill] sm:$0xff]  ;;  %v16166_v55 = vmax.f32 %v13568_v38, 0.0  ;;  %v13720_v31 = vpop.f32.mrb[95].mxu1 }
 0x589   : > { %v8833_v20 = vpop.eup %8832  ;;  %8848 = vpow2.f32 %v5711_v46  ;;  %v5371_v21 = vadd.f32 %v16165_v1, %v16162_v13  ;;  %v5634_v46 = vsub.f32 0.0, %v5570_v17  ;;  %v5572_v37 = vand.u32 2147483647, %v13705_v32  ;;  %16167 = vst [vmem:[#allocation26_spill] sm:$0xff] %v13720_v31 }
 0x58a   : > { %v8835_v45 = vpop.eup %8834  ;;  %8850 = vpow2.f32 %v5713_v39  ;;  %v6006_v47 = vadd.f32 %v5884_v23, %v16166_v55  ;;  %v5888_v59 = vmul.f32 0.6931472, %v8833_v20  ;;  %v5717_v42 = vmul.f32 1.442695, %v5635_v33  ;;  %v16168_v23 = vld [vmem:[#allocation88_spill] sm:$0xff] }
 0x58b   : > { %v8837_v51 = vpop.eup %8836  ;;  %v5818_v8 = vadd.f32 1.0, %v8835_v45  ;;  %v13718_v39 = vmul.f32 1.3862944, %v5258_v62  ;;  %v5636_v38 = vsub.f32 0.0, %v5572_v37  ;;  %v13722_v55 = vmul.f32 1.3862944, %v5371_v21 }
 0x58c   : > { %v5820_v36 = vadd.f32 1.0, %v8837_v51  ;;  %v8839_v48 = vpop.eup %8838  ;;  %v5715_v51 = vmul.f32 1.442695, %v5634_v46  ;;  %v13726_v20 = vmul.f32 1.442695, %v6006_v47 }
 0x58d   : > { %8852 = vlog2.f32 %v5818_v8  ;;  %v5821_v14 = vadd.f32 1.0, %v8839_v48  ;;  %v8841_v1 = vpop.eup %8840  ;;  %v5260_v8 = vadd.f32 %v16168_v23, %v16162_v13  ;;  %v5573_v48 = vand.u32 2147483647, %v13718_v39  ;;  %v16169_v23 = vld [vmem:[#allocation87_spill] sm:$0xff] }
 0x58e   : > { %8854 = vlog2.f32 %v5820_v36  ;;  %v5719_v46 = vmul.f32 1.442695, %v5636_v38  ;;  %v5575_v21 = vand.u32 2147483647, %v13722_v55  ;;  %v5373_v47 = vadd.f32 %v16169_v23, %v16162_v13  ;;  %v16171_v13 = vld [vmem:[#allocation124_spill] sm:$0xff] }
 0x58f   : > { %8856 = vpow2.f32 %v5717_v42  ;;  %v8843_v17 = vpop.eup %8842  ;;  %v5637_v37 = vsub.f32 0.0, %v5573_v48  ;;  %v13732_v45 = vmul.f32 1.3862944, %v5260_v8  ;;  %v5890_v56 = vmul.f32 0.6931472, %v8841_v1 }
 0x590   : > { %8858 = vlog2.f32 %v5821_v14  ;;  %v5823_v62 = vadd.f32 1.0, %v8843_v17  ;;  %v16170_v14 = vmax.f32 %v13589_v29, 0.0  ;;  %v5639_v48 = vsub.f32 0.0, %v5575_v21 }
 0x591   : > { %8860 = vpow2.f32 %v5715_v51  ;;  %v8845_v42 = vpop.eup %8844  ;;  %v5721_v25 = vmul.f32 1.442695, %v5637_v37  ;;  %v5574_v61 = vand.u32 2147483647, %v13732_v45  ;;  %v5264_v23 = vadd.f32 %v13344_v4, %v16171_v13 }
 0x592   : > { %v8847_v31 = vpop.eup %8846  ;;  %v6008_v33 = vadd.f32 %v5888_v59, %v16170_v14  ;;  %8862 = vlog2.f32 %v5823_v62  ;;  %v5725_v1 = vmul.f32 1.442695, %v5639_v48  ;;  %v13743_v62 = vmul.f32 1.3862944, %v5373_v47 }
 0x593   : > { %v8849_v36 = vpop.eup %8848  ;;  %v5822_v51 = vadd.f32 1.0, %v8847_v31  ;;  %8864 = vpow2.f32 %v5719_v46  ;;  %v16172_v31 = vmax.f32 %v13600_v9, 0.0  ;;  %v5894_v46 = vmul.f32 0.6931472, %v8845_v42 }
 0x594   : > { %v8851_v43 = vpop.eup %8850  ;;  %v5824_v8 = vadd.f32 1.0, %v8849_v36  ;;  %v5638_v21 = vsub.f32 0.0, %v5574_v61  ;;  %v13747_v36 = vmul.f32 1.442695, %v6008_v33  ;;  %v5576_v37 = vand.u32 2147483647, %v13743_v62 }
 0x595   : > { %8866 = vlog2.f32 %v5822_v51  ;;  %v5825_v59 = vadd.f32 1.0, %v8851_v43  ;;  %v6009_v38 = vadd.f32 %v5890_v56, %v16172_v31  ;;  %v5377_v4 = vadd.f32 %v13346_v0, %v16171_v13 }
 0x596   : > { %8868 = vlog2.f32 %v5824_v8  ;;  %v5723_v47 = vmul.f32 1.442695, %v5638_v21  ;;  %v13752_v48 = vmul.f32 1.3862944, %v5264_v23  ;;  %v5640_v42 = vsub.f32 0.0, %v5576_v37 }
 0x597   : > { %v8853_v29 = vpop.eup %8852  ;;  %8870 = vlog2.f32 %v5825_v59  ;;  %v13754_v33 = vmul.f32 1.442695, %v6009_v38  ;;  %v16174_v8 = vmax.f32 %v13615_v40, 0.0  ;;  %v16175_v21 = vmax.f32 %v13628_v15, 0.0 }
 0x598   : > { %v8855_v14 = vpop.eup %8854  ;;  %v5892_v43 = vmul.f32 0.6931472, %v8853_v29  ;;  %8872 = vpow2.f32 %v5721_v25  ;;  %v5727_v29 = vmul.f32 1.442695, %v5640_v42  ;;  %v13762_v37 = vmul.f32 1.3862944, %v5377_v4 }
 0x599   : > { %v8857_v51 = vpop.eup %8856  ;;  %v5896_v9 = vmul.f32 0.6931472, %v8855_v14  ;;  %8874 = vpow2.f32 %v5725_v1  ;;  %16173 = vst [vmem:[#allocation37_spill] sm:$0xff] %v13754_v33  ;;  %v6011_v59 = vadd.f32 %v5894_v46, %v16174_v8  ;;  %v5577_v1 = vand.u32 2147483647, %v13752_v48 }
 0x59a   : > { %v8859_v17 = vpop.eup %8858  ;;  %v5827_v56 = vadd.f32 1.0, %v8857_v51  ;;  %8876 = vpow2.f32 %v5723_v47  ;;  %v6010_v14 = vadd.f32 %v5892_v43, %v16175_v21  ;;  %v5266_v38 = vadd.f32 %v13366_v24, %v16171_v13 }
 0x59b   : > { %v8861_v61 = vpop.eup %8860  ;;  %v5898_v31 = vmul.f32 0.6931472, %v8859_v17  ;;  %v16176_v17 = vmax.f32 %v13640_v5, 0.0  ;;  %v13772_v15 = vmul.f32 1.442695, %v6011_v59  ;;  %v16178_v43 = vmax.f32 %v13643_v28, 0.0 }
 0x59c   : > { %8878 = vlog2.f32 %v5827_v56  ;;  %v5826_v0 = vadd.f32 1.0, %v8861_v61  ;;  %v8863_v23 = vpop.eup %8862  ;;  %v5379_v56 = vadd.f32 %v13368_v19, %v16171_v13  ;;  %v5641_v42 = vsub.f32 0.0, %v5577_v1 }
 0x59d   : > { %v8865_v40 = vpop.eup %8864  ;;  %v6012_v46 = vadd.f32 %v5896_v9, %v16176_v17  ;;  %16177 = vst [vmem:[#allocation17_spill] sm:$0xff] %v13772_v15  ;;  %v6013_v4 = vadd.f32 %v5898_v31, %v16178_v43  ;;  %8880 = vpow2.f32 %v5727_v29  ;;  %v5902_v24 = vmul.f32 0.6931472, %v8863_v23 }
 0x59e   : > { %8882 = vlog2.f32 %v5826_v0  ;;  %v5579_v5 = vand.u32 2147483647, %v13762_v37  ;;  %v13777_v9 = vmul.f32 1.3862944, %v5266_v38  ;;  %v13779_v21 = vmul.f32 1.442695, %v6010_v14 }
 0x59f   : > { %v8867_v61 = vpop.eup %8866  ;;  %v5828_v17 = vadd.f32 1.0, %v8865_v40  ;;  %v5729_v13 = vmul.f32 1.442695, %v5641_v42  ;;  %v13782_v47 = vmul.f32 1.442695, %v6012_v46  ;;  %v16179_v38 = vld [vmem:[#allocation100_spill] sm:$0xff] }
 0x5a0   : > { %v8869_v8 = vpop.eup %8868  ;;  %v5643_v31 = vsub.f32 0.0, %v5579_v5  ;;  %v13785_v29 = vmul.f32 1.3862944, %v5379_v56  ;;  %v5900_v23 = vmul.f32 0.6931472, %v8867_v61  ;;  %v5268_v14 = vadd.f32 %v13379_v54, %v16179_v38 }
 0x5a1   : > { %v8871_v59 = vpop.eup %8870  ;;  %8884 = vpow2.f32 %v5729_v13  ;;  %v5578_v1 = vand.u32 2147483647, %v13777_v9  ;;  %v13790_v43 = vmul.f32 1.442695, %v6013_v4  ;;  %v16181_v42 = vmax.f32 %v13654_v10, 0.0 }
 0x5a2   : > { %v8873_v0 = vpop.eup %8872  ;;  %8886 = vlog2.f32 %v5828_v17  ;;  %v5733_v51 = vmul.f32 1.442695, %v5643_v31  ;;  %v5904_v25 = vmul.f32 0.6931472, %v8869_v8  ;;  %v5580_v54 = vand.u32 2147483647, %v13785_v29 }
 0x5a3   : > { %v8875_v40 = vpop.eup %8874  ;;  %16180 = vst [vmem:[#allocation45_spill] sm:$0xff] %v13790_v43  ;;  %v6015_v46 = vadd.f32 %v5902_v24, %v16181_v42  ;;  %v5829_v19 = vadd.f32 1.0, %v8873_v0  ;;  %v5642_v61 = vsub.f32 0.0, %v5578_v1  ;;  %v16182_v4 = vmax.f32 %v13666_v50, 0.0 }
 0x5a4   : > { %v8877_v5 = vpop.eup %8876  ;;  %v5831_v56 = vadd.f32 1.0, %v8875_v40  ;;  %v5906_v33 = vmul.f32 0.6931472, %v8871_v59  ;;  %v5644_v24 = vsub.f32 0.0, %v5580_v54  ;;  %v13798_v0 = vmul.f32 1.3862944, %v5268_v14 }
 0x5a5   : > { %8888 = vlog2.f32 %v5829_v19  ;;  %v5830_v15 = vadd.f32 1.0, %v8877_v5  ;;  %v6014_v43 = vadd.f32 %v5900_v23, %v16182_v4  ;;  %v5731_v10 = vmul.f32 1.442695, %v5642_v61 }
 0x5a6   : > { %v8879_v13 = vpop.eup %8878  ;;  %8890 = vlog2.f32 %v5831_v56  ;;  %v5381_v17 = vadd.f32 %v13390_v26, %v16179_v38  ;;  %v13802_v1 = vmul.f32 1.442695, %v6015_v46  ;;  %v5270_v19 = vadd.f32 %v13410_v16, %v16179_v38 }
 0x5a7   : > { %8892 = vlog2.f32 %v5830_v15  ;;  %v8881_v31 = vpop.eup %8880  ;;  %v5910_v8 = vmul.f32 0.6931472, %v8879_v13  ;;  %v16183_v59 = vmax.f32 %v13668_v22, 0.0  ;;  %v5735_v14 = vmul.f32 1.442695, %v5644_v24 }
 0x5a8   : > { %8894 = vpow2.f32 %v5733_v51  ;;  %v8883_v50 = vpop.eup %8882  ;;  %v13809_v40 = vmul.f32 1.442695, %v6014_v43  ;;  %v5581_v26 = vand.u32 2147483647, %v13798_v0  ;;  %v13812_v42 = vmul.f32 1.3862944, %v5381_v17 }
 0x5a9   : > { %v6016_v23 = vadd.f32 %v5904_v25, %v16183_v59  ;;  %8896 = vpow2.f32 %v5731_v10  ;;  %v16184_v46 = vmax.f32 %v13671_v3, 0.0  ;;  %v5832_v5 = vadd.f32 1.0, %v8881_v31 }
 0x5aa   : > { %v13816_v56 = vmul.f32 1.3862944, %v5270_v19  ;;  %v5383_v16 = vadd.f32 %v13412_v63, %v16179_v38  ;;  %v16185_v25 = vmax.f32 %v13696_v53, 0.0  ;;  %v5908_v13 = vmul.f32 0.6931472, %v8883_v50  ;;  %v16186_v63 = vld [vmem:[#allocation128_spill] sm:$0xff] }
 0x5ab   : > { %v6017_v51 = vadd.f32 %v5906_v33, %v16184_v46  ;;  %v8885_v22 = vpop.eup %8884  ;;  %8898 = vpow2.f32 %v5735_v14  ;;  %v5645_v43 = vsub.f32 0.0, %v5581_v26  ;;  %v13822_v54 = vmul.f32 1.442695, %v6016_v23 }
 0x5ac   : > { %v6019_v61 = vadd.f32 %v5910_v8, %v16185_v25  ;;  %v5833_v4 = vadd.f32 1.0, %v8885_v22  ;;  %v5583_v3 = vand.u32 2147483647, %v13812_v42  ;;  %v8887_v33 = vpop.eup %8886  ;;  %v5582_v17 = vand.u32 2147483647, %v13816_v56 }
 0x5ad   : > { %v5737_v24 = vmul.f32 1.442695, %v5645_v43  ;;  %v13827_v31 = vmul.f32 1.3862944, %v5383_v16  ;;  %v5274_v53 = vadd.f32 %v13435_v58, %v16186_v63  ;;  %v13831_v8 = vmul.f32 1.442695, %v6017_v51 }
 0x5ae   : > { %8900 = vlog2.f32 %v5832_v5  ;;  %v5647_v50 = vsub.f32 0.0, %v5583_v3  ;;  %v13834_v23 = vmul.f32 1.442695, %v6019_v61  ;;  %v16188_v14 = vmax.f32 %v13698_v7, 0.0 }
 0x5af   : > { %v8889_v38 = vpop.eup %8888  ;;  %8902 = vpow2.f32 %v5737_v24  ;;  %v5646_v46 = vsub.f32 0.0, %v5582_v17  ;;  %v5912_v22 = vmul.f32 0.6931472, %v8887_v33  ;;  %v5584_v58 = vand.u32 2147483647, %v13827_v31 }
 0x5b0   : > { %v8891_v59 = vpop.eup %8890  ;;  %16187 = vst [vmem:[#allocation48_spill] sm:$0xff] %v13834_v23  ;;  %v6018_v26 = vadd.f32 %v5908_v13, %v16188_v14  ;;  %v5741_v25 = vmul.f32 1.442695, %v5647_v50  ;;  %v5914_v51 = vmul.f32 0.6931472, %v8889_v38  ;;  %8904 = vlog2.f32 %v5833_v4  ;;  %v16189_v13 = vld [vmem:[#allocation35_spill] sm:$0xff] }
 0x5b1   : > { %v8893_v16 = vpop.eup %8892  ;;  %v5739_v5 = vmul.f32 1.442695, %v5646_v46  ;;  %v13839_v10 = vmul.f32 1.3862944, %v5274_v53  ;;  %v5648_v61 = vsub.f32 0.0, %v5584_v58  ;;  %v5387_v7 = vadd.f32 %v13441_v44, %v16186_v63 }
 0x5b2   : > { %v8895_v43 = vpop.eup %8894  ;;  %8906 = vpow2.f32 %v5741_v25  ;;  %v5276_v24 = vadd.f32 %v16189_v13, %v16186_v63  ;;  %v13845_v17 = vmul.f32 1.442695, %v6018_v26  ;;  %v16190_v4 = vmax.f32 %v13705_v32, 0.0 }
 0x5b3   : > { %v8897_v3 = vpop.eup %8896  ;;  %v5835_v33 = vadd.f32 1.0, %v8895_v43  ;;  %8908 = vpow2.f32 %v5739_v5  ;;  %v5918_v53 = vmul.f32 0.6931472, %v8891_v59  ;;  %v5743_v46 = vmul.f32 1.442695, %v5648_v61  ;;  %v16192_v59 = vld [vmem:[#allocation78_spill] sm:$0xff] }
 0x5b4   : > { %v6020_v38 = vadd.f32 %v5912_v22, %v16190_v4  ;;  %v5834_v14 = vadd.f32 1.0, %v8897_v3  ;;  %v16191_v58 = vmax.f32 %v13718_v39, 0.0  ;;  %v5916_v44 = vmul.f32 0.6931472, %v8893_v16  ;;  %v16193_v3 = vld [vmem:[#allocation130_spill] sm:$0xff]  ;;  %v16194_v61 = vld [vmem:[#allocation77_spill] sm:$0xff] }
 0x5b5   : > { %v8899_v25 = vpop.eup %8898  ;;  %v5585_v26 = vand.u32 2147483647, %v13839_v10  ;;  %8910 = vpow2.f32 %v5743_v46  ;;  %v13854_v43 = vmul.f32 1.3862944, %v5387_v7  ;;  %v13856_v5 = vmul.f32 1.3862944, %v5276_v24 }
 0x5b6   : > { %v6021_v19 = vadd.f32 %v5914_v51, %v16191_v58  ;;  %v5836_v13 = vadd.f32 1.0, %v8899_v25  ;;  %8912 = vlog2.f32 %v5835_v33  ;;  %v5389_v22 = vadd.f32 %v16192_v59, %v16186_v63  ;;  %v16196_v25 = vld [vmem:[#allocation99_spill] sm:$0xff] }
 0x5b7   : > { %v5649_v32 = vsub.f32 0.0, %v5585_v26  ;;  %v5278_v39 = vadd.f32 %v16194_v61, %v16193_v3  ;;  %v13862_v16 = vmul.f32 1.442695, %v6020_v38  ;;  %v16195_v4 = vmax.f32 %v13722_v55, 0.0 }
 0x5b8   : > { %v8901_v51 = vpop.eup %8900  ;;  %8914 = vlog2.f32 %v5834_v14  ;;  %v5587_v7 = vand.u32 2147483647, %v13854_v43  ;;  %v13867_v24 = vmul.f32 1.442695, %v6021_v19  ;;  %v5391_v63 = vadd.f32 %v16196_v25, %v16193_v3 }
 0x5b9   : > { %v6023_v58 = vadd.f32 %v5918_v53, %v16195_v4  ;;  %v8903_v46 = vpop.eup %8902  ;;  %8916 = vlog2.f32 %v5836_v13  ;;  %v5745_v33 = vmul.f32 1.442695, %v5649_v32  ;;  %v5586_v61 = vand.u32 2147483647, %v13856_v5 }
 0x5ba   : > { %v5837_v26 = vadd.f32 1.0, %v8903_v46  ;;  %v5651_v59 = vsub.f32 0.0, %v5587_v7  ;;  %v13872_v38 = vmul.f32 1.3862944, %v5389_v22  ;;  %v8905_v15 = vpop.eup %8904  ;;  %v16197_v55 = vmax.f32 %v13732_v45, 0.0 }
 0x5bb   : > { %v5920_v14 = vmul.f32 0.6931472, %v8901_v51  ;;  %8918 = vpow2.f32 %v5745_v33  ;;  %v13876_v4 = vmul.f32 1.3862944, %v5278_v39  ;;  %v5650_v50 = vsub.f32 0.0, %v5586_v61 }
 0x5bc   : > { %v6022_v53 = vadd.f32 %v5916_v44, %v16197_v55  ;;  %v8907_v19 = vpop.eup %8906  ;;  %v5749_v32 = vmul.f32 1.442695, %v5651_v59  ;;  %v13879_v25 = vmul.f32 1.3862944, %v5391_v63  ;;  %v13881_v46 = vmul.f32 1.442695, %v6023_v58 }
 0x5bd   : > { %v8909_v7 = vpop.eup %8908  ;;  %8920 = vlog2.f32 %v5837_v26  ;;  %v5839_v22 = vadd.f32 1.0, %v8907_v19  ;;  %v5588_v28 = vand.u32 2147483647, %v13872_v38  ;;  %v5747_v44 = vmul.f32 1.442695, %v5650_v50 }
 0x5be   : > { %16198 = vst [vmem:[#allocation46_spill] sm:$0xff] %v13881_v46  ;;  %v5838_v45 = vadd.f32 1.0, %v8909_v7  ;;  %8922 = vpow2.f32 %v5749_v32  ;;  %v5589_v39 = vand.u32 2147483647, %v13876_v4  ;;  %v13885_v51 = vmul.f32 1.442695, %v6022_v53 }
 0x5bf   : > { %v5922_v33 = vmul.f32 0.6931472, %v8905_v15  ;;  %v5652_v61 = vsub.f32 0.0, %v5588_v28  ;;  %v8911_v63 = vpop.eup %8910  ;;  %v16199_v55 = vmax.f32 %v13743_v62, 0.0  ;;  %8924 = vlog2.f32 %v5839_v22  ;;  %v16200_v28 = vld [vmem:[#allocation76_spill] sm:$0xff] }
 0x5c0   : > { %v5653_v26 = vsub.f32 0.0, %v5589_v39  ;;  %v5591_v19 = vand.u32 2147483647, %v13879_v25  ;;  %v8913_v13 = vpop.eup %8912  ;;  %v5840_v7 = vadd.f32 1.0, %v8911_v63  ;;  %8926 = vpow2.f32 %v5747_v44  ;;  %v16202_v39 = vld [vmem:[#allocation39_spill] sm:$0xff] }
 0x5c1   : > { %v6024_v58 = vadd.f32 %v5920_v14, %v16199_v55  ;;  %v5751_v32 = vmul.f32 1.442695, %v5652_v61  ;;  %8928 = vlog2.f32 %v5838_v45  ;;  %v5280_v59 = vadd.f32 %v16200_v28, %v16193_v3  ;;  %v16203_v28 = vld [vmem:[#allocation94_spill] sm:$0xff] }
 0x5c2   : > { %v8915_v53 = vpop.eup %8914  ;;  %v5753_v15 = vmul.f32 1.442695, %v5653_v26  ;;  %v5655_v46 = vsub.f32 0.0, %v5591_v19  ;;  %v16201_v62 = vmax.f32 %v13752_v48, 0.0  ;;  %8930 = vlog2.f32 %v5840_v7 }
 0x5c3   : > { %v8917_v23 = vpop.eup %8916  ;;  %v5393_v63 = vadd.f32 %v16202_v39, %v16193_v3  ;;  %v5926_v55 = vmul.f32 0.6931472, %v8913_v13  ;;  %8932 = vpow2.f32 %v5751_v32  ;;  %v13899_v61 = vmul.f32 1.3862944, %v5280_v59 }
 0x5c4   : > { %v6025_v14 = vadd.f32 %v5922_v33, %v16201_v62  ;;  %v5757_v44 = vmul.f32 1.442695, %v5655_v46  ;;  %v5924_v26 = vmul.f32 0.6931472, %v8915_v53  ;;  %8934 = vpow2.f32 %v5753_v15 }
 0x5c5   : > { %v8919_v45 = vpop.eup %8918  ;;  %v13901_v19 = vmul.f32 1.3862944, %v5393_v63  ;;  %v5284_v48 = vadd.f32 %v13510_v12, %v16203_v28  ;;  %v5928_v33 = vmul.f32 0.6931472, %v8917_v23  ;;  %v5590_v62 = vand.u32 2147483647, %v13899_v61 }
 0x5c6   : > { %v5841_v7 = vadd.f32 1.0, %v8919_v45  ;;  %8936 = vpow2.f32 %v5757_v44  ;;  %v13906_v3 = vmul.f32 1.442695, %v6024_v58  ;;  %v13908_v13 = vmul.f32 1.442695, %v6025_v14 }
 0x5c7   : > { %v8921_v22 = vpop.eup %8920  ;;  %v5397_v59 = vadd.f32 %v13512_v2, %v16203_v28  ;;  %v16205_v53 = vmax.f32 %v13762_v37, 0.0  ;;  %v5654_v12 = vsub.f32 0.0, %v5590_v62  ;;  %v5592_v23 = vand.u32 2147483647, %v13901_v19 }
 0x5c8   : > { %16204 = vst [vmem:[#allocation42_spill] sm:$0xff] %v13908_v13  ;;  %v8923_v32 = vpop.eup %8922  ;;  %v13916_v39 = vmul.f32 1.3862944, %v5284_v48  ;;  %v16206_v63 = vmax.f32 %v13777_v9, 0.0  ;;  %8938 = vlog2.f32 %v5841_v7  ;;  %v16207_v46 = vmax.f32 %v13785_v29, 0.0 }
 0x5c9   : > { %v6027_v15 = vadd.f32 %v5926_v55, %v16205_v53  ;;  %v5843_v14 = vadd.f32 1.0, %v8923_v32  ;;  %v13920_v44 = vmul.f32 1.3862944, %v5397_v59  ;;  %v8925_v45 = vpop.eup %8924  ;;  %v5755_v50 = vmul.f32 1.442695, %v5654_v12 }
 0x5ca   : > { %v6026_v58 = vadd.f32 %v5924_v26, %v16206_v63  ;;  %v6028_v2 = vadd.f32 %v5928_v33, %v16207_v46  ;;  %v5656_v13 = vsub.f32 0.0, %v5592_v23  ;;  %v5286_v37 = vadd.f32 %v13519_v18, %v16203_v28  ;;  %v8927_v55 = vpop.eup %8926 }
 0x5cb   : > { %v5930_v62 = vmul.f32 0.6931472, %v8921_v22  ;;  %8940 = vlog2.f32 %v5843_v14  ;;  %v5593_v9 = vand.u32 2147483647, %v13916_v39  ;;  %v8929_v26 = vpop.eup %8928  ;;  %v13928_v7 = vmul.f32 1.442695, %v6027_v15 }
 0x5cc   : > { %v5842_v59 = vadd.f32 1.0, %v8927_v55  ;;  %8942 = vpow2.f32 %v5755_v50  ;;  %v5759_v32 = vmul.f32 1.442695, %v5656_v13  ;;  %v8931_v29 = vpop.eup %8930  ;;  %v13930_v33 = vmul.f32 1.442695, %v6026_v58 }
 0x5cd   : > { %16208 = vst [vmem:[#allocation53_spill] sm:$0xff] %v13928_v7  ;;  %v5657_v53 = vsub.f32 0.0, %v5593_v9  ;;  %v5595_v18 = vand.u32 2147483647, %v13920_v44  ;;  %v8933_v22 = vpop.eup %8932  ;;  %v13934_v12 = vmul.f32 1.442695, %v6028_v2 }
 0x5ce   : > { %v13938_v15 = vmul.f32 1.3862944, %v5286_v37  ;;  %v8935_v14 = vpop.eup %8934  ;;  %v16210_v50 = vmax.f32 %v13798_v0, 0.0  ;;  %v5934_v58 = vmul.f32 0.6931472, %v8925_v45  ;;  %v5844_v55 = vadd.f32 1.0, %v8933_v22 }
 0x5cf   : > { %16209 = vst [vmem:[#allocation52_spill] sm:$0xff] %v13934_v12  ;;  %8944 = vpow2.f32 %v5759_v32  ;;  %v5845_v9 = vadd.f32 1.0, %v8935_v14  ;;  %v5761_v48 = vmul.f32 1.442695, %v5657_v53  ;;  %v5659_v7 = vsub.f32 0.0, %v5595_v18  ;;  %v16211_v0 = vld [vmem:[#allocation132_spill] sm:$0xff] }
 0x5d0   : > { %v6029_v13 = vadd.f32 %v5930_v62, %v16210_v50  ;;  %v8937_v46 = vpop.eup %8936  ;;  %8946 = vlog2.f32 %v5842_v59  ;;  %v5594_v23 = vand.u32 2147483647, %v13938_v15  ;;  %v5399_v37 = vadd.f32 %v13523_v35, %v16203_v28 }
 0x5d1   : > { %8948 = vlog2.f32 %v5844_v55  ;;  %v5847_v2 = vadd.f32 1.0, %v8937_v46  ;;  %v5932_v63 = vmul.f32 0.6931472, %v8929_v26  ;;  %v5765_v12 = vmul.f32 1.442695, %v5659_v7 }
 0x5d2   : > { %8950 = vlog2.f32 %v5845_v9  ;;  %v5288_v45 = vadd.f32 %v13550_v60, %v16211_v0  ;;  %v8939_v62 = vpop.eup %8938  ;;  %v5936_v32 = vmul.f32 0.6931472, %v8931_v29  ;;  %v5658_v59 = vsub.f32 0.0, %v5594_v23 }
 0x5d3   : > { %8952 = vlog2.f32 %v5847_v2  ;;  %v13947_v22 = vmul.f32 1.3862944, %v5399_v37  ;;  %v5401_v46 = vadd.f32 %v13552_v11, %v16211_v0  ;;  %v5290_v35 = vadd.f32 %v13558_v52, %v16211_v0 }
 0x5d4   : > { %8954 = vpow2.f32 %v5761_v48  ;;  %v13949_v53 = vmul.f32 1.3862944, %v5288_v45  ;;  %v16212_v26 = vmax.f32 %v13812_v42, 0.0  ;;  %v5529_v60 = vmax.f32 %v13916_v39, 0.0 }
 0x5d5   : > { %v8941_v28 = vpop.eup %8940  ;;  %8956 = vpow2.f32 %v5765_v12  ;;  %v5763_v29 = vmul.f32 1.442695, %v5658_v59  ;;  %v16213_v23 = vmax.f32 %v13816_v56, 0.0  ;;  %v5938_v14 = vmul.f32 0.6931472, %v8939_v62 }
 0x5d6   : > { %v6031_v7 = vadd.f32 %v5934_v58, %v16212_v26  ;;  %v8943_v18 = vpop.eup %8942  ;;  %v5596_v50 = vand.u32 2147483647, %v13947_v22  ;;  %v5403_v11 = vadd.f32 %v13562_v6, %v16211_v0  ;;  %v16214_v52 = vmax.f32 %v13827_v31, 0.0 }
 0x5d7   : > { %v6030_v48 = vadd.f32 %v5932_v63, %v16213_v23  ;;  %v5942_v9 = vmul.f32 0.6931472, %v8941_v28  ;;  %v5846_v42 = vadd.f32 1.0, %v8943_v18  ;;  %v5597_v58 = vand.u32 2147483647, %v13949_v53 }
 0x5d8   : > { %v6032_v55 = vadd.f32 %v5936_v32, %v16214_v52  ;;  %8958 = vpow2.f32 %v5763_v29  ;;  %v5660_v12 = vsub.f32 0.0, %v5596_v50  ;;  %v13966_v2 = vmul.f32 1.3862944, %v5401_v46 }
 0x5d9   : > { %v13968_v37 = vmul.f32 1.3862944, %v5290_v35  ;;  %v8945_v56 = vpop.eup %8944  ;;  %v13970_v63 = vmul.f32 1.442695, %v6029_v13  ;;  %v13972_v45 = vmul.f32 1.442695, %v6031_v7  ;;  %8960 = vlog2.f32 %v5846_v42 }
 0x5da   : > { %v5661_v6 = vsub.f32 0.0, %v5597_v58  ;;  %v8947_v0 = vpop.eup %8946  ;;  %v13974_v31 = vmul.f32 1.442695, %v6030_v48  ;;  %v16215_v62 = vmax.f32 %v13839_v10, 0.0  ;;  %v5767_v59 = vmul.f32 1.442695, %v5660_v12 }
 0x5db   : > { %v13978_v28 = vmul.f32 1.3862944, %v5403_v11  ;;  %v8949_v46 = vpop.eup %8948  ;;  %v5848_v26 = vadd.f32 1.0, %v8945_v56  ;;  %v5599_v13 = vand.u32 2147483647, %v13966_v2  ;;  %v16216_v23 = vmax.f32 %v13854_v43, 0.0 }
 0x5dc   : > { %v6033_v32 = vadd.f32 %v5938_v14, %v16215_v62  ;;  %v5769_v29 = vmul.f32 1.442695, %v5661_v6  ;;  %v8951_v7 = vpop.eup %8950  ;;  %v13982_v18 = vmul.f32 1.442695, %v6032_v55  ;;  %v5598_v10 = vand.u32 2147483647, %v13968_v37 }
 0x5dd   : > { %v6035_v48 = vadd.f32 %v5942_v9, %v16216_v23  ;;  %v8953_v14 = vpop.eup %8952  ;;  %v5940_v11 = vmul.f32 0.6931472, %v8947_v0  ;;  %8962 = vpow2.f32 %v5767_v59  ;;  %v5663_v42 = vsub.f32 0.0, %v5599_v13 }
 0x5de   : > { %v8955_v58 = vpop.eup %8954  ;;  %v13989_v12 = vmul.f32 1.442695, %v6033_v32  ;;  %v5533_v56 = vmax.f32 %v13949_v53, 0.0  ;;  %8964 = vpow2.f32 %v5769_v29  ;;  %v5662_v55 = vsub.f32 0.0, %v5598_v10  ;;  %v16245_v53 = vld [vmem:[#allocation59_spill] sm:$0xff] }
 0x5df   : > { %v8957_v6 = vpop.eup %8956  ;;  %8966 = vlog2.f32 %v5848_v26  ;;  %v5849_v43 = vadd.f32 1.0, %v8955_v58  ;;  %v5773_v9 = vmul.f32 1.442695, %v5663_v42  ;;  %v5600_v62 = vand.u32 2147483647, %v13978_v28 }
 0x5e0   : > { %v13993_v23 = vmul.f32 1.442695, %v6035_v48  ;;  %v5944_v0 = vmul.f32 0.6931472, %v8949_v46  ;;  %v5851_v50 = vadd.f32 1.0, %v8957_v6  ;;  %v5535_v59 = vmax.f32 %v13966_v2, 0.0 }
 0x5e1   : > { %v16217_v13 = vmax.f32 %v13856_v5, 0.0  ;;  %v5771_v52 = vmul.f32 1.442695, %v5662_v55  ;;  %v5664_v35 = vsub.f32 0.0, %v5600_v62  ;;  %v6130_v29 = vpack.c.bf16 %v13726_v20, %v13647_v49  ;;  %v16219_v20 = vld [vmem:[#allocation111_spill] sm:$0xff] }
 0x5e2   : > { %v8959_v10 = vpop.eup %8958  ;;  %v5946_v26 = vmul.f32 0.6931472, %v8951_v7  ;;  %v5950_v58 = vmul.f32 0.6931472, %v8953_v14  ;;  %8968 = vlog2.f32 %v5849_v43  ;;  %v6132_v48 = vpack.c.bf16 %v13747_v36, %v13651_v34  ;;  %v16220_v7 = vld [vmem:[#allocation28_spill] sm:$0xff]  ;;  %v16221_v34 = vld [vmem:[#allocation34_spill] sm:$0xff] }
 0x5e3   : > { %v6034_v32 = vadd.f32 %v5940_v11, %v16217_v13  ;;  %v8961_v42 = vpop.eup %8960  ;;  %8970 = vpow2.f32 %v5773_v9  ;;  %v5775_v46 = vmul.f32 1.442695, %v5664_v35  ;;  %6161 = vmatprep.subr.bf16.mxu0 %v6130_v29  ;;  %v6129_v5 = vpack.c.bf16 %v13663_v30, %v13622_v41  ;;  %v16222_v41 = vld [vmem:[#allocation58_spill] sm:$0xff] }
 0x5e4   : > { %v6131_v11 = vpack.c.bf16 %v13678_v57, %v13637_v27  ;;  %v16218_v55 = vmax.f32 %v13872_v38, 0.0  ;;  %8972 = vlog2.f32 %v5851_v50  ;;  %6274 = vmatprep.subr.bf16.mxu1 %v6132_v48  ;;  %v5294_v14 = vadd.f32 %v16220_v7, %v16219_v20  ;;  %v16223_v27 = vld [vmem:[#allocation27_spill] sm:$0xff] }
 0x5e5   : > { %v5407_v36 = vadd.f32 %v16221_v34, %v16219_v20  ;;  %v5850_v6 = vadd.f32 1.0, %v8959_v10  ;;  %8974 = vpow2.f32 %v5771_v52  ;;  %6162 = vmatpush1.bf16.msra.mxu0 %v6129_v5  ;;  %v5296_v30 = vadd.f32 %v16222_v41, %v16219_v20  ;;  %v16227_v41 = vld [vmem:[#allocation102_spill] sm:$0xff] }
 0x5e6   : > { %v6036_v49 = vadd.f32 %v5944_v0, %v16218_v55  ;;  %6275 = vmatpush1.bf16.msra.mxu1 %v6131_v11  ;;  %v5409_v57 = vadd.f32 %v16223_v27, %v16219_v20  ;;  %v5948_v38 = vmul.f32 0.6931472, %v8961_v42  ;;  %8976 = vpow2.f32 %v5775_v46 }
 0x5e7   : > { %v14016_v35 = vmul.f32 1.3862944, %v5294_v14  ;;  %v14018_v50 = vmul.f32 1.3862944, %v5407_v36  ;;  %v8963_v43 = vpop.eup %8962  ;;  %v16224_v9 = vmax.f32 %v13876_v4, 0.0  ;;  %v16225_v52 = vmax.f32 %v13879_v25, 0.0 }
 0x5e8   : > { %v14025_v29 = vmul.f32 1.3862944, %v5296_v30  ;;  %v8965_v10 = vpop.eup %8964  ;;  %v14027_v48 = vmul.f32 1.442695, %v6034_v32  ;;  %v5852_v42 = vadd.f32 1.0, %v8963_v43  ;;  %8978 = vlog2.f32 %v5850_v6  ;;  %v16228_v6 = vld [vmem:[#allocation89_spill] sm:$0xff] }
 0x5e9   : > { %v6037_v62 = vadd.f32 %v5946_v26, %v16224_v9  ;;  %v6039_v0 = vadd.f32 %v5950_v58, %v16225_v52  ;;  %v5601_v5 = vand.u32 2147483647, %v14016_v35  ;;  %v8967_v11 = vpop.eup %8966  ;;  %v5853_v55 = vadd.f32 1.0, %v8965_v10  ;;  %v16229_v52 = vld [vmem:[#allocation80_spill] sm:$0xff] }
 0x5ea   : > { %v5603_v4 = vand.u32 2147483647, %v14018_v50  ;;  %v14032_v26 = vmul.f32 1.3862944, %v5409_v57  ;;  %v14034_v25 = vmul.f32 1.442695, %v6036_v49  ;;  %v5298_v30 = vadd.f32 %v16228_v6, %v16227_v41 }
 0x5eb   : > { %v16226_v58 = vmax.f32 %v13899_v61, 0.0  ;;  %v5665_v7 = vsub.f32 0.0, %v5601_v5  ;;  %v5602_v32 = vand.u32 2147483647, %v14025_v29  ;;  %v14039_v14 = vmul.f32 1.442695, %v6037_v62 }
 0x5ec   : > { %v14041_v34 = vmul.f32 1.442695, %v6039_v0  ;;  %v5667_v36 = vsub.f32 0.0, %v5603_v4  ;;  %v8969_v27 = vpop.eup %8968  ;;  %v5952_v43 = vmul.f32 0.6931472, %v8967_v11  ;;  %8980 = vlog2.f32 %v5852_v42  ;;  %v16230_v11 = vld [vmem:[#allocation30_spill] sm:$0xff] }
 0x5ed   : > { %v6038_v20 = vadd.f32 %v5948_v38, %v16226_v58  ;;  %v5777_v57 = vmul.f32 1.442695, %v5665_v7  ;;  %v5666_v49 = vsub.f32 0.0, %v5602_v32  ;;  %v8971_v9 = vpop.eup %8970  ;;  %8982 = vlog2.f32 %v5853_v55 }
 0x5ee   : > { %v5781_v61 = vmul.f32 1.442695, %v5667_v36  ;;  %v5604_v38 = vand.u32 2147483647, %v14032_v26  ;;  %v5411_v62 = vadd.f32 %v16229_v52, %v16227_v41  ;;  %v8973_v10 = vpop.eup %8972  ;;  %v5855_v5 = vadd.f32 1.0, %v8971_v9  ;;  %v16231_v52 = vld [vmem:[#allocation67_spill] sm:$0xff] }
 0x5ef   : > { %v14048_v0 = vmul.f32 1.442695, %v6038_v20  ;;  %8984 = vpow2.f32 %v5777_v57  ;;  %v5779_v4 = vmul.f32 1.442695, %v5666_v49  ;;  %v8975_v58 = vpop.eup %8974  ;;  %v5954_v6 = vmul.f32 0.6931472, %v8969_v27 }
 0x5f0   : > { %8986 = vpow2.f32 %v5781_v61  ;;  %v5668_v42 = vsub.f32 0.0, %v5604_v38  ;;  %v5300_v7 = vadd.f32 %v16230_v11, %v16227_v41  ;;  %v8977_v55 = vpop.eup %8976  ;;  %v5854_v32 = vadd.f32 1.0, %v8975_v58 }
 0x5f1   : > { %8988 = vlog2.f32 %v5855_v5  ;;  %v14052_v36 = vmul.f32 1.3862944, %v5298_v30  ;;  %v5413_v46 = vadd.f32 %v16231_v52, %v16227_v41  ;;  %v5958_v20 = vmul.f32 0.6931472, %v8973_v10 }
 0x5f2   : > { %v5856_v13 = vadd.f32 1.0, %v8977_v55  ;;  %v5537_v57 = vmax.f32 %v14016_v35, 0.0  ;;  %8990 = vpow2.f32 %v5779_v4  ;;  %v16232_v27 = vmax.f32 %v13901_v19, 0.0  ;;  %v8979_v5 = vpop.eup %8978 }
 0x5f3   : > { %v5783_v61 = vmul.f32 1.442695, %v5668_v42  ;;  %v5605_v38 = vand.u32 2147483647, %v14052_v36  ;;  %v6041_v30 = vadd.f32 %v5954_v6, %v5529_v60  ;;  %8992 = vlog2.f32 %v5854_v32 }
 0x5f4   : > { %v6040_v49 = vadd.f32 %v5952_v43, %v16232_v27  ;;  %v14063_v58 = vmul.f32 1.3862944, %v5411_v62  ;;  %v14065_v41 = vmul.f32 1.3862944, %v5300_v7  ;;  %v14067_v4 = vmul.f32 1.3862944, %v5413_v46 }
 0x5f5   : > { %8994 = vpow2.f32 %v5783_v61  ;;  %v5669_v10 = vsub.f32 0.0, %v5605_v38  ;;  %v6134_v19 = vpack.c.bf16 %v13809_v40, %v13779_v21  ;;  %v16233_v43 = vmax.f32 %v13920_v44, 0.0  ;;  %v16234_v27 = vld [vmem:[#allocation37_spill] sm:$0xff] }
 0x5f6   : > { %8996 = vlog2.f32 %v5856_v13  ;;  %v5607_v39 = vand.u32 2147483647, %v14063_v58  ;;  %v8981_v60 = vpop.eup %8980  ;;  %v5956_v62 = vmul.f32 0.6931472, %v8979_v5  ;;  %v5606_v7 = vand.u32 2147483647, %v14065_v41 }
 0x5f7   : > { %v6043_v42 = vadd.f32 %v5958_v20, %v16233_v43  ;;  %v5785_v6 = vmul.f32 1.442695, %v5669_v10  ;;  %6163 = vmatprep.subr.bf16.mxu0 %v6134_v19  ;;  %v6136_v46 = vpack.c.bf16 %v13822_v54, %v13782_v47  ;;  %v8983_v55 = vpop.eup %8982  ;;  %v14078_v32 = vmul.f32 1.442695, %v6040_v49  ;;  %v16235_v61 = vld [vmem:[#allocation45_spill] sm:$0xff] }
 0x5f8   : > { %v5671_v40 = vsub.f32 0.0, %v5607_v39  ;;  %v5608_v44 = vand.u32 2147483647, %v14067_v4  ;;  %v14082_v52 = vmul.f32 1.442695, %v6041_v30  ;;  %v5670_v20 = vsub.f32 0.0, %v5606_v7 }
 0x5f9   : > { %v8985_v13 = vpop.eup %8984  ;;  %8998 = vpow2.f32 %v5785_v6  ;;  %6276 = vmatprep.subr.bf16.mxu1 %v6136_v46  ;;  %v6133_v38 = vpack.c.bf16 %v16235_v61, %v16234_v27  ;;  %v14086_v10 = vmul.f32 1.442695, %v6043_v42  ;;  %v16236_v43 = vmax.f32 %v13938_v15, 0.0  ;;  %v16237_v30 = vld [vmem:[#allocation17_spill] sm:$0xff]  ;;  %v16238_v61 = vld [vmem:[#allocation107_spill] sm:$0xff] }
 0x5fa   : > { %v8987_v5 = vpop.eup %8986  ;;  %v5857_v47 = vadd.f32 1.0, %v8985_v13  ;;  %v5789_v54 = vmul.f32 1.442695, %v5671_v40  ;;  %v5672_v49 = vsub.f32 0.0, %v5608_v44  ;;  %v5960_v21 = vmul.f32 0.6931472, %v8981_v60 }
 0x5fb   : > { %v8989_v19 = vpop.eup %8988  ;;  %v6042_v39 = vadd.f32 %v5956_v62, %v16236_v43  ;;  %v5859_v11 = vadd.f32 1.0, %v8987_v5  ;;  %6164 = vmatpush1.bf16.msra.mxu0 %v6133_v38  ;;  %v6135_v6 = vpack.c.bf16 %v13802_v1, %v16237_v30  ;;  %v5787_v46 = vmul.f32 1.442695, %v5670_v20  ;;  %v16239_v42 = vld [vmem:[#allocation71_spill] sm:$0xff]  ;;  %v16240_v44 = vld [vmem:[#allocation98_spill] sm:$0xff] }
 0x5fc   : > { %v8991_v7 = vpop.eup %8990  ;;  %9000 = vlog2.f32 %v5857_v47  ;;  %v5791_v27 = vmul.f32 1.442695, %v5672_v49  ;;  %v5304_v9 = vadd.f32 %v16239_v42, %v16238_v61  ;;  %v5417_v15 = vadd.f32 %v16240_v44, %v16238_v61  ;;  %v16241_v60 = vld [vmem:[#allocation90_spill] sm:$0xff] }
 0x5fd   : > { %9002 = vlog2.f32 %v5859_v11  ;;  %v5858_v40 = vadd.f32 1.0, %v8991_v7  ;;  %6277 = vmatpush1.bf16.msra.mxu1 %v6135_v6  ;;  %v5306_v62 = vadd.f32 %v16241_v60, %v16238_v61  ;;  %v8993_v13 = vpop.eup %8992  ;;  %v5962_v38 = vmul.f32 0.6931472, %v8983_v55 }
 0x5fe   : > { %v5966_v5 = vmul.f32 0.6931472, %v8989_v19  ;;  %9004 = vpow2.f32 %v5789_v54  ;;  %v14098_v1 = vmul.f32 1.3862944, %v5304_v9  ;;  %v14101_v49 = vmul.f32 1.3862944, %v5417_v15 }
 0x5ff   : > { %v8995_v20 = vpop.eup %8994  ;;  %9006 = vlog2.f32 %v5858_v40  ;;  %v14103_v11 = vmul.f32 1.3862944, %v5306_v62  ;;  %v14105_v30 = vmul.f32 1.442695, %v6042_v39  ;;  %v16242_v55 = vmax.f32 %v13947_v22, 0.0 }
 0x600   : > { %v8997_v43 = vpop.eup %8996  ;;  %v5860_v6 = vadd.f32 1.0, %v8995_v20  ;;  %9008 = vpow2.f32 %v5787_v46  ;;  %v5609_v19 = vand.u32 2147483647, %v14098_v1  ;;  %v6045_v42 = vadd.f32 %v5962_v38, %v5533_v56 }
 0x601   : > { %v6044_v54 = vadd.f32 %v5960_v21, %v16242_v55  ;;  %9010 = vpow2.f32 %v5791_v27  ;;  %v6047_v40 = vadd.f32 %v5966_v5, %v5535_v59  ;;  %v5964_v39 = vmul.f32 0.6931472, %v8993_v13  ;;  %v16243_v27 = vld [vmem:[#allocation44_spill] sm:$0xff]  ;;  %v16244_v55 = vld [vmem:[#allocation113_spill] sm:$0xff] }
 0x602   : > { %v5611_v44 = vand.u32 2147483647, %v14101_v49  ;;  %v5968_v60 = vmul.f32 0.6931472, %v8997_v43  ;;  %9012 = vlog2.f32 %v5860_v6  ;;  %v5673_v46 = vsub.f32 0.0, %v5609_v19  ;;  %v16246_v13 = vld [vmem:[#allocation65_spill] sm:$0xff] }
 0x603   : > { %v8999_v15 = vpop.eup %8998  ;;  %v5610_v22 = vand.u32 2147483647, %v14103_v11  ;;  %v5419_v20 = vadd.f32 %v16243_v27, %v16238_v61  ;;  %v5308_v56 = vadd.f32 %v16245_v53, %v16244_v55  ;;  %v14122_v38 = vmul.f32 1.442695, %v6044_v54 }
 0x604   : > { %v5861_v21 = vadd.f32 1.0, %v8999_v15  ;;  %v5675_v62 = vsub.f32 0.0, %v5611_v44  ;;  %v5793_v2 = vmul.f32 1.442695, %v5673_v46  ;;  %v5421_v5 = vadd.f32 %v16246_v13, %v16244_v55 }
 0x605   : > { %v5674_v59 = vsub.f32 0.0, %v5610_v22  ;;  %v14126_v19 = vmul.f32 1.3862944, %v5419_v20  ;;  %v14128_v15 = vmul.f32 1.3862944, %v5308_v56  ;;  %v16247_v61 = vmax.f32 %v13968_v37, 0.0 }
 0x606   : > { %v9001_v43 = vpop.eup %9000  ;;  %9014 = vlog2.f32 %v5861_v21  ;;  %v5797_v6 = vmul.f32 1.442695, %v5675_v62  ;;  %v14130_v9 = vmul.f32 1.442695, %v6045_v42  ;;  %v14134_v22 = vmul.f32 1.442695, %v6047_v40 }
 0x607   : > { %v9003_v44 = vpop.eup %9002  ;;  %v6046_v27 = vadd.f32 %v5964_v39, %v16247_v61  ;;  %9016 = vpow2.f32 %v5793_v2  ;;  %v5795_v54 = vmul.f32 1.442695, %v5674_v59  ;;  %v16248_v53 = vmax.f32 %v13978_v28, 0.0  ;;  %v16249_v40 = vld [vmem:[#allocation20_spill] sm:$0xff] }
 0x608   : > { %v9005_v46 = vpop.eup %9004  ;;  %9018 = vpow2.f32 %v5797_v6  ;;  %v5612_v21 = vand.u32 2147483647, %v14126_v19  ;;  %v5970_v20 = vmul.f32 0.6931472, %v9001_v43  ;;  %v14139_v42 = vmul.f32 1.3862944, %v5421_v5 }
 0x609   : > { %v6048_v13 = vadd.f32 %v5968_v60, %v16248_v53  ;;  %v9007_v62 = vpop.eup %9006  ;;  %v5863_v56 = vadd.f32 1.0, %v9005_v46  ;;  %9020 = vpow2.f32 %v5795_v54  ;;  %v5974_v37 = vmul.f32 0.6931472, %v9003_v44 }
 0x60a   : > { %v9009_v7 = vpop.eup %9008  ;;  %v5676_v39 = vsub.f32 0.0, %v5612_v21  ;;  %v5613_v2 = vand.u32 2147483647, %v14128_v15  ;;  %v5310_v59 = vadd.f32 %v16249_v40, %v16244_v55  ;;  %v14144_v28 = vmul.f32 1.442695, %v6046_v27 }
 0x60b   : > { %v9011_v61 = vpop.eup %9010  ;;  %v5972_v60 = vmul.f32 0.6931472, %v9007_v62  ;;  %9022 = vlog2.f32 %v5863_v56  ;;  %v5862_v6 = vadd.f32 1.0, %v9009_v7  ;;  %v14146_v53 = vmul.f32 1.442695, %v6048_v13  ;;  %v16251_v7 = vld [vmem:[#allocation26_spill] sm:$0xff] }
 0x60c   : > { %v5544_v43 = vmax.f32 %v14067_v4, 0.0  ;;  %v5864_v5 = vadd.f32 1.0, %v9011_v61  ;;  %v5799_v54 = vmul.f32 1.442695, %v5676_v39  ;;  %v9013_v46 = vpop.eup %9012  ;;  %v6049_v44 = vadd.f32 %v5970_v20, %v5537_v57 }
 0x60d   : > { %9024 = vlog2.f32 %v5862_v6  ;;  %v5677_v21 = vsub.f32 0.0, %v5613_v2  ;;  %v5615_v40 = vand.u32 2147483647, %v14139_v42  ;;  %v16250_v27 = vmax.f32 %v14018_v50, 0.0 }
 0x60e   : > { %9026 = vlog2.f32 %v5864_v5  ;;  %v14154_v62 = vmul.f32 1.3862944, %v5310_v59  ;;  %v5423_v13 = vadd.f32 %v16251_v7, %v16244_v55  ;;  %v16252_v56 = vmax.f32 %v14025_v29, 0.0 }
 0x60f   : > { %v6051_v47 = vadd.f32 %v5974_v37, %v16250_v27  ;;  %9028 = vpow2.f32 %v5799_v54  ;;  %v5801_v61 = vmul.f32 1.442695, %v5677_v21  ;;  %v5679_v35 = vsub.f32 0.0, %v5615_v40 }
 0x610   : > { %v6050_v39 = vadd.f32 %v5972_v60, %v16252_v56  ;;  %v9015_v57 = vpop.eup %9014  ;;  %v5976_v20 = vmul.f32 0.6931472, %v9013_v46  ;;  %v5614_v2 = vand.u32 2147483647, %v14154_v62  ;;  %v14161_v6 = vmul.f32 1.3862944, %v5423_v13 }
 0x611   : > { %v6138_v50 = vpack.c.bf16 %v13885_v51, %v13845_v17  ;;  %v9017_v37 = vpop.eup %9016  ;;  %v14165_v59 = vmul.f32 1.442695, %v6049_v44  ;;  %v5978_v5 = vmul.f32 0.6931472, %v9015_v57  ;;  %9030 = vpow2.f32 %v5801_v61 }
 0x612   : > { %v5805_v55 = vmul.f32 1.442695, %v5679_v35  ;;  %v9019_v29 = vpop.eup %9018  ;;  %v14167_v60 = vmul.f32 1.442695, %v6051_v47  ;;  %v5865_v54 = vadd.f32 1.0, %v9017_v37  ;;  %v5678_v21 = vsub.f32 0.0, %v5614_v2 }
 0x613   : > { %v5616_v46 = vand.u32 2147483647, %v14161_v6  ;;  %6165 = vmatprep.subr.bf16.mxu0 %v6138_v50  ;;  %v9021_v40 = vpop.eup %9020  ;;  %v14170_v27 = vmul.f32 1.442695, %v6050_v39  ;;  %v16253_v7 = vmax.f32 %v14052_v36, 0.0  ;;  %v6140_v51 = vpack.c.bf16 %v13906_v3, %v13862_v16  ;;  %v16255_v2 = vld [vmem:[#allocation48_spill] sm:$0xff] }
 0x614   : > { %9032 = vpow2.f32 %v5805_v55  ;;  %v16254_v44 = vmax.f32 %v14032_v26, 0.0  ;;  %v5867_v47 = vadd.f32 1.0, %v9019_v29  ;;  %v5803_v56 = vmul.f32 1.442695, %v5678_v21  ;;  %v16256_v36 = vld [vmem:[#allocation46_spill] sm:$0xff] }
 0x615   : > { %v6053_v17 = vadd.f32 %v5978_v5, %v16253_v7  ;;  %v5680_v61 = vsub.f32 0.0, %v5616_v46  ;;  %v9023_v35 = vpop.eup %9022  ;;  %9034 = vlog2.f32 %v5865_v54  ;;  %v5866_v57 = vadd.f32 1.0, %v9021_v40  ;;  %6278 = vmatprep.subr.bf16.mxu1 %v6140_v51  ;;  %v16258_v29 = vld [vmem:[#allocation42_spill] sm:$0xff] }
 0x616   : > { %v6052_v13 = vadd.f32 %v5976_v20, %v16254_v44  ;;  %v6137_v39 = vpack.c.bf16 %v13867_v24, %v13831_v8  ;;  %v6139_v50 = vpack.c.bf16 %v16256_v36, %v16255_v2  ;;  %v5982_v5 = vmul.f32 0.6931472, %v9023_v35  ;;  %v16257_v20 = vld [vmem:[#allocation52_spill] sm:$0xff]  ;;  %v16259_v24 = vld [vmem:[#allocation53_spill] sm:$0xff] }
 0x617   : > { %v14182_v37 = vmul.f32 1.442695, %v6053_v17  ;;  %v5807_v16 = vmul.f32 1.442695, %v5680_v61  ;;  %v6142_v3 = vpack.c.bf16 %v13974_v31, %v13930_v33  ;;  %v9025_v26 = vpop.eup %9024  ;;  %9036 = vpow2.f32 %v5803_v56 }
 0x618   : > { %6166 = vmatpush1.bf16.msra.mxu0 %v6137_v39  ;;  %6279 = vmatpush1.bf16.msra.mxu1 %v6139_v50  ;;  %v6144_v55 = vpack.c.bf16 %v13982_v18, %v16257_v20  ;;  %v6141_v8 = vpack.c.bf16 %v13970_v63, %v16258_v29  ;;  %v6143_v54 = vpack.c.bf16 %v13972_v45, %v16259_v24  ;;  %v9027_v21 = vpop.eup %9026  ;;  %v16260_v46 = vmax.f32 %v14063_v58, 0.0 }
 0x619   : > { %v5980_v7 = vmul.f32 0.6931472, %v9025_v26  ;;  %9038 = vpow2.f32 %v5807_v16  ;;  %6167 = vmatprep.subr.bf16.mxu0 %v6142_v3  ;;  %v6146_v33 = vpack.c.bf16 %v14048_v0, %v14027_v48  ;;  %v9029_v31 = vpop.eup %9028  ;;  %v5984_v17 = vmul.f32 0.6931472, %v9027_v21 }
 0x61a   : > { %v6055_v40 = vadd.f32 %v5982_v5, %v16260_v46  ;;  %6280 = vmatprep.subr.bf16.mxu1 %v6144_v55  ;;  %v6148_v18 = vpack.c.bf16 %v14078_v32, %v14034_v25  ;;  %v6145_v63 = vpack.c.bf16 %v14039_v14, %v13989_v12  ;;  %v6147_v45 = vpack.c.bf16 %v14041_v34, %v13993_v23 }
 0x61b   : > { %v16261_v51 = vmax.f32 %v14065_v41, 0.0  ;;  %9040 = vlog2.f32 %v5867_v47  ;;  %v6150_v48 = vpack.c.bf16 %v14144_v28, %v14105_v30  ;;  %v9031_v0 = vpop.eup %9030  ;;  %v6056_v56 = vadd.f32 %v5984_v17, %v5544_v43 }
 0x61c   : > { %v6119_v58 = vmul.f32 1.442695, %v6055_v40  ;;  %v5868_v61 = vadd.f32 1.0, %v9029_v31  ;;  %6168 = vmatpush1.bf16.msra.mxu0 %v6141_v8  ;;  %6281 = vmatpush1.bf16.msra.mxu1 %v6143_v54  ;;  %v6152_v12 = vpack.c.bf16 %v14146_v53, %v14122_v38  ;;  %v6149_v23 = vpack.c.bf16 %v14130_v9, %v14082_v52 }
 0x61d   : > { %v6054_v44 = vadd.f32 %v5980_v7, %v16261_v51  ;;  %v6116_v25 = vmul.f32 1.442695, %v6052_v13  ;;  %v5869_v34 = vadd.f32 1.0, %v9031_v0  ;;  %6169 = vmatprep.subr.bf16.mxu0 %v6146_v33  ;;  %6282 = vmatprep.subr.bf16.mxu1 %v6148_v18  ;;  %v6151_v41 = vpack.c.bf16 %v14134_v22, %v14086_v10 }
 0x61e   : > { %v9033_v32 = vpop.eup %9032  ;;  %v6120_v4 = vmul.f32 1.442695, %v6056_v56  ;;  %9042 = vlog2.f32 %v5866_v57  ;;  %v6153_v30 = vpack.c.bf16 %v14182_v37, %v14165_v59  ;;  %v6155_v28 = vpack.c.bf16 %v6119_v58, %v14167_v60 }
 0x61f   : > { %v6118_v14 = vmul.f32 1.442695, %v6054_v44  ;;  %9044 = vlog2.f32 %v5869_v34  ;;  %v5871_v38 = vadd.f32 1.0, %v9033_v32  ;;  %v9035_v9 = vpop.eup %9034  ;;  %v5545_v47 = vmax.f32 %v14098_v1, 0.0  ;;  %v9356_v34 = vld [vmem:[%s15089_s5 + $0x30] sm:$0xff]  }
 0x620   : > { %9046 = vlog2.f32 %v5868_v61  ;;  %6170 = vmatpush1.bf16.msra.mxu0 %v6145_v63  ;;  %6283 = vmatpush1.bf16.msra.mxu1 %v6147_v45  ;;  %v6156_v53 = vpack.c.bf16 %v6120_v4, %v6116_v25  ;;  %v5986_v60 = vmul.f32 0.6931472, %v9035_v9  ;;  %v5547_v36 = vmax.f32 %v14101_v49, 0.0  ;;  %v9351_v61 = vld [vmem:[%s15089_s5 + $0x8] sm:$0xff]   ;;  %v9354_v25 = vld [vmem:[%s15089_s5 + $0x20] sm:$0xff]  }
 0x621   : > { %v6154_v52 = vpack.c.bf16 %v6118_v14, %v14170_v27  ;;  %9048 = vlog2.f32 %v5871_v38  ;;  %6171 = vmatprep.subr.bf16.mxu0 %v6150_v48  ;;  %6284 = vmatprep.subr.bf16.mxu1 %v6152_v12  ;;  %v9037_v10 = vpop.eup %9036  ;;  %v5549_v50 = vmax.f32 %v14128_v15, 0.0  ;;  %v5551_v20 = vmax.f32 %v14139_v42, 0.0  ;;  %v9352_v12 = vld [vmem:[%s15089_s5 + $0x10] sm:$0xff]   ;;  %v9355_v14 = vld [vmem:[%s15089_s5 + $0x28] sm:$0xff]  }
 0x622   : > { %v5870_v43 = vadd.f32 1.0, %v9037_v10  ;;  %v6057_v2 = vadd.f32 %v5986_v60, %v5545_v47  ;;  %v5546_v1 = vmax.f32 %v14103_v11, 0.0  ;;  %v5548_v49 = vmax.f32 %v14126_v19, 0.0  ;;  %v16263_v4 = vld [vmem:[#allocation115_spill] sm:$0xff] }
 0x623   : > { %v9039_v22 = vpop.eup %9038  ;;  %v5550_v15 = vmax.f32 %v14154_v62, 0.0  ;;  %v5552_v42 = vmax.f32 %v14161_v6, 0.0  ;;  %v9350_v62 = vld [vmem:[%s15089_s5] sm:$0xff]   ;;  %v16262_v6 = vmov 0  }
 0x624   : > { %v5872_v13 = vadd.f32 1.0, %v9039_v22  ;;  %6172 = vmatpush1.bf16.msra.mxu0 %v6149_v23  ;;  %6285 = vmatpush1.bf16.msra.mxu1 %v6151_v41  ;;  %9050 = vlog2.f32 %v5870_v43  ;;  %v6121_v8 = vmul.f32 1.442695, %v6057_v2  ;;  %v9353_v23 = vld [vmem:[%s15089_s5 + $0x18] sm:$0xff]  }
 0x625   : > { %v9041_v59 = vpop.eup %9040  ;;  %6173 = vmatprep.subr.bf16.mxu0 %v6154_v52  ;;  %6286 = vmatprep.subr.bf16.mxu1 %v6156_v53  ;;  %v9357_v41 = vld [vmem:[%s15089_s5 + $0x38] sm:$0xff]  }
 0x626   : > { %9052 = vlog2.f32 %v5872_v13  ;;  %v5990_v35 = vmul.f32 0.6931472, %v9041_v59  ;;  %v16264_v13 = vld [vmem:[#allocation114_spill] sm:$0xff] }
 0x628   : > { %v9043_v27 = vpop.eup %9042  ;;  %6174 = vmatpush1.bf16.msra.mxu0 %v6153_v30  ;;  %6287 = vmatpush1.bf16.msra.mxu1 %v6155_v28  ;;  %v6059_v3 = vadd.f32 %v5990_v35, %v5547_v36 }
 0x629   : > { %v9045_v57 = vpop.eup %9044  ;;  %v5988_v16 = vmul.f32 0.6931472, %v9043_v27 }
 0x62a   : > { %v9047_v39 = vpop.eup %9046  ;;  %v5994_v37 = vmul.f32 0.6931472, %v9045_v57  ;;  %v6123_v7 = vmul.f32 1.442695, %v6059_v3 }
 0x62b   : > { %v9049_v5 = vpop.eup %9048  ;;  %v5992_v29 = vmul.f32 0.6931472, %v9047_v39  ;;  %v6058_v46 = vadd.f32 %v5988_v16, %v5546_v1 }
 0x62c   : > { %v6061_v26 = vadd.f32 %v5994_v37, %v5549_v50  ;;  %v5998_v55 = vmul.f32 0.6931472, %v9049_v5 }
 0x62d   : > { %v6060_v18 = vadd.f32 %v5992_v29, %v5548_v49  ;;  %v6122_v51 = vmul.f32 1.442695, %v6058_v46 }
 0x62e   : > { %v6125_v24 = vmul.f32 1.442695, %v6061_v26  ;;  %v6063_v54 = vadd.f32 %v5998_v55, %v5551_v20  ;;  %v9051_v21 = vpop.eup %9050 }
 0x62f   : > { %v5996_v31 = vmul.f32 0.6931472, %v9051_v21  ;;  %v6124_v48 = vmul.f32 1.442695, %v6060_v18 }
 0x630   : > { %v9053_v40 = vpop.eup %9052  ;;  %v6127_v33 = vmul.f32 1.442695, %v6063_v54  ;;  %v6157_v17 = vpack.c.bf16 %v6125_v24, %v6121_v8 }
 0x631   : > { %v6000_v63 = vmul.f32 0.6931472, %v9053_v40  ;;  %v6062_v11 = vadd.f32 %v5996_v31, %v5550_v15 }
 0x632   : > { %v6159_v45 = vpack.c.bf16 %v6127_v33, %v6123_v7 }
 0x633   : > { %v6064_v58 = vadd.f32 %v6000_v63, %v5552_v42  ;;  %v6126_v44 = vmul.f32 1.442695, %v6062_v11  ;;  %v16265_v11 = vld [vmem:[#allocation117_spill] sm:$0xff] }
 0x635   : > { %v6128_v0 = vmul.f32 1.442695, %v6064_v58  ;;  %v6158_v56 = vpack.c.bf16 %v6126_v44, %v6122_v51 }
 0x637   : > { %v6160_v19 = vpack.c.bf16 %v6128_v0, %v6124_v48  ;;  %6175 = vmatprep.subr.bf16.mxu0 %v6158_v56 }
 0x638   : > { %6176 = vmatpush1.bf16.msra.mxu0 %v6157_v17 }
 0x639   : > { %6288 = vmatprep.subr.bf16.mxu1 %v6160_v19 }
 0x63a   : > { %6289 = vmatpush1.bf16.msra.mxu1 %v6159_v45 }
 0x63b   : > { %6194 = vmatmul.mubr.bf16.vlgmr.msra.gmra.mrb[96].mxu0 %v9350_v62 }
 0x63c   : > { %6203 = vmatprep.mubr.bf16.mxu0 %v16262_v6 }
 0x63d   : > { %6307 = vmatmul.mubr.bf16.vlgmr.msra.gmra.mrb[96].mxu1 %v9350_v62 }
 0x63e   : > { %6316 = vmatprep.mubr.bf16.mxu1 %v16262_v6 }
 0x643   : > { %6204 = vmatmul.mubr.bf16.gmra.mrb[100].mxu0 %v9351_v61 }
 0x644   : > { %6213 = vmatprep.mubr.bf16.mxu0 %v16262_v6 }
 0x645   : > { %6317 = vmatmul.mubr.bf16.gmra.mrb[100].mxu1 %v9351_v61 }
 0x646   : > { %6326 = vmatprep.mubr.bf16.mxu1 %v16262_v6 }
 0x64b   : > { %6214 = vmatmul.mubr.bf16.gmra.mrb[104].mxu0 %v9352_v12 }
 0x64c   : > { %6223 = vmatprep.mubr.bf16.mxu0 %v16262_v6 }
 0x64d   : > { %6327 = vmatmul.mubr.bf16.gmra.mrb[104].mxu1 %v9352_v12 }
 0x64e   : > { %6336 = vmatprep.mubr.bf16.mxu1 %v16262_v6 }
 0x653   : > { %6224 = vmatmul.mubr.bf16.gmra.mrb[108].mxu0 %v9353_v23 }
 0x654   : > { %6233 = vmatprep.mubr.bf16.mxu0 %v16262_v6 }
 0x655   : > { %6337 = vmatmul.mubr.bf16.gmra.mrb[108].mxu1 %v9353_v23 }
 0x656   : > { %6346 = vmatprep.mubr.bf16.mxu1 %v16262_v6 }
 0x65b   : > { %6234 = vmatmul.mubr.bf16.gmra.mrb[112].mxu0 %v9354_v25 }
 0x65c   : > { %6243 = vmatprep.mubr.bf16.mxu0 %v16262_v6 }
 0x65d   : > { %6347 = vmatmul.mubr.bf16.gmra.mrb[112].mxu1 %v9354_v25 }
 0x65e   : > { %6356 = vmatprep.mubr.bf16.mxu1 %v16262_v6 }
 0x663   : > { %6244 = vmatmul.mubr.bf16.gmra.mrb[116].mxu0 %v9355_v14 }
 0x664   : > { %6253 = vmatprep.mubr.bf16.mxu0 %v16262_v6 }
 0x665   : > { %6357 = vmatmul.mubr.bf16.gmra.mrb[116].mxu1 %v9355_v14 }
 0x666   : > { %6366 = vmatprep.mubr.bf16.mxu1 %v16262_v6 }
 0x66b   : > { %6254 = vmatmul.mubr.bf16.gmra.mrb[120].mxu0 %v9356_v34 }
 0x66c   : > { %6263 = vmatprep.mubr.bf16.mxu0 %v16262_v6 }
 0x66d   : > { %6367 = vmatmul.mubr.bf16.gmra.mrb[120].mxu1 %v9356_v34 }
 0x66e   : > { %6376 = vmatprep.mubr.bf16.mxu1 %v16262_v6 }
 0x673   : > { %6264 = vmatmul.mubr.bf16.gmra.mrb[124].mxu0 %v9357_v41 }
 0x675   : > { %6377 = vmatmul.mubr.bf16.gmra.mrb[124].mxu1 %v9357_v41 }
 0x70e   : > { %v6195_v32 = vpop.f32.mrb[96].mxu0 }
 0x70f   : > { %v6196_v30 = vadd.f32 %v6195_v32, %v16263_v4  ;;  %v6197_v38 = vpop.f32.mrb[97].mxu0 }
 0x710   : > { %v6308_v28 = vpop.f32.mrb[96].mxu1  ;;  %v6198_v9 = vadd.f32 %v6197_v38, %v16263_v4  ;;  %v6199_v10 = vpop.f32.mrb[98].mxu0 }
 0x711   : > { %v6309_v52 = vadd.f32 %v6308_v28, %v16263_v4  ;;  %v6310_v53 = vpop.f32.mrb[97].mxu1  ;;  %v14267_v22 = vmul.f32 1.3862944, %v6196_v30  ;;  %v6200_v59 = vadd.f32 %v6199_v10, %v16264_v13  ;;  %v6201_v27 = vpop.f32.mrb[99].mxu0 }
 0x712   : > { %v6311_v43 = vadd.f32 %v6310_v53, %v16263_v4  ;;  %v6312_v60 = vpop.f32.mrb[98].mxu1  ;;  %v14273_v35 = vmul.f32 1.3862944, %v6198_v9  ;;  %v6202_v39 = vadd.f32 %v6201_v27, %v16264_v13 }
 0x713   : > { %v14271_v47 = vmul.f32 1.3862944, %v6309_v52  ;;  %v6313_v57 = vadd.f32 %v6312_v60, %v16264_v13  ;;  %v6314_v2 = vpop.f32.mrb[99].mxu1  ;;  %v6515_v36 = vand.u32 2147483647, %v14267_v22  ;;  %v6451_v24 = vmax.f32 %v14267_v22, 0.0 }
 0x714   : > { %v14278_v50 = vmul.f32 1.3862944, %v6311_v43  ;;  %v6516_v5 = vand.u32 2147483647, %v14273_v35  ;;  %v14283_v26 = vmul.f32 1.3862944, %v6200_v59  ;;  %v6315_v20 = vadd.f32 %v6314_v2, %v16264_v13 }
 0x715   : > { %v6517_v37 = vand.u32 2147483647, %v14271_v47  ;;  %v6579_v16 = vsub.f32 0.0, %v6515_v36  ;;  %v14286_v29 = vmul.f32 1.3862944, %v6313_v57  ;;  %v6453_v49 = vmax.f32 %v14271_v47, 0.0 }
 0x716   : > { %v6518_v3 = vand.u32 2147483647, %v14278_v50  ;;  %v6580_v1 = vsub.f32 0.0, %v6516_v5  ;;  %v14288_v8 = vmul.f32 1.3862944, %v6202_v39  ;;  %v6452_v40 = vmax.f32 %v14273_v35, 0.0 }
 0x717   : > { %v6581_v55 = vsub.f32 0.0, %v6517_v37  ;;  %v6643_v54 = vmul.f32 1.442695, %v6579_v16  ;;  %v6519_v46 = vand.u32 2147483647, %v14283_v26  ;;  %v6205_v18 = vpop.f32.mrb[100].mxu0 }
 0x718   : > { %v6582_v21 = vsub.f32 0.0, %v6518_v3  ;;  %v6645_v7 = vmul.f32 1.442695, %v6580_v1  ;;  %v6521_v17 = vand.u32 2147483647, %v14286_v29  ;;  %v6206_v45 = vadd.f32 %v6205_v18, %v16265_v11  ;;  %v6318_v58 = vpop.f32.mrb[100].mxu1 }
 0x719   : > { %v6647_v15 = vmul.f32 1.442695, %v6581_v55  ;;  %9054 = vpow2.f32 %v6643_v54  ;;  %v6583_v31 = vsub.f32 0.0, %v6519_v46  ;;  %v6520_v42 = vand.u32 2147483647, %v14288_v8  ;;  %v6207_v51 = vpop.f32.mrb[101].mxu0 }
 0x71a   : > { %v6649_v33 = vmul.f32 1.442695, %v6582_v21  ;;  %v14296_v63 = vmul.f32 1.3862944, %v6315_v20  ;;  %v6585_v48 = vsub.f32 0.0, %v6521_v17  ;;  %v6319_v0 = vadd.f32 %v6318_v58, %v16265_v11  ;;  %v6320_v56 = vpop.f32.mrb[101].mxu1 }
 0x71b   : > { %9056 = vpow2.f32 %v6647_v15  ;;  %v6651_v44 = vmul.f32 1.442695, %v6583_v31  ;;  %v6209_v19 = vpop.f32.mrb[102].mxu0  ;;  %v6454_v62 = vmax.f32 %v14278_v50, 0.0  ;;  %v6584_v6 = vsub.f32 0.0, %v6520_v42  ;;  %v6322_v12 = vpop.f32.mrb[102].mxu1 }
 0x71c   : > { %9058 = vpow2.f32 %v6645_v7  ;;  %v6522_v61 = vand.u32 2147483647, %v14296_v63  ;;  %v6211_v23 = vpop.f32.mrb[103].mxu0  ;;  %v6655_v25 = vmul.f32 1.442695, %v6585_v48  ;;  %v6208_v4 = vadd.f32 %v6207_v51, %v16265_v11  ;;  %v6324_v28 = vpop.f32.mrb[103].mxu1 }
 0x71d   : > { %9060 = vpow2.f32 %v6649_v33  ;;  %v14302_v14 = vmul.f32 1.3862944, %v6206_v45  ;;  %v14304_v34 = vmul.f32 1.3862944, %v6319_v0  ;;  %v6653_v41 = vmul.f32 1.442695, %v6584_v6 }
 0x71e   : > { %9062 = vpow2.f32 %v6651_v44  ;;  %v6586_v32 = vsub.f32 0.0, %v6522_v61  ;;  %v6321_v30 = vadd.f32 %v6320_v56, %v16265_v11  ;;  %v14308_v38 = vpop.f32.mrb[104].mxu0  ;;  %v14318_v60 = vmul.f32 1.3862944, %v6208_v4  ;;  %v16266_v39 = vld [vmem:[#allocation116_spill] sm:$0xff] }
 0x71f   : > { %9064 = vpow2.f32 %v6655_v25  ;;  %v6523_v53 = vand.u32 2147483647, %v14302_v14  ;;  %v14315_v43 = vpop.f32.mrb[105].mxu0  ;;  %v6525_v59 = vand.u32 2147483647, %v14304_v34  ;;  %v6210_v2 = vadd.f32 %v6209_v19, %v16266_v39 }
 0x720   : > { %v14313_v10 = vpop.f32.mrb[104].mxu1  ;;  %9066 = vpow2.f32 %v6653_v41  ;;  %v6657_v13 = vmul.f32 1.442695, %v6586_v32  ;;  %v14320_v57 = vmul.f32 1.3862944, %v6321_v30  ;;  %v6323_v36 = vadd.f32 %v6322_v12, %v16266_v39  ;;  %v14326_v5 = vpop.f32.mrb[106].mxu0 }
 0x721   : > { %v6587_v27 = vsub.f32 0.0, %v6523_v53  ;;  %v14324_v37 = vpop.f32.mrb[105].mxu1  ;;  %v6589_v3 = vsub.f32 0.0, %v6525_v59  ;;  %v6524_v20 = vand.u32 2147483647, %v14318_v60  ;;  %v14332_v1 = vpop.f32.mrb[107].mxu0  ;;  %v6212_v51 = vadd.f32 %v6211_v23, %v16266_v39 }
 0x722   : > { %9068 = vpow2.f32 %v6657_v13  ;;  %v14330_v55 = vpop.f32.mrb[106].mxu1  ;;  %v6526_v15 = vand.u32 2147483647, %v14320_v57  ;;  %v14339_v42 = vmul.f32 1.3862944, %v6210_v2  ;;  %v6325_v2 = vadd.f32 %v6324_v28, %v16266_v39 }
 0x723   : > { %v9055_v54 = vpop.eup %9054  ;;  %v6659_v46 = vmul.f32 1.442695, %v6587_v27  ;;  %v14336_v7 = vpop.f32.mrb[107].mxu1  ;;  %v6588_v18 = vsub.f32 0.0, %v6524_v20  ;;  %v14341_v58 = vmul.f32 1.3862944, %v6323_v36 }
 0x724   : > { %v6771_v31 = vadd.f32 1.0, %v9055_v54  ;;  %v6663_v0 = vmul.f32 1.442695, %v6589_v3  ;;  %v6590_v56 = vsub.f32 0.0, %v6526_v15  ;;  %v6527_v25 = vand.u32 2147483647, %v14339_v42 }
 0x725   : > { %v9057_v33 = vpop.eup %9056  ;;  %9070 = vpow2.f32 %v6659_v46  ;;  %v6661_v12 = vmul.f32 1.442695, %v6588_v18  ;;  %v6529_v23 = vand.u32 2147483647, %v14341_v58  ;;  %v14355_v27 = vmul.f32 1.3862944, %v6212_v51 }
 0x726   : > { %v9059_v11 = vpop.eup %9058  ;;  %v6773_v45 = vadd.f32 1.0, %v9057_v33  ;;  %9072 = vlog2.f32 %v6771_v31  ;;  %v14344_v19 = vpop.f32.mrb[108].mxu0  ;;  %v6591_v59 = vsub.f32 0.0, %v6527_v25  ;;  %v16267_v15 = vld [vmem:[#allocation119_spill] sm:$0xff]  ;;  %v6665_v28 = vmul.f32 1.442695, %v6590_v56 }
 0x727   : > { %v9061_v44 = vpop.eup %9060  ;;  %v6772_v48 = vadd.f32 1.0, %v9059_v11  ;;  %v14351_v30 = vpop.f32.mrb[109].mxu0  ;;  %v6593_v46 = vsub.f32 0.0, %v6529_v23  ;;  %v6216_v33 = vadd.f32 %v14308_v38, %v16267_v15  ;;  %v6329_v38 = vadd.f32 %v14313_v10, %v16267_v15 }
 0x728   : > { %v9063_v6 = vpop.eup %9062  ;;  %9074 = vlog2.f32 %v6773_v45  ;;  %v6774_v61 = vadd.f32 1.0, %v9061_v44  ;;  %v14347_v41 = vpop.f32.mrb[108].mxu1  ;;  %v6667_v51 = vmul.f32 1.442695, %v6591_v59  ;;  %v6528_v44 = vand.u32 2147483647, %v14355_v27 }
 0x729   : > { %9076 = vlog2.f32 %v6772_v48  ;;  %v6775_v32 = vadd.f32 1.0, %v9063_v6  ;;  %v14353_v53 = vpop.f32.mrb[109].mxu1  ;;  %v9065_v13 = vpop.eup %9064  ;;  %v14370_v48 = vmul.f32 1.3862944, %v6325_v2  ;;  %v6671_v25 = vmul.f32 1.442695, %v6593_v46 }
 0x72a   : > { %9078 = vlog2.f32 %v6774_v61  ;;  %v14358_v36 = vpop.f32.mrb[110].mxu0  ;;  %v14360_v3 = vpop.f32.mrb[110].mxu1  ;;  %v6777_v54 = vadd.f32 1.0, %v9065_v13  ;;  %v14372_v61 = vmul.f32 1.3862944, %v6216_v33 }
 0x72b   : > { %v9067_v20 = vpop.eup %9066  ;;  %9080 = vlog2.f32 %v6775_v32  ;;  %v14364_v31 = vpop.f32.mrb[111].mxu0  ;;  %v6530_v32 = vand.u32 2147483647, %v14370_v48  ;;  %v14381_v2 = vmul.f32 1.3862944, %v6329_v38 }
 0x72c   : > { %v14366_v18 = vpop.f32.mrb[111].mxu1  ;;  %v6776_v11 = vadd.f32 1.0, %v9067_v20  ;;  %9082 = vpow2.f32 %v6663_v0  ;;  %v9069_v39 = vpop.eup %9068  ;;  %v6592_v0 = vsub.f32 0.0, %v6528_v44  ;;  %v6531_v59 = vand.u32 2147483647, %v14372_v61 }
 0x72d   : > { %9084 = vlog2.f32 %v6777_v54  ;;  %v6778_v6 = vadd.f32 1.0, %v9069_v39 }
 0x72e   : > { %9086 = vlog2.f32 %v6776_v11  ;;  %v14377_v56 = vpop.f32.mrb[112].mxu0  ;;  %v6669_v10 = vmul.f32 1.442695, %v6592_v0  ;;  %v6595_v13 = vsub.f32 0.0, %v6531_v59  ;;  %v6533_v0 = vand.u32 2147483647, %v14381_v2 }
 0x72f   : > { %9088 = vpow2.f32 %v6661_v12  ;;  %v9071_v23 = vpop.eup %9070  ;;  %v6594_v12 = vsub.f32 0.0, %v6530_v32  ;;  %v14385_v46 = vpop.f32.mrb[113].mxu0 }
 0x730   : > { %9090 = vlog2.f32 %v6778_v6  ;;  %v14383_v20 = vpop.f32.mrb[112].mxu1  ;;  %v9073_v54 = vpop.eup %9072  ;;  %v6779_v33 = vadd.f32 1.0, %v9071_v23 }
 0x731   : > { %9092 = vpow2.f32 %v6665_v28  ;;  %v14387_v11 = vpop.f32.mrb[113].mxu1  ;;  %v6836_v44 = vmul.f32 0.6931472, %v9073_v54  ;;  %v14390_v45 = vpop.f32.mrb[114].mxu0  ;;  %v6673_v28 = vmul.f32 1.442695, %v6594_v12 }
 0x732   : > { %v9075_v39 = vpop.eup %9074  ;;  %9094 = vpow2.f32 %v6667_v51  ;;  %v14392_v38 = vpop.f32.mrb[114].mxu1  ;;  %v6675_v54 = vmul.f32 1.442695, %v6595_v13  ;;  %v6597_v12 = vsub.f32 0.0, %v6533_v0  ;;  %v16268_v0 = vmax.f32 %v14283_v26, 0.0 }
 0x733   : > { %v9077_v4 = vpop.eup %9076  ;;  %v6840_v17 = vmul.f32 0.6931472, %v9075_v39  ;;  %9096 = vlog2.f32 %v6779_v33  ;;  %v6963_v23 = vadd.f32 %v6836_v44, %v6451_v24  ;;  %v14397_v6 = vpop.f32.mrb[115].mxu0 }
 0x734   : > { %v9079_v32 = vpop.eup %9078  ;;  %v6838_v21 = vmul.f32 0.6931472, %v9077_v4  ;;  %9098 = vpow2.f32 %v6671_v25  ;;  %v14399_v51 = vpop.f32.mrb[115].mxu1 }
 0x735   : > { %v9081_v59 = vpop.eup %9080  ;;  %v6965_v16 = vadd.f32 %v6840_v17, %v6453_v49  ;;  %v6842_v39 = vmul.f32 0.6931472, %v9079_v32  ;;  %v7027_v52 = vmul.f32 1.442695, %v6963_v23  ;;  %9100 = vpow2.f32 %v6669_v10 }
 0x736   : > { %v9083_v9 = vpop.eup %9082  ;;  %v6964_v22 = vadd.f32 %v6838_v21, %v6452_v40  ;;  %v6844_v24 = vmul.f32 0.6931472, %v9081_v59  ;;  %9102 = vpow2.f32 %v6673_v28  ;;  %v14408_v47 = vpop.f32.mrb[116].mxu0  ;;  %v6679_v21 = vmul.f32 1.442695, %v6597_v12 }
 0x737   : > { %v9085_v4 = vpop.eup %9084  ;;  %v7029_v25 = vmul.f32 1.442695, %v6965_v16  ;;  %v6966_v13 = vadd.f32 %v6842_v39, %v6454_v62  ;;  %v6781_v44 = vadd.f32 1.0, %v9083_v9  ;;  %9104 = vpow2.f32 %v6675_v54  ;;  %v14414_v16 = vpop.f32.mrb[117].mxu0 }
 0x738   : > { %v9087_v49 = vpop.eup %9086  ;;  %v7028_v17 = vmul.f32 1.442695, %v6964_v22  ;;  %v6967_v32 = vadd.f32 %v6844_v24, %v16268_v0  ;;  %v6848_v23 = vmul.f32 0.6931472, %v9085_v4  ;;  %v14412_v10 = vpop.f32.mrb[116].mxu1  ;;  %16269 = vst [vmem:[#allocation54_spill] sm:$0xff] %v14414_v16 }
 0x739   : > { %v9089_v35 = vpop.eup %9088  ;;  %v6846_v40 = vmul.f32 0.6931472, %v9087_v49  ;;  %9106 = vlog2.f32 %v6781_v44  ;;  %v16270_v9 = vmax.f32 %v14286_v29, 0.0  ;;  %v14419_v26 = vpop.f32.mrb[117].mxu1  ;;  %v7030_v24 = vmul.f32 1.442695, %v6966_v13 }
 0x73a   : > { %v9091_v50 = vpop.eup %9090  ;;  %v7031_v62 = vmul.f32 1.442695, %v6967_v32  ;;  %v6780_v59 = vadd.f32 1.0, %v9089_v35  ;;  %16271 = vst [vmem:[#allocation50_spill] sm:$0xff] %v14419_v26  ;;  %v14421_v22 = vpop.f32.mrb[118].mxu0  ;;  %v16273_v12 = vmax.f32 %v14288_v8, 0.0  ;;  %v6218_v49 = vadd.f32 %v14315_v43, %v16267_v15 }
 0x73b   : > { %v6969_v28 = vadd.f32 %v6848_v23, %v16270_v9  ;;  %16272 = vst [vmem:[#allocation61_spill] sm:$0xff] %v14421_v22  ;;  %v9093_v54 = vpop.eup %9092  ;;  %v6850_v44 = vmul.f32 0.6931472, %v9091_v50  ;;  %v14427_v0 = vpop.f32.mrb[118].mxu1  ;;  %v16276_v8 = vmax.f32 %v14296_v63, 0.0 }
 0x73c   : > { %v6968_v4 = vadd.f32 %v6846_v40, %v16273_v12  ;;  %16274 = vst [vmem:[#allocation83_spill] sm:$0xff] %v14427_v0  ;;  %v14429_v29 = vpop.f32.mrb[119].mxu0  ;;  %v9095_v32 = vpop.eup %9094  ;;  %v7091_v23 = vpack.c.bf16 %v7031_v62, %v7027_v52  ;;  %9108 = vlog2.f32 %v6780_v59  ;;  %v6782_v9 = vadd.f32 1.0, %v9093_v54  ;;  %v16278_v59 = vld [vmem:[#allocation40_spill] sm:$0xff] }
 0x73d   : > { %16275 = vst [vmem:[#allocation82_spill] sm:$0xff] %v14429_v29  ;;  %v7033_v35 = vmul.f32 1.442695, %v6969_v28  ;;  %v14431_v39 = vpop.f32.mrb[119].mxu1  ;;  %v9097_v33 = vpop.eup %9096  ;;  %v6970_v40 = vadd.f32 %v6850_v44, %v16276_v8  ;;  %v6783_v50 = vadd.f32 1.0, %v9095_v32  ;;  %9110 = vpow2.f32 %v6679_v21 }
 0x73e   : > { %v7032_v13 = vmul.f32 1.442695, %v6968_v4  ;;  %v9099_v12 = vpop.eup %9098  ;;  %v7123_v43 = vunpack.c.l.bf16 %v7091_v23  ;;  %v7127_v22 = vunpack.c.h.bf16 %v7091_v23  ;;  %v6852_v26 = vmul.f32 0.6931472, %v9097_v33  ;;  %v14437_v62 = vpop.f32.mrb[120].mxu0  ;;  %v16279_v4 = vld [vmem:[#allocation66_spill] sm:$0xff] }
 0x73f   : > { %v7093_v0 = vpack.c.bf16 %v7033_v35, %v7029_v25  ;;  %v7034_v16 = vmul.f32 1.442695, %v6970_v40  ;;  %9112 = vlog2.f32 %v6782_v9  ;;  %v14435_v52 = vmul.f32 1.3862944, %v6218_v49  ;;  %16277 = vst [vmem:[#allocation43_spill] sm:$0xff] %v14437_v62  ;;  %v9101_v28 = vpop.eup %9100  ;;  %v14443_v8 = vpop.f32.mrb[121].mxu0 }
 0x740   : > { %v7092_v29 = vpack.c.bf16 %v7032_v13, %v7028_v17  ;;  %v7187_v54 = vmul.f32 %v7123_v43, %v16278_v59  ;;  %v7191_v63 = vmul.f32 %v7127_v22, %v16279_v4  ;;  %v6785_v32 = vadd.f32 1.0, %v9099_v12  ;;  %v14441_v21 = vpop.f32.mrb[120].mxu1  ;;  %16281 = vst [vmem:[#allocation38_spill] sm:$0xff] %v14443_v8  ;;  %v9103_v25 = vpop.eup %9102 }
 0x741   : > { %v7125_v44 = vunpack.c.l.bf16 %v7093_v0  ;;  %16280 = vst [vmem:[#allocation49_spill] sm:$0xff] %v14441_v21  ;;  %v7129_v33 = vunpack.c.h.bf16 %v7093_v0  ;;  %v7094_v23 = vpack.c.bf16 %v7034_v16, %v7030_v24  ;;  %v14446_v35 = vpop.f32.mrb[121].mxu1  ;;  %v9105_v9 = vpop.eup %9104  ;;  %v16282_v40 = vmax.f32 %v14302_v14, 0.0 }
 0x742   : > { %v7124_v17 = vunpack.c.l.bf16 %v7092_v29  ;;  %v7128_v13 = vunpack.c.h.bf16 %v7092_v29  ;;  %9114 = vlog2.f32 %v6783_v50  ;;  %v6331_v16 = vadd.f32 %v14324_v37, %v16267_v15  ;;  %v14454_v24 = vpop.f32.mrb[122].mxu0  ;;  %v14456_v0 = vpop.f32.mrb[122].mxu1 }
 0x743   : > { %v6971_v43 = vadd.f32 %v6852_v26, %v16282_v40  ;;  %v9107_v12 = vpop.eup %9106  ;;  %v7126_v21 = vunpack.c.l.bf16 %v7094_v23  ;;  %v7130_v62 = vunpack.c.h.bf16 %v7094_v23  ;;  %16283 = vst [vmem:[#allocation41_spill] sm:$0xff] %v14454_v24  ;;  %16284 = vst [vmem:[#allocation109_spill] sm:$0xff] %v14456_v0  ;;  %v14458_v49 = vadd.f32 %v7191_v63, %v7187_v54 }
 0x744   : > { %v7189_v14 = vmul.f32 %v7125_v44, %v16278_v59  ;;  %9116 = vlog2.f32 %v6785_v32  ;;  %v7193_v29 = vmul.f32 %v7129_v33, %v16279_v4  ;;  %v7188_v50 = vmul.f32 %v7124_v17, %v16278_v59  ;;  %v14468_v32 = vpop.f32.mrb[123].mxu0 }
 0x745   : > { %v6856_v23 = vmul.f32 0.6931472, %v9107_v12  ;;  %v6784_v40 = vadd.f32 1.0, %v9101_v28  ;;  %v7192_v37 = vmul.f32 %v7128_v13, %v16279_v4  ;;  %v7035_v15 = vmul.f32 1.442695, %v6971_v43  ;;  %v16285_v28 = vld [vmem:[#allocation118_spill] sm:$0xff] }
 0x746   : > { %v9109_v8 = vpop.eup %9108  ;;  %v6786_v22 = vadd.f32 1.0, %v9103_v25  ;;  %v6787_v24 = vadd.f32 1.0, %v9105_v9  ;;  %v7190_v54 = vmul.f32 %v7126_v21, %v16278_v59  ;;  %v7194_v63 = vmul.f32 %v7130_v62, %v16279_v4 }
 0x747   : > { %v9111_v0 = vpop.eup %9110  ;;  %9118 = vlog2.f32 %v6784_v40  ;;  %v6532_v44 = vand.u32 2147483647, %v14435_v52  ;;  %v6854_v33 = vmul.f32 0.6931472, %v9109_v8  ;;  %v14470_v17 = vmul.f32 1.3862944, %v6331_v16 }
 0x748   : > { %9120 = vlog2.f32 %v6786_v22  ;;  %v6220_v13 = vadd.f32 %v14326_v5, %v16285_v28  ;;  %v16286_v25 = vmax.f32 %v14304_v34, 0.0  ;;  %v6333_v62 = vadd.f32 %v14330_v55, %v16285_v28 }
 0x749   : > { %v9113_v43 = vpop.eup %9112  ;;  %9122 = vlog2.f32 %v6787_v24  ;;  %v6596_v59 = vsub.f32 0.0, %v6532_v44  ;;  %v14478_v4 = vadd.f32 %v7193_v29, %v7189_v14  ;;  %v6789_v12 = vadd.f32 1.0, %v9111_v0 }
 0x74a   : > { %v6973_v9 = vadd.f32 %v6856_v23, %v16286_v25  ;;  %v6858_v21 = vmul.f32 0.6931472, %v9113_v43  ;;  %v6534_v8 = vand.u32 2147483647, %v14470_v17  ;;  %v14481_v22 = vadd.f32 %v7192_v37, %v7188_v50 }
 0x74b   : > { %v14483_v16 = vadd.f32 %v7194_v63, %v7190_v54  ;;  %v6677_v5 = vmul.f32 1.442695, %v6596_v59  ;;  %v14485_v40 = vmul.f32 1.3862944, %v6220_v13  ;;  %v16287_v24 = vmax.f32 %v14318_v60, 0.0 }
 0x74c   : > { %v9115_v34 = vpop.eup %9114  ;;  %v6598_v44 = vsub.f32 0.0, %v6534_v8  ;;  %v14489_v25 = vmul.f32 1.3862944, %v6333_v62  ;;  %v6222_v55 = vadd.f32 %v14332_v1, %v16285_v28  ;;  %v7037_v0 = vmul.f32 1.442695, %v6973_v9 }
 0x74d   : > { %v6972_v23 = vadd.f32 %v6854_v33, %v16287_v24  ;;  %v6860_v14 = vmul.f32 0.6931472, %v9115_v34  ;;  %9124 = vpow2.f32 %v6677_v5  ;;  %v6535_v29 = vand.u32 2147483647, %v14485_v40  ;;  %v14497_v33 = vpop.f32.mrb[123].mxu1 }
 0x74e   : > { %v9117_v50 = vpop.eup %9116  ;;  %v16288_v37 = vmax.f32 %v14320_v57, 0.0  ;;  %9126 = vlog2.f32 %v6789_v12  ;;  %v6681_v60 = vmul.f32 1.442695, %v6598_v44  ;;  %v16289_v13 = vmax.f32 %v14339_v42, 0.0 }
 0x74f   : > { %v6864_v59 = vmul.f32 0.6931472, %v9117_v50  ;;  %v6599_v1 = vsub.f32 0.0, %v6535_v29  ;;  %v6537_v9 = vand.u32 2147483647, %v14489_v25  ;;  %v6335_v57 = vadd.f32 %v14336_v7, %v16285_v28 }
 0x750   : > { %v6974_v54 = vadd.f32 %v6858_v21, %v16288_v37  ;;  %v6975_v43 = vadd.f32 %v6860_v14, %v16289_v13  ;;  %v7036_v62 = vmul.f32 1.442695, %v6972_v23  ;;  %9128 = vpow2.f32 %v6681_v60  ;;  %v16291_v37 = vld [vmem:[#allocation120_spill] sm:$0xff] }
 0x751   : > { %v14502_v8 = vmul.f32 1.3862944, %v6222_v55  ;;  %v9119_v21 = vpop.eup %9118  ;;  %v16290_v5 = vmax.f32 %v14341_v58, 0.0  ;;  %v6683_v24 = vmul.f32 1.442695, %v6599_v1  ;;  %v6601_v44 = vsub.f32 0.0, %v6537_v9 }
 0x752   : > { %v7039_v12 = vmul.f32 1.442695, %v6975_v43  ;;  %v9121_v42 = vpop.eup %9120  ;;  %v7038_v14 = vmul.f32 1.442695, %v6974_v54  ;;  %v6862_v50 = vmul.f32 0.6931472, %v9119_v21  ;;  %v6226_v23 = vadd.f32 %v14344_v19, %v16291_v37 }
 0x753   : > { %v6977_v34 = vadd.f32 %v6864_v59, %v16290_v5  ;;  %v9123_v55 = vpop.eup %9122  ;;  %v6866_v63 = vmul.f32 0.6931472, %v9121_v42  ;;  %9130 = vpow2.f32 %v6683_v24  ;;  %v16292_v7 = vmax.f32 %v14355_v27, 0.0 }
 0x754   : > { %v7095_v60 = vpack.c.bf16 %v7039_v12, %v7035_v15  ;;  %v6868_v58 = vmul.f32 0.6931472, %v9123_v55  ;;  %v6687_v43 = vmul.f32 1.442695, %v6601_v44  ;;  %v6536_v59 = vand.u32 2147483647, %v14502_v8 }
 0x755   : > { %v7041_v13 = vmul.f32 1.442695, %v6977_v34  ;;  %v6976_v28 = vadd.f32 %v6862_v50, %v16292_v7  ;;  %v16293_v21 = vmax.f32 %v14370_v48, 0.0  ;;  %v14517_v15 = vmul.f32 1.3862944, %v6335_v57  ;;  %v14519_v12 = vpop.f32.mrb[124].mxu0 }
 0x756   : > { %v7131_v1 = vunpack.c.l.bf16 %v7095_v60  ;;  %v7135_v54 = vunpack.c.h.bf16 %v7095_v60  ;;  %9132 = vpow2.f32 %v6687_v43  ;;  %16294 = vst [vmem:[#allocation129_spill] sm:$0xff] %v14519_v12  ;;  %v16295_v34 = vld [vmem:[#allocation97_spill] sm:$0xff]  ;;  %v14522_v50 = vmul.f32 1.3862944, %v6226_v23  ;;  %v14524_v55 = vpop.f32.mrb[124].mxu1  ;;  %v16298_v57 = vld [vmem:[#allocation63_spill] sm:$0xff] }
 0x757   : > { %v7097_v9 = vpack.c.bf16 %v7041_v13, %v7037_v0  ;;  %v6978_v5 = vadd.f32 %v6866_v63, %v16293_v21  ;;  %v7040_v29 = vmul.f32 1.442695, %v6976_v28  ;;  %v9125_v27 = vpop.eup %9124  ;;  %16296 = vst [vmem:[#allocation29_spill] sm:$0xff] %v14524_v55  ;;  %v16297_v60 = vmax.f32 %v14372_v61, 0.0 }
 0x758   : > { %v7195_v24 = vmul.f32 %v7131_v1, %v16295_v34  ;;  %v9127_v0 = vpop.eup %9126  ;;  %v6600_v7 = vsub.f32 0.0, %v6536_v59  ;;  %v7199_v28 = vmul.f32 %v7135_v54, %v16298_v57  ;;  %v6788_v1 = vadd.f32 1.0, %v9125_v27 }
 0x759   : > { %v7133_v44 = vunpack.c.l.bf16 %v7097_v9  ;;  %v7137_v42 = vunpack.c.h.bf16 %v7097_v9  ;;  %v7096_v48 = vpack.c.bf16 %v7040_v29, %v7036_v62  ;;  %v7042_v63 = vmul.f32 1.442695, %v6978_v5  ;;  %v14535_v29 = vpop.f32.mrb[125].mxu0  ;;  %v14538_v5 = vpop.f32.mrb[125].mxu1 }
 0x75a   : > { %v6979_v13 = vadd.f32 %v6868_v58, %v16297_v60  ;;  %v7252_v43 = vadd.f32 %v14458_v49, %v7195_v24  ;;  %v9129_v19 = vpop.eup %9128  ;;  %9134 = vlog2.f32 %v6788_v1  ;;  %v6872_v54 = vmul.f32 0.6931472, %v9127_v0 }
 0x75b   : > { %v7197_v21 = vmul.f32 %v7133_v44, %v16295_v34  ;;  %v7201_v23 = vmul.f32 %v7137_v42, %v16298_v57  ;;  %v7132_v9 = vunpack.c.l.bf16 %v7096_v48  ;;  %v7136_v26 = vunpack.c.h.bf16 %v7096_v48 }
 0x75c   : > { %v7098_v55 = vpack.c.bf16 %v7042_v63, %v7038_v14  ;;  %v14532_v12 = vadd.f32 %v7252_v43, %v7199_v28  ;;  %v6790_v61 = vadd.f32 1.0, %v9129_v19  ;;  %v6685_v44 = vmul.f32 1.442695, %v6600_v7  ;;  %v14546_v63 = vpop.f32.mrb[126].mxu0  ;;  %v14550_v28 = vpop.f32.mrb[126].mxu1 }
 0x75d   : > { %v7294_v62 = vadd.f32 %v14478_v4, %v7197_v21  ;;  %v7196_v58 = vmul.f32 %v7132_v9, %v16295_v34  ;;  %v9131_v27 = vpop.eup %9130  ;;  %v7200_v14 = vmul.f32 %v7136_v26, %v16298_v57  ;;  %v6538_v42 = vand.u32 2147483647, %v14517_v15 }
 0x75e   : > { %v7134_v49 = vunpack.c.l.bf16 %v7098_v55  ;;  %v7138_v59 = vunpack.c.h.bf16 %v7098_v55  ;;  %9136 = vlog2.f32 %v6790_v61  ;;  %v6791_v48 = vadd.f32 1.0, %v9131_v27  ;;  %v16299_v61 = vld [vmem:[#allocation122_spill] sm:$0xff] }
 0x75f   : > { %v14540_v24 = vadd.f32 %v7294_v62, %v7201_v23  ;;  %v7273_v4 = vadd.f32 %v14481_v22, %v7196_v58  ;;  %9138 = vpow2.f32 %v6685_v44  ;;  %v6602_v0 = vsub.f32 0.0, %v6538_v42  ;;  %v14576_v44 = vpop.f32.mrb[127].mxu0 }
 0x760   : > { %v7198_v19 = vmul.f32 %v7134_v49, %v16295_v34  ;;  %v7202_v55 = vmul.f32 %v7138_v59, %v16298_v57  ;;  %v6539_v60 = vand.u32 2147483647, %v14522_v50  ;;  %v9133_v26 = vpop.eup %9132  ;;  %9140 = vlog2.f32 %v6791_v48 }
 0x761   : > { %v14552_v7 = vadd.f32 %v7273_v4, %v7200_v14  ;;  %v6339_v22 = vadd.f32 %v14347_v41, %v16291_v37  ;;  %v6793_v34 = vadd.f32 1.0, %v9133_v26  ;;  %v6689_v21 = vmul.f32 1.442695, %v6602_v0 }
 0x762   : > { %v7315_v43 = vadd.f32 %v14483_v16, %v7198_v19  ;;  %v6603_v1 = vsub.f32 0.0, %v6539_v60  ;;  %v6228_v57 = vadd.f32 %v14351_v30, %v16291_v37  ;;  %v6341_v62 = vadd.f32 %v14353_v53, %v16291_v37 }
 0x763   : > { %v14561_v9 = vmul.f32 1.3862944, %v6339_v22  ;;  %v6230_v16 = vadd.f32 %v14358_v36, %v16299_v61  ;;  %9142 = vlog2.f32 %v6793_v34  ;;  %v6343_v41 = vadd.f32 %v14360_v3, %v16299_v61 }
 0x764   : > { %v14559_v23 = vadd.f32 %v7315_v43, %v7202_v55  ;;  %v6691_v58 = vmul.f32 1.442695, %v6603_v1  ;;  %v14567_v49 = vmul.f32 1.3862944, %v6228_v57  ;;  %v16300_v59 = vmax.f32 %v14381_v2, 0.0  ;;  %v9135_v53 = vpop.eup %9134 }
 0x765   : > { %9144 = vpow2.f32 %v6689_v21  ;;  %v6541_v27 = vand.u32 2147483647, %v14561_v9  ;;  %v14574_v14 = vmul.f32 1.3862944, %v6341_v62  ;;  %v7043_v37 = vmul.f32 1.442695, %v6979_v13 }
 0x766   : > { %v6981_v30 = vadd.f32 %v6872_v54, %v16300_v59  ;;  %9146 = vpow2.f32 %v6691_v58  ;;  %v6540_v36 = vand.u32 2147483647, %v14567_v49  ;;  %v14579_v42 = vmul.f32 1.3862944, %v6230_v16 }
 0x767   : > { %v6870_v4 = vmul.f32 0.6931472, %v9135_v53  ;;  %v6472_v3 = vmax.f32 %v14502_v8, 0.0  ;;  %v6605_v19 = vsub.f32 0.0, %v6541_v27  ;;  %v6542_v2 = vand.u32 2147483647, %v14574_v14 }
 0x768   : > { %v6604_v48 = vsub.f32 0.0, %v6540_v36  ;;  %v6543_v55 = vand.u32 2147483647, %v14579_v42  ;;  %v14585_v0 = vmul.f32 1.3862944, %v6343_v41  ;;  %v9137_v60 = vpop.eup %9136  ;;  %v16301_v58 = vmax.f32 %v14435_v52, 0.0 }
 0x769   : > { %v7045_v13 = vmul.f32 1.442695, %v6981_v30  ;;  %v6695_v43 = vmul.f32 1.442695, %v6605_v19  ;;  %v6606_v22 = vsub.f32 0.0, %v6542_v2  ;;  %v9139_v34 = vpop.eup %9138  ;;  %v16302_v52 = vmax.f32 %v14485_v40, 0.0 }
 0x76a   : > { %v6693_v1 = vmul.f32 1.442695, %v6604_v48  ;;  %v6607_v57 = vsub.f32 0.0, %v6543_v55  ;;  %v6545_v62 = vand.u32 2147483647, %v14585_v0  ;;  %v9141_v16 = vpop.eup %9140  ;;  %v6980_v59 = vadd.f32 %v6870_v4, %v16301_v58  ;;  %v14595_v55 = vpop.f32.mrb[127].mxu1 }
 0x76b   : > { %v6792_v27 = vadd.f32 1.0, %v9139_v34  ;;  %9148 = vpow2.f32 %v6695_v43  ;;  %v6876_v30 = vmul.f32 0.6931472, %v9141_v16  ;;  %v6697_v53 = vmul.f32 1.442695, %v6606_v22  ;;  %v16303_v34 = vld [vmem:[#allocation125_spill] sm:$0xff] }
 0x76c   : > { %9150 = vpow2.f32 %v6693_v1  ;;  %v6699_v36 = vmul.f32 1.442695, %v6607_v57  ;;  %v6874_v19 = vmul.f32 0.6931472, %v9137_v60  ;;  %v6609_v2 = vsub.f32 0.0, %v6545_v62  ;;  %v16307_v41 = vld [vmem:[#allocation79_spill] sm:$0xff] }
 0x76d   : > { %9152 = vlog2.f32 %v6792_v27  ;;  %v6232_v48 = vadd.f32 %v14364_v31, %v16299_v61  ;;  %v9143_v21 = vpop.eup %9142  ;;  %v6983_v4 = vadd.f32 %v6876_v30, %v16302_v52  ;;  %v6345_v43 = vadd.f32 %v14366_v18, %v16299_v61 }
 0x76e   : > { %9154 = vpow2.f32 %v6697_v53  ;;  %v6236_v22 = vadd.f32 %v14377_v56, %v16303_v34  ;;  %v6880_v60 = vmul.f32 0.6931472, %v9143_v21  ;;  %v6703_v57 = vmul.f32 1.442695, %v6609_v2 }
 0x76f   : > { %v9145_v1 = vpop.eup %9144  ;;  %9156 = vpow2.f32 %v6699_v36  ;;  %v14603_v62 = vmul.f32 1.3862944, %v6232_v48  ;;  %v7047_v16 = vmul.f32 1.442695, %v6983_v4  ;;  %v14606_v40 = vmul.f32 1.3862944, %v6345_v43 }
 0x770   : > { %v9147_v31 = vpop.eup %9146  ;;  %v6794_v58 = vadd.f32 1.0, %v9145_v1  ;;  %v7044_v30 = vmul.f32 1.442695, %v6980_v59  ;;  %v16304_v53 = vmax.f32 %v14489_v25, 0.0  ;;  %9158 = vpow2.f32 %v6703_v57 }
 0x771   : > { %v6795_v61 = vadd.f32 1.0, %v9147_v31  ;;  %v7099_v56 = vpack.c.bf16 %v7047_v16, %v7043_v37  ;;  %v6544_v21 = vand.u32 2147483647, %v14603_v62  ;;  %v6349_v36 = vadd.f32 %v14383_v20, %v16303_v34 }
 0x772   : > { %v6985_v18 = vadd.f32 %v6880_v60, %v16304_v53  ;;  %9160 = vlog2.f32 %v6794_v58  ;;  %v6546_v48 = vand.u32 2147483647, %v14606_v40  ;;  %v14614_v52 = vmul.f32 1.3862944, %v6236_v22  ;;  %v16306_v58 = vld [vmem:[#allocation33_spill] sm:$0xff] }
 0x773   : > { %v7139_v4 = vunpack.c.l.bf16 %v7099_v56  ;;  %v7143_v43 = vunpack.c.h.bf16 %v7099_v56  ;;  %9162 = vlog2.f32 %v6795_v61  ;;  %v6608_v59 = vsub.f32 0.0, %v6544_v21 }
 0x774   : > { %v7049_v2 = vmul.f32 1.442695, %v6985_v18  ;;  %v16305_v1 = vmax.f32 %v14470_v17, 0.0  ;;  %v6610_v57 = vsub.f32 0.0, %v6546_v48  ;;  %v6547_v31 = vand.u32 2147483647, %v14614_v52 }
 0x775   : > { %v9149_v25 = vpop.eup %9148  ;;  %v7203_v20 = vmul.f32 %v7139_v4, %v16306_v58  ;;  %v6701_v18 = vmul.f32 1.442695, %v6608_v59  ;;  %v14620_v27 = vmul.f32 1.3862944, %v6349_v36  ;;  %v7207_v56 = vmul.f32 %v7143_v43, %v16307_v41 }
 0x776   : > { %v6982_v60 = vadd.f32 %v6874_v19, %v16305_v1  ;;  %v7101_v37 = vpack.c.bf16 %v7049_v2, %v7045_v13  ;;  %v9151_v16 = vpop.eup %9150  ;;  %v6797_v53 = vadd.f32 1.0, %v9149_v25  ;;  %v6611_v19 = vsub.f32 0.0, %v6547_v31 }
 0x777   : > { %v9153_v22 = vpop.eup %9152  ;;  %v6796_v26 = vadd.f32 1.0, %v9151_v16  ;;  %v7254_v17 = vadd.f32 %v14532_v12, %v7203_v20  ;;  %v6705_v59 = vmul.f32 1.442695, %v6610_v57  ;;  %v6238_v8 = vadd.f32 %v14385_v46, %v16303_v34 }
 0x778   : > { %v7141_v61 = vunpack.c.l.bf16 %v7101_v37  ;;  %v7145_v21 = vunpack.c.h.bf16 %v7101_v37  ;;  %v9155_v54 = vpop.eup %9154  ;;  %v6878_v13 = vmul.f32 0.6931472, %v9153_v22  ;;  %9164 = vlog2.f32 %v6797_v53 }
 0x779   : > { %v9157_v2 = vpop.eup %9156  ;;  %9166 = vlog2.f32 %v6796_v26  ;;  %v6798_v4 = vadd.f32 1.0, %v9155_v54  ;;  %v14625_v36 = vadd.f32 %v7254_v17, %v7207_v56  ;;  %v6707_v31 = vmul.f32 1.442695, %v6611_v19 }
 0x77a   : > { %v7205_v48 = vmul.f32 %v7141_v61, %v16306_v58  ;;  %v6984_v43 = vadd.f32 %v6878_v13, %v6472_v3  ;;  %v6799_v25 = vadd.f32 1.0, %v9157_v2  ;;  %9168 = vpow2.f32 %v6701_v18  ;;  %v9159_v1 = vpop.eup %9158 }
 0x77b   : > { %v7209_v37 = vmul.f32 %v7145_v21, %v16307_v41  ;;  %9170 = vlog2.f32 %v6798_v4  ;;  %v6801_v26 = vadd.f32 1.0, %v9159_v1  ;;  %v6549_v54 = vand.u32 2147483647, %v14620_v27 }
 0x77c   : > { %v7296_v12 = vadd.f32 %v14540_v24, %v7205_v48  ;;  %v9161_v16 = vpop.eup %9160  ;;  %v7048_v20 = vmul.f32 1.442695, %v6984_v43  ;;  %9172 = vlog2.f32 %v6799_v25  ;;  %v6479_v22 = vmax.f32 %v14579_v42, 0.0 }
 0x77d   : > { %v6882_v53 = vmul.f32 0.6931472, %v9161_v16  ;;  %9174 = vpow2.f32 %v6705_v59  ;;  %v9163_v3 = vpop.eup %9162  ;;  %v6613_v24 = vsub.f32 0.0, %v6549_v54  ;;  %v16308_v56 = vmax.f32 %v14517_v15, 0.0 }
 0x77e   : > { %v14632_v57 = vadd.f32 %v7296_v12, %v7209_v37  ;;  %v7100_v18 = vpack.c.bf16 %v7048_v20, %v7044_v30  ;;  %9176 = vlog2.f32 %v6801_v26  ;;  %v6481_v21 = vmax.f32 %v14585_v0, 0.0  ;;  %v16309_v37 = vld [vmem:[#allocation123_spill] sm:$0xff] }
 0x77f   : > { %v6986_v61 = vadd.f32 %v6882_v53, %v16308_v56  ;;  %9178 = vpow2.f32 %v6707_v31  ;;  %v14640_v17 = vmul.f32 1.3862944, %v6238_v8  ;;  %v7046_v13 = vmul.f32 1.442695, %v6982_v60 }
 0x780   : > { %v7140_v19 = vunpack.c.l.bf16 %v7100_v18  ;;  %v7144_v2 = vunpack.c.h.bf16 %v7100_v18  ;;  %v6711_v48 = vmul.f32 1.442695, %v6613_v24  ;;  %v6884_v46 = vmul.f32 0.6931472, %v9163_v3 }
 0x781   : > { %v7050_v4 = vmul.f32 1.442695, %v6986_v61  ;;  %v6548_v30 = vand.u32 2147483647, %v14640_v17  ;;  %v6480_v43 = vmax.f32 %v14603_v62, 0.0  ;;  %v6351_v15 = vadd.f32 %v14387_v11, %v16303_v34  ;;  %v16316_v62 = vld [vmem:[#allocation126_spill] sm:$0xff] }
 0x782   : > { %v9165_v59 = vpop.eup %9164  ;;  %v7204_v42 = vmul.f32 %v7140_v19, %v16306_v58  ;;  %9180 = vpow2.f32 %v6711_v48  ;;  %v6482_v60 = vmax.f32 %v14606_v40, 0.0  ;;  %v6240_v12 = vadd.f32 %v14390_v45, %v16309_v37 }
 0x783   : > { %v9167_v0 = vpop.eup %9166  ;;  %v7102_v25 = vpack.c.bf16 %v7050_v4, %v7046_v13  ;;  %v6612_v1 = vsub.f32 0.0, %v6548_v30  ;;  %v7208_v16 = vmul.f32 %v7144_v2, %v16307_v41  ;;  %v6888_v26 = vmul.f32 0.6931472, %v9165_v59 }
 0x784   : > { %v9169_v31 = vpop.eup %9168  ;;  %v7275_v20 = vadd.f32 %v14552_v7, %v7204_v42  ;;  %v6483_v54 = vmax.f32 %v14614_v52, 0.0  ;;  %v16310_v11 = vmax.f32 %v14522_v50, 0.0  ;;  %v6886_v61 = vmul.f32 0.6931472, %v9167_v0 }
 0x785   : > { %v9171_v53 = vpop.eup %9170  ;;  %v7142_v8 = vunpack.c.l.bf16 %v7102_v25  ;;  %v7146_v3 = vunpack.c.h.bf16 %v7102_v25  ;;  %v6800_v18 = vadd.f32 1.0, %v9169_v31  ;;  %v6709_v45 = vmul.f32 1.442695, %v6612_v1 }
 0x786   : > { %v6987_v34 = vadd.f32 %v6884_v46, %v16310_v11  ;;  %v9173_v24 = vpop.eup %9172  ;;  %v14655_v56 = vadd.f32 %v7275_v20, %v7208_v16  ;;  %v14657_v13 = vmul.f32 1.3862944, %v6351_v15  ;;  %v14660_v48 = vmul.f32 1.3862944, %v6240_v12 }
 0x787   : > { %v9175_v19 = vpop.eup %9174  ;;  %v7206_v7 = vmul.f32 %v7142_v8, %v16306_v58  ;;  %v6892_v2 = vmul.f32 0.6931472, %v9173_v24  ;;  %v6353_v4 = vadd.f32 %v14392_v38, %v16309_v37  ;;  %v7210_v50 = vmul.f32 %v7146_v3, %v16307_v41 }
 0x788   : > { %v9177_v30 = vpop.eup %9176  ;;  %v16311_v46 = vmax.f32 %v14561_v9, 0.0  ;;  %9182 = vlog2.f32 %v6800_v18  ;;  %v6802_v42 = vadd.f32 1.0, %v9175_v19  ;;  %v7051_v58 = vmul.f32 1.442695, %v6987_v34 }
 0x789   : > { %v9179_v0 = vpop.eup %9178  ;;  %v7317_v15 = vadd.f32 %v14559_v23, %v7206_v7  ;;  %v6991_v25 = vadd.f32 %v6892_v2, %v6479_v22  ;;  %v6896_v1 = vmul.f32 0.6931472, %v9177_v30  ;;  %9184 = vpow2.f32 %v6709_v45 }
 0x78a   : > { %v6989_v59 = vadd.f32 %v6888_v26, %v16311_v46  ;;  %v6890_v12 = vmul.f32 0.6931472, %v9171_v53  ;;  %9186 = vlog2.f32 %v6802_v42  ;;  %v6803_v31 = vadd.f32 1.0, %v9179_v0 }
 0x78b   : > { %v14668_v16 = vadd.f32 %v7317_v15, %v7210_v50  ;;  %v7055_v38 = vmul.f32 1.442695, %v6991_v25  ;;  %v6993_v20 = vadd.f32 %v6896_v1, %v6481_v21  ;;  %v6550_v41 = vand.u32 2147483647, %v14657_v13  ;;  %v16315_v25 = vld [vmem:[#allocation21_spill] sm:$0xff] }
 0x78c   : > { %v9181_v9 = vpop.eup %9180  ;;  %v7053_v26 = vmul.f32 1.442695, %v6989_v59  ;;  %v16312_v8 = vmax.f32 %v14567_v49, 0.0  ;;  %v6551_v23 = vand.u32 2147483647, %v14660_v48  ;;  %v16313_v24 = vmax.f32 %v14574_v14, 0.0 }
 0x78d   : > { %v14674_v22 = vmul.f32 1.3862944, %v6353_v4  ;;  %v7103_v11 = vpack.c.bf16 %v7055_v38, %v7051_v58  ;;  %v7057_v34 = vmul.f32 1.442695, %v6993_v20  ;;  %v6805_v53 = vadd.f32 1.0, %v9181_v9  ;;  %v16314_v59 = vld [vmem:[#allocation93_spill] sm:$0xff] }
 0x78e   : > { %v6988_v3 = vadd.f32 %v6886_v61, %v16312_v8  ;;  %v6614_v18 = vsub.f32 0.0, %v6550_v41  ;;  %v6990_v45 = vadd.f32 %v6890_v12, %v16313_v24  ;;  %v6615_v19 = vsub.f32 0.0, %v6551_v23 }
 0x78f   : > { %v6553_v21 = vand.u32 2147483647, %v14674_v22  ;;  %v6242_v7 = vadd.f32 %v14397_v6, %v16309_v37  ;;  %v7147_v2 = vunpack.c.l.bf16 %v7103_v11  ;;  %v7151_v49 = vunpack.c.h.bf16 %v7103_v11 }
 0x790   : > { %v7105_v61 = vpack.c.bf16 %v7057_v34, %v7053_v26  ;;  %9188 = vlog2.f32 %v6803_v31  ;;  %v6713_v30 = vmul.f32 1.442695, %v6614_v18  ;;  %v6715_v4 = vmul.f32 1.442695, %v6615_v19 }
 0x791   : > { %v6617_v50 = vsub.f32 0.0, %v6553_v21  ;;  %v6355_v46 = vadd.f32 %v14399_v51, %v16309_v37  ;;  %v7211_v42 = vmul.f32 %v7147_v2, %v16314_v59  ;;  %9190 = vlog2.f32 %v6805_v53 }
 0x792   : > { %v7149_v14 = vunpack.c.l.bf16 %v7105_v61  ;;  %v7153_v0 = vunpack.c.h.bf16 %v7105_v61  ;;  %v9183_v15 = vpop.eup %9182  ;;  %v7215_v1 = vmul.f32 %v7151_v49, %v16315_v25  ;;  %9192 = vpow2.f32 %v6713_v30 }
 0x793   : > { %v14685_v6 = vmul.f32 1.3862944, %v6242_v7  ;;  %v14687_v58 = vmul.f32 1.3862944, %v6355_v46  ;;  %v9185_v12 = vpop.eup %9184  ;;  %v7256_v31 = vadd.f32 %v14625_v36, %v7211_v42  ;;  %v6894_v20 = vmul.f32 0.6931472, %v9183_v15 }
 0x794   : > { %v7213_v38 = vmul.f32 %v7149_v14, %v16314_v59  ;;  %v6719_v51 = vmul.f32 1.442695, %v6617_v50  ;;  %v9187_v37 = vpop.eup %9186  ;;  %v7217_v41 = vmul.f32 %v7153_v0, %v16315_v25  ;;  %v6804_v9 = vadd.f32 1.0, %v9185_v12 }
 0x795   : > { %9194 = vpow2.f32 %v6715_v4  ;;  %v6552_v26 = vand.u32 2147483647, %v14685_v6  ;;  %v14693_v8 = vadd.f32 %v7256_v31, %v7215_v1  ;;  %v6992_v11 = vadd.f32 %v6894_v20, %v6480_v43 }
 0x796   : > { %v7298_v23 = vadd.f32 %v14632_v57, %v7213_v38  ;;  %v6898_v34 = vmul.f32 0.6931472, %v9187_v37  ;;  %v6485_v36 = vmax.f32 %v14620_v27, 0.0  ;;  %v6484_v53 = vmax.f32 %v14640_v17, 0.0 }
 0x797   : > { %v6616_v18 = vsub.f32 0.0, %v6552_v26  ;;  %v6554_v24 = vand.u32 2147483647, %v14687_v58  ;;  %v7052_v19 = vmul.f32 1.442695, %v6988_v3  ;;  %9196 = vpow2.f32 %v6719_v51 }
 0x798   : > { %v14701_v21 = vadd.f32 %v7298_v23, %v7217_v41  ;;  %v7056_v7 = vmul.f32 1.442695, %v6992_v11  ;;  %v6994_v2 = vadd.f32 %v6898_v34, %v6482_v60  ;;  %v6246_v43 = vadd.f32 %v14408_v47, %v16316_v62 }
 0x799   : > { %v6717_v57 = vmul.f32 1.442695, %v6616_v18  ;;  %v6618_v49 = vsub.f32 0.0, %v6554_v24  ;;  %v7054_v30 = vmul.f32 1.442695, %v6990_v45  ;;  %9198 = vlog2.f32 %v6804_v9 }
 0x79a   : > { %v9189_v61 = vpop.eup %9188  ;;  %v7104_v4 = vpack.c.bf16 %v7056_v7, %v7052_v19  ;;  %v7058_v50 = vmul.f32 1.442695, %v6994_v2  ;;  %v14707_v3 = vmul.f32 1.3862944, %v6246_v43  ;;  %v6359_v42 = vadd.f32 %v14412_v10, %v16316_v62 }
 0x79b   : > { %9200 = vpow2.f32 %v6717_v57  ;;  %v6721_v46 = vmul.f32 1.442695, %v6618_v49  ;;  %v9191_v40 = vpop.eup %9190  ;;  %v6486_v15 = vmax.f32 %v14657_v13, 0.0  ;;  %v6487_v47 = vmax.f32 %v14660_v48, 0.0 }
 0x79c   : > { %v7148_v60 = vunpack.c.l.bf16 %v7104_v4  ;;  %v7152_v14 = vunpack.c.h.bf16 %v7104_v4  ;;  %v7106_v0 = vpack.c.bf16 %v7058_v50, %v7054_v30  ;;  %v9193_v1 = vpop.eup %9192  ;;  %v6489_v45 = vmax.f32 %v14674_v22, 0.0 }
 0x79d   : > { %9202 = vpow2.f32 %v6721_v46  ;;  %v6555_v12 = vand.u32 2147483647, %v14707_v3  ;;  %v6488_v10 = vmax.f32 %v14685_v6, 0.0  ;;  %v6900_v37 = vmul.f32 0.6931472, %v9189_v61 }
 0x79e   : > { %v7212_v31 = vmul.f32 %v7148_v60, %v16314_v59  ;;  %v7150_v38 = vunpack.c.l.bf16 %v7106_v0  ;;  %v7154_v20 = vunpack.c.h.bf16 %v7106_v0  ;;  %v6806_v41 = vadd.f32 1.0, %v9193_v1  ;;  %v16320_v60 = vld [vmem:[#allocation61_spill] sm:$0xff] }
 0x79f   : > { %v9195_v51 = vpop.eup %9194  ;;  %v6619_v9 = vsub.f32 0.0, %v6555_v12  ;;  %v14717_v26 = vmul.f32 1.3862944, %v6359_v42  ;;  %v7216_v23 = vmul.f32 %v7152_v14, %v16315_v25  ;;  %v6904_v24 = vmul.f32 0.6931472, %v9191_v40 }
 0x7a0   : > { %v7277_v11 = vadd.f32 %v14655_v56, %v7212_v31  ;;  %v7214_v34 = vmul.f32 %v7150_v38, %v16314_v59  ;;  %v6807_v18 = vadd.f32 1.0, %v9195_v51  ;;  %9204 = vlog2.f32 %v6806_v41  ;;  %v16317_v56 = vld [vmem:[#allocation54_spill] sm:$0xff]  ;;  %v16321_v31 = vld [vmem:[#allocation83_spill] sm:$0xff] }
 0x7a1   : > { %v6723_v19 = vmul.f32 1.442695, %v6619_v9  ;;  %v6557_v7 = vand.u32 2147483647, %v14717_v26  ;;  %v7218_v57 = vmul.f32 %v7154_v20, %v16315_v25  ;;  %v9197_v43 = vpop.eup %9196  ;;  %v6248_v30 = vadd.f32 %v16317_v56, %v16316_v62  ;;  %v16318_v59 = vld [vmem:[#allocation50_spill] sm:$0xff]  ;;  %v16319_v25 = vld [vmem:[#allocation73_spill] sm:$0xff] }
 0x7a2   : > { %v14723_v2 = vadd.f32 %v7277_v11, %v7216_v23  ;;  %v7319_v49 = vadd.f32 %v14668_v16, %v7214_v34  ;;  %9206 = vlog2.f32 %v6807_v18  ;;  %v6361_v4 = vadd.f32 %v16318_v59, %v16316_v62  ;;  %v16322_v18 = vld [vmem:[#allocation82_spill] sm:$0xff] }
 0x7a3   : > { %9208 = vpow2.f32 %v6723_v19  ;;  %v6621_v61 = vsub.f32 0.0, %v6557_v7  ;;  %v9199_v50 = vpop.eup %9198  ;;  %v6995_v42 = vadd.f32 %v6900_v37, %v6483_v54  ;;  %v6809_v40 = vadd.f32 1.0, %v9197_v43 }
 0x7a4   : > { %v14731_v46 = vadd.f32 %v7319_v49, %v7218_v57  ;;  %v6250_v16 = vadd.f32 %v16320_v60, %v16319_v25  ;;  %v14737_v1 = vmul.f32 1.3862944, %v6248_v30  ;;  %v14739_v12 = vmul.f32 1.3862944, %v6361_v4  ;;  %v16324_v60 = vld [vmem:[#allocation43_spill] sm:$0xff] }
 0x7a5   : > { %v9201_v14 = vpop.eup %9200  ;;  %v6727_v0 = vmul.f32 1.442695, %v6621_v61  ;;  %v6363_v38 = vadd.f32 %v16321_v31, %v16319_v25  ;;  %v6997_v62 = vadd.f32 %v6904_v24, %v6485_v36  ;;  %9210 = vlog2.f32 %v6809_v40  ;;  %v16323_v40 = vld [vmem:[#allocation127_spill] sm:$0xff] }
 0x7a6   : > { %v6808_v20 = vadd.f32 1.0, %v9201_v14  ;;  %v14745_v52 = vmul.f32 1.3862944, %v6250_v16  ;;  %v6902_v51 = vmul.f32 0.6931472, %v9199_v50  ;;  %v6490_v37 = vmax.f32 %v14687_v58, 0.0 }
 0x7a7   : > { %v9203_v54 = vpop.eup %9202  ;;  %9212 = vpow2.f32 %v6727_v0  ;;  %v6556_v41 = vand.u32 2147483647, %v14737_v1  ;;  %v7059_v9 = vmul.f32 1.442695, %v6995_v42  ;;  %v6558_v11 = vand.u32 2147483647, %v14739_v12 }
 0x7a8   : > { %9214 = vlog2.f32 %v6808_v20  ;;  %v6810_v23 = vadd.f32 1.0, %v9203_v54  ;;  %v6559_v27 = vand.u32 2147483647, %v14745_v52  ;;  %v14751_v36 = vmul.f32 1.3862944, %v6363_v38 }
 0x7a9   : > { %v6620_v34 = vsub.f32 0.0, %v6556_v41  ;;  %v6252_v24 = vadd.f32 %v16322_v18, %v16319_v25  ;;  %v7061_v19 = vmul.f32 1.442695, %v6997_v62  ;;  %v6491_v7 = vmax.f32 %v14707_v3, 0.0 }
 0x7aa   : > { %9216 = vlog2.f32 %v6810_v23  ;;  %v6622_v57 = vsub.f32 0.0, %v6558_v11  ;;  %v9205_v49 = vpop.eup %9204  ;;  %v6996_v43 = vadd.f32 %v6902_v51, %v6484_v53  ;;  %v6623_v56 = vsub.f32 0.0, %v6559_v27 }
 0x7ab   : > { %v6725_v61 = vmul.f32 1.442695, %v6620_v34  ;;  %v6561_v30 = vand.u32 2147483647, %v14751_v36  ;;  %v14759_v50 = vmul.f32 1.3862944, %v6252_v24  ;;  %v6365_v42 = vadd.f32 %v14431_v39, %v16319_v25 }
 0x7ac   : > { %v9207_v59 = vpop.eup %9206  ;;  %v6729_v4 = vmul.f32 1.442695, %v6622_v57  ;;  %v6256_v16 = vadd.f32 %v16324_v60, %v16323_v40  ;;  %v6731_v31 = vmul.f32 1.442695, %v6623_v56  ;;  %v6906_v53 = vmul.f32 0.6931472, %v9205_v49 }
 0x7ad   : > { %v9209_v14 = vpop.eup %9208  ;;  %v6908_v0 = vmul.f32 0.6931472, %v9207_v59  ;;  %9218 = vpow2.f32 %v6725_v61  ;;  %v6625_v17 = vsub.f32 0.0, %v6561_v30  ;;  %v6493_v62 = vmax.f32 %v14717_v26, 0.0 }
 0x7ae   : > { %v6811_v38 = vadd.f32 1.0, %v9209_v14  ;;  %9220 = vpow2.f32 %v6729_v4  ;;  %v6560_v39 = vand.u32 2147483647, %v14759_v50  ;;  %v7060_v51 = vmul.f32 1.442695, %v6996_v43 }
 0x7af   : > { %v6999_v20 = vadd.f32 %v6908_v0, %v6487_v47  ;;  %9222 = vpow2.f32 %v6731_v31  ;;  %v6735_v54 = vmul.f32 1.442695, %v6625_v17  ;;  %v9211_v25 = vpop.eup %9210  ;;  %v14769_v41 = vmul.f32 1.3862944, %v6365_v42  ;;  %v16325_v42 = vld [vmem:[#allocation49_spill] sm:$0xff]  ;;  %v16326_v31 = vld [vmem:[#allocation23_spill] sm:$0xff] }
 0x7b0   : > { %v14771_v23 = vmul.f32 1.3862944, %v6256_v16  ;;  %v6912_v27 = vmul.f32 0.6931472, %v9211_v25  ;;  %v6624_v18 = vsub.f32 0.0, %v6560_v39  ;;  %v6998_v48 = vadd.f32 %v6906_v53, %v6486_v15  ;;  %v16327_v39 = vld [vmem:[#allocation70_spill] sm:$0xff] }
 0x7b1   : > { %v9213_v11 = vpop.eup %9212  ;;  %v7063_v34 = vmul.f32 1.442695, %v6999_v20  ;;  %9224 = vpow2.f32 %v6735_v54  ;;  %v6562_v57 = vand.u32 2147483647, %v14769_v41  ;;  %v6369_v60 = vadd.f32 %v16325_v42, %v16323_v40 }
 0x7b2   : > { %v9215_v24 = vpop.eup %9214  ;;  %9226 = vlog2.f32 %v6811_v38  ;;  %v6813_v47 = vadd.f32 1.0, %v9213_v11  ;;  %v7001_v43 = vadd.f32 %v6912_v27, %v6489_v45  ;;  %v6733_v56 = vmul.f32 1.442695, %v6624_v18 }
 0x7b3   : > { %v7107_v49 = vpack.c.bf16 %v7063_v34, %v7059_v9  ;;  %v6910_v61 = vmul.f32 0.6931472, %v9215_v24  ;;  %v6626_v59 = vsub.f32 0.0, %v6562_v57  ;;  %v6563_v4 = vand.u32 2147483647, %v14771_v23 }
 0x7b4   : > { %v9217_v30 = vpop.eup %9216  ;;  %9228 = vlog2.f32 %v6813_v47  ;;  %v7065_v16 = vmul.f32 1.442695, %v7001_v43  ;;  %v7062_v9 = vmul.f32 1.442695, %v6998_v48 }
 0x7b5   : > { %v7155_v13 = vunpack.c.l.bf16 %v7107_v49  ;;  %v7159_v15 = vunpack.c.h.bf16 %v7107_v49  ;;  %v7000_v14 = vadd.f32 %v6910_v61, %v6488_v10  ;;  %v6914_v0 = vmul.f32 0.6931472, %v9217_v30 }
 0x7b6   : > { %9230 = vpow2.f32 %v6733_v56  ;;  %v6737_v22 = vmul.f32 1.442695, %v6626_v59  ;;  %v7109_v53 = vpack.c.bf16 %v7065_v16, %v7061_v19  ;;  %v6627_v20 = vsub.f32 0.0, %v6563_v4 }
 0x7b7   : > { %v9219_v45 = vpop.eup %9218  ;;  %v7219_v17 = vmul.f32 %v7155_v13, %v16326_v31  ;;  %v7064_v38 = vmul.f32 1.442695, %v7000_v14  ;;  %v7223_v25 = vmul.f32 %v7159_v15, %v16327_v39  ;;  %v7002_v11 = vadd.f32 %v6914_v0, %v6490_v37 }
 0x7b8   : > { %v9221_v54 = vpop.eup %9220  ;;  %v6812_v34 = vadd.f32 1.0, %v9219_v45  ;;  %9232 = vpow2.f32 %v6737_v22  ;;  %v7157_v27 = vunpack.c.l.bf16 %v7109_v53  ;;  %v7161_v18 = vunpack.c.h.bf16 %v7109_v53 }
 0x7b9   : > { %v9223_v6 = vpop.eup %9222  ;;  %v7258_v10 = vadd.f32 %v14693_v8, %v7219_v17  ;;  %v7108_v24 = vpack.c.bf16 %v7064_v38, %v7060_v51  ;;  %v7066_v48 = vmul.f32 1.442695, %v7002_v11  ;;  %v6814_v47 = vadd.f32 1.0, %v9221_v54  ;;  %v16328_v11 = vld [vmem:[#allocation38_spill] sm:$0xff] }
 0x7ba   : > { %9234 = vlog2.f32 %v6812_v34  ;;  %v6815_v19 = vadd.f32 1.0, %v9223_v6  ;;  %v7221_v43 = vmul.f32 %v7157_v27, %v16326_v31  ;;  %v6739_v58 = vmul.f32 1.442695, %v6627_v20  ;;  %v16329_v6 = vld [vmem:[#allocation131_spill] sm:$0xff] }
 0x7bb   : > { %v9225_v57 = vpop.eup %9224  ;;  %v14788_v49 = vadd.f32 %v7258_v10, %v7223_v25  ;;  %v7156_v61 = vunpack.c.l.bf16 %v7108_v24  ;;  %v7225_v56 = vmul.f32 %v7161_v18, %v16327_v39  ;;  %v7160_v30 = vunpack.c.h.bf16 %v7108_v24  ;;  %v16330_v10 = vld [vmem:[#allocation41_spill] sm:$0xff] }
 0x7bc   : > { %v9227_v37 = vpop.eup %9226  ;;  %v7110_v59 = vpack.c.bf16 %v7066_v48, %v7062_v9  ;;  %9236 = vlog2.f32 %v6814_v47  ;;  %v7300_v8 = vadd.f32 %v14701_v21, %v7221_v43  ;;  %v6817_v4 = vadd.f32 1.0, %v9225_v57 }
 0x7bd   : > { %v7220_v51 = vmul.f32 %v7156_v61, %v16326_v31  ;;  %9238 = vlog2.f32 %v6815_v19  ;;  %v6492_v16 = vmax.f32 %v14737_v1, 0.0  ;;  %v14795_v14 = vmul.f32 1.3862944, %v6369_v60 }
 0x7be   : > { %v9229_v42 = vpop.eup %9228  ;;  %v7158_v13 = vunpack.c.l.bf16 %v7110_v59  ;;  %v7162_v15 = vunpack.c.h.bf16 %v7110_v59  ;;  %v14797_v0 = vadd.f32 %v7300_v8, %v7225_v56  ;;  %v7224_v22 = vmul.f32 %v7160_v30, %v16327_v39 }
 0x7bf   : > { %v7279_v9 = vadd.f32 %v14723_v2, %v7220_v51  ;;  %9240 = vlog2.f32 %v6817_v4  ;;  %v6916_v17 = vmul.f32 0.6931472, %v9227_v37  ;;  %v6494_v53 = vmax.f32 %v14739_v12, 0.0 }
 0x7c0   : > { %v9231_v45 = vpop.eup %9230  ;;  %v7222_v21 = vmul.f32 %v7158_v13, %v16326_v31  ;;  %v6495_v38 = vmax.f32 %v14745_v52, 0.0  ;;  %v7226_v1 = vmul.f32 %v7162_v15, %v16327_v39  ;;  %9242 = vpow2.f32 %v6739_v58 }
 0x7c1   : > { %v14804_v20 = vadd.f32 %v7279_v9, %v7224_v22  ;;  %v6816_v60 = vadd.f32 1.0, %v9231_v45  ;;  %v6565_v2 = vand.u32 2147483647, %v14795_v14  ;;  %v6258_v34 = vadd.f32 %v16328_v11, %v16323_v40 }
 0x7c2   : > { %v9233_v54 = vpop.eup %9232  ;;  %v7321_v25 = vadd.f32 %v14731_v46, %v7222_v21  ;;  %v6371_v31 = vadd.f32 %v14446_v35, %v16323_v40  ;;  %v6920_v12 = vmul.f32 0.6931472, %v9229_v42  ;;  %v6260_v27 = vadd.f32 %v16330_v10, %v16329_v6  ;;  %v16331_v35 = vld [vmem:[#allocation109_spill] sm:$0xff] }
 0x7c3   : > { %9244 = vlog2.f32 %v6816_v60  ;;  %v6818_v52 = vadd.f32 1.0, %v9233_v54  ;;  %v6629_v24 = vsub.f32 0.0, %v6565_v2  ;;  %v14817_v48 = vmul.f32 1.3862944, %v6258_v34 }
 0x7c4   : > { %v9235_v39 = vpop.eup %9234  ;;  %v14815_v18 = vadd.f32 %v7321_v25, %v7226_v1  ;;  %v14819_v46 = vmul.f32 1.3862944, %v6371_v31  ;;  %v14821_v19 = vmul.f32 1.3862944, %v6260_v27  ;;  %v6373_v40 = vadd.f32 %v16331_v35, %v16329_v6 }
 0x7c5   : > { %v6918_v47 = vmul.f32 0.6931472, %v9235_v39  ;;  %9246 = vlog2.f32 %v6818_v52  ;;  %v7003_v43 = vadd.f32 %v6916_v17, %v6491_v7  ;;  %v6497_v61 = vmax.f32 %v14751_v36, 0.0 }
 0x7c6   : > { %v9237_v57 = vpop.eup %9236  ;;  %v6743_v58 = vmul.f32 1.442695, %v6629_v24  ;;  %v6564_v37 = vand.u32 2147483647, %v14817_v48  ;;  %v7005_v30 = vadd.f32 %v6920_v12, %v6493_v62  ;;  %v6566_v51 = vand.u32 2147483647, %v14819_v46 }
 0x7c7   : > { %v9239_v56 = vpop.eup %9238  ;;  %v7004_v59 = vadd.f32 %v6918_v47, %v6492_v16  ;;  %v6922_v8 = vmul.f32 0.6931472, %v9237_v57  ;;  %v6567_v13 = vand.u32 2147483647, %v14821_v19  ;;  %v6496_v7 = vmax.f32 %v14759_v50, 0.0 }
 0x7c8   : > { %v6924_v4 = vmul.f32 0.6931472, %v9239_v56  ;;  %9248 = vpow2.f32 %v6743_v58  ;;  %v6628_v42 = vsub.f32 0.0, %v6564_v37  ;;  %v6498_v36 = vmax.f32 %v14769_v41, 0.0 }
 0x7c9   : > { %v9241_v3 = vpop.eup %9240  ;;  %v6630_v15 = vsub.f32 0.0, %v6566_v51  ;;  %v14835_v22 = vmul.f32 1.3862944, %v6373_v40  ;;  %v6631_v16 = vsub.f32 0.0, %v6567_v13  ;;  %v7067_v21 = vmul.f32 1.442695, %v7003_v43 }
 0x7ca   : > { %v7007_v9 = vadd.f32 %v6924_v4, %v6495_v38  ;;  %v6928_v26 = vmul.f32 0.6931472, %v9241_v3  ;;  %v6741_v62 = vmul.f32 1.442695, %v6628_v42  ;;  %v9243_v45 = vpop.eup %9242  ;;  %v7069_v17 = vmul.f32 1.442695, %v7005_v30 }
 0x7cb   : > { %v7068_v1 = vmul.f32 1.442695, %v7004_v59  ;;  %v7006_v60 = vadd.f32 %v6922_v8, %v6494_v53  ;;  %v6747_v2 = vmul.f32 1.442695, %v6631_v16  ;;  %v6745_v50 = vmul.f32 1.442695, %v6630_v15 }
 0x7cc   : > { %v7071_v54 = vmul.f32 1.442695, %v7007_v9  ;;  %v7009_v25 = vadd.f32 %v6928_v26, %v6497_v61  ;;  %9250 = vpow2.f32 %v6741_v62  ;;  %v6569_v41 = vand.u32 2147483647, %v14835_v22  ;;  %v16333_v51 = vld [vmem:[#allocation32_spill] sm:$0xff] }
 0x7cd   : > { %v9245_v11 = vpop.eup %9244  ;;  %v6262_v34 = vadd.f32 %v14468_v32, %v16329_v6  ;;  %v6375_v38 = vadd.f32 %v14497_v33, %v16329_v6  ;;  %v6819_v10 = vadd.f32 1.0, %v9243_v45  ;;  %v7070_v53 = vmul.f32 1.442695, %v7006_v60  ;;  %v16332_v6 = vld [vmem:[#allocation19_spill] sm:$0xff]  ;;  %v16334_v60 = vld [vmem:[#allocation110_spill] sm:$0xff] }
 0x7ce   : > { %v7111_v31 = vpack.c.bf16 %v7071_v54, %v7067_v21  ;;  %v7073_v12 = vmul.f32 1.442695, %v7009_v25  ;;  %v6926_v52 = vmul.f32 0.6931472, %v9245_v11  ;;  %9252 = vpow2.f32 %v6747_v2  ;;  %v16335_v54 = vld [vmem:[#allocation129_spill] sm:$0xff] }
 0x7cf   : > { %v9247_v27 = vpop.eup %9246  ;;  %v6633_v39 = vsub.f32 0.0, %v6569_v41  ;;  %v14842_v24 = vmul.f32 1.3862944, %v6262_v34  ;;  %9254 = vpow2.f32 %v6745_v50  ;;  %v14844_v61 = vmul.f32 1.3862944, %v6375_v38 }
 0x7d0   : > { %v7163_v47 = vunpack.c.l.bf16 %v7111_v31  ;;  %v7167_v35 = vunpack.c.h.bf16 %v7111_v31  ;;  %v7113_v40 = vpack.c.bf16 %v7073_v12, %v7069_v17  ;;  %v7008_v57 = vadd.f32 %v6926_v52, %v6496_v7 }
 0x7d1   : > { %v6930_v43 = vmul.f32 0.6931472, %v9247_v27  ;;  %v6751_v32 = vmul.f32 1.442695, %v6633_v39  ;;  %9256 = vlog2.f32 %v6819_v10  ;;  %v6568_v3 = vand.u32 2147483647, %v14842_v24 }
 0x7d2   : > { %v9249_v33 = vpop.eup %9248  ;;  %v7227_v58 = vmul.f32 %v7163_v47, %v16332_v6  ;;  %v7165_v37 = vunpack.c.l.bf16 %v7113_v40  ;;  %v7169_v56 = vunpack.c.h.bf16 %v7113_v40  ;;  %v7072_v30 = vmul.f32 1.442695, %v7008_v57 }
 0x7d3   : > { %v7010_v59 = vadd.f32 %v6930_v43, %v6498_v36  ;;  %v6821_v8 = vadd.f32 1.0, %v9249_v33  ;;  %9258 = vpow2.f32 %v6751_v32  ;;  %v7231_v4 = vmul.f32 %v7167_v35, %v16333_v51  ;;  %v16336_v32 = vld [vmem:[#allocation29_spill] sm:$0xff] }
 0x7d4   : > { %v7260_v42 = vadd.f32 %v14788_v49, %v7227_v58  ;;  %v7229_v13 = vmul.f32 %v7165_v37, %v16332_v6  ;;  %v7233_v7 = vmul.f32 %v7169_v56, %v16333_v51  ;;  %v7112_v15 = vpack.c.bf16 %v7072_v30, %v7068_v1 }
 0x7d5   : > { %v7074_v9 = vmul.f32 1.442695, %v7010_v59  ;;  %v6570_v26 = vand.u32 2147483647, %v14844_v61  ;;  %9260 = vlog2.f32 %v6821_v8  ;;  %v6632_v45 = vsub.f32 0.0, %v6568_v3 }
 0x7d6   : > { %v9251_v62 = vpop.eup %9250  ;;  %v14853_v16 = vadd.f32 %v7260_v42, %v7231_v4  ;;  %v7302_v36 = vadd.f32 %v14797_v0, %v7229_v13  ;;  %v7164_v21 = vunpack.c.l.bf16 %v7112_v15  ;;  %v7168_v17 = vunpack.c.h.bf16 %v7112_v15 }
 0x7d7   : > { %v7114_v49 = vpack.c.bf16 %v7074_v9, %v7070_v53  ;;  %v6266_v25 = vadd.f32 %v16335_v54, %v16334_v60  ;;  %v6820_v11 = vadd.f32 1.0, %v9251_v62  ;;  %v6749_v1 = vmul.f32 1.442695, %v6632_v45 }
 0x7d8   : > { %v14858_v2 = vadd.f32 %v7302_v36, %v7233_v7  ;;  %v6634_v50 = vsub.f32 0.0, %v6570_v26  ;;  %v9253_v41 = vpop.eup %9252  ;;  %v7228_v34 = vmul.f32 %v7164_v21, %v16332_v6  ;;  %v7232_v52 = vmul.f32 %v7168_v17, %v16333_v51 }
 0x7d9   : > { %v7166_v38 = vunpack.c.l.bf16 %v7114_v49  ;;  %v7170_v31 = vunpack.c.h.bf16 %v7114_v49  ;;  %v6823_v12 = vadd.f32 1.0, %v9253_v41  ;;  %v9255_v0 = vpop.eup %9254  ;;  %9262 = vpow2.f32 %v6749_v1 }
 0x7da   : > { %v7281_v10 = vadd.f32 %v14804_v20, %v7228_v34  ;;  %9264 = vlog2.f32 %v6820_v11  ;;  %v6753_v47 = vmul.f32 1.442695, %v6634_v50  ;;  %v14865_v35 = vmul.f32 1.3862944, %v6266_v25 }
 0x7db   : > { %v7230_v27 = vmul.f32 %v7166_v38, %v16332_v6  ;;  %v9257_v53 = vpop.eup %9256  ;;  %v7234_v39 = vmul.f32 %v7170_v31, %v16333_v51  ;;  %9266 = vlog2.f32 %v6823_v12  ;;  %v6379_v33 = vadd.f32 %v16336_v32, %v16334_v60  ;;  %v16337_v51 = vld [vmem:[#allocation112_spill] sm:$0xff] }
 0x7dc   : > { %v14867_v57 = vadd.f32 %v7281_v10, %v7232_v52  ;;  %v6822_v20 = vadd.f32 1.0, %v9255_v0  ;;  %9268 = vpow2.f32 %v6753_v47  ;;  %v6571_v6 = vand.u32 2147483647, %v14865_v35 }
 0x7dd   : > { %v9259_v40 = vpop.eup %9258  ;;  %v7323_v43 = vadd.f32 %v14815_v18, %v7230_v27  ;;  %v14875_v56 = vmul.f32 1.3862944, %v6379_v33  ;;  %v6268_v30 = vadd.f32 %v14535_v29, %v16334_v60  ;;  %v6381_v59 = vadd.f32 %v14538_v5, %v16334_v60 }
 0x7de   : > { %v6825_v58 = vadd.f32 1.0, %v9259_v40  ;;  %v6635_v8 = vsub.f32 0.0, %v6571_v6  ;;  %v6270_v4 = vadd.f32 %v14546_v63, %v16337_v51  ;;  %v6932_v42 = vmul.f32 0.6931472, %v9257_v53 }
 0x7df   : > { %v14873_v37 = vadd.f32 %v7323_v43, %v7234_v39  ;;  %v9261_v18 = vpop.eup %9260  ;;  %v6573_v13 = vand.u32 2147483647, %v14875_v56  ;;  %v14884_v3 = vmul.f32 1.3862944, %v6268_v30  ;;  %v14886_v15 = vmul.f32 1.3862944, %v6381_v59 }
 0x7e0   : > { %9270 = vlog2.f32 %v6825_v58  ;;  %v6755_v7 = vmul.f32 1.442695, %v6635_v8  ;;  %v14888_v9 = vmul.f32 1.3862944, %v6270_v4  ;;  %v6383_v29 = vadd.f32 %v14550_v28, %v16337_v51 }
 0x7e1   : > { %v6499_v5 = vmax.f32 %v14771_v23, 0.0  ;;  %9272 = vlog2.f32 %v6822_v20  ;;  %v6637_v26 = vsub.f32 0.0, %v6573_v13  ;;  %v6572_v62 = vand.u32 2147483647, %v14884_v3 }
 0x7e2   : > { %9274 = vpow2.f32 %v6755_v7  ;;  %v6574_v63 = vand.u32 2147483647, %v14886_v15  ;;  %v6936_v21 = vmul.f32 0.6931472, %v9261_v18  ;;  %v6501_v54 = vmax.f32 %v14795_v14, 0.0 }
 0x7e3   : > { %v9263_v36 = vpop.eup %9262  ;;  %v7011_v45 = vadd.f32 %v6932_v42, %v6499_v5  ;;  %v6759_v17 = vmul.f32 1.442695, %v6637_v26  ;;  %v6636_v49 = vsub.f32 0.0, %v6572_v62  ;;  %v6575_v28 = vand.u32 2147483647, %v14888_v9 }
 0x7e4   : > { %v9265_v60 = vpop.eup %9264  ;;  %v6824_v25 = vadd.f32 1.0, %v9263_v36  ;;  %v14897_v11 = vmul.f32 1.3862944, %v6383_v29  ;;  %v6500_v1 = vmax.f32 %v14817_v48, 0.0  ;;  %v6503_v50 = vmax.f32 %v14821_v19, 0.0 }
 0x7e5   : > { %v9267_v23 = vpop.eup %9266  ;;  %9276 = vpow2.f32 %v6759_v17  ;;  %v6638_v41 = vsub.f32 0.0, %v6574_v63  ;;  %v6505_v31 = vmax.f32 %v14835_v22, 0.0  ;;  %v6639_v12 = vsub.f32 0.0, %v6575_v28 }
 0x7e6   : > { %v9269_v34 = vpop.eup %9268  ;;  %v6940_v38 = vmul.f32 0.6931472, %v9267_v23  ;;  %9278 = vlog2.f32 %v6824_v25  ;;  %v7075_v0 = vmul.f32 1.442695, %v7011_v45  ;;  %v7013_v14 = vadd.f32 %v6936_v21, %v6501_v54  ;;  %v16338_v45 = vld [vmem:[#allocation85_spill] sm:$0xff]  ;;  %v16339_v23 = vld [vmem:[#allocation86_spill] sm:$0xff] }
 0x7e7   : > { %v6826_v52 = vadd.f32 1.0, %v9269_v34  ;;  %v6757_v10 = vmul.f32 1.442695, %v6636_v49  ;;  %v6934_v53 = vmul.f32 0.6931472, %v9265_v60  ;;  %v6272_v43 = vadd.f32 %v14576_v44, %v16337_v51 }
 0x7e8   : > { %v7015_v39 = vadd.f32 %v6940_v38, %v6503_v50  ;;  %v6763_v47 = vmul.f32 1.442695, %v6639_v12  ;;  %v6577_v48 = vand.u32 2147483647, %v14897_v11  ;;  %v6761_v19 = vmul.f32 1.442695, %v6638_v41 }
 0x7e9   : > { %9280 = vlog2.f32 %v6826_v52  ;;  %v6385_v33 = vadd.f32 %v14595_v55, %v16337_v51  ;;  %v6502_v58 = vmax.f32 %v14819_v46, 0.0  ;;  %v14908_v30 = vmul.f32 1.3862944, %v6272_v43 }
 0x7ea   : > { %v9271_v27 = vpop.eup %9270  ;;  %v7079_v32 = vmul.f32 1.442695, %v7015_v39  ;;  %9282 = vpow2.f32 %v6763_v47  ;;  %v6641_v22 = vsub.f32 0.0, %v6577_v48  ;;  %v7077_v18 = vmul.f32 1.442695, %v7013_v14 }
 0x7eb   : > { %v6944_v40 = vmul.f32 0.6931472, %v9271_v27  ;;  %v9273_v20 = vpop.eup %9272  ;;  %9284 = vpow2.f32 %v6757_v10  ;;  %v14910_v42 = vmul.f32 1.3862944, %v6385_v33  ;;  %v6576_v7 = vand.u32 2147483647, %v14908_v30 }
 0x7ec   : > { %v9275_v59 = vpop.eup %9274  ;;  %v7115_v8 = vpack.c.bf16 %v7079_v32, %v7075_v0  ;;  %v6767_v4 = vmul.f32 1.442695, %v6641_v22  ;;  %9286 = vpow2.f32 %v6761_v19  ;;  %v7012_v29 = vadd.f32 %v6934_v53, %v6500_v1 }
 0x7ed   : > { %v7017_v6 = vadd.f32 %v6944_v40, %v6505_v31  ;;  %v6827_v13 = vadd.f32 1.0, %v9275_v59  ;;  %v6938_v5 = vmul.f32 0.6931472, %v9273_v20  ;;  %v6640_v62 = vsub.f32 0.0, %v6576_v7 }
 0x7ee   : > { %v7171_v55 = vunpack.c.l.bf16 %v7115_v8  ;;  %v7175_v51 = vunpack.c.h.bf16 %v7115_v8  ;;  %9288 = vpow2.f32 %v6767_v4  ;;  %v6578_v63 = vand.u32 2147483647, %v14910_v42  ;;  %v16341_v8 = vld [vmem:[#allocation56_spill] sm:$0xff] }
 0x7ef   : > { %v7081_v44 = vmul.f32 1.442695, %v7017_v6  ;;  %v9277_v46 = vpop.eup %9276  ;;  %v6504_v17 = vmax.f32 %v14842_v24, 0.0  ;;  %v6506_v49 = vmax.f32 %v14844_v61, 0.0  ;;  %9290 = vlog2.f32 %v6827_v13 }
 0x7f0   : > { %v9279_v36 = vpop.eup %9278  ;;  %v7235_v21 = vmul.f32 %v7171_v55, %v16338_v45  ;;  %v6829_v60 = vadd.f32 1.0, %v9277_v46  ;;  %v7239_v1 = vmul.f32 %v7175_v51, %v16339_v23  ;;  %v6765_v41 = vmul.f32 1.442695, %v6640_v62  ;;  %v16342_v55 = vld [vmem:[#allocation12_spill] sm:$0xff] }
 0x7f1   : > { %v7117_v26 = vpack.c.bf16 %v7081_v44, %v7077_v18  ;;  %v6942_v28 = vmul.f32 0.6931472, %v9279_v36  ;;  %v6642_v34 = vsub.f32 0.0, %v6578_v63  ;;  %v7076_v31 = vmul.f32 1.442695, %v7012_v29  ;;  %v16343_v36 = vld [vmem:[#allocation10_spill] sm:$0xff] }
 0x7f2   : > { %v7262_v50 = vadd.f32 %v14853_v16, %v7235_v21  ;;  %v7014_v12 = vadd.f32 %v6938_v5, %v6502_v58  ;;  %9292 = vlog2.f32 %v6829_v60  ;;  %v16340_v58 = vld [vmem:[#allocation9_spill] sm:$0xff]  ;;  %v4253_v4 = vrot.slane %v16341_v8, 4 }
 0x7f3   : > { %v7173_v54 = vunpack.c.l.bf16 %v7117_v26  ;;  %v7177_v25 = vunpack.c.h.bf16 %v7117_v26  ;;  %v9281_v38 = vpop.eup %9280  ;;  %v7016_v14 = vadd.f32 %v6942_v28, %v6504_v17  ;;  %v6769_v10 = vmul.f32 1.442695, %v6642_v34 }
 0x7f4   : > { %v9283_v24 = vpop.eup %9282  ;;  %v14920_v52 = vadd.f32 %v7262_v50, %v7239_v1  ;;  %v6946_v61 = vmul.f32 0.6931472, %v9281_v38  ;;  %9294 = vpow2.f32 %v6765_v41  ;;  %v7078_v19 = vmul.f32 1.442695, %v7014_v12 }
 0x7f5   : > { %v7237_v0 = vmul.f32 %v7173_v54, %v16338_v45  ;;  %v9285_v27 = vpop.eup %9284  ;;  %v7241_v53 = vmul.f32 %v7177_v25, %v16339_v23  ;;  %v7080_v16 = vmul.f32 1.442695, %v7016_v14  ;;  %v6831_v47 = vadd.f32 1.0, %v9283_v24  ;;  %v16345_v14 = vld [vmem:[#allocation16_spill] sm:$0xff] }
 0x7f6   : > { %v7018_v48 = vadd.f32 %v6946_v61, %v6506_v49  ;;  %v9287_v40 = vpop.eup %9286  ;;  %v6828_v20 = vadd.f32 1.0, %v9285_v27  ;;  %v7342_v6 = vmul.f32 %v16340_v58, %v16340_v58  ;;  %v7340_v51 = vmul.f32 %v16342_v55, %v16342_v55  ;;  %v16344_v49 = vld [vmem:[#allocation81_spill] sm:$0xff]  ;;  %v4325_v58 = vpop.permute.xlu0 %4324 }
 0x7f7   : > { %v7304_v39 = vadd.f32 %v14858_v2, %v7237_v0  ;;  %v7116_v32 = vpack.c.bf16 %v7080_v16, %v7076_v31  ;;  %9296 = vlog2.f32 %v6831_v47  ;;  %v6830_v29 = vadd.f32 1.0, %v9287_v40 }
 0x7f8   : > { %v9289_v22 = vpop.eup %9288  ;;  %v7082_v33 = vmul.f32 1.442695, %v7018_v48  ;;  %9298 = vpow2.f32 %v6769_v10  ;;  %v7656_v26 = vrot.slane %v7342_v6, 9  ;;  %v7343_v21 = vmul.f32 %v16343_v36, %v16343_v36 }
 0x7f9   : > { %v14924_v43 = vadd.f32 %v7304_v39, %v7241_v53  ;;  %v7172_v59 = vunpack.c.l.bf16 %v7116_v32  ;;  %v7176_v18 = vunpack.c.h.bf16 %v7116_v32  ;;  %v6833_v2 = vadd.f32 1.0, %v9289_v22  ;;  %v9291_v13 = vpop.eup %9290 }
 0x7fa   : > { %v7118_v44 = vpack.c.bf16 %v7082_v33, %v7078_v19  ;;  %v4295_v60 = vrot.slane %v16344_v49, 4  ;;  %v6948_v25 = vmul.f32 0.6931472, %v9291_v13  ;;  %v4254_v28 = vadd.f32 %v4253_v4, %v16341_v8  ;;  %v16346_v19 = vld [vmem:[#allocation8_spill] sm:$0xff] }
 0x7fb   : > { %v7236_v7 = vmul.f32 %v7172_v59, %v16338_v45  ;;  %9300 = vlog2.f32 %v6833_v2  ;;  %v7240_v62 = vmul.f32 %v7176_v18, %v16339_v23  ;;  %v6507_v50 = vmax.f32 %v14865_v35, 0.0 }
 0x7fc   : > { %v7174_v46 = vunpack.c.l.bf16 %v7118_v44  ;;  %v7178_v5 = vunpack.c.h.bf16 %v7118_v44  ;;  %9302 = vlog2.f32 %v6828_v20  ;;  %v9293_v17 = vpop.eup %9292  ;;  %v7658_v41 = vadd.f32 -1.0, %v16342_v55  ;;  %v16347_v44 = vld [vmem:[#allocation31_spill] sm:$0xff] }
 0x7fd   : > { %v7283_v63 = vadd.f32 %v14867_v57, %v7236_v7  ;;  %9304 = vlog2.f32 %v6830_v29  ;;  %v7352_v31 = vadd.f32 %v7656_v26, %v7340_v51  ;;  %v6511_v0 = vmax.f32 %v14888_v9, 0.0 }
 0x7fe   : > { %v7238_v54 = vmul.f32 %v7174_v46, %v16338_v45  ;;  %v9295_v34 = vpop.eup %9294  ;;  %v7242_v57 = vmul.f32 %v7178_v5, %v16339_v23  ;;  %v7341_v24 = vmul.f32 %v16345_v14, %v16345_v14  ;;  %v7657_v61 = vrot.slane %v7343_v21, 9 }
 0x7ff   : > { %v14939_v1 = vadd.f32 %v7283_v63, %v7240_v62  ;;  %v6832_v45 = vadd.f32 1.0, %v9295_v34  ;;  %v7019_v35 = vadd.f32 %v6948_v25, %v6507_v50  ;;  %v6952_v53 = vmul.f32 0.6931472, %v9293_v17 }
 0x800   : > { %v7325_v38 = vadd.f32 %v14873_v37, %v7238_v54  ;;  %v4296_v23 = vadd.f32 %v4295_v60, %v16344_v49  ;;  %v7659_v16 = vadd.f32 -1.0, %v16345_v14  ;;  %v6509_v47 = vmax.f32 %v14875_v56, 0.0  ;;  %v16348_v49 = vld [vmem:[#allocation84_spill] sm:$0xff]  ;;  %v16349_v54 = vld [vmem:[#allocation101_spill] sm:$0xff] }
 0x801   : > { %v9297_v12 = vpop.eup %9296  ;;  %9306 = vlog2.f32 %v6832_v45  ;;  %v7358_v48 = vmul.f32 %v7658_v41, %v7658_v41  ;;  %v4329_v32 = vsub.s32 0, %v16346_v19  ;;  %v6513_v22 = vmax.f32 %v14897_v11, 0.0 }
 0x802   : > { %v9299_v10 = vpop.eup %9298  ;;  %v14948_v27 = vadd.f32 %v7325_v38, %v7242_v57  ;;  %v6956_v39 = vmul.f32 0.6931472, %v9297_v12  ;;  %9308 = vtanh.f32 %v7352_v31  ;;  %v7353_v33 = vadd.f32 %v7657_v61, %v7341_v24  ;;  %v16350_v38 = vld [vmem:[#allocation25_spill] sm:$0xff] }
 0x803   : > { %v6834_v37 = vadd.f32 1.0, %v9299_v10  ;;  %v7083_v6 = vmul.f32 1.442695, %v7019_v35  ;;  %v7021_v59 = vadd.f32 %v6952_v53, %v6509_v47  ;;  %v4255_v8 = vrot.slane %v4254_v28, 2 }
 0x804   : > { %v7023_v9 = vadd.f32 %v6956_v39, %v6511_v0  ;;  %v4297_v4 = vrot.slane %v4296_v23, 2  ;;  %v4274_v56 = vrot.slane %v16347_v44, 4  ;;  %v7359_v29 = vmul.f32 %v7659_v16, %v7659_v16  ;;  %v7365_v39 = vpop.permute.xlu1 %7364 }
 0x805   : > { %v9301_v40 = vpop.eup %9300  ;;  %9310 = vlog2.f32 %v6834_v37  ;;  %v14958_v55 = vrot.slane %v4325_v58, %v4329_v32  ;;  %v7085_v46 = vmul.f32 1.442695, %v7021_v59  ;;  %v4256_v63 = vadd.f32 %v4255_v8, %v4254_v28 }
 0x806   : > { %v9303_v20 = vpop.eup %9302  ;;  %v7087_v18 = vmul.f32 1.442695, %v7023_v9  ;;  %v6960_v2 = vmul.f32 0.6931472, %v9301_v40  ;;  %9312 = vtanh.f32 %v7358_v48  ;;  %v4298_v36 = vadd.f32 %v4297_v4, %v4296_v23 }
 0x807   : > { %v6950_v11 = vmul.f32 0.6931472, %v9303_v20  ;;  %9314 = vtanh.f32 %v7353_v33  ;;  %v9305_v51 = vpop.eup %9304  ;;  %v4275_v21 = vadd.f32 %v4274_v56, %v16347_v44  ;;  %v6508_v17 = vmax.f32 %v14884_v3, 0.0 }
 0x808   : > { %v7119_v13 = vpack.c.bf16 %v7087_v18, %v7083_v6  ;;  %v7025_v7 = vadd.f32 %v6960_v2, %v6513_v22  ;;  %v4316_v60 = vrot.slane %v16348_v49, 4  ;;  %9316 = vtanh.f32 %v7359_v29 }
 0x809   : > { %v7020_v34 = vadd.f32 %v6950_v11, %v6508_v17  ;;  %v6954_v57 = vmul.f32 0.6931472, %v9305_v51  ;;  %v6512_v12 = vmax.f32 %v14908_v30, 0.0  ;;  %v4257_v61 = vrot.slane %v4256_v63, 1 }
 0x80a   : > { %v7179_v5 = vunpack.c.l.bf16 %v7119_v13  ;;  %v7183_v26 = vunpack.c.h.bf16 %v7119_v13  ;;  %v7089_v62 = vmul.f32 1.442695, %v7025_v7  ;;  %v4299_v10 = vrot.slane %v4298_v36, 1 }
 0x80b   : > { %v9307_v41 = vpop.eup %9306  ;;  %v4276_v35 = vrot.slane %v4275_v21, 2  ;;  %v6510_v53 = vmax.f32 %v14886_v15, 0.0  ;;  %v4317_v23 = vadd.f32 %v4316_v60, %v16348_v49  ;;  %v7084_v47 = vmul.f32 1.442695, %v7020_v34 }
 0x80c   : > { %v7243_v25 = vmul.f32 %v7179_v5, %v16349_v54  ;;  %v7121_v50 = vpack.c.bf16 %v7089_v62, %v7085_v46  ;;  %v7247_v31 = vmul.f32 %v7183_v26, %v16350_v38  ;;  %v14966_v0 = vpop.eup %9308  ;;  %v6958_v3 = vmul.f32 0.6931472, %v9307_v41 }
 0x80d   : > { %v7022_v9 = vadd.f32 %v6954_v57, %v6510_v53  ;;  %v14981_v6 = vrot.slane %v7365_v39, %v4329_v32  ;;  %v4258_v59 = vadd.f32 %v4257_v61, %v4256_v63  ;;  %v4277_v2 = vadd.f32 %v4276_v35, %v4275_v21  ;;  %v16351_v63 = vld [vmem:[#allocation13_spill] sm:$0xff] }
 0x80e   : > { %v7264_v28 = vadd.f32 %v14920_v52, %v7243_v25  ;;  %v7181_v45 = vunpack.c.l.bf16 %v7121_v50  ;;  %v7185_v14 = vunpack.c.h.bf16 %v7121_v50  ;;  %v7024_v30 = vadd.f32 %v6958_v3, %v6512_v12 }
 0x80f   : > { %v9311_v24 = vpop.eup %9310  ;;  %v6514_v52 = vmax.f32 %v14910_v42, 0.0  ;;  %v4300_v56 = vadd.f32 %v4299_v10, %v4298_v36  ;;  %v4318_v13 = vrot.slane %v4317_v23, 2  ;;  %v4331_v5 = vadd.f32 %v14958_v55, %v4258_v59 }
 0x810   : > { %v7265_v37 = vadd.f32 %v7264_v28, %v7247_v31  ;;  %v7245_v16 = vmul.f32 %v7181_v45, %v16349_v54  ;;  %v6962_v48 = vmul.f32 0.6931472, %v9311_v24  ;;  %v14973_v40 = vpop.eup %9312  ;;  %v7249_v33 = vmul.f32 %v7185_v14, %v16350_v38 }
 0x811   : > { %v7088_v15 = vmul.f32 1.442695, %v7024_v30  ;;  %v14977_v58 = vpop.eup %9314  ;;  %v14985_v42 = vadd.f32 %v14973_v40, %v14966_v0  ;;  %v4278_v36 = vrot.slane %v4277_v2, 1  ;;  %v4333_v25 = vadd.f32 %v14958_v55, %v4300_v56  ;;  %v16352_v56 = vld [vmem:[#allocation14_spill] sm:$0xff] }
 0x812   : > { %v7266_v22 = vrot.slane %v7265_v37, 4  ;;  %v7306_v20 = vadd.f32 %v14924_v43, %v7245_v16  ;;  %v7026_v18 = vadd.f32 %v6962_v48, %v6514_v52  ;;  %v7086_v43 = vmul.f32 1.442695, %v7022_v9  ;;  %v14987_v29 = vpop.eup %9316 }
 0x813   : > { %v7120_v44 = vpack.c.bf16 %v7088_v15, %v7084_v47  ;;  %v14992_v62 = vadd.f32 %v14987_v29, %v14977_v58  ;;  %v7450_v21 = vrot.slane %v14985_v42, %v16351_v63  ;;  %v4319_v50 = vadd.f32 %v4318_v13, %v4317_v23 }
 0x814   : > { %v7267_v8 = vadd.f32 %v7266_v22, %v7265_v37  ;;  %v7307_v4 = vadd.f32 %v7306_v20, %v7249_v33  ;;  %v7090_v7 = vmul.f32 1.442695, %v7026_v18  ;;  %v7371_v45 = vsub.f32 %v4331_v5, %v14981_v6 }
 0x815   : > { %v7180_v32 = vunpack.c.l.bf16 %v7120_v44  ;;  %v7184_v46 = vunpack.c.h.bf16 %v7120_v44  ;;  %v7458_v3 = vrot.slane %v14992_v62, %v16351_v63  ;;  %9318 = vrcp.f32 %v7450_v21 }
 0x816   : > { %v7268_v11 = vrot.slane %v7267_v8, 2  ;;  %v7308_v51 = vrot.slane %v7307_v4, 4  ;;  %v7122_v26 = vpack.c.bf16 %v7090_v7, %v7086_v43  ;;  %v7373_v35 = vsub.f32 %v4333_v25, %v14981_v6 }
 0x817   : > { %v7244_v60 = vmul.f32 %v7180_v32, %v16349_v54  ;;  %v7248_v12 = vmul.f32 %v7184_v46, %v16350_v38  ;;  %v4279_v53 = vadd.f32 %v4278_v36, %v4277_v2  ;;  %v4320_v37 = vrot.slane %v4319_v50, 1 }
 0x818   : > { %v7269_v17 = vadd.f32 %v7268_v11, %v7267_v8  ;;  %v7309_v49 = vadd.f32 %v7308_v51, %v7307_v4  ;;  %v7182_v41 = vunpack.c.l.bf16 %v7122_v26  ;;  %v7186_v34 = vunpack.c.h.bf16 %v7122_v26 }
 0x819   : > { %v7285_v28 = vadd.f32 %v14939_v1, %v7244_v60  ;;  %v7392_v9 = vrot.slane %v14973_v40, %v16351_v63  ;;  %9320 = vrcp.f32 %v7458_v3  ;;  %v7418_v33 = vrot.slane %v14966_v0, %v16351_v63 }
 0x81a   : > { %v7270_v57 = vrot.slane %v7269_v17, 1  ;;  %v7310_v31 = vrot.slane %v7309_v49, 2  ;;  %v7246_v14 = vmul.f32 %v7182_v41, %v16349_v54  ;;  %v7250_v39 = vmul.f32 %v7186_v34, %v16350_v38 }
 0x81b   : > { %v7286_v10 = vadd.f32 %v7285_v28, %v7248_v12  ;;  %v7375_v54 = vadd.f32 1.0, %v7371_v45  ;;  %v7377_v38 = vadd.f32 1.0, %v7373_v35  ;;  %v4321_v15 = vadd.f32 %v4320_v37, %v4319_v50 }
 0x81c   : > { %v7271_v24 = vadd.f32 %v7270_v57, %v7269_v17  ;;  %v7311_v61 = vadd.f32 %v7310_v31, %v7309_v49  ;;  %v7327_v23 = vadd.f32 %v14948_v27, %v7246_v14  ;;  %v4332_v27 = vadd.f32 %v14958_v55, %v4279_v53 }
 0x81d   : > { %v7287_v30 = vrot.slane %v7286_v10, 4  ;;  %v7400_v4 = vrot.slane %v14987_v29, %v16351_v63  ;;  %v7409_v44 = vmul.f32 %v7392_v9, %v7375_v54  ;;  %v7454_v13 = vrot.slane %v14985_v42, %v16352_v56 }
 0x81e   : > { %v7335_v1 = vadd.f32 %v7271_v24, %v14958_v55  ;;  %v7312_v16 = vrot.slane %v7311_v61, 1  ;;  %v7328_v47 = vadd.f32 %v7327_v23, %v7250_v39  ;;  %v7426_v11 = vrot.slane %v14977_v58, %v16351_v63 }
 0x81f   : > { %v7288_v22 = vadd.f32 %v7287_v30, %v7286_v10  ;;  %v9319_v32 = vpop.eup %9318  ;;  %v7462_v36 = vrot.slane %v14992_v62, %v16352_v56  ;;  %v7372_v17 = vsub.f32 %v4332_v27, %v14981_v6  ;;  %v4334_v49 = vadd.f32 %v14958_v55, %v4321_v15 }
 0x820   : > { %v7379_v52 = vsub.f32 %v4331_v5, %v7335_v1  ;;  %v7313_v48 = vadd.f32 %v7312_v16, %v7311_v61  ;;  %v7329_v20 = vrot.slane %v7328_v47, 4  ;;  %9322 = vrcp.f32 %v7454_v13 }
 0x821   : > { %v7289_v2 = vrot.slane %v7288_v22, 2  ;;  %9324 = vrcp.f32 %v7462_v36  ;;  %v7376_v28 = vadd.f32 1.0, %v7372_v17  ;;  %v7374_v62 = vsub.f32 %v4334_v49, %v14981_v6 }
 0x822   : > { %v7383_v59 = vadd.f32 1.0, %v7379_v52  ;;  %v7337_v18 = vadd.f32 %v7313_v48, %v14958_v55  ;;  %v7330_v8 = vadd.f32 %v7329_v20, %v7328_v47  ;;  %v7396_v14 = vrot.slane %v14973_v40, %v16352_v56 }
 0x823   : > { %v7290_v7 = vadd.f32 %v7289_v2, %v7288_v22  ;;  %v9321_v63 = vpop.eup %9320  ;;  %v7422_v24 = vrot.slane %v14966_v0, %v16352_v56  ;;  %v7378_v37 = vadd.f32 1.0, %v7374_v62  ;;  %v7404_v6 = vrot.slane %v14987_v29, %v16352_v56 }
 0x824   : > { %v7381_v43 = vsub.f32 %v4333_v25, %v7337_v18  ;;  %v7435_v51 = vmul.f32 %v7418_v33, %v7383_v59  ;;  %v7331_v46 = vrot.slane %v7330_v8, 2  ;;  %v7411_v25 = vmul.f32 %v7400_v4, %v7377_v38 }
 0x825   : > { %v7291_v26 = vrot.slane %v7290_v7, 1  ;;  %v7430_v16 = vrot.slane %v14977_v58, %v16352_v56  ;;  %v7410_v40 = vmul.f32 %v7396_v14, %v7376_v28  ;;  %v7412_v22 = vmul.f32 %v7404_v6, %v7378_v37 }
 0x826   : > { %v7385_v5 = vadd.f32 1.0, %v7381_v43  ;;  %v7439_v21 = vadd.f32 %v7435_v51, %v7409_v44  ;;  %v7332_v60 = vadd.f32 %v7331_v46, %v7330_v8 }
 0x827   : > { %v7292_v42 = vadd.f32 %v7291_v26, %v7290_v7 }
 0x828   : > { %v7437_v50 = vmul.f32 %v7426_v11, %v7385_v5  ;;  %v7468_v41 = vmul.f32 %v9319_v32, %v7439_v21  ;;  %v7333_v34 = vrot.slane %v7332_v60, 1 }
 0x829   : > { %v7336_v57 = vadd.f32 %v7292_v42, %v14958_v55 }
 0x82a   : > { %v7441_v31 = vadd.f32 %v7437_v50, %v7411_v25  ;;  %v7660_v12 = vadd.f32 -1.0, %v7468_v41  ;;  %v7334_v45 = vadd.f32 %v7333_v34, %v7332_v60  ;;  %v9323_v0 = vpop.eup %9322  ;;  %v9424_v50 = vmov 1966171168  }
 0x82b   : > { %v7380_v3 = vsub.f32 %v4332_v27, %v7336_v57  ;;  %v9325_v38 = vpop.eup %9324  ;;  %v7530_v41 = vunpack.c.l.s4 %v9424_v50 }
 0x82c   : > { %v7472_v61 = vmul.f32 %v9321_v63, %v7441_v31  ;;  %v7479_v10 = vmul.f32 1.3862944, %v7660_v12  ;;  %v7338_v35 = vadd.f32 %v7334_v45, %v14958_v55 }
 0x82d   : > { %v7384_v53 = vadd.f32 1.0, %v7380_v3  ;;  %v7531_v62 = vunpack.c.0.s8 %v7530_v41 }
 0x82e   : > { %v7662_v39 = vadd.f32 -1.0, %v7472_v61  ;;  %v7487_v23 = vand.u32 2147483647, %v7479_v10  ;;  %v7382_v1 = vsub.f32 %v4334_v49, %v7338_v35  ;;  %v7483_v42 = vmax.f32 %v7479_v10, 0.0 }
 0x82f   : > { %v7436_v30 = vmul.f32 %v7422_v24, %v7384_v53 }
 0x830   : > { %v7481_v54 = vmul.f32 1.3862944, %v7662_v39  ;;  %v7491_v47 = vsub.f32 0.0, %v7487_v23  ;;  %v7386_v9 = vadd.f32 1.0, %v7382_v1  ;;  %v7534_v39 = vsub.s32 %v7531_v62, %v16346_v19 }
 0x831   : > { %v7440_v52 = vadd.f32 %v7436_v30, %v7410_v40  ;;  %v16353_v30 = vlaneseq }
 0x832   : > { %v7489_v48 = vand.u32 2147483647, %v7481_v54  ;;  %v7495_v55 = vmul.f32 1.442695, %v7491_v47  ;;  %v7438_v33 = vmul.f32 %v7430_v16, %v7386_v9  ;;  %v7485_v57 = vmax.f32 %v7481_v54, 0.0 }
 0x833   : > { %v7470_v27 = vmul.f32 %v9323_v0, %v7440_v52  ;;  %vm7554_vm4 = vcmp.lt.s32.totalorder %v16353_v30, 512 }
 0x834   : > { %v7493_v20 = vsub.f32 0.0, %v7489_v48  ;;  %9326 = vpow2.f32 %v7495_v55  ;;  %v7442_v15 = vadd.f32 %v7438_v33, %v7412_v22 }
 0x835   : > { %v7661_v29 = vadd.f32 -1.0, %v7470_v27 }
 0x836   : > { %v7499_v59 = vmul.f32 1.442695, %v7493_v20  ;;  %v7474_v18 = vmul.f32 %v9325_v38, %v7442_v15 }
 0x837   : > { %v7480_v58 = vmul.f32 1.3862944, %v7661_v29 }
 0x838   : > { %9328 = vpow2.f32 %v7499_v59  ;;  %v7663_v2 = vadd.f32 -1.0, %v7474_v18 }
 0x839   : > { %v7488_v8 = vand.u32 2147483647, %v7480_v58  ;;  %v7484_v31 = vmax.f32 %v7480_v58, 0.0 }
 0x83a   : > { %v7482_v4 = vmul.f32 1.3862944, %v7663_v2 }
 0x83b   : > { %v7492_v44 = vsub.f32 0.0, %v7488_v8 }
 0x83c   : > { %v7490_v56 = vand.u32 2147483647, %v7482_v4  ;;  %v7486_v24 = vmax.f32 %v7482_v4, 0.0 }
 0x83d   : > { %v7497_v43 = vmul.f32 1.442695, %v7492_v44 }
 0x83e   : > { %v9327_v13 = vpop.eup %9326  ;;  %v7494_v7 = vsub.f32 0.0, %v7490_v56 }
 0x83f   : > { %9330 = vpow2.f32 %v7497_v43  ;;  %v7503_v51 = vadd.f32 1.0, %v9327_v13 }
 0x840   : > { %v7501_v11 = vmul.f32 1.442695, %v7494_v7 }
 0x842   : > { %v9329_v32 = vpop.eup %9328  ;;  %9332 = vpow2.f32 %v7501_v11 }
 0x843   : > { %v7505_v46 = vadd.f32 1.0, %v9329_v32  ;;  %9334 = vlog2.f32 %v7503_v51 }
 0x845   : > { %9336 = vlog2.f32 %v7505_v46 }
 0x849   : > { %v9331_v5 = vpop.eup %9330 }
 0x84a   : > { %v7504_v26 = vadd.f32 1.0, %v9331_v5 }
 0x84c   : > { %v9333_v21 = vpop.eup %9332  ;;  %9338 = vlog2.f32 %v7504_v26 }
 0x84d   : > { %v7506_v36 = vadd.f32 1.0, %v9333_v21  ;;  %v9335_v17 = vpop.eup %9334 }
 0x84e   : > { %v7508_v60 = vmul.f32 0.6931472, %v9335_v17 }
 0x84f   : > { %9340 = vlog2.f32 %v7506_v36  ;;  %v9337_v49 = vpop.eup %9336 }
 0x850   : > { %v7512_v25 = vmul.f32 0.6931472, %v9337_v49  ;;  %v7515_v63 = vadd.f32 %v7508_v60, %v7483_v42 }
 0x852   : > { %v7517_v28 = vadd.f32 %v7512_v25, %v7485_v57  ;;  %v7519_v3 = vmul.f32 1.442695, %v7515_v63 }
 0x854   : > { %v7521_v10 = vmul.f32 1.442695, %v7517_v28 }
 0x856   : > { %v9339_v34 = vpop.eup %9338 }
 0x857   : > { %v7510_v12 = vmul.f32 0.6931472, %v9339_v34 }
 0x859   : > { %v9341_v45 = vpop.eup %9340  ;;  %v7516_v14 = vadd.f32 %v7510_v12, %v7484_v31 }
 0x85a   : > { %v7514_v61 = vmul.f32 0.6931472, %v9341_v45 }
 0x85b   : > { %v7520_v35 = vmul.f32 1.442695, %v7516_v14 }
 0x85c   : > { %v7518_v53 = vadd.f32 %v7514_v61, %v7486_v24 }
 0x85d   : > { %v7527_v23 = vcombine.low %v7519_v3, %v7520_v35 }
 0x85e   : > { %v7522_v37 = vmul.f32 1.442695, %v7518_v53 }
 0x85f   : > { %v7535_v6 = vrot.slane %v7527_v23, %v7534_v39 }
 0x860   : > { %v7528_v1 = vcombine.low %v7521_v10, %v7522_v37 }
 0x862   : > { %v7542_v16 = vrot.slane %v7528_v1, %v7534_v39 }
 0x864   : > { %v7543_v40 = vcombine.low %v7535_v6, %v7542_v16 }
 0x866   : > { %v7550_v54 = vrot.slane %v7543_v40, %v7534_v39 }
 0x868   : > { %7556 = vst.msk [vmem:[%s357_s22] sm:$0xf] %vm7554_vm4, %v7550_v54 }
 0x869   : > { %9371 = shalt.err (!%p9368_p3)
}
 0x86a   : > { %s9372_s14 = scalar_lea.hbm %s15042_s29, 64  ;;  %s9376_s9 = scalar_lea.hbm %s15093_s10, 256 }
 0x86b   : > { %p9373_p4 = scmp.ne.s32.totalorder %s15042_s29, %s9372_s14  ;;  %p9377_p9 = scmp.lt.u32.totalorder %s15042_s29, %s15093_s10 }
 0x86c   : > { %p9378_p10 = scmp.lt.u32.totalorder %s9376_s9, %s9372_s14  ;;  %p9380_p12 = scmp.lt.u32.totalorder %s9372_s14, %s15042_s29 }
 0x86d   : > { %p9374_p7 = pnand %p9373_p4, %p9525_p5 }
 0x86e   : > { %p9379_p11 = por %p9378_p10, %p9377_p9 }
 0x86f   : > { %p9375_p8 = pneg %p9374_p7 }
 0x870   : > { %p9381_p13 = por %p9380_p12, %p9379_p11 }
 0x872   : > { %p9382_p0 = pnand %p9381_p13, %p9375_p8 }
 0x874   : > { %9385 = shalt.err (!%p9382_p0)
}
 0x875   : > { %7670 = dma.vmem_to_hbm [thread:$0]  (%p9525_p5), %s15044_s23, 64, %s15042_s29, %s7558_s30  }
 0x876 PF: > { %p7676_p1 = scmp.ge.s32.totalorder %s9420_s20, 2  ;;  %s7584_s28 = sand.u32 1, %s9408_s17  }
 0x877   : > { %s7585_s11 = scalar_lea.sflag [#allocation5], %s7584_s28 }
 0x878   : > { %p7673_p2 = pnand %p7676_p1, %p9529_p6 }
 0x87a   : > { %9403 = dma.done.wait (!%p7673_p2), %s7585_s11, 64  }
 0x87b   : > { %9405 = vsyncadd (!%p7673_p2), %s7585_s11, 4294967232  ;;  %p24_p3 = scmp.ge.s32.totalorder %s9512_s21, 6   ;;  %s16354_s17 = smov %s9412_s18 }
 0x87c   : > { %s16355_s18 = smov %s9416_s19  ;;  %s16356_s19 = smov %s9523_s24 }
 0x87d   : > { %s16357_s20 = smov %s9512_s21  ;;  %26 = sbr.rel (!%p24_p3) target bundleno = 6 (0x6), region = 95 }
 0x884   :  { %7590 = vsyncpa [#allocation5], 1 }
 0x885   :  { %7592 = vsyncpa [#allocation5 + $0x1], 1 }

</bundles_post_ra>
